<compile_context>
chip_gen: v6e
topology: v6e:2x2x1
jax: 0.10.0
libtpu: 0.0.40
codegen_flags: <defaults>
</compile_context>

<pallas_src>
import functools

import jax
import jax.numpy as jnp
import numpy as np
from jax.experimental import pallas as pl
from jax.experimental.pallas import tpu as pltpu

NEG_INF = -1e9
LEAKY_SLOPE = 0.2        # PyTorch GAT default negative slope
PAD_MULT = 256           # pad N up to a multiple of this
PROJ_TILE = 256          # row tile for the projection kernel


def _chip_kind():
    try:
        return jax.devices()[0].device_kind.lower()
    except Exception:  # pragma: no cover
        return ""


_KIND = _chip_kind()
_OLD_GEN = any(t in _KIND for t in ("v2", "v3", "v4", "v5"))   # no bf16 VPU/EUP
_BIG_VMEM = any(t in _KIND for t in ("v5", "v6"))              # 128 MiB VMEM chips

SCORE_DTYPE = jnp.float32 if _OLD_GEN else jnp.bfloat16        # bf16 score math on v6e/v7x
ROW_TILE = 256 if _BIG_VMEM else 128                           # v7x: keep tiles small (64 MiB VMEM)
VMEM_LIMIT = (96 if _BIG_VMEM else 48) * 1024 * 1024


# ----------------------------- Pallas kernels ------------------------------ #

def _project_kernel(x_ref, w_ref, a_ref, haug_ref, esrc_ref, edstT_ref, *,
                    num_heads, head_dim):
    """Row-tiled fused projection for all heads + attention score reductions.

    x_ref    : (tn, F_in)        bf16
    w_ref    : (F_in, H*(D+1))   bf16  (zero columns at the per-head 'ones' slots)
    a_ref    : (H*(D+1), 2H)     bf16  block-diag [a_src | a_dst], zero rows at ones slots
    haug_ref : (H, tn, D+1)      bf16 out  -- per-head features + trailing ones column
    esrc_ref : (H, tn, 1)        f32 out   -- per-head source scores (column layout)
    edstT_ref: (H, tn)           f32 out   -- per-head dest scores (row layout, pre-transposed)
    """
    dp1 = head_dim + 1
    hproj = jnp.dot(x_ref[...], w_ref[...], preferred_element_type=jnp.float32)   # MXU
    col = jax.lax.broadcasted_iota(jnp.int32, hproj.shape, 1)
    haug = jnp.where(col % dp1 == head_dim, 1.0, hproj).astype(jnp.bfloat16)      # ones slots
    e = jnp.dot(haug, a_ref[...], preferred_element_type=jnp.float32)             # (tn, 2H) MXU
    edstT_ref[...] = jnp.transpose(e[:, num_heads:])                              # (H, tn), once
    for hh in range(num_heads):                                                   # static, tiny
        haug_ref[hh] = haug[:, hh * dp1:(hh + 1) * dp1]                           # (tn, D+1)
        esrc_ref[hh] = e[:, hh:hh + 1]                                            # (tn, 1)


def _attention_kernel(esrc_ref, edstT_ref, haug_ref, adj_ref, out_ref, *,
                      num_heads, head_dim, apply_elu, apply_log_softmax,
                      score_dtype):
    """Row-tiled masked softmax attention + aggregation; heads via fori_loop.

    esrc_ref : (H, tm, 1)     f32   source scores for this tile's query rows
    edstT_ref: (H, Np)        f32   resident, row-vector layout
    haug_ref : (H, Np, D+1)   bf16  resident projected features (+ ones column)
    adj_ref  : (tm, Np)       int8  adjacency (1 = edge, 0 = masked)
    out_ref  : (H, tm, D)     out   per-head results (ELU / log_softmax fused)
    """
    neg = jnp.asarray(NEG_INF, score_dtype)
    slope = jnp.asarray(LEAKY_SLOPE, score_dtype)
    edge = adj_ref[...] != 0                                        # (tm, Np) computed once

    def head_body(hh, carry):
        esrc_col = esrc_ref[hh].astype(score_dtype)                 # (tm, 1)
        edst_row = edstT_ref[hh].astype(score_dtype)                # (Np,)
        s = esrc_col + edst_row                                     # (tm, Np)
        s = jnp.where(s > 0, s, slope * s)                          # LeakyReLU
        s = jnp.where(edge, s, neg)                                 # adjacency mask
        m = jnp.max(s, axis=-1, keepdims=True)                      # (tm, 1), exact
        p = jnp.exp(s - m).astype(jnp.bfloat16)                     # (tm, Np)
        # One MXU matmul gives aggregation AND softmax denominator (ones column).
        ad = jnp.dot(p, haug_ref[hh], preferred_element_type=jnp.float32)   # (tm, D+1)
        res = ad[:, :head_dim] * pl.reciprocal(ad[:, head_dim:], approx=True)
        if apply_elu:
            res = jnp.where(res > 0, res, jnp.exp(jnp.minimum(res, 0.0)) - 1.0)
        if apply_log_softmax:   # only used with num_heads == 1 (full class dim in res)
            mx = jnp.max(res, axis=-1, keepdims=True)
            sh = res - mx
            res = sh - jnp.log(jnp.sum(jnp.exp(sh), axis=-1, keepdims=True))
        out_ref[hh] = res.astype(out_ref.dtype)
        return carry

    jax.lax.fori_loop(0, num_heads, head_body, 0)


# ------------------------------ JAX wrappers -------------------------------- #

def _augmented_weights(W, a_src, a_dst):
    """W_aug: (F_in, H*(D+1)) with zero 'ones' columns; A_aug: block-diag (H*(D+1), 2H)."""
    H, F_in, D = W.shape
    dp1 = D + 1
    W_aug = jnp.concatenate([W, jnp.zeros((H, F_in, 1), W.dtype)], axis=2)       # (H, F_in, D+1)
    W_aug = jnp.transpose(W_aug, (1, 0, 2)).reshape(F_in, H * dp1)
    eye = jnp.eye(H, dtype=W.dtype)
    a_src_p = jnp.concatenate([a_src[:, 0, :], jnp.zeros((H, 1), W.dtype)], axis=1)  # (H, D+1)
    a_dst_p = jnp.concatenate([a_dst[:, 0, :], jnp.zeros((H, 1), W.dtype)], axis=1)
    A_src = a_src_p[:, :, None] * eye[:, None, :]                                # (H, D+1, H)
    A_dst = a_dst_p[:, :, None] * eye[:, None, :]
    A_aug = jnp.concatenate([A_src, A_dst], axis=2).reshape(H * dp1, 2 * H)
    return W_aug.astype(jnp.bfloat16), A_aug.astype(jnp.bfloat16)


def gat_layer(x, adj_i8, W, a_src, a_dst, *, apply_elu, apply_log_softmax, out_dtype):
    """One dense-adjacency multi-head GAT layer on padded inputs -> (H, Np, D)."""
    Np, F_in = x.shape
    H, _, D = W.shape
    dp1 = D + 1
    assert Np % 128 == 0
    assert (not apply_log_softmax) or H == 1

    W_aug, A_aug = _augmented_weights(W, a_src, a_dst)
    x_b = x.astype(jnp.bfloat16)

    # --- row-tiled fused projection for all heads ---
    tn = PROJ_TILE if Np % PROJ_TILE == 0 else 128
    haug, esrc, edstT = pl.pallas_call(
        functools.partial(_project_kernel, num_heads=H, head_dim=D),
        grid=(Np // tn,),
        in_specs=[
            pl.BlockSpec((tn, F_in), lambda i: (i, 0)),
            pl.BlockSpec((F_in, H * dp1), lambda i: (0, 0)),
            pl.BlockSpec((H * dp1, 2 * H), lambda i: (0, 0)),
        ],
        out_specs=(
            pl.BlockSpec((H, tn, dp1), lambda i: (0, i, 0)),
            pl.BlockSpec((H, tn, 1), lambda i: (0, i, 0)),
            pl.BlockSpec((H, tn), lambda i: (0, i)),
        ),
        out_shape=(
            jax.ShapeDtypeStruct((H, Np, dp1), jnp.bfloat16),
            jax.ShapeDtypeStruct((H, Np, 1), jnp.float32),
            jax.ShapeDtypeStruct((H, Np), jnp.float32),
        ),
        compiler_params=pltpu.CompilerParams(dimension_semantics=("parallel",)),
    )(x_b, W_aug, A_aug)

    # --- row-tiled masked softmax attention + aggregation ---
    tm = ROW_TILE if Np % ROW_TILE == 0 else 128
    out = pl.pallas_call(
        functools.partial(_attention_kernel, num_heads=H, head_dim=D,
                          apply_elu=apply_elu, apply_log_softmax=apply_log_softmax,
                          score_dtype=SCORE_DTYPE),
        grid=(Np // tm,),
        in_specs=[
            pl.BlockSpec((H, tm, 1), lambda i: (0, i, 0)),     # e_src: per row-tile
            pl.BlockSpec((H, Np), lambda i: (0, 0)),           # e_dst^T: resident
            pl.BlockSpec((H, Np, dp1), lambda i: (0, 0, 0)),   # h_aug: resident
            pl.BlockSpec((tm, Np), lambda i: (i, 0)),          # int8 adjacency tile
        ],
        out_specs=pl.BlockSpec((H, tm, D), lambda i: (0, i, 0)),
        out_shape=jax.ShapeDtypeStruct((H, Np, D), out_dtype),
        compiler_params=pltpu.CompilerParams(
            dimension_semantics=("parallel",),
            vmem_limit_bytes=VMEM_LIMIT),
    )(esrc, edstT, haug, adj_i8)
    return out


def _round_up(n, m):
    return ((n + m - 1) // m) * m


def net_forward(params, x, adj):
    # eval mode: F.dropout(p=0.6, training=False) == identity
    N = x.shape[0]
    Np = _round_up(N, PAD_MULT)
    pad = Np - N
    xp = jnp.pad(x, ((0, pad), (0, 0)))                                   # zero features
    adj_i8 = jnp.pad((adj > 0).astype(jnp.int8), ((0, pad), (0, pad)))    # no edges in padding

    h1 = gat_layer(xp, adj_i8, params["W1"], params["a1_src"], params["a1_dst"],
                   apply_elu=True, apply_log_softmax=False,
                   out_dtype=jnp.bfloat16)                                # (H1, Np, D1), fused ELU
    H1, _, D1 = params["W1"].shape
    h1_flat = jnp.transpose(h1, (1, 0, 2)).reshape(Np, H1 * D1)           # tiny bf16 relayout

    out = gat_layer(h1_flat, adj_i8, params["W2"], params["a2_src"], params["a2_dst"],
                    apply_elu=False, apply_log_softmax=True,
                    out_dtype=jnp.float32)                                # (1, Np, C), fused log_softmax
    return out[0, :N, :]                                                  # drop padded rows


# ------------------------------ pure-JAX reference --------------------------- #
# Mirrors the kernel arithmetic: bf16 MXU inputs, f32 accumulation, bf16/f32 score
# path (per chip), ones-column denominator from bf16 probabilities.

def _gat_layer_ref(x, adj, W, a_src, a_dst, apply_elu, apply_log_softmax):
    H, F_in, D = W.shape
    dp1 = D + 1
    W_aug, A_aug = _augmented_weights(W, a_src, a_dst)
    hproj = jnp.dot(x.astype(jnp.bfloat16), W_aug, preferred_element_type=jnp.float32)
    col = jnp.arange(H * dp1)[None, :]
    haug = jnp.where(col % dp1 == D, 1.0, hproj).astype(jnp.bfloat16)
    e = jnp.dot(haug, A_aug, preferred_element_type=jnp.float32)
    sd = SCORE_DTYPE
    edge = adj > 0
    neg = jnp.asarray(NEG_INF, sd)
    slope = jnp.asarray(LEAKY_SLOPE, sd)
    outs = []
    for hh in range(H):
        s = e[:, hh:hh + 1].astype(sd) + e[:, H + hh][None, :].astype(sd)
        s = jnp.where(s > 0, s, slope * s)
        s = jnp.where(edge, s, neg)
        m = jnp.max(s, axis=-1, keepdims=True)
        p = jnp.exp(s - m).astype(jnp.bfloat16)
        ad = jnp.dot(p, haug[:, hh * dp1:(hh + 1) * dp1], preferred_element_type=jnp.float32)
        res = ad[:, :D] / ad[:, D:]
        if apply_elu:
            res = jnp.where(res > 0, res, jnp.exp(jnp.minimum(res, 0.0)) - 1.0)
        if apply_log_softmax:
            res = jax.nn.log_softmax(res, axis=-1)
        outs.append(res)
    return jnp.concatenate(outs, axis=-1)


def _net_ref(params, x, adj):
    h1 = _gat_layer_ref(x, adj, params["W1"], params["a1_src"], params["a1_dst"], True, False)
    h1 = h1.astype(jnp.bfloat16)
    return _gat_layer_ref(h1, adj, params["W2"], params["a2_src"], params["a2_dst"], False, True)


# ---------------------------------- main ------------------------------------ #

if __name__ == "__main__":
    # Small synthetic "Cora": N nodes (not a multiple of 128 -> exercises padding),
    # F_in features, 8 heads x 8 dims for layer 1, 7 classes for layer 2.
    N, F_IN = 300, 64
    H1, D1 = 8, 8            # att1 = GAT(num_features, 8, 8)
    NUM_TARGETS = 7          # att2 = GAT(64, num_targets) -> single head

    key = jax.random.PRNGKey(0)
    k_x, k_e, k_w1, k_a1s, k_a1d, k_w2, k_a2s, k_a2d = jax.random.split(key, 8)

    # Node features.
    x = jax.random.normal(k_x, (N, F_IN), dtype=jnp.float32)

    # Deterministic graph: self-loops + ring edges + random extra edges, symmetrized.
    adj_np = np.eye(N, dtype=np.float32)
    for i in range(N):
        adj_np[i, (i + 1) % N] = 1.0
        adj_np[(i + 1) % N, i] = 1.0
    extra = np.asarray(jax.random.randint(k_e, (2, 600), 0, N))
    adj_np[extra[0], extra[1]] = 1.0
    adj_np[extra[1], extra[0]] = 1.0
    adj = jnp.asarray(adj_np)

    # Deterministic parameters (synthetic init, not a checkpoint).
    params = {
        "W1":     0.1 * jax.random.normal(k_w1,  (H1, F_IN, D1),            dtype=jnp.float32),
        "a1_src": 0.1 * jax.random.normal(k_a1s, (H1, 1, D1),               dtype=jnp.float32),
        "a1_dst": 0.1 * jax.random.normal(k_a1d, (H1, 1, D1),               dtype=jnp.float32),
        "W2":     0.1 * jax.random.normal(k_w2,  (1, H1 * D1, NUM_TARGETS), dtype=jnp.float32),
        "a2_src": 0.1 * jax.random.normal(k_a2s, (1, 1, NUM_TARGETS),       dtype=jnp.float32),
        "a2_dst": 0.1 * jax.random.normal(k_a2d, (1, 1, NUM_TARGETS),       dtype=jnp.float32),
    }

    out = jax.jit(net_forward)(params, x, adj)
    out = jax.block_until_ready(out)

    ref = _net_ref(params, x, adj)
    # Tolerance covers EUP-vs-XLA bf16 exp rounding and approx-reciprocal normalization.
    np.testing.assert_allclose(np.asarray(out), np.asarray(ref), rtol=5e-2, atol=5e-2)

    print("KERNEL_OK")
</pallas_src>

<mosaic_0001>
module attributes {stable_mosaic.version = 11 : i64} {
  func.func @_project_kernel(%arg0: i32, %arg1: memref<256x64xbf16, #tpu.memory_space<vmem>>, %arg2: memref<64x72xbf16, #tpu.memory_space<vmem>>, %arg3: memref<72x16xbf16, #tpu.memory_space<vmem>>, %arg4: memref<8x256x9xbf16, #tpu.memory_space<vmem>>, %arg5: memref<8x256x1xf32, #tpu.memory_space<vmem>>, %arg6: memref<8x256xf32, #tpu.memory_space<vmem>>) attributes {dimension_semantics = [#tpu.dimension_semantics<parallel>], iteration_bounds = array<i64: 2>, scalar_prefetch = 0 : i64, scratch_operands = 0 : i64, tpu.core_type = #tpu.core_type<tc>, window_params = [{transform_indices = @transform_0, window_bounds = array<i64: 256, 64>}, {pipeline_mode = #tpu.pipeline_mode<synchronous>, transform_indices = @transform_1, window_bounds = array<i64: 64, 72>}, {pipeline_mode = #tpu.pipeline_mode<synchronous>, transform_indices = @transform_2, window_bounds = array<i64: 72, 16>}, {transform_indices = @transform_3, window_bounds = array<i64: 8, 256, 9>}, {transform_indices = @transform_4, window_bounds = array<i64: 8, 256, 1>}, {transform_indices = @transform_5, window_bounds = array<i64: 8, 256>}]} {
    %c0 = arith.constant 0 : index
    %c0_0 = arith.constant 0 : index
    %0 = vector.load %arg1[%c0, %c0_0] : memref<256x64xbf16, #tpu.memory_space<vmem>>, vector<256x64xbf16>
    %c0_1 = arith.constant 0 : index
    %c0_2 = arith.constant 0 : index
    %1 = vector.load %arg2[%c0_1, %c0_2] : memref<64x72xbf16, #tpu.memory_space<vmem>>, vector<64x72xbf16>
    %cst = arith.constant dense<0.000000e+00> : vector<256x72xf32>
    %2 = tpu.matmul %0, %1, %cst {dimension_numbers = #tpu.dot_dimension_numbers<[1], [0], [0], [1], [0, 0, 1, 1], [], []>} : vector<256x64xbf16>, vector<64x72xbf16>, vector<256x72xf32> -> vector<256x72xf32>
    %3 = tpu.iota {dimensions = array<i32: 1>} : vector<256x72xi32>
    %c9_i32 = arith.constant 9 : i32
    %c0_i32 = arith.constant 0 : i32
    %4 = arith.cmpi eq, %c9_i32, %c0_i32 : i32
    %c1_i32 = arith.constant 1 : i32
    %5 = arith.select %4, %c1_i32, %c9_i32 : i32
    %6 = vector.broadcast %5 : i32 to vector<256x72xi32>
    %7 = arith.remsi %3, %6 : vector<256x72xi32>
    %c0_i32_3 = arith.constant 0 : i32
    %8 = vector.broadcast %c0_i32_3 : i32 to vector<256x72xi32>
    %9 = arith.cmpi ne, %7, %8 : vector<256x72xi32>
    %c0_i32_4 = arith.constant 0 : i32
    %10 = vector.broadcast %c0_i32_4 : i32 to vector<256x72xi32>
    %11 = arith.cmpi slt, %7, %10 : vector<256x72xi32>
    %c0_i32_5 = arith.constant 0 : i32
    %12 = arith.cmpi slt, %5, %c0_i32_5 : i32
    %13 = vector.broadcast %12 : i1 to vector<256x72xi1>
    %14 = vector.broadcast %13 : vector<256x72xi1> to vector<256x72xi1>
    %15 = arith.xori %11, %14 : vector<256x72xi1>
    %16 = arith.andi %15, %9 : vector<256x72xi1>
    %17 = vector.broadcast %5 : i32 to vector<256x72xi32>
    %18 = arith.addi %7, %17 : vector<256x72xi32>
    %19 = arith.select %16, %18, %7 : vector<256x72xi1>, vector<256x72xi32>
    %c8_i32 = arith.constant 8 : i32
    %20 = vector.broadcast %c8_i32 : i32 to vector<256x72xi32>
    %21 = arith.cmpi eq, %19, %20 : vector<256x72xi32>
    %cst_6 = arith.constant 1.000000e+00 : f32
    %22 = vector.broadcast %cst_6 : f32 to vector<256x72xf32>
    %23 = arith.select %21, %22, %2 : vector<256x72xi1>, vector<256x72xf32>
    %24 = arith.truncf %23 : vector<256x72xf32> to vector<256x72xbf16>
    %c0_7 = arith.constant 0 : index
    %c0_8 = arith.constant 0 : index
    %25 = vector.load %arg3[%c0_7, %c0_8] : memref<72x16xbf16, #tpu.memory_space<vmem>>, vector<72x16xbf16>
    %cst_9 = arith.constant dense<0.000000e+00> : vector<256x16xf32>
    %26 = tpu.matmul %24, %25, %cst_9 {dimension_numbers = #tpu.dot_dimension_numbers<[1], [0], [0], [1], [0, 0, 1, 1], [], []>} : vector<256x72xbf16>, vector<72x16xbf16>, vector<256x16xf32> -> vector<256x16xf32>
    %27 = vector.extract_strided_slice %26 {offsets = [0, 8], sizes = [256, 8], strides = [1, 1]} : vector<256x16xf32> to vector<256x8xf32>
    %28 = tpu.transpose %27, [1, 0] : vector<256x8xf32> -> vector<8x256xf32>
    %c0_10 = arith.constant 0 : index
    %c0_11 = arith.constant 0 : index
    %29 = vector.load %arg6[%c0_10, %c0_11] : memref<8x256xf32, #tpu.memory_space<vmem>>, vector<8x256xf32>
    tpu.vector_store %arg6[%c0_10, %c0_11], %28 {strides = array<i32>} : memref<8x256xf32, #tpu.memory_space<vmem>>, vector<8x256xf32>,
    %30 = vector.extract_strided_slice %24 {offsets = [0, 0], sizes = [256, 9], strides = [1, 1]} : vector<256x72xbf16> to vector<256x9xbf16>
    %c0_12 = arith.constant 0 : index
    %c0_13 = arith.constant 0 : index
    %c0_14 = arith.constant 0 : index
    %31 = vector.load %arg4[%c0_12, %c0_13, %c0_14] : memref<8x256x9xbf16, #tpu.memory_space<vmem>>, vector<1x256x9xbf16>
    %32 = vector.shape_cast %31 : vector<1x256x9xbf16> to vector<256x9xbf16>
    %33 = vector.shape_cast %30 : vector<256x9xbf16> to vector<1x256x9xbf16>
    tpu.vector_store %arg4[%c0_12, %c0_13, %c0_14], %33 {strides = array<i32>} : memref<8x256x9xbf16, #tpu.memory_space<vmem>>, vector<1x256x9xbf16>,
    %34 = vector.extract_strided_slice %26 {offsets = [0, 0], sizes = [256, 1], strides = [1, 1]} : vector<256x16xf32> to vector<256x1xf32>
    %c0_15 = arith.constant 0 : index
    %c0_16 = arith.constant 0 : index
    %c0_17 = arith.constant 0 : index
    %35 = vector.load %arg5[%c0_15, %c0_16, %c0_17] : memref<8x256x1xf32, #tpu.memory_space<vmem>>, vector<1x256x1xf32>
    %36 = vector.shape_cast %35 : vector<1x256x1xf32> to vector<256x1xf32>
    %37 = vector.shape_cast %34 : vector<256x1xf32> to vector<1x256x1xf32>
    tpu.vector_store %arg5[%c0_15, %c0_16, %c0_17], %37 {strides = array<i32>} : memref<8x256x1xf32, #tpu.memory_space<vmem>>, vector<1x256x1xf32>,
    %38 = vector.extract_strided_slice %24 {offsets = [0, 9], sizes = [256, 9], strides = [1, 1]} : vector<256x72xbf16> to vector<256x9xbf16>
    %c1 = arith.constant 1 : index
    %c0_18 = arith.constant 0 : index
    %c0_19 = arith.constant 0 : index
    %39 = vector.load %arg4[%c1, %c0_18, %c0_19] : memref<8x256x9xbf16, #tpu.memory_space<vmem>>, vector<1x256x9xbf16>
    %40 = vector.shape_cast %39 : vector<1x256x9xbf16> to vector<256x9xbf16>
    %41 = vector.shape_cast %38 : vector<256x9xbf16> to vector<1x256x9xbf16>
    tpu.vector_store %arg4[%c1, %c0_18, %c0_19], %41 {strides = array<i32>} : memref<8x256x9xbf16, #tpu.memory_space<vmem>>, vector<1x256x9xbf16>,
    %42 = vector.extract_strided_slice %26 {offsets = [0, 1], sizes = [256, 1], strides = [1, 1]} : vector<256x16xf32> to vector<256x1xf32>
    %c1_20 = arith.constant 1 : index
    %c0_21 = arith.constant 0 : index
    %c0_22 = arith.constant 0 : index
    %43 = vector.load %arg5[%c1_20, %c0_21, %c0_22] : memref<8x256x1xf32, #tpu.memory_space<vmem>>, vector<1x256x1xf32>
    %44 = vector.shape_cast %43 : vector<1x256x1xf32> to vector<256x1xf32>
    %45 = vector.shape_cast %42 : vector<256x1xf32> to vector<1x256x1xf32>
    tpu.vector_store %arg5[%c1_20, %c0_21, %c0_22], %45 {strides = array<i32>} : memref<8x256x1xf32, #tpu.memory_space<vmem>>, vector<1x256x1xf32>,
    %46 = vector.extract_strided_slice %24 {offsets = [0, 18], sizes = [256, 9], strides = [1, 1]} : vector<256x72xbf16> to vector<256x9xbf16>
    %c2 = arith.constant 2 : index
    %c0_23 = arith.constant 0 : index
    %c0_24 = arith.constant 0 : index
    %47 = vector.load %arg4[%c2, %c0_23, %c0_24] : memref<8x256x9xbf16, #tpu.memory_space<vmem>>, vector<1x256x9xbf16>
    %48 = vector.shape_cast %47 : vector<1x256x9xbf16> to vector<256x9xbf16>
    %49 = vector.shape_cast %46 : vector<256x9xbf16> to vector<1x256x9xbf16>
    tpu.vector_store %arg4[%c2, %c0_23, %c0_24], %49 {strides = array<i32>} : memref<8x256x9xbf16, #tpu.memory_space<vmem>>, vector<1x256x9xbf16>,
    %50 = vector.extract_strided_slice %26 {offsets = [0, 2], sizes = [256, 1], strides = [1, 1]} : vector<256x16xf32> to vector<256x1xf32>
    %c2_25 = arith.constant 2 : index
    %c0_26 = arith.constant 0 : index
    %c0_27 = arith.constant 0 : index
    %51 = vector.load %arg5[%c2_25, %c0_26, %c0_27] : memref<8x256x1xf32, #tpu.memory_space<vmem>>, vector<1x256x1xf32>
    %52 = vector.shape_cast %51 : vector<1x256x1xf32> to vector<256x1xf32>
    %53 = vector.shape_cast %50 : vector<256x1xf32> to vector<1x256x1xf32>
    tpu.vector_store %arg5[%c2_25, %c0_26, %c0_27], %53 {strides = array<i32>} : memref<8x256x1xf32, #tpu.memory_space<vmem>>, vector<1x256x1xf32>,
    %54 = vector.extract_strided_slice %24 {offsets = [0, 27], sizes = [256, 9], strides = [1, 1]} : vector<256x72xbf16> to vector<256x9xbf16>
    %c3 = arith.constant 3 : index
    %c0_28 = arith.constant 0 : index
    %c0_29 = arith.constant 0 : index
    %55 = vector.load %arg4[%c3, %c0_28, %c0_29] : memref<8x256x9xbf16, #tpu.memory_space<vmem>>, vector<1x256x9xbf16>
    %56 = vector.shape_cast %55 : vector<1x256x9xbf16> to vector<256x9xbf16>
    %57 = vector.shape_cast %54 : vector<256x9xbf16> to vector<1x256x9xbf16>
    tpu.vector_store %arg4[%c3, %c0_28, %c0_29], %57 {strides = array<i32>} : memref<8x256x9xbf16, #tpu.memory_space<vmem>>, vector<1x256x9xbf16>,
    %58 = vector.extract_strided_slice %26 {offsets = [0, 3], sizes = [256, 1], strides = [1, 1]} : vector<256x16xf32> to vector<256x1xf32>
    %c3_30 = arith.constant 3 : index
    %c0_31 = arith.constant 0 : index
    %c0_32 = arith.constant 0 : index
    %59 = vector.load %arg5[%c3_30, %c0_31, %c0_32] : memref<8x256x1xf32, #tpu.memory_space<vmem>>, vector<1x256x1xf32>
    %60 = vector.shape_cast %59 : vector<1x256x1xf32> to vector<256x1xf32>
    %61 = vector.shape_cast %58 : vector<256x1xf32> to vector<1x256x1xf32>
    tpu.vector_store %arg5[%c3_30, %c0_31, %c0_32], %61 {strides = array<i32>} : memref<8x256x1xf32, #tpu.memory_space<vmem>>, vector<1x256x1xf32>,
    %62 = vector.extract_strided_slice %24 {offsets = [0, 36], sizes = [256, 9], strides = [1, 1]} : vector<256x72xbf16> to vector<256x9xbf16>
    %c4 = arith.constant 4 : index
    %c0_33 = arith.constant 0 : index
    %c0_34 = arith.constant 0 : index
    %63 = vector.load %arg4[%c4, %c0_33, %c0_34] : memref<8x256x9xbf16, #tpu.memory_space<vmem>>, vector<1x256x9xbf16>
    %64 = vector.shape_cast %63 : vector<1x256x9xbf16> to vector<256x9xbf16>
    %65 = vector.shape_cast %62 : vector<256x9xbf16> to vector<1x256x9xbf16>
    tpu.vector_store %arg4[%c4, %c0_33, %c0_34], %65 {strides = array<i32>} : memref<8x256x9xbf16, #tpu.memory_space<vmem>>, vector<1x256x9xbf16>,
    %66 = vector.extract_strided_slice %26 {offsets = [0, 4], sizes = [256, 1], strides = [1, 1]} : vector<256x16xf32> to vector<256x1xf32>
    %c4_35 = arith.constant 4 : index
    %c0_36 = arith.constant 0 : index
    %c0_37 = arith.constant 0 : index
    %67 = vector.load %arg5[%c4_35, %c0_36, %c0_37] : memref<8x256x1xf32, #tpu.memory_space<vmem>>, vector<1x256x1xf32>
    %68 = vector.shape_cast %67 : vector<1x256x1xf32> to vector<256x1xf32>
    %69 = vector.shape_cast %66 : vector<256x1xf32> to vector<1x256x1xf32>
    tpu.vector_store %arg5[%c4_35, %c0_36, %c0_37], %69 {strides = array<i32>} : memref<8x256x1xf32, #tpu.memory_space<vmem>>, vector<1x256x1xf32>,
    %70 = vector.extract_strided_slice %24 {offsets = [0, 45], sizes = [256, 9], strides = [1, 1]} : vector<256x72xbf16> to vector<256x9xbf16>
    %c5 = arith.constant 5 : index
    %c0_38 = arith.constant 0 : index
    %c0_39 = arith.constant 0 : index
    %71 = vector.load %arg4[%c5, %c0_38, %c0_39] : memref<8x256x9xbf16, #tpu.memory_space<vmem>>, vector<1x256x9xbf16>
    %72 = vector.shape_cast %71 : vector<1x256x9xbf16> to vector<256x9xbf16>
    %73 = vector.shape_cast %70 : vector<256x9xbf16> to vector<1x256x9xbf16>
    tpu.vector_store %arg4[%c5, %c0_38, %c0_39], %73 {strides = array<i32>} : memref<8x256x9xbf16, #tpu.memory_space<vmem>>, vector<1x256x9xbf16>,
    %74 = vector.extract_strided_slice %26 {offsets = [0, 5], sizes = [256, 1], strides = [1, 1]} : vector<256x16xf32> to vector<256x1xf32>
    %c5_40 = arith.constant 5 : index
    %c0_41 = arith.constant 0 : index
    %c0_42 = arith.constant 0 : index
    %75 = vector.load %arg5[%c5_40, %c0_41, %c0_42] : memref<8x256x1xf32, #tpu.memory_space<vmem>>, vector<1x256x1xf32>
    %76 = vector.shape_cast %75 : vector<1x256x1xf32> to vector<256x1xf32>
    %77 = vector.shape_cast %74 : vector<256x1xf32> to vector<1x256x1xf32>
    tpu.vector_store %arg5[%c5_40, %c0_41, %c0_42], %77 {strides = array<i32>} : memref<8x256x1xf32, #tpu.memory_space<vmem>>, vector<1x256x1xf32>,
    %78 = vector.extract_strided_slice %24 {offsets = [0, 54], sizes = [256, 9], strides = [1, 1]} : vector<256x72xbf16> to vector<256x9xbf16>
    %c6 = arith.constant 6 : index
    %c0_43 = arith.constant 0 : index
    %c0_44 = arith.constant 0 : index
    %79 = vector.load %arg4[%c6, %c0_43, %c0_44] : memref<8x256x9xbf16, #tpu.memory_space<vmem>>, vector<1x256x9xbf16>
    %80 = vector.shape_cast %79 : vector<1x256x9xbf16> to vector<256x9xbf16>
    %81 = vector.shape_cast %78 : vector<256x9xbf16> to vector<1x256x9xbf16>
    tpu.vector_store %arg4[%c6, %c0_43, %c0_44], %81 {strides = array<i32>} : memref<8x256x9xbf16, #tpu.memory_space<vmem>>, vector<1x256x9xbf16>,
    %82 = vector.extract_strided_slice %26 {offsets = [0, 6], sizes = [256, 1], strides = [1, 1]} : vector<256x16xf32> to vector<256x1xf32>
    %c6_45 = arith.constant 6 : index
    %c0_46 = arith.constant 0 : index
    %c0_47 = arith.constant 0 : index
    %83 = vector.load %arg5[%c6_45, %c0_46, %c0_47] : memref<8x256x1xf32, #tpu.memory_space<vmem>>, vector<1x256x1xf32>
    %84 = vector.shape_cast %83 : vector<1x256x1xf32> to vector<256x1xf32>
    %85 = vector.shape_cast %82 : vector<256x1xf32> to vector<1x256x1xf32>
    tpu.vector_store %arg5[%c6_45, %c0_46, %c0_47], %85 {strides = array<i32>} : memref<8x256x1xf32, #tpu.memory_space<vmem>>, vector<1x256x1xf32>,
    %86 = vector.extract_strided_slice %24 {offsets = [0, 63], sizes = [256, 9], strides = [1, 1]} : vector<256x72xbf16> to vector<256x9xbf16>
    %c7 = arith.constant 7 : index
    %c0_48 = arith.constant 0 : index
    %c0_49 = arith.constant 0 : index
    %87 = vector.load %arg4[%c7, %c0_48, %c0_49] : memref<8x256x9xbf16, #tpu.memory_space<vmem>>, vector<1x256x9xbf16>
    %88 = vector.shape_cast %87 : vector<1x256x9xbf16> to vector<256x9xbf16>
    %89 = vector.shape_cast %86 : vector<256x9xbf16> to vector<1x256x9xbf16>
    tpu.vector_store %arg4[%c7, %c0_48, %c0_49], %89 {strides = array<i32>} : memref<8x256x9xbf16, #tpu.memory_space<vmem>>, vector<1x256x9xbf16>,
    %90 = vector.extract_strided_slice %26 {offsets = [0, 7], sizes = [256, 1], strides = [1, 1]} : vector<256x16xf32> to vector<256x1xf32>
    %c7_50 = arith.constant 7 : index
    %c0_51 = arith.constant 0 : index
    %c0_52 = arith.constant 0 : index
    %91 = vector.load %arg5[%c7_50, %c0_51, %c0_52] : memref<8x256x1xf32, #tpu.memory_space<vmem>>, vector<1x256x1xf32>
    %92 = vector.shape_cast %91 : vector<1x256x1xf32> to vector<256x1xf32>
    %93 = vector.shape_cast %90 : vector<256x1xf32> to vector<1x256x1xf32>
    tpu.vector_store %arg5[%c7_50, %c0_51, %c0_52], %93 {strides = array<i32>} : memref<8x256x1xf32, #tpu.memory_space<vmem>>, vector<1x256x1xf32>,
    return
  }
  func.func @transform_0(%arg0: i32) -> (i32, i32) {
    %c0_i32 = arith.constant 0 : i32
    %c0_i32_0 = arith.constant 0 : i32
    return %arg0, %c0_i32 : i32, i32
  }
  func.func @transform_1(%arg0: i32) -> (i32, i32) {
    %c0_i32 = arith.constant 0 : i32
    %c0_i32_0 = arith.constant 0 : i32
    %c0_i32_1 = arith.constant 0 : i32
    return %c0_i32, %c0_i32_0 : i32, i32
  }
  func.func @transform_2(%arg0: i32) -> (i32, i32) {
    %c0_i32 = arith.constant 0 : i32
    %c0_i32_0 = arith.constant 0 : i32
    %c0_i32_1 = arith.constant 0 : i32
    return %c0_i32, %c0_i32_0 : i32, i32
  }
  func.func @transform_3(%arg0: i32) -> (i32, i32, i32) {
    %c0_i32 = arith.constant 0 : i32
    %c0_i32_0 = arith.constant 0 : i32
    %c0_i32_1 = arith.constant 0 : i32
    return %c0_i32, %arg0, %c0_i32_0 : i32, i32, i32
  }
  func.func @transform_4(%arg0: i32) -> (i32, i32, i32) {
    %c0_i32 = arith.constant 0 : i32
    %c0_i32_0 = arith.constant 0 : i32
    %c0_i32_1 = arith.constant 0 : i32
    return %c0_i32, %arg0, %c0_i32_0 : i32, i32, i32
  }
  func.func @transform_5(%arg0: i32) -> (i32, i32) {
    %c0_i32 = arith.constant 0 : i32
    %c0_i32_0 = arith.constant 0 : i32
    return %c0_i32, %arg0 : i32, i32
  }
}

module attributes {stable_mosaic.version = 11 : i64} {
  func.func @_attention_kernel(%arg0: i32, %arg1: memref<8x128x1xf32, #tpu.memory_space<vmem>>, %arg2: memref<8x512xf32, #tpu.memory_space<vmem>>, %arg3: memref<8x512x9xbf16, #tpu.memory_space<vmem>>, %arg4: memref<128x512xi8, #tpu.memory_space<vmem>>, %arg5: memref<8x128x8xbf16, #tpu.memory_space<vmem>>) attributes {dimension_semantics = [#tpu.dimension_semantics<parallel>], iteration_bounds = array<i64: 4>, scalar_prefetch = 0 : i64, scratch_operands = 0 : i64, tpu.core_type = #tpu.core_type<tc>, window_params = [{transform_indices = @transform_0, window_bounds = array<i64: 8, 128, 1>}, {pipeline_mode = #tpu.pipeline_mode<synchronous>, transform_indices = @transform_1, window_bounds = array<i64: 8, 512>}, {pipeline_mode = #tpu.pipeline_mode<synchronous>, transform_indices = @transform_2, window_bounds = array<i64: 8, 512, 9>}, {transform_indices = @transform_3, window_bounds = array<i64: 128, 512>}, {transform_indices = @transform_4, window_bounds = array<i64: 8, 128, 8>}]} {
    %c0 = arith.constant 0 : index
    %c0_0 = arith.constant 0 : index
    %0 = vector.load %arg4[%c0, %c0_0] : memref<128x512xi8, #tpu.memory_space<vmem>>, vector<128x512xi8>
    %c0_i8 = arith.constant 0 : i8
    %1 = vector.broadcast %c0_i8 : i8 to vector<128x512xi8>
    %2 = arith.cmpi ne, %0, %1 : vector<128x512xi8>
    %cst = arith.constant 2.001950e-01 : bf16
    %cst_1 = arith.constant -9.982440e+08 : bf16
    %c0_i32 = arith.constant 0 : i32
    %c8_i32 = arith.constant 8 : i32
    %3 = arith.addi %c0_i32, %c8_i32 : i32
    %c1_i32 = arith.constant 1 : i32
    scf.for %arg6 = %c0_i32 to %3 step %c1_i32  : i32 {
      %4 = arith.index_cast %arg6 : i32 to index
      %c0_3 = arith.constant 0 : index
      %c0_4 = arith.constant 0 : index
      %5 = vector.load %arg1[%4, %c0_3, %c0_4] : memref<8x128x1xf32, #tpu.memory_space<vmem>>, vector<1x128x1xf32>
      %6 = vector.shape_cast %5 : vector<1x128x1xf32> to vector<128x1xf32>
      %7 = arith.truncf %6 : vector<128x1xf32> to vector<128x1xbf16>
      %8 = arith.index_cast %arg6 : i32 to index
      %c0_5 = arith.constant 0 : index
      %9 = vector.load %arg2[%8, %c0_5] : memref<8x512xf32, #tpu.memory_space<vmem>>, vector<1x512xf32>
      %10 = vector.shape_cast %9 : vector<1x512xf32> to vector<512xf32>
      %11 = arith.truncf %10 : vector<512xf32> to vector<512xbf16>
      %12 = vector.shape_cast %11 : vector<512xbf16> to vector<1x512xbf16>
      %13 = vector.broadcast %7 : vector<128x1xbf16> to vector<128x512xbf16>
      %14 = vector.broadcast %12 : vector<1x512xbf16> to vector<128x512xbf16>
      %15 = arith.addf %13, %14 : vector<128x512xbf16>
      %cst_6 = arith.constant 0.000000e+00 : bf16
      %16 = vector.broadcast %cst_6 : bf16 to vector<128x512xbf16>
      %17 = arith.cmpf ogt, %15, %16 : vector<128x512xbf16>
      %18 = vector.broadcast %cst : bf16 to vector<128x512xbf16>
      %19 = arith.mulf %18, %15 : vector<128x512xbf16>
      %20 = arith.select %17, %15, %19 : vector<128x512xi1>, vector<128x512xbf16>
      %21 = vector.broadcast %cst_1 : bf16 to vector<128x512xbf16>
      %22 = arith.select %2, %20, %21 : vector<128x512xi1>, vector<128x512xbf16>
      %cst_7 = arith.constant dense<0xFF80> : vector<128xbf16>
      %23 = vector.multi_reduction <maximumf>, %22, %cst_7 [1] : vector<128x512xbf16> to vector<128xbf16>
      %24 = vector.shape_cast %23 : vector<128xbf16> to vector<128x1xbf16>
      %25 = vector.broadcast %24 : vector<128x1xbf16> to vector<128x512xbf16>
      %26 = arith.subf %22, %25 : vector<128x512xbf16>
      %27 = math.exp %26 : vector<128x512xbf16>
      %28 = arith.index_cast %arg6 : i32 to index
      %c0_8 = arith.constant 0 : index
      %c0_9 = arith.constant 0 : index
      %29 = vector.load %arg3[%28, %c0_8, %c0_9] : memref<8x512x9xbf16, #tpu.memory_space<vmem>>, vector<1x512x9xbf16>
      %30 = vector.shape_cast %29 : vector<1x512x9xbf16> to vector<512x9xbf16>
      %cst_10 = arith.constant dense<0.000000e+00> : vector<128x9xf32>
      %31 = tpu.matmul %27, %30, %cst_10 {dimension_numbers = #tpu.dot_dimension_numbers<[1], [0], [0], [1], [0, 0, 1, 1], [], []>} : vector<128x512xbf16>, vector<512x9xbf16>, vector<128x9xf32> -> vector<128x9xf32>
      %32 = vector.extract_strided_slice %31 {offsets = [0, 0], sizes = [128, 8], strides = [1, 1]} : vector<128x9xf32> to vector<128x8xf32>
      %33 = vector.extract_strided_slice %31 {offsets = [0, 8], sizes = [128, 1], strides = [1, 1]} : vector<128x9xf32> to vector<128x1xf32>
      %34 = tpu.reciprocal %33 {approx = true} : vector<128x1xf32> -> vector<128x1xf32>
      %35 = vector.broadcast %34 : vector<128x1xf32> to vector<128x8xf32>
      %36 = arith.mulf %32, %35 : vector<128x8xf32>
      %cst_11 = arith.constant 0.000000e+00 : f32
      %37 = vector.broadcast %cst_11 : f32 to vector<128x8xf32>
      %38 = arith.cmpf ogt, %36, %37 : vector<128x8xf32>
      %cst_12 = arith.constant 0.000000e+00 : f32
      %39 = vector.broadcast %cst_12 : f32 to vector<128x8xf32>
      %40 = arith.minimumf %36, %39 : vector<128x8xf32>
      %41 = math.exp %40 : vector<128x8xf32>
      %cst_13 = arith.constant 1.000000e+00 : f32
      %42 = vector.broadcast %cst_13 : f32 to vector<128x8xf32>
      %43 = arith.subf %41, %42 : vector<128x8xf32>
      %44 = arith.select %38, %36, %43 : vector<128x8xi1>, vector<128x8xf32>
      %45 = arith.truncf %44 : vector<128x8xf32> to vector<128x8xbf16>
      %46 = arith.index_cast %arg6 : i32 to index
      %c0_14 = arith.constant 0 : index
      %c0_15 = arith.constant 0 : index
      %47 = vector.load %arg5[%46, %c0_14, %c0_15] : memref<8x128x8xbf16, #tpu.memory_space<vmem>>, vector<1x128x8xbf16>
      %48 = vector.shape_cast %47 : vector<1x128x8xbf16> to vector<128x8xbf16>
      %49 = vector.shape_cast %45 : vector<128x8xbf16> to vector<1x128x8xbf16>
      tpu.vector_store %arg5[%46, %c0_14, %c0_15], %49 {strides = array<i32>} : memref<8x128x8xbf16, #tpu.memory_space<vmem>>, vector<1x128x8xbf16>,
    }
    %c8_i32_2 = arith.constant 8 : i32
    return
  }
  func.func @transform_0(%arg0: i32) -> (i32, i32, i32) {
    %c0_i32 = arith.constant 0 : i32
    %c0_i32_0 = arith.constant 0 : i32
    %c0_i32_1 = arith.constant 0 : i32
    return %c0_i32, %arg0, %c0_i32_0 : i32, i32, i32
  }
  func.func @transform_1(%arg0: i32) -> (i32, i32) {
    %c0_i32 = arith.constant 0 : i32
    %c0_i32_0 = arith.constant 0 : i32
    %c0_i32_1 = arith.constant 0 : i32
    return %c0_i32, %c0_i32_0 : i32, i32
  }
  func.func @transform_2(%arg0: i32) -> (i32, i32, i32) {
    %c0_i32 = arith.constant 0 : i32
    %c0_i32_0 = arith.constant 0 : i32
    %c0_i32_1 = arith.constant 0 : i32
    %c0_i32_2 = arith.constant 0 : i32
    return %c0_i32, %c0_i32_0, %c0_i32_1 : i32, i32, i32
  }
  func.func @transform_3(%arg0: i32) -> (i32, i32) {
    %c0_i32 = arith.constant 0 : i32
    %c0_i32_0 = arith.constant 0 : i32
    return %arg0, %c0_i32 : i32, i32
  }
  func.func @transform_4(%arg0: i32) -> (i32, i32, i32) {
    %c0_i32 = arith.constant 0 : i32
    %c0_i32_0 = arith.constant 0 : i32
    %c0_i32_1 = arith.constant 0 : i32
    return %c0_i32, %arg0, %c0_i32_0 : i32, i32, i32
  }
}

module attributes {stable_mosaic.version = 11 : i64} {
  func.func @_project_kernel(%arg0: i32, %arg1: memref<256x64xbf16, #tpu.memory_space<vmem>>, %arg2: memref<64x8xbf16, #tpu.memory_space<vmem>>, %arg3: memref<8x2xbf16, #tpu.memory_space<vmem>>, %arg4: memref<1x256x8xbf16, #tpu.memory_space<vmem>>, %arg5: memref<1x256x1xf32, #tpu.memory_space<vmem>>, %arg6: memref<1x256xf32, #tpu.memory_space<vmem>>) attributes {dimension_semantics = [#tpu.dimension_semantics<parallel>], iteration_bounds = array<i64: 2>, scalar_prefetch = 0 : i64, scratch_operands = 0 : i64, tpu.core_type = #tpu.core_type<tc>, window_params = [{transform_indices = @transform_0, window_bounds = array<i64: 256, 64>}, {pipeline_mode = #tpu.pipeline_mode<synchronous>, transform_indices = @transform_1, window_bounds = array<i64: 64, 8>}, {pipeline_mode = #tpu.pipeline_mode<synchronous>, transform_indices = @transform_2, window_bounds = array<i64: 8, 2>}, {transform_indices = @transform_3, window_bounds = array<i64: 1, 256, 8>}, {transform_indices = @transform_4, window_bounds = array<i64: 1, 256, 1>}, {transform_indices = @transform_5, window_bounds = array<i64: 1, 256>}]} {
    %c0 = arith.constant 0 : index
    %c0_0 = arith.constant 0 : index
    %0 = vector.load %arg1[%c0, %c0_0] : memref<256x64xbf16, #tpu.memory_space<vmem>>, vector<256x64xbf16>
    %c0_1 = arith.constant 0 : index
    %c0_2 = arith.constant 0 : index
    %1 = vector.load %arg2[%c0_1, %c0_2] : memref<64x8xbf16, #tpu.memory_space<vmem>>, vector<64x8xbf16>
    %cst = arith.constant dense<0.000000e+00> : vector<256x8xf32>
    %2 = tpu.matmul %0, %1, %cst {dimension_numbers = #tpu.dot_dimension_numbers<[1], [0], [0], [1], [0, 0, 1, 1], [], []>} : vector<256x64xbf16>, vector<64x8xbf16>, vector<256x8xf32> -> vector<256x8xf32>
    %3 = tpu.iota {dimensions = array<i32: 1>} : vector<256x8xi32>
    %c8_i32 = arith.constant 8 : i32
    %c0_i32 = arith.constant 0 : i32
    %4 = arith.cmpi eq, %c8_i32, %c0_i32 : i32
    %c1_i32 = arith.constant 1 : i32
    %5 = arith.select %4, %c1_i32, %c8_i32 : i32
    %6 = vector.broadcast %5 : i32 to vector<256x8xi32>
    %7 = arith.remsi %3, %6 : vector<256x8xi32>
    %c0_i32_3 = arith.constant 0 : i32
    %8 = vector.broadcast %c0_i32_3 : i32 to vector<256x8xi32>
    %9 = arith.cmpi ne, %7, %8 : vector<256x8xi32>
    %c0_i32_4 = arith.constant 0 : i32
    %10 = vector.broadcast %c0_i32_4 : i32 to vector<256x8xi32>
    %11 = arith.cmpi slt, %7, %10 : vector<256x8xi32>
    %c0_i32_5 = arith.constant 0 : i32
    %12 = arith.cmpi slt, %5, %c0_i32_5 : i32
    %13 = vector.broadcast %12 : i1 to vector<256x8xi1>
    %14 = vector.broadcast %13 : vector<256x8xi1> to vector<256x8xi1>
    %15 = arith.xori %11, %14 : vector<256x8xi1>
    %16 = arith.andi %15, %9 : vector<256x8xi1>
    %17 = vector.broadcast %5 : i32 to vector<256x8xi32>
    %18 = arith.addi %7, %17 : vector<256x8xi32>
    %19 = arith.select %16, %18, %7 : vector<256x8xi1>, vector<256x8xi32>
    %c7_i32 = arith.constant 7 : i32
    %20 = vector.broadcast %c7_i32 : i32 to vector<256x8xi32>
    %21 = arith.cmpi eq, %19, %20 : vector<256x8xi32>
    %cst_6 = arith.constant 1.000000e+00 : f32
    %22 = vector.broadcast %cst_6 : f32 to vector<256x8xf32>
    %23 = arith.select %21, %22, %2 : vector<256x8xi1>, vector<256x8xf32>
    %24 = arith.truncf %23 : vector<256x8xf32> to vector<256x8xbf16>
    %c0_7 = arith.constant 0 : index
    %c0_8 = arith.constant 0 : index
    %25 = vector.load %arg3[%c0_7, %c0_8] : memref<8x2xbf16, #tpu.memory_space<vmem>>, vector<8x2xbf16>
    %cst_9 = arith.constant dense<0.000000e+00> : vector<256x2xf32>
    %26 = tpu.matmul %24, %25, %cst_9 {dimension_numbers = #tpu.dot_dimension_numbers<[1], [0], [0], [1], [0, 0, 1, 1], [], []>} : vector<256x8xbf16>, vector<8x2xbf16>, vector<256x2xf32> -> vector<256x2xf32>
    %27 = vector.extract_strided_slice %26 {offsets = [0, 1], sizes = [256, 1], strides = [1, 1]} : vector<256x2xf32> to vector<256x1xf32>
    %28 = tpu.transpose %27, [1, 0] : vector<256x1xf32> -> vector<1x256xf32>
    %c0_10 = arith.constant 0 : index
    %c0_11 = arith.constant 0 : index
    %29 = vector.load %arg6[%c0_10, %c0_11] : memref<1x256xf32, #tpu.memory_space<vmem>>, vector<1x256xf32>
    tpu.vector_store %arg6[%c0_10, %c0_11], %28 {strides = array<i32>} : memref<1x256xf32, #tpu.memory_space<vmem>>, vector<1x256xf32>,
    %c0_12 = arith.constant 0 : index
    %c0_13 = arith.constant 0 : index
    %c0_14 = arith.constant 0 : index
    %30 = vector.load %arg4[%c0_12, %c0_13, %c0_14] : memref<1x256x8xbf16, #tpu.memory_space<vmem>>, vector<1x256x8xbf16>
    %31 = vector.shape_cast %30 : vector<1x256x8xbf16> to vector<256x8xbf16>
    %32 = vector.shape_cast %24 : vector<256x8xbf16> to vector<1x256x8xbf16>
    tpu.vector_store %arg4[%c0_12, %c0_13, %c0_14], %32 {strides = array<i32>} : memref<1x256x8xbf16, #tpu.memory_space<vmem>>, vector<1x256x8xbf16>,
    %33 = vector.extract_strided_slice %26 {offsets = [0, 0], sizes = [256, 1], strides = [1, 1]} : vector<256x2xf32> to vector<256x1xf32>
    %c0_15 = arith.constant 0 : index
    %c0_16 = arith.constant 0 : index
    %c0_17 = arith.constant 0 : index
    %34 = vector.load %arg5[%c0_15, %c0_16, %c0_17] : memref<1x256x1xf32, #tpu.memory_space<vmem>>, vector<1x256x1xf32>
    %35 = vector.shape_cast %34 : vector<1x256x1xf32> to vector<256x1xf32>
    %36 = vector.shape_cast %33 : vector<256x1xf32> to vector<1x256x1xf32>
    tpu.vector_store %arg5[%c0_15, %c0_16, %c0_17], %36 {strides = array<i32>} : memref<1x256x1xf32, #tpu.memory_space<vmem>>, vector<1x256x1xf32>,
    return
  }
  func.func @transform_0(%arg0: i32) -> (i32, i32) {
    %c0_i32 = arith.constant 0 : i32
    %c0_i32_0 = arith.constant 0 : i32
    return %arg0, %c0_i32 : i32, i32
  }
  func.func @transform_1(%arg0: i32) -> (i32, i32) {
    %c0_i32 = arith.constant 0 : i32
    %c0_i32_0 = arith.constant 0 : i32
    %c0_i32_1 = arith.constant 0 : i32
    return %c0_i32, %c0_i32_0 : i32, i32
  }
  func.func @transform_2(%arg0: i32) -> (i32, i32) {
    %c0_i32 = arith.constant 0 : i32
    %c0_i32_0 = arith.constant 0 : i32
    %c0_i32_1 = arith.constant 0 : i32
    return %c0_i32, %c0_i32_0 : i32, i32
  }
  func.func @transform_3(%arg0: i32) -> (i32, i32, i32) {
    %c0_i32 = arith.constant 0 : i32
    %c0_i32_0 = arith.constant 0 : i32
    %c0_i32_1 = arith.constant 0 : i32
    return %c0_i32, %arg0, %c0_i32_0 : i32, i32, i32
  }
  func.func @transform_4(%arg0: i32) -> (i32, i32, i32) {
    %c0_i32 = arith.constant 0 : i32
    %c0_i32_0 = arith.constant 0 : i32
    %c0_i32_1 = arith.constant 0 : i32
    return %c0_i32, %arg0, %c0_i32_0 : i32, i32, i32
  }
  func.func @transform_5(%arg0: i32) -> (i32, i32) {
    %c0_i32 = arith.constant 0 : i32
    %c0_i32_0 = arith.constant 0 : i32
    return %c0_i32, %arg0 : i32, i32
  }
}

module attributes {stable_mosaic.version = 11 : i64} {
  func.func @_attention_kernel(%arg0: i32, %arg1: memref<1x128x1xf32, #tpu.memory_space<vmem>>, %arg2: memref<1x512xf32, #tpu.memory_space<vmem>>, %arg3: memref<1x512x8xbf16, #tpu.memory_space<vmem>>, %arg4: memref<128x512xi8, #tpu.memory_space<vmem>>, %arg5: memref<1x128x7xf32, #tpu.memory_space<vmem>>) attributes {dimension_semantics = [#tpu.dimension_semantics<parallel>], iteration_bounds = array<i64: 4>, scalar_prefetch = 0 : i64, scratch_operands = 0 : i64, tpu.core_type = #tpu.core_type<tc>, window_params = [{transform_indices = @transform_0, window_bounds = array<i64: 1, 128, 1>}, {pipeline_mode = #tpu.pipeline_mode<synchronous>, transform_indices = @transform_1, window_bounds = array<i64: 1, 512>}, {pipeline_mode = #tpu.pipeline_mode<synchronous>, transform_indices = @transform_2, window_bounds = array<i64: 1, 512, 8>}, {transform_indices = @transform_3, window_bounds = array<i64: 128, 512>}, {transform_indices = @transform_4, window_bounds = array<i64: 1, 128, 7>}]} {
    %c0 = arith.constant 0 : index
    %c0_0 = arith.constant 0 : index
    %0 = vector.load %arg4[%c0, %c0_0] : memref<128x512xi8, #tpu.memory_space<vmem>>, vector<128x512xi8>
    %c0_i8 = arith.constant 0 : i8
    %1 = vector.broadcast %c0_i8 : i8 to vector<128x512xi8>
    %2 = arith.cmpi ne, %0, %1 : vector<128x512xi8>
    %cst = arith.constant 2.001950e-01 : bf16
    %cst_1 = arith.constant -9.982440e+08 : bf16
    %c0_i32 = arith.constant 0 : i32
    %3 = arith.index_cast %c0_i32 : i32 to index
    %c0_2 = arith.constant 0 : index
    %c0_3 = arith.constant 0 : index
    %4 = vector.load %arg1[%3, %c0_2, %c0_3] : memref<1x128x1xf32, #tpu.memory_space<vmem>>, vector<1x128x1xf32>
    %5 = vector.shape_cast %4 : vector<1x128x1xf32> to vector<128x1xf32>
    %6 = arith.truncf %5 : vector<128x1xf32> to vector<128x1xbf16>
    %7 = arith.index_cast %c0_i32 : i32 to index
    %c0_4 = arith.constant 0 : index
    %8 = vector.load %arg2[%7, %c0_4] : memref<1x512xf32, #tpu.memory_space<vmem>>, vector<1x512xf32>
    %9 = vector.shape_cast %8 : vector<1x512xf32> to vector<512xf32>
    %10 = arith.truncf %9 : vector<512xf32> to vector<512xbf16>
    %11 = vector.shape_cast %10 : vector<512xbf16> to vector<1x512xbf16>
    %12 = vector.broadcast %6 : vector<128x1xbf16> to vector<128x512xbf16>
    %13 = vector.broadcast %11 : vector<1x512xbf16> to vector<128x512xbf16>
    %14 = arith.addf %12, %13 : vector<128x512xbf16>
    %cst_5 = arith.constant 0.000000e+00 : bf16
    %15 = vector.broadcast %cst_5 : bf16 to vector<128x512xbf16>
    %16 = arith.cmpf ogt, %14, %15 : vector<128x512xbf16>
    %17 = vector.broadcast %cst : bf16 to vector<128x512xbf16>
    %18 = arith.mulf %17, %14 : vector<128x512xbf16>
    %19 = arith.select %16, %14, %18 : vector<128x512xi1>, vector<128x512xbf16>
    %20 = vector.broadcast %cst_1 : bf16 to vector<128x512xbf16>
    %21 = arith.select %2, %19, %20 : vector<128x512xi1>, vector<128x512xbf16>
    %cst_6 = arith.constant dense<0xFF80> : vector<128xbf16>
    %22 = vector.multi_reduction <maximumf>, %21, %cst_6 [1] : vector<128x512xbf16> to vector<128xbf16>
    %23 = vector.shape_cast %22 : vector<128xbf16> to vector<128x1xbf16>
    %24 = vector.broadcast %23 : vector<128x1xbf16> to vector<128x512xbf16>
    %25 = arith.subf %21, %24 : vector<128x512xbf16>
    %26 = math.exp %25 : vector<128x512xbf16>
    %27 = arith.index_cast %c0_i32 : i32 to index
    %c0_7 = arith.constant 0 : index
    %c0_8 = arith.constant 0 : index
    %28 = vector.load %arg3[%27, %c0_7, %c0_8] : memref<1x512x8xbf16, #tpu.memory_space<vmem>>, vector<1x512x8xbf16>
    %29 = vector.shape_cast %28 : vector<1x512x8xbf16> to vector<512x8xbf16>
    %cst_9 = arith.constant dense<0.000000e+00> : vector<128x8xf32>
    %30 = tpu.matmul %26, %29, %cst_9 {dimension_numbers = #tpu.dot_dimension_numbers<[1], [0], [0], [1], [0, 0, 1, 1], [], []>} : vector<128x512xbf16>, vector<512x8xbf16>, vector<128x8xf32> -> vector<128x8xf32>
    %31 = vector.extract_strided_slice %30 {offsets = [0, 0], sizes = [128, 7], strides = [1, 1]} : vector<128x8xf32> to vector<128x7xf32>
    %32 = vector.extract_strided_slice %30 {offsets = [0, 7], sizes = [128, 1], strides = [1, 1]} : vector<128x8xf32> to vector<128x1xf32>
    %33 = tpu.reciprocal %32 {approx = true} : vector<128x1xf32> -> vector<128x1xf32>
    %34 = vector.broadcast %33 : vector<128x1xf32> to vector<128x7xf32>
    %35 = arith.mulf %31, %34 : vector<128x7xf32>
    %cst_10 = arith.constant dense<0xFF800000> : vector<128xf32>
    %36 = vector.multi_reduction <maximumf>, %35, %cst_10 [1] : vector<128x7xf32> to vector<128xf32>
    %37 = vector.shape_cast %36 : vector<128xf32> to vector<128x1xf32>
    %38 = vector.broadcast %37 : vector<128x1xf32> to vector<128x7xf32>
    %39 = arith.subf %35, %38 : vector<128x7xf32>
    %40 = math.exp %39 : vector<128x7xf32>
    %cst_11 = arith.constant dense<0.000000e+00> : vector<128xf32>
    %41 = vector.multi_reduction <add>, %40, %cst_11 [1] : vector<128x7xf32> to vector<128xf32>
    %42 = vector.shape_cast %41 : vector<128xf32> to vector<128x1xf32>
    %43 = math.log %42 : vector<128x1xf32>
    %44 = vector.broadcast %43 : vector<128x1xf32> to vector<128x7xf32>
    %45 = arith.subf %39, %44 : vector<128x7xf32>
    %46 = arith.index_cast %c0_i32 : i32 to index
    %c0_12 = arith.constant 0 : index
    %c0_13 = arith.constant 0 : index
    %47 = vector.load %arg5[%46, %c0_12, %c0_13] : memref<1x128x7xf32, #tpu.memory_space<vmem>>, vector<1x128x7xf32>
    %48 = vector.shape_cast %47 : vector<1x128x7xf32> to vector<128x7xf32>
    %49 = vector.shape_cast %45 : vector<128x7xf32> to vector<1x128x7xf32>
    tpu.vector_store %arg5[%46, %c0_12, %c0_13], %49 {strides = array<i32>} : memref<1x128x7xf32, #tpu.memory_space<vmem>>, vector<1x128x7xf32>,
    %c1_i32 = arith.constant 1 : i32
    return
  }
  func.func @transform_0(%arg0: i32) -> (i32, i32, i32) {
    %c0_i32 = arith.constant 0 : i32
    %c0_i32_0 = arith.constant 0 : i32
    %c0_i32_1 = arith.constant 0 : i32
    return %c0_i32, %arg0, %c0_i32_0 : i32, i32, i32
  }
  func.func @transform_1(%arg0: i32) -> (i32, i32) {
    %c0_i32 = arith.constant 0 : i32
    %c0_i32_0 = arith.constant 0 : i32
    %c0_i32_1 = arith.constant 0 : i32
    return %c0_i32, %c0_i32_0 : i32, i32
  }
  func.func @transform_2(%arg0: i32) -> (i32, i32, i32) {
    %c0_i32 = arith.constant 0 : i32
    %c0_i32_0 = arith.constant 0 : i32
    %c0_i32_1 = arith.constant 0 : i32
    %c0_i32_2 = arith.constant 0 : i32
    return %c0_i32, %c0_i32_0, %c0_i32_1 : i32, i32, i32
  }
  func.func @transform_3(%arg0: i32) -> (i32, i32) {
    %c0_i32 = arith.constant 0 : i32
    %c0_i32_0 = arith.constant 0 : i32
    return %arg0, %c0_i32 : i32, i32
  }
  func.func @transform_4(%arg0: i32) -> (i32, i32, i32) {
    %c0_i32 = arith.constant 0 : i32
    %c0_i32_0 = arith.constant 0 : i32
    %c0_i32_1 = arith.constant 0 : i32
    return %c0_i32, %arg0, %c0_i32_0 : i32, i32, i32
  }
}

</mosaic_0001>

<bundles_post_ra>
// kernel: net_forward.5
= control target key start
LH: loop header
LB: loop body
LE: loop exit
PB: predicated region body
PF: predicated region fallthrough
CT: control target
= control target key end

     0   :  { %s3337_s15 = smov 0   ;;  %s3339_s16 = smov 0   ;;  %s4629_s0 = inlined_call_operand.vmem [shape: f32[8,512,1], index: 0, kind: input, shape index: {}]   ;;  %s4630_s1 = inlined_call_operand.vmem [shape: f32[8,512], index: 1, kind: input, shape index: {}]   ;;  %s4631_s2 = inlined_call_operand.vmem [shape: bf16[8,512,9], index: 2, kind: input, shape index: {}]   ;;  %s4632_s3 = inlined_call_operand.vmem [shape: s8[512,512], index: 3, kind: input, shape index: {}]   ;;  %s4633_s4 = inlined_call_operand.vmem [shape: bf16[8,512,8], index: 4, kind: output, shape index: {}]  }
   0x1   :  { %s3341_s17 = smov 0  }
   0x2 LB: > { %s3353_s18 = sadd.s32 4294967295, %s3304_s17   ;;  %s3356_s19 = sadd.s32 1, %s3304_s17   ;;  %s3304_s17 = sphi %s3341_s17, %s4743_s17   ;;  %s3300_s16 = sphi %s3339_s16, %s4742_s16   ;;  %s3296_s15 = sphi %s3337_s15, %s4741_s15  }
   0x3   : > { %s18_s20 = ssub.s32 %s3304_s17, %s3356_s19  ;;  %s21_s21 = sadd.s32 1, %s3300_s16 }
   0x4   : > { %p19_p0 = scmp.eq.s32.totalorder %s18_s20, 0  ;;  %p28_p1 = scmp.ne.s32.totalorder %s3300_s16, %s3296_s15 }
   0x5   : > { %p29_p2 = scmp.eq.s32.totalorder %s3304_s17, 0  ;;  %p126_p3 = scmp.eq.s32.totalorder %s3353_s18, 3 }
   0x6   : > { %s3366_s22 = scalar_select %p19_p0, %s3300_s16, %s21_s21  }
   0x7   : > { %p30_p4 = por %p29_p2, %p28_p1  ;;  %p3368_p5 = por %p126_p3, %p28_p1 }
   0x8   : > { %p2844_p6 = scmp.ge.s32.totalorder %s3304_s17, 4 }
   0xa   : > { %154 = sbr.rel (%p2844_p6) target bundleno = 83 (0x53), region = 24 }
   0xf   : > { %157 = sbr.rel (!%p30_p4) target bundleno = 83 (0x53), region = 28  ;;  %s159_s24 = sand.u32 (%p30_p4), 1, %s3300_s16  }
  0x10   : > { %s2930_s25 = sshll.u32 (%p30_p4), %s3304_s17, 7  ;;  %s2845_s26 = sshll.u32 (%p30_p4), %s159_s24, 10 }
  0x11   : > { %s3378_s29 = scalar_lea.vmem (%p30_p4), %s4629_s0, %s2930_s25  ;;  %s3383_s30 = scalar_lea.vmem (%p30_p4), [#allocation2], %s2845_s26 }
  0x12   : > { %v447_v0 = vld [vmem:[%s3378_s29] sm:$0xff] (%p30_p4)  ;;  %v449_v1 = vld [vmem:[%s3378_s29 + $0x8] sm:$0xff] (%p30_p4)  ;;  %v451_v2 = vld [vmem:[%s3378_s29 + $0x10] sm:$0xff] (%p30_p4) }
  0x13   : > { %448 = vst [vmem:[%s3383_s30] sm:$0xff] (%p30_p4), %v447_v0  ;;  %450 = vst [vmem:[%s3383_s30 + $0x8] sm:$0xff] (%p30_p4), %v449_v1  ;;  %v453_v3 = vld [vmem:[%s3378_s29 + $0x18] sm:$0xff] (%p30_p4)  ;;  %v455_v4 = vld [vmem:[%s3378_s29 + $0x20] sm:$0xff] (%p30_p4) }
  0x14   : > { %452 = vst [vmem:[%s3383_s30 + $0x10] sm:$0xff] %v451_v2  ;;  %v457_v5 = vld [vmem:[%s3378_s29 + $0x28] sm:$0xff]  ;;  %454 = vst [vmem:[%s3383_s30 + $0x18] sm:$0xff] %v453_v3  ;;  %v459_v6 = vld [vmem:[%s3378_s29 + $0x30] sm:$0xff] }
  0x15   : > { %456 = vst [vmem:[%s3383_s30 + $0x20] sm:$0xff] %v455_v4  ;;  %458 = vst [vmem:[%s3383_s30 + $0x28] sm:$0xff] %v457_v5  ;;  %v461_v7 = vld [vmem:[%s3378_s29 + $0x38] sm:$0xff]  ;;  %v463_v8 = vld [vmem:[%s3378_s29 + $0x40] sm:$0xff] }
  0x16   : > { %460 = vst [vmem:[%s3383_s30 + $0x30] sm:$0xff] %v459_v6  ;;  %462 = vst [vmem:[%s3383_s30 + $0x38] sm:$0xff] %v461_v7  ;;  %v465_v9 = vld [vmem:[%s3378_s29 + $0x48] sm:$0xff]  ;;  %v467_v10 = vld [vmem:[%s3378_s29 + $0x50] sm:$0xff] }
  0x17   : > { %464 = vst [vmem:[%s3383_s30 + $0x40] sm:$0xff] %v463_v8  ;;  %v469_v11 = vld [vmem:[%s3378_s29 + $0x58] sm:$0xff]  ;;  %466 = vst [vmem:[%s3383_s30 + $0x48] sm:$0xff] %v465_v9  ;;  %v471_v12 = vld [vmem:[%s3378_s29 + $0x60] sm:$0xff] }
  0x18   : > { %468 = vst [vmem:[%s3383_s30 + $0x50] sm:$0xff] %v467_v10  ;;  %470 = vst [vmem:[%s3383_s30 + $0x58] sm:$0xff] %v469_v11  ;;  %v473_v13 = vld [vmem:[%s3378_s29 + $0x68] sm:$0xff]  ;;  %v475_v14 = vld [vmem:[%s3378_s29 + $0x70] sm:$0xff] }
  0x19   : > { %472 = vst [vmem:[%s3383_s30 + $0x60] sm:$0xff] %v471_v12  ;;  %474 = vst [vmem:[%s3383_s30 + $0x68] sm:$0xff] %v473_v13  ;;  %v477_v15 = vld [vmem:[%s3378_s29 + $0x78] sm:$0xff]  ;;  %v479_v16 = vld [vmem:[%s3378_s29 + $0x200] sm:$0xff] }
  0x1a   : > { %476 = vst [vmem:[%s3383_s30 + $0x70] sm:$0xff] %v475_v14  ;;  %v481_v17 = vld [vmem:[%s3378_s29 + $0x208] sm:$0xff]  ;;  %478 = vst [vmem:[%s3383_s30 + $0x78] sm:$0xff] %v477_v15  ;;  %v483_v18 = vld [vmem:[%s3378_s29 + $0x210] sm:$0xff] }
  0x1b   : > { %480 = vst [vmem:[%s3383_s30 + $0x80] sm:$0xff] %v479_v16  ;;  %482 = vst [vmem:[%s3383_s30 + $0x88] sm:$0xff] %v481_v17  ;;  %v485_v19 = vld [vmem:[%s3378_s29 + $0x218] sm:$0xff]  ;;  %v487_v20 = vld [vmem:[%s3378_s29 + $0x220] sm:$0xff] }
  0x1c   : > { %484 = vst [vmem:[%s3383_s30 + $0x90] sm:$0xff] %v483_v18  ;;  %486 = vst [vmem:[%s3383_s30 + $0x98] sm:$0xff] %v485_v19  ;;  %v489_v21 = vld [vmem:[%s3378_s29 + $0x228] sm:$0xff]  ;;  %v491_v22 = vld [vmem:[%s3378_s29 + $0x230] sm:$0xff] }
  0x1d   : > { %488 = vst [vmem:[%s3383_s30 + $0xa0] sm:$0xff] %v487_v20  ;;  %v493_v23 = vld [vmem:[%s3378_s29 + $0x238] sm:$0xff]  ;;  %490 = vst [vmem:[%s3383_s30 + $0xa8] sm:$0xff] %v489_v21  ;;  %v495_v24 = vld [vmem:[%s3378_s29 + $0x240] sm:$0xff] }
  0x1e   : > { %492 = vst [vmem:[%s3383_s30 + $0xb0] sm:$0xff] %v491_v22  ;;  %494 = vst [vmem:[%s3383_s30 + $0xb8] sm:$0xff] %v493_v23  ;;  %v497_v25 = vld [vmem:[%s3378_s29 + $0x248] sm:$0xff]  ;;  %v499_v26 = vld [vmem:[%s3378_s29 + $0x250] sm:$0xff] }
  0x1f   : > { %496 = vst [vmem:[%s3383_s30 + $0xc0] sm:$0xff] %v495_v24  ;;  %498 = vst [vmem:[%s3383_s30 + $0xc8] sm:$0xff] %v497_v25  ;;  %v501_v27 = vld [vmem:[%s3378_s29 + $0x258] sm:$0xff]  ;;  %v503_v28 = vld [vmem:[%s3378_s29 + $0x260] sm:$0xff] }
  0x20   : > { %500 = vst [vmem:[%s3383_s30 + $0xd0] sm:$0xff] %v499_v26  ;;  %v505_v29 = vld [vmem:[%s3378_s29 + $0x268] sm:$0xff]  ;;  %502 = vst [vmem:[%s3383_s30 + $0xd8] sm:$0xff] %v501_v27  ;;  %v507_v30 = vld [vmem:[%s3378_s29 + $0x270] sm:$0xff] }
  0x21   : > { %504 = vst [vmem:[%s3383_s30 + $0xe0] sm:$0xff] %v503_v28  ;;  %506 = vst [vmem:[%s3383_s30 + $0xe8] sm:$0xff] %v505_v29  ;;  %v509_v31 = vld [vmem:[%s3378_s29 + $0x278] sm:$0xff]  ;;  %v511_v32 = vld [vmem:[%s3378_s29 + $0x400] sm:$0xff] }
  0x22   : > { %508 = vst [vmem:[%s3383_s30 + $0xf0] sm:$0xff] %v507_v30  ;;  %510 = vst [vmem:[%s3383_s30 + $0xf8] sm:$0xff] %v509_v31  ;;  %v513_v33 = vld [vmem:[%s3378_s29 + $0x408] sm:$0xff]  ;;  %v515_v34 = vld [vmem:[%s3378_s29 + $0x410] sm:$0xff] }
  0x23   : > { %512 = vst [vmem:[%s3383_s30 + $0x100] sm:$0xff] %v511_v32  ;;  %v517_v35 = vld [vmem:[%s3378_s29 + $0x418] sm:$0xff]  ;;  %514 = vst [vmem:[%s3383_s30 + $0x108] sm:$0xff] %v513_v33  ;;  %v519_v36 = vld [vmem:[%s3378_s29 + $0x420] sm:$0xff] }
  0x24   : > { %516 = vst [vmem:[%s3383_s30 + $0x110] sm:$0xff] %v515_v34  ;;  %518 = vst [vmem:[%s3383_s30 + $0x118] sm:$0xff] %v517_v35  ;;  %v521_v37 = vld [vmem:[%s3378_s29 + $0x428] sm:$0xff]  ;;  %v523_v38 = vld [vmem:[%s3378_s29 + $0x430] sm:$0xff] }
  0x25   : > { %520 = vst [vmem:[%s3383_s30 + $0x120] sm:$0xff] %v519_v36  ;;  %522 = vst [vmem:[%s3383_s30 + $0x128] sm:$0xff] %v521_v37  ;;  %v525_v39 = vld [vmem:[%s3378_s29 + $0x438] sm:$0xff]  ;;  %v527_v40 = vld [vmem:[%s3378_s29 + $0x440] sm:$0xff] }
  0x26   : > { %524 = vst [vmem:[%s3383_s30 + $0x130] sm:$0xff] %v523_v38  ;;  %v529_v41 = vld [vmem:[%s3378_s29 + $0x448] sm:$0xff]  ;;  %526 = vst [vmem:[%s3383_s30 + $0x138] sm:$0xff] %v525_v39  ;;  %v531_v42 = vld [vmem:[%s3378_s29 + $0x450] sm:$0xff] }
  0x27   : > { %528 = vst [vmem:[%s3383_s30 + $0x140] sm:$0xff] %v527_v40  ;;  %530 = vst [vmem:[%s3383_s30 + $0x148] sm:$0xff] %v529_v41  ;;  %v533_v43 = vld [vmem:[%s3378_s29 + $0x458] sm:$0xff]  ;;  %v535_v44 = vld [vmem:[%s3378_s29 + $0x460] sm:$0xff] }
  0x28   : > { %532 = vst [vmem:[%s3383_s30 + $0x150] sm:$0xff] %v531_v42  ;;  %534 = vst [vmem:[%s3383_s30 + $0x158] sm:$0xff] %v533_v43  ;;  %v537_v45 = vld [vmem:[%s3378_s29 + $0x468] sm:$0xff]  ;;  %v539_v46 = vld [vmem:[%s3378_s29 + $0x470] sm:$0xff] }
  0x29   : > { %536 = vst [vmem:[%s3383_s30 + $0x160] sm:$0xff] %v535_v44  ;;  %v541_v47 = vld [vmem:[%s3378_s29 + $0x478] sm:$0xff]  ;;  %538 = vst [vmem:[%s3383_s30 + $0x168] sm:$0xff] %v537_v45  ;;  %v543_v48 = vld [vmem:[%s3378_s29 + $0x600] sm:$0xff] }
  0x2a   : > { %540 = vst [vmem:[%s3383_s30 + $0x170] sm:$0xff] %v539_v46  ;;  %542 = vst [vmem:[%s3383_s30 + $0x178] sm:$0xff] %v541_v47  ;;  %v545_v49 = vld [vmem:[%s3378_s29 + $0x608] sm:$0xff]  ;;  %v547_v50 = vld [vmem:[%s3378_s29 + $0x610] sm:$0xff] }
  0x2b   : > { %544 = vst [vmem:[%s3383_s30 + $0x180] sm:$0xff] %v543_v48  ;;  %546 = vst [vmem:[%s3383_s30 + $0x188] sm:$0xff] %v545_v49  ;;  %v549_v51 = vld [vmem:[%s3378_s29 + $0x618] sm:$0xff]  ;;  %v551_v52 = vld [vmem:[%s3378_s29 + $0x620] sm:$0xff] }
  0x2c   : > { %548 = vst [vmem:[%s3383_s30 + $0x190] sm:$0xff] %v547_v50  ;;  %v553_v53 = vld [vmem:[%s3378_s29 + $0x628] sm:$0xff]  ;;  %550 = vst [vmem:[%s3383_s30 + $0x198] sm:$0xff] %v549_v51  ;;  %v555_v54 = vld [vmem:[%s3378_s29 + $0x630] sm:$0xff] }
  0x2d   : > { %552 = vst [vmem:[%s3383_s30 + $0x1a0] sm:$0xff] %v551_v52  ;;  %554 = vst [vmem:[%s3383_s30 + $0x1a8] sm:$0xff] %v553_v53  ;;  %v557_v55 = vld [vmem:[%s3378_s29 + $0x638] sm:$0xff]  ;;  %v559_v56 = vld [vmem:[%s3378_s29 + $0x640] sm:$0xff] }
  0x2e   : > { %556 = vst [vmem:[%s3383_s30 + $0x1b0] sm:$0xff] %v555_v54  ;;  %558 = vst [vmem:[%s3383_s30 + $0x1b8] sm:$0xff] %v557_v55  ;;  %v561_v57 = vld [vmem:[%s3378_s29 + $0x648] sm:$0xff]  ;;  %v563_v58 = vld [vmem:[%s3378_s29 + $0x650] sm:$0xff] }
  0x2f   : > { %560 = vst [vmem:[%s3383_s30 + $0x1c0] sm:$0xff] %v559_v56  ;;  %v565_v59 = vld [vmem:[%s3378_s29 + $0x658] sm:$0xff]  ;;  %562 = vst [vmem:[%s3383_s30 + $0x1c8] sm:$0xff] %v561_v57  ;;  %v567_v60 = vld [vmem:[%s3378_s29 + $0x660] sm:$0xff] }
  0x30   : > { %564 = vst [vmem:[%s3383_s30 + $0x1d0] sm:$0xff] %v563_v58  ;;  %566 = vst [vmem:[%s3383_s30 + $0x1d8] sm:$0xff] %v565_v59  ;;  %v569_v61 = vld [vmem:[%s3378_s29 + $0x668] sm:$0xff]  ;;  %v571_v62 = vld [vmem:[%s3378_s29 + $0x670] sm:$0xff] }
  0x31   : > { %568 = vst [vmem:[%s3383_s30 + $0x1e0] sm:$0xff] %v567_v60  ;;  %570 = vst [vmem:[%s3383_s30 + $0x1e8] sm:$0xff] %v569_v61  ;;  %v573_v63 = vld [vmem:[%s3378_s29 + $0x678] sm:$0xff]  ;;  %v575_v0 = vld [vmem:[%s3378_s29 + $0x800] sm:$0xff] }
  0x32   : > { %572 = vst [vmem:[%s3383_s30 + $0x1f0] sm:$0xff] %v571_v62  ;;  %v577_v1 = vld [vmem:[%s3378_s29 + $0x808] sm:$0xff]  ;;  %574 = vst [vmem:[%s3383_s30 + $0x1f8] sm:$0xff] %v573_v63  ;;  %v579_v2 = vld [vmem:[%s3378_s29 + $0x810] sm:$0xff] }
  0x33   : > { %576 = vst [vmem:[%s3383_s30 + $0x200] sm:$0xff] %v575_v0  ;;  %578 = vst [vmem:[%s3383_s30 + $0x208] sm:$0xff] %v577_v1  ;;  %v581_v3 = vld [vmem:[%s3378_s29 + $0x818] sm:$0xff]  ;;  %v583_v4 = vld [vmem:[%s3378_s29 + $0x820] sm:$0xff] }
  0x34   : > { %580 = vst [vmem:[%s3383_s30 + $0x210] sm:$0xff] %v579_v2  ;;  %582 = vst [vmem:[%s3383_s30 + $0x218] sm:$0xff] %v581_v3  ;;  %v585_v5 = vld [vmem:[%s3378_s29 + $0x828] sm:$0xff]  ;;  %v587_v6 = vld [vmem:[%s3378_s29 + $0x830] sm:$0xff] }
  0x35   : > { %584 = vst [vmem:[%s3383_s30 + $0x220] sm:$0xff] %v583_v4  ;;  %v589_v7 = vld [vmem:[%s3378_s29 + $0x838] sm:$0xff]  ;;  %586 = vst [vmem:[%s3383_s30 + $0x228] sm:$0xff] %v585_v5  ;;  %v591_v8 = vld [vmem:[%s3378_s29 + $0x840] sm:$0xff] }
  0x36   : > { %588 = vst [vmem:[%s3383_s30 + $0x230] sm:$0xff] %v587_v6  ;;  %590 = vst [vmem:[%s3383_s30 + $0x238] sm:$0xff] %v589_v7  ;;  %v593_v9 = vld [vmem:[%s3378_s29 + $0x848] sm:$0xff]  ;;  %v595_v10 = vld [vmem:[%s3378_s29 + $0x850] sm:$0xff] }
  0x37   : > { %592 = vst [vmem:[%s3383_s30 + $0x240] sm:$0xff] %v591_v8  ;;  %594 = vst [vmem:[%s3383_s30 + $0x248] sm:$0xff] %v593_v9  ;;  %v597_v11 = vld [vmem:[%s3378_s29 + $0x858] sm:$0xff]  ;;  %v599_v12 = vld [vmem:[%s3378_s29 + $0x860] sm:$0xff] }
  0x38   : > { %596 = vst [vmem:[%s3383_s30 + $0x250] sm:$0xff] %v595_v10  ;;  %v601_v13 = vld [vmem:[%s3378_s29 + $0x868] sm:$0xff]  ;;  %598 = vst [vmem:[%s3383_s30 + $0x258] sm:$0xff] %v597_v11  ;;  %v603_v14 = vld [vmem:[%s3378_s29 + $0x870] sm:$0xff] }
  0x39   : > { %600 = vst [vmem:[%s3383_s30 + $0x260] sm:$0xff] %v599_v12  ;;  %602 = vst [vmem:[%s3383_s30 + $0x268] sm:$0xff] %v601_v13  ;;  %v605_v15 = vld [vmem:[%s3378_s29 + $0x878] sm:$0xff]  ;;  %v607_v16 = vld [vmem:[%s3378_s29 + $0xa00] sm:$0xff] }
  0x3a   : > { %604 = vst [vmem:[%s3383_s30 + $0x270] sm:$0xff] %v603_v14  ;;  %606 = vst [vmem:[%s3383_s30 + $0x278] sm:$0xff] %v605_v15  ;;  %v609_v17 = vld [vmem:[%s3378_s29 + $0xa08] sm:$0xff]  ;;  %v611_v18 = vld [vmem:[%s3378_s29 + $0xa10] sm:$0xff] }
  0x3b   : > { %608 = vst [vmem:[%s3383_s30 + $0x280] sm:$0xff] %v607_v16  ;;  %v613_v19 = vld [vmem:[%s3378_s29 + $0xa18] sm:$0xff]  ;;  %610 = vst [vmem:[%s3383_s30 + $0x288] sm:$0xff] %v609_v17  ;;  %v615_v20 = vld [vmem:[%s3378_s29 + $0xa20] sm:$0xff] }
  0x3c   : > { %612 = vst [vmem:[%s3383_s30 + $0x290] sm:$0xff] %v611_v18  ;;  %614 = vst [vmem:[%s3383_s30 + $0x298] sm:$0xff] %v613_v19  ;;  %v617_v21 = vld [vmem:[%s3378_s29 + $0xa28] sm:$0xff]  ;;  %v619_v22 = vld [vmem:[%s3378_s29 + $0xa30] sm:$0xff] }
  0x3d   : > { %616 = vst [vmem:[%s3383_s30 + $0x2a0] sm:$0xff] %v615_v20  ;;  %618 = vst [vmem:[%s3383_s30 + $0x2a8] sm:$0xff] %v617_v21  ;;  %v621_v23 = vld [vmem:[%s3378_s29 + $0xa38] sm:$0xff]  ;;  %v623_v24 = vld [vmem:[%s3378_s29 + $0xa40] sm:$0xff] }
  0x3e   : > { %620 = vst [vmem:[%s3383_s30 + $0x2b0] sm:$0xff] %v619_v22  ;;  %v625_v25 = vld [vmem:[%s3378_s29 + $0xa48] sm:$0xff]  ;;  %622 = vst [vmem:[%s3383_s30 + $0x2b8] sm:$0xff] %v621_v23  ;;  %v627_v26 = vld [vmem:[%s3378_s29 + $0xa50] sm:$0xff] }
  0x3f   : > { %624 = vst [vmem:[%s3383_s30 + $0x2c0] sm:$0xff] %v623_v24  ;;  %626 = vst [vmem:[%s3383_s30 + $0x2c8] sm:$0xff] %v625_v25  ;;  %v629_v27 = vld [vmem:[%s3378_s29 + $0xa58] sm:$0xff]  ;;  %v631_v28 = vld [vmem:[%s3378_s29 + $0xa60] sm:$0xff] }
  0x40   : > { %628 = vst [vmem:[%s3383_s30 + $0x2d0] sm:$0xff] %v627_v26  ;;  %630 = vst [vmem:[%s3383_s30 + $0x2d8] sm:$0xff] %v629_v27  ;;  %v633_v29 = vld [vmem:[%s3378_s29 + $0xa68] sm:$0xff]  ;;  %v635_v30 = vld [vmem:[%s3378_s29 + $0xa70] sm:$0xff] }
  0x41   : > { %632 = vst [vmem:[%s3383_s30 + $0x2e0] sm:$0xff] %v631_v28  ;;  %v637_v31 = vld [vmem:[%s3378_s29 + $0xa78] sm:$0xff]  ;;  %634 = vst [vmem:[%s3383_s30 + $0x2e8] sm:$0xff] %v633_v29  ;;  %v639_v32 = vld [vmem:[%s3378_s29 + $0xc00] sm:$0xff] }
  0x42   : > { %636 = vst [vmem:[%s3383_s30 + $0x2f0] sm:$0xff] %v635_v30  ;;  %638 = vst [vmem:[%s3383_s30 + $0x2f8] sm:$0xff] %v637_v31  ;;  %v641_v33 = vld [vmem:[%s3378_s29 + $0xc08] sm:$0xff]  ;;  %v643_v34 = vld [vmem:[%s3378_s29 + $0xc10] sm:$0xff] }
  0x43   : > { %640 = vst [vmem:[%s3383_s30 + $0x300] sm:$0xff] %v639_v32  ;;  %642 = vst [vmem:[%s3383_s30 + $0x308] sm:$0xff] %v641_v33  ;;  %v645_v35 = vld [vmem:[%s3378_s29 + $0xc18] sm:$0xff]  ;;  %v647_v36 = vld [vmem:[%s3378_s29 + $0xc20] sm:$0xff] }
  0x44   : > { %644 = vst [vmem:[%s3383_s30 + $0x310] sm:$0xff] %v643_v34  ;;  %v649_v37 = vld [vmem:[%s3378_s29 + $0xc28] sm:$0xff]  ;;  %646 = vst [vmem:[%s3383_s30 + $0x318] sm:$0xff] %v645_v35  ;;  %v651_v38 = vld [vmem:[%s3378_s29 + $0xc30] sm:$0xff] }
  0x45   : > { %648 = vst [vmem:[%s3383_s30 + $0x320] sm:$0xff] %v647_v36  ;;  %650 = vst [vmem:[%s3383_s30 + $0x328] sm:$0xff] %v649_v37  ;;  %v653_v39 = vld [vmem:[%s3378_s29 + $0xc38] sm:$0xff]  ;;  %v655_v40 = vld [vmem:[%s3378_s29 + $0xc40] sm:$0xff] }
  0x46   : > { %652 = vst [vmem:[%s3383_s30 + $0x330] sm:$0xff] %v651_v38  ;;  %654 = vst [vmem:[%s3383_s30 + $0x338] sm:$0xff] %v653_v39  ;;  %v657_v41 = vld [vmem:[%s3378_s29 + $0xc48] sm:$0xff]  ;;  %v659_v42 = vld [vmem:[%s3378_s29 + $0xc50] sm:$0xff] }
  0x47   : > { %656 = vst [vmem:[%s3383_s30 + $0x340] sm:$0xff] %v655_v40  ;;  %v661_v43 = vld [vmem:[%s3378_s29 + $0xc58] sm:$0xff]  ;;  %658 = vst [vmem:[%s3383_s30 + $0x348] sm:$0xff] %v657_v41  ;;  %v663_v44 = vld [vmem:[%s3378_s29 + $0xc60] sm:$0xff] }
  0x48   : > { %660 = vst [vmem:[%s3383_s30 + $0x350] sm:$0xff] %v659_v42  ;;  %662 = vst [vmem:[%s3383_s30 + $0x358] sm:$0xff] %v661_v43  ;;  %v665_v45 = vld [vmem:[%s3378_s29 + $0xc68] sm:$0xff]  ;;  %v667_v46 = vld [vmem:[%s3378_s29 + $0xc70] sm:$0xff] }
  0x49   : > { %664 = vst [vmem:[%s3383_s30 + $0x360] sm:$0xff] %v663_v44  ;;  %666 = vst [vmem:[%s3383_s30 + $0x368] sm:$0xff] %v665_v45  ;;  %v669_v47 = vld [vmem:[%s3378_s29 + $0xc78] sm:$0xff]  ;;  %v671_v48 = vld [vmem:[%s3378_s29 + $0xe00] sm:$0xff] }
  0x4a   : > { %668 = vst [vmem:[%s3383_s30 + $0x370] sm:$0xff] %v667_v46  ;;  %v673_v49 = vld [vmem:[%s3378_s29 + $0xe08] sm:$0xff]  ;;  %670 = vst [vmem:[%s3383_s30 + $0x378] sm:$0xff] %v669_v47  ;;  %v675_v50 = vld [vmem:[%s3378_s29 + $0xe10] sm:$0xff] }
  0x4b   : > { %672 = vst [vmem:[%s3383_s30 + $0x380] sm:$0xff] %v671_v48  ;;  %674 = vst [vmem:[%s3383_s30 + $0x388] sm:$0xff] %v673_v49  ;;  %v677_v51 = vld [vmem:[%s3378_s29 + $0xe18] sm:$0xff]  ;;  %v679_v52 = vld [vmem:[%s3378_s29 + $0xe20] sm:$0xff] }
  0x4c   : > { %676 = vst [vmem:[%s3383_s30 + $0x390] sm:$0xff] %v675_v50  ;;  %678 = vst [vmem:[%s3383_s30 + $0x398] sm:$0xff] %v677_v51  ;;  %v681_v53 = vld [vmem:[%s3378_s29 + $0xe28] sm:$0xff]  ;;  %v683_v54 = vld [vmem:[%s3378_s29 + $0xe30] sm:$0xff] }
  0x4d   : > { %680 = vst [vmem:[%s3383_s30 + $0x3a0] sm:$0xff] %v679_v52  ;;  %v685_v55 = vld [vmem:[%s3378_s29 + $0xe38] sm:$0xff]  ;;  %682 = vst [vmem:[%s3383_s30 + $0x3a8] sm:$0xff] %v681_v53  ;;  %v687_v56 = vld [vmem:[%s3378_s29 + $0xe40] sm:$0xff] }
  0x4e   : > { %684 = vst [vmem:[%s3383_s30 + $0x3b0] sm:$0xff] %v683_v54  ;;  %686 = vst [vmem:[%s3383_s30 + $0x3b8] sm:$0xff] %v685_v55  ;;  %v689_v57 = vld [vmem:[%s3378_s29 + $0xe48] sm:$0xff]  ;;  %v691_v58 = vld [vmem:[%s3378_s29 + $0xe50] sm:$0xff] }
  0x4f   : > { %688 = vst [vmem:[%s3383_s30 + $0x3c0] sm:$0xff] %v687_v56  ;;  %690 = vst [vmem:[%s3383_s30 + $0x3c8] sm:$0xff] %v689_v57  ;;  %v693_v59 = vld [vmem:[%s3378_s29 + $0xe58] sm:$0xff]  ;;  %v695_v60 = vld [vmem:[%s3378_s29 + $0xe60] sm:$0xff] }
  0x50   : > { %692 = vst [vmem:[%s3383_s30 + $0x3d0] sm:$0xff] %v691_v58  ;;  %v697_v61 = vld [vmem:[%s3378_s29 + $0xe68] sm:$0xff]  ;;  %694 = vst [vmem:[%s3383_s30 + $0x3d8] sm:$0xff] %v693_v59  ;;  %v699_v62 = vld [vmem:[%s3378_s29 + $0xe70] sm:$0xff] }
  0x51   : > { %696 = vst [vmem:[%s3383_s30 + $0x3e0] sm:$0xff] %v695_v60  ;;  %698 = vst [vmem:[%s3383_s30 + $0x3e8] sm:$0xff] %v697_v61  ;;  %v701_v63 = vld [vmem:[%s3378_s29 + $0xe78] sm:$0xff] }
  0x52   : > { %700 = vst [vmem:[%s3383_s30 + $0x3f0] sm:$0xff] %v699_v62  ;;  %702 = vst [vmem:[%s3383_s30 + $0x3f8] sm:$0xff] %v701_v63 }
  0x53 PF: > { %p2848_p7 = scmp.ge.s32.totalorder %s3304_s17, 1  ;;  %p717_p8 = scmp.lt.s32.totalorder %s3304_s17, 5 }
  0x55   : > { %p718_p9 = pnand %p2848_p7, %p717_p8 }
  0x57   : > { %721 = sbr.rel (%p718_p9) target bundleno = 905 (0x389), region = 70 }
  0x5c   : > { %s724_s5 = sand.u32 1, %s3296_s15   ;;  %s2851_s6 = sshll.u32 %s3353_s18, 2 }
  0x5d   : > { %s3642_s7 = sshll.u32 %s724_s5, 10  ;;  %s3644_s8 = sshll.u32 %s724_s5, 9 }
  0x5e   : > { %p756_p10 = scmp.lt.s32.totalorder %s2851_s6, 15  ;;  %s726_s13 = scalar_lea.vmem [#allocation2], %s3642_s7 }
  0x5f   : > { %s3699_s14 = scalar_lea.vmem [#allocation3], %s3644_s8  ;;  %s3701_s15 = smov 0  }
  0x60   : > { %s4745_s6 = smov (!%p756_p10, %s2851_s6), 15 }
  0x61   : > { %s2931_s9 = sshll.u32 %s4745_s6, 5 }
  0x62   : > { %s760_s12 = scalar_lea.vmem %s4632_s3, %s2931_s9 }
  0x63   : > { %v3649_v0 = vld [vmem:[%s760_s12] sm:$0xff]  ;;  %v3651_v1 = vld [vmem:[%s760_s12 + $0x8] sm:$0xff]  ;;  %v3653_v2 = vld [vmem:[%s760_s12 + $0x10] sm:$0xff] }
  0x64   : > { %4660 = vst [vmem:[#allocation4_spill] sm:$0xff] %v3649_v0  ;;  %4661 = vst [vmem:[#allocation5_spill] sm:$0xff] %v3651_v1  ;;  %v3655_v3 = vld [vmem:[%s760_s12 + $0x18] sm:$0xff]  ;;  %v3657_v4 = vld [vmem:[%s760_s12 + $0x20] sm:$0xff] }
  0x65   : > { %4662 = vst [vmem:[#allocation6_spill] sm:$0xff] %v3653_v2  ;;  %4663 = vst [vmem:[#allocation7_spill] sm:$0xff] %v3655_v3  ;;  %v3659_v5 = vld [vmem:[%s760_s12 + $0x28] sm:$0xff]  ;;  %v3664_v6 = vld [vmem:[%s760_s12 + $0x30] sm:$0xff] }
  0x66   : > { %4664 = vst [vmem:[#allocation8_spill] sm:$0xff] %v3657_v4  ;;  %4665 = vst [vmem:[#allocation9_spill] sm:$0xff] %v3659_v5  ;;  %v3666_v7 = vld [vmem:[%s760_s12 + $0x38] sm:$0xff]  ;;  %v3668_v8 = vld [vmem:[%s760_s12 + $0x40] sm:$0xff] }
  0x67   : > { %4666 = vst [vmem:[#allocation10_spill] sm:$0xff] %v3664_v6  ;;  %4667 = vst [vmem:[#allocation11_spill] sm:$0xff] %v3666_v7  ;;  %v3673_v9 = vld [vmem:[%s760_s12 + $0x48] sm:$0xff]  ;;  %v3675_v10 = vld [vmem:[%s760_s12 + $0x50] sm:$0xff] }
  0x68   : > { %4668 = vst [vmem:[#allocation12_spill] sm:$0xff] %v3668_v8  ;;  %4669 = vst [vmem:[#allocation13_spill] sm:$0xff] %v3673_v9  ;;  %v3677_v11 = vld [vmem:[%s760_s12 + $0x58] sm:$0xff]  ;;  %v3682_v12 = vld [vmem:[%s760_s12 + $0x60] sm:$0xff] }
  0x69   : > { %4670 = vst [vmem:[#allocation14_spill] sm:$0xff] %v3675_v10  ;;  %4671 = vst [vmem:[#allocation15_spill] sm:$0xff] %v3677_v11  ;;  %v3684_v13 = vld [vmem:[%s760_s12 + $0x68] sm:$0xff]  ;;  %v3686_v14 = vld [vmem:[%s760_s12 + $0x70] sm:$0xff] }
  0x6a   : > { %4672 = vst [vmem:[#allocation16_spill] sm:$0xff] %v3682_v12  ;;  %4673 = vst [vmem:[#allocation17_spill] sm:$0xff] %v3684_v13  ;;  %v3691_v15 = vld [vmem:[%s760_s12 + $0x78] sm:$0xff] }
  0x6b   : > { %4674 = vst [vmem:[#allocation18_spill] sm:$0xff] %v3686_v14  ;;  %4675 = vst [vmem:[#allocation19_spill] sm:$0xff] %v3691_v15 }
  0x6c LB: >> { %v3310_v16 = vmov 0   ;;  %s2854_s17 = sshll.u32 %s3308_s15, 7  ;;  %s2933_s21 = sshll.u32 %s3308_s15, 8  ;;  %v843_v53 = vlaneseq  ;;  %v4676_v0 = vld [vmem:[#allocation4_spill] sm:$0xff]  ;;  %v4678_v1 = vld [vmem:[#allocation5_spill] sm:$0xff]  ;;  %v4680_v2 = vld [vmem:[#allocation6_spill] sm:$0xff]  ;;  %s3308_s15 = sphi %s3701_s15, %s806_s15  }
  0x6d   : >> { %3115 = vset.pattern.permute.xlu1 %v3310_v16  ;;  %3114 = vset.pattern.permute.xlu0 %v3310_v16  ;;  %s808_s20 = scalar_lea.vmem %s726_s13, %s2854_s17 [#allocation2]  ;;  %s3715_s26 = scalar_lea.vmem %s4631_s2, %s2933_s21  ;;  %vm4677_vm0 = vnez %v4676_v0  ;;  %vm4679_vm1 = vnez %v4678_v1  ;;  %vm4681_vm2 = vnez %v4680_v2  ;;  %v4682_v3 = vld [vmem:[#allocation7_spill] sm:$0xff]  ;;  %v4684_v4 = vld [vmem:[#allocation8_spill] sm:$0xff]  ;;  %v4686_v5 = vld [vmem:[#allocation9_spill] sm:$0xff] }
  0x6e   : >> { %v813_v17 = vld [vmem:[%s808_s20 + $0x20] sm:$0xff]  ;;  %v814_v18 = vld [vmem:[%s808_s20 + $0x28] sm:$0xff]  ;;  %v815_v22 = vld [vmem:[%s808_s20 + $0x30] sm:$0xff]  ;;  %s833_s27 = sshra.s32 %s3308_s15, 3  ;;  %s836_s28 = sand.u32 7, %s3308_s15  ;;  %v844_v54 = vshrl.u32 %v843_v53, 7  ;;  %vm4683_vm3 = vnez %v4682_v3  ;;  %vm4685_vm4 = vnez %v4684_v4  ;;  %vm4687_vm5 = vnez %v4686_v5 }
  0x6f   : >> { %v809_v19 = vld [vmem:[%s808_s20] sm:$0xff]  ;;  %v827_v20 = vpack.c.bf16 %v814_v18, %v813_v17  ;;  %v810_v21 = vld [vmem:[%s808_s20 + $0x8] sm:$0xff]  ;;  %v816_v23 = vld [vmem:[%s808_s20 + $0x38] sm:$0xff]  ;;  %s2932_s29 = sshll.u32 %s833_s27, 5  ;;  %v1063_v61 = vsel %vm4677_vm0, 16843009, %v3310_v16 }
  0x70   : >> { %v825_v24 = vpack.c.bf16 %v810_v21, %v809_v19  ;;  %v811_v25 = vld [vmem:[%s808_s20 + $0x10] sm:$0xff]  ;;  %v812_v26 = vld [vmem:[%s808_s20 + $0x18] sm:$0xff]  ;;  %v828_v27 = vpack.c.bf16 %v816_v23, %v815_v22  ;;  %v817_v31 = vld [vmem:[%s808_s20 + $0x40] sm:$0xff]  ;;  %s839_s30 = sadd.s32 %s2932_s29, %s836_s28  ;;  %v845_v55 = vsub.s32 0, %v844_v54  ;;  %v849_v57 = vsub.s32 1, %v844_v54  ;;  %s2950_s9 = sshll.u32 %s3308_s15, 6 }
  0x71   : >> { %879 = vperm.xlu1 %3115, %v827_v20   ;;  %v826_v28 = vpack.c.bf16 %v812_v26, %v811_v25  ;;  %v819_v29 = vld [vmem:[%s808_s20 + $0x50] sm:$0xff]  ;;  %v820_v30 = vld [vmem:[%s808_s20 + $0x58] sm:$0xff]  ;;  %v818_v32 = vld [vmem:[%s808_s20 + $0x48] sm:$0xff]  ;;  %s840_s8 = scalar_lea.vmem %s4630_s1, %s839_s30  ;;  %v853_v58 = vsub.s32 2, %v844_v54  ;;  %v857_v59 = vsub.s32 3, %v844_v54  ;;  %s4436_s10 = scalar_lea.vmem %s3699_s14, %s2950_s9 [#allocation3] }
  0x72   : >> { %869 = vperm.xlu0 %3114, %v825_v24   ;;  %v823_v33 = vld [vmem:[%s808_s20 + $0x70] sm:$0xff]  ;;  %v824_v34 = vld [vmem:[%s808_s20 + $0x78] sm:$0xff]  ;;  %v830_v35 = vpack.c.bf16 %v820_v30, %v819_v29  ;;  %v821_v36 = vld [vmem:[%s808_s20 + $0x60] sm:$0xff]  ;;  %v829_v38 = vpack.c.bf16 %v818_v32, %v817_v31  ;;  %v1064_v62 = vsel %vm4679_vm1, 16843009, %v3310_v16  ;;  %s806_s15 = sadd.s32 1, %s3308_s15  }
  0x73   : >> { %v822_v37 = vld [vmem:[%s808_s20 + $0x68] sm:$0xff]  ;;  %v832_v39 = vpack.c.bf16 %v824_v34, %v823_v33  ;;  %v3118_v41 = vld [vmem:[%s3715_s26 + $0x78] sm:$0xff]   ;;  %v3122_v45 = vld [vmem:[%s3715_s26 + $0x70] sm:$0xff]   ;;  %v1065_v19 = vsel %vm4681_vm2, 16843009, %v3310_v16  ;;  %v1079_v21 = vcombine.low %v1063_v61, %v1064_v62  ;;  %p803_p11 = scmp.ge.s32.totalorder %s806_s15, 8  }
  0x74   : >> { %v831_v40 = vpack.c.bf16 %v822_v37, %v821_v36  ;;  %v3119_v42 = vld [vmem:[%s3715_s26 + $0xf8] sm:$0xff]   ;;  %v3123_v46 = vld [vmem:[%s3715_s26 + $0xf0] sm:$0xff]   ;;  %2952 = vmatprep.subr.bf16.mxu0 %v3118_v41  ;;  %v3126_v49 = vld [vmem:[%s3715_s26 + $0x68] sm:$0xff]   ;;  %v1066_v20 = vsel %vm4683_vm3, 16843009, %v3310_v16 }
  0x75   : >> { %884 = vperm.xlu1 %3115, %v828_v27   ;;  %v3120_v43 = vld [vmem:[%s3715_s26 + $0x38] sm:$0xff]   ;;  %3016 = vmatprep.subr.bf16.mxu1 %v3119_v42  ;;  %v3124_v47 = vld [vmem:[%s3715_s26 + $0x30] sm:$0xff]   ;;  %v3127_v50 = vld [vmem:[%s3715_s26 + $0xe8] sm:$0xff]   ;;  %v1081_v23 = vcombine.low %v1065_v19, %v1066_v20  ;;  %vm1095_vm0 = vnez %v1079_v21  ;;  %v1080_v27 = vcombine.high %v1063_v61, %v1064_v62  ;;  %v1082_v29 = vcombine.high %v1065_v19, %v1066_v20 }
  0x76   : >> { %874 = vperm.xlu0 %3114, %v826_v28   ;;  %v3121_v44 = vld [vmem:[%s3715_s26 + $0xb8] sm:$0xff]   ;;  %2953 = vmatpush3.bf16.msra.mxu0 %v3120_v43  ;;  %v3125_v48 = vld [vmem:[%s3715_s26 + $0xb0] sm:$0xff]   ;;  %v3128_v51 = vld [vmem:[%s3715_s26 + $0x28] sm:$0xff]   ;;  %v1067_v30 = vsel %vm4685_vm4, 16843009, %v3310_v16 }
  0x77   : >> { %3017 = vmatpush3.bf16.msra.mxu1 %v3121_v44  ;;  %2954 = vmatprep.subr.bf16.mxu0 %v3122_v45  ;;  %v3129_v52 = vld [vmem:[%s3715_s26 + $0xa8] sm:$0xff]   ;;  %v1068_v31 = vsel %vm4687_vm5, 16843009, %v3310_v16  ;;  %vm1096_vm1 = vnez %v1081_v23  ;;  %v4688_v6 = vld [vmem:[#allocation10_spill] sm:$0xff]  ;;  %v4690_v7 = vld [vmem:[#allocation11_spill] sm:$0xff]  ;;  %vm1097_vm2 = vnez %v1080_v27  ;;  %vm1098_vm3 = vnez %v1082_v29 }
  0x78   : >> { %3018 = vmatprep.subr.bf16.mxu1 %v3123_v46  ;;  %v841_v56 = vld [vmem:[%s840_s8] ss:$8 sm:$0xf]  ;;  %vm4689_vm6 = vnez %v4688_v6  ;;  %vm4691_vm7 = vnez %v4690_v7  ;;  %v1111_v37 = vsel %vm1095_vm0, 16843009, %v3310_v16 }
  0x79   : >> { %894 = vperm.xlu1 %3115, %v830_v35   ;;  %v846_v60 = vrot.slane %v841_v56, %v845_v55  ;;  %v850_v63 = vrot.slane %v841_v56, %v849_v57  ;;  %v854_v17 = vrot.slane %v841_v56, %v853_v58  ;;  %v858_v18 = vrot.slane %v841_v56, %v857_v59  ;;  %v4692_v8 = vld [vmem:[#allocation12_spill] sm:$0xff]  ;;  %v4694_v9 = vld [vmem:[#allocation13_spill] sm:$0xff]  ;;  %v4696_v10 = vld [vmem:[#allocation14_spill] sm:$0xff] }
  0x7a   : >> { %889 = vperm.xlu0 %3114, %v829_v38   ;;  %2955 = vmatpush3.bf16.msra.mxu0 %v3124_v47  ;;  %v1069_v32 = vsel %vm4689_vm6, 16843009, %v3310_v16  ;;  %v1070_v33 = vsel %vm4691_vm7, 16843009, %v3310_v16  ;;  %v1083_v38 = vcombine.low %v1067_v30, %v1068_v31  ;;  %v1127_v42 = vunpack.c.1.s8 %v1111_v37  ;;  %v4698_v11 = vld [vmem:[#allocation15_spill] sm:$0xff]  ;;  %v4700_v12 = vld [vmem:[#allocation16_spill] sm:$0xff] }
  0x7b   : >> { %3019 = vmatpush3.bf16.msra.mxu1 %v3125_v48  ;;  %2956 = vmatprep.subr.bf16.mxu0 %v3126_v49  ;;  %v863_v22 = vpack.c.bf16 %v846_v60, %v846_v60  ;;  %v864_v24 = vpack.c.bf16 %v850_v63, %v850_v63  ;;  %v865_v25 = vpack.c.bf16 %v854_v17, %v854_v17  ;;  %v1128_v43 = vunpack.c.0.s8 %v1111_v37  ;;  %v4702_v13 = vld [vmem:[#allocation17_spill] sm:$0xff]  ;;  %v4704_v14 = vld [vmem:[#allocation18_spill] sm:$0xff]  ;;  %v4706_v15 = vld [vmem:[#allocation19_spill] sm:$0xff] }
  0x7c   : >> { %3020 = vmatprep.subr.bf16.mxu1 %v3127_v50  ;;  %v866_v26 = vpack.c.bf16 %v858_v18, %v858_v18  ;;  %v1085_v41 = vcombine.low %v1069_v32, %v1070_v33  ;;  %v1130_v44 = vunpack.c.3.s8 %v1111_v37  ;;  %v1131_v45 = vunpack.c.2.s8 %v1111_v37 }
  0x7d   : >> { %904 = vperm.xlu1 %3115, %v832_v39   ;;  %v908_v28 = vpack.i.b16 %v863_v22, %v863_v22  ;;  %v915_v34 = vpack.i.b16 %v864_v24, %v864_v24  ;;  %v922_v35 = vpack.i.b16 %v865_v25, %v865_v25  ;;  %v1113_v49 = vsel %vm1097_vm2, 16843009, %v3310_v16 }
  0x7e   : >> { %899 = vperm.xlu0 %3114, %v831_v40   ;;  %2957 = vmatpush3.bf16.msra.mxu0 %v3128_v51  ;;  %v929_v36 = vpack.i.b16 %v866_v26, %v866_v26  ;;  %v1112_v40 = vsel %vm1096_vm1, 16843009, %v3310_v16  ;;  %vm1099_vm0 = vnez %v1083_v38  ;;  %vm1100_vm1 = vnez %v1085_v41 }
  0x7f   : >> { %3021 = vmatpush3.bf16.msra.mxu1 %v3129_v52  ;;  %v3759_v39 = vrot.slane %v908_v28, %v845_v55  ;;  %v3762_v46 = vrot.slane %v915_v34, %v845_v55  ;;  %v3764_v47 = vrot.slane %v922_v35, %v845_v55  ;;  %v1133_v50 = vunpack.c.1.s8 %v1112_v40 }
  0x80   : >> { %v3766_v48 = vrot.slane %v929_v36, %v845_v55  ;;  %v1134_v51 = vunpack.c.0.s8 %v1112_v40  ;;  %v1114_v52 = vsel %vm1098_vm3, 16843009, %v3310_v16  ;;  %v1136_v53 = vunpack.c.3.s8 %v1112_v40 }
  0x81   : >> { %v1137_v54 = vunpack.c.2.s8 %v1112_v40  ;;  %v1084_v56 = vcombine.high %v1067_v30, %v1068_v31  ;;  %v3770_v57 = vpack.c.b16 %v1127_v42, %v1128_v43  ;;  %v3772_v58 = vpack.c.b16 %v1130_v44, %v1131_v45 }
  0x82   : >> { %v1139_v59 = vunpack.c.1.s8 %v1113_v49  ;;  %v1140_v60 = vunpack.c.0.s8 %v1113_v49  ;;  %v1142_v61 = vunpack.c.3.s8 %v1113_v49  ;;  %v1143_v55 = vunpack.c.2.s8 %v1113_v49 }
  0x83   : >> { %v1145_v62 = vunpack.c.1.s8 %v1114_v52  ;;  %v1115_v63 = vsel %vm1099_vm0, 16843009, %v3310_v16  ;;  %v1146_v17 = vunpack.c.0.s8 %v1114_v52  ;;  %v1116_v18 = vsel %vm1100_vm1, 16843009, %v3310_v16 }
  0x84   : >> { %vm4693_vm8 = vnez %v4692_v8  ;;  %vm4695_vm9 = vnez %v4694_v9  ;;  %v1148_v21 = vunpack.c.3.s8 %v1114_v52  ;;  %v1149_v22 = vunpack.c.2.s8 %v1114_v52 }
  0x85   : >> { %v1071_v19 = vsel %vm4693_vm8, 16843009, %v3310_v16  ;;  %v1072_v20 = vsel %vm4695_vm9, 16843009, %v3310_v16  ;;  %v1086_v23 = vcombine.high %v1069_v32, %v1070_v33  ;;  %vm1101_vm2 = vnez %v1084_v56 }
  0x86   : >> { %v1151_v24 = vunpack.c.1.s8 %v1115_v63  ;;  %v1152_v25 = vunpack.c.0.s8 %v1115_v63  ;;  %vm4697_vm10 = vnez %v4696_v10  ;;  %vm4699_vm11 = vnez %v4698_v11 }
  0x87   : >> { %v1073_v26 = vsel %vm4697_vm10, 16843009, %v3310_v16  ;;  %v1074_v27 = vsel %vm4699_vm11, 16843009, %v3310_v16  ;;  %v1154_v28 = vunpack.c.3.s8 %v1115_v63  ;;  %v1155_v29 = vunpack.c.2.s8 %v1115_v63 }
  0x88   : >> { %v1157_v30 = vunpack.c.1.s8 %v1116_v18  ;;  %v1087_v31 = vcombine.low %v1071_v19, %v1072_v20  ;;  %v1158_v34 = vunpack.c.0.s8 %v1116_v18  ;;  %v1160_v35 = vunpack.c.3.s8 %v1116_v18 }
  0x89   : >> { %v1161_v36 = vunpack.c.2.s8 %v1116_v18  ;;  %v1117_v32 = vsel %vm1101_vm2, 16843009, %v3310_v16  ;;  %v3789_v33 = vpack.c.b16 %v1133_v50, %v1134_v51  ;;  %v3791_v37 = vpack.c.b16 %v1136_v53, %v1137_v54 }
  0x8a   : >> { %vm1102_vm3 = vnez %v1086_v23  ;;  %v1089_v38 = vcombine.low %v1073_v26, %v1074_v27  ;;  %v3793_v40 = vpack.c.b16 %v1139_v59, %v1140_v60  ;;  %v3795_v41 = vpack.c.b16 %v1142_v61, %v1143_v55 }
  0x8b   : >> { %v3797_v42 = vpack.c.b16 %v1145_v62, %v1146_v17  ;;  %v3799_v43 = vpack.c.b16 %v1148_v21, %v1149_v22  ;;  %v3801_v44 = vpack.c.b16 %v1151_v24, %v1152_v25  ;;  %v1163_v45 = vunpack.c.1.s8 %v1117_v32 }
  0x8c   : >> { %v1164_v49 = vunpack.c.0.s8 %v1117_v32  ;;  %vm1103_vm0 = vnez %v1087_v31  ;;  %v3803_v52 = vpack.c.b16 %v1154_v28, %v1155_v29  ;;  %v3805_v50 = vpack.c.b16 %v1157_v30, %v1158_v34 }
  0x8d   : >> { %v3807_v51 = vpack.c.b16 %v1160_v35, %v1161_v36  ;;  %v1118_v53 = vsel %vm1102_vm3, 16843009, %v3310_v16  ;;  %vm1104_vm1 = vnez %v1089_v38  ;;  %v1088_v54 = vcombine.high %v1071_v19, %v1072_v20 }
  0x8e   : >> { %vm4701_vm12 = vnez %v4700_v12  ;;  %vm4703_vm13 = vnez %v4702_v13  ;;  %v1166_v60 = vunpack.c.3.s8 %v1117_v32  ;;  %v1119_v61 = vsel %vm1103_vm0, 16843009, %v3310_v16 }
  0x8f   : >> { %v1075_v56 = vsel %vm4701_vm12, 16843009, %v3310_v16  ;;  %v1076_v59 = vsel %vm4703_vm13, 16843009, %v3310_v16  ;;  %vm4705_vm14 = vnez %v4704_v14  ;;  %vm4707_vm15 = vnez %v4706_v15 }
  0x90   : >> { %v1077_v55 = vsel %vm4705_vm14, 16843009, %v3310_v16  ;;  %v1078_v62 = vsel %vm4707_vm15, 16843009, %v3310_v16  ;;  %v3823_v63 = vpack.c.b16 %v1163_v45, %v1164_v49  ;;  %v1167_v17 = vunpack.c.2.s8 %v1117_v32 }
  0x91   : >> { %v1169_v18 = vunpack.c.1.s8 %v1118_v53  ;;  %v1090_v19 = vcombine.high %v1073_v26, %v1074_v27  ;;  %v1170_v20 = vunpack.c.0.s8 %v1118_v53  ;;  %v1172_v21 = vunpack.c.3.s8 %v1118_v53 }
  0x92   : >> { %v1120_v22 = vsel %vm1104_vm1, 16843009, %v3310_v16  ;;  %v1091_v23 = vcombine.low %v1075_v56, %v1076_v59  ;;  %v1173_v24 = vunpack.c.2.s8 %v1118_v53  ;;  %v1175_v25 = vunpack.c.1.s8 %v1119_v61 }
  0x93   : >> { %vm1105_vm2 = vnez %v1088_v54  ;;  %v1093_v28 = vcombine.low %v1077_v55, %v1078_v62  ;;  %v1176_v29 = vunpack.c.0.s8 %v1119_v61  ;;  %v1178_v30 = vunpack.c.3.s8 %v1119_v61 }
  0x94   : >> { %v1179_v31 = vunpack.c.2.s8 %v1119_v61  ;;  %v1092_v34 = vcombine.high %v1075_v56, %v1076_v59  ;;  %v1181_v35 = vunpack.c.1.s8 %v1120_v22  ;;  %v1182_v36 = vunpack.c.0.s8 %v1120_v22 }
  0x95   : >> { %vm1106_vm3 = vnez %v1090_v19  ;;  %v1094_v38 = vcombine.high %v1077_v55, %v1078_v62  ;;  %v3826_v32 = vpack.c.b16 %v1166_v60, %v1167_v17  ;;  %v3828_v26 = vpack.c.b16 %v1169_v18, %v1170_v20 }
  0x96   : >> { %v1121_v27 = vsel %vm1105_vm2, 16843009, %v3310_v16  ;;  %vm1107_vm0 = vnez %v1091_v23  ;;  %v3831_v45 = vpack.c.b16 %v1172_v21, %v1173_v24  ;;  %v1184_v49 = vunpack.c.3.s8 %v1120_v22 }
  0x97   : >> { %v1185_v53 = vunpack.c.2.s8 %v1120_v22  ;;  %vm1108_vm1 = vnez %v1093_v28  ;;  %v3833_v54 = vpack.c.b16 %v1175_v25, %v1176_v29  ;;  %v3835_v61 = vpack.c.b16 %v1178_v30, %v1179_v31 }
  0x98   : >> { %v1122_v56 = vsel %vm1106_vm3, 16843009, %v3310_v16  ;;  %vm1109_vm4 = vnez %v1092_v34  ;;  %v3838_v59 = vpack.c.b16 %v1181_v35, %v1182_v36  ;;  %v1187_v60 = vunpack.c.1.s8 %v1121_v27 }
  0x99   : >> { %v1123_v55 = vsel %vm1107_vm0, 16843009, %v3310_v16  ;;  %vm1110_vm5 = vnez %v1094_v38  ;;  %v1188_v62 = vunpack.c.0.s8 %v1121_v27  ;;  %v1190_v17 = vunpack.c.3.s8 %v1121_v27 }
  0x9a   : >> { %v1191_v18 = vunpack.c.2.s8 %v1121_v27  ;;  %v1124_v19 = vsel %vm1108_vm1, 16843009, %v3310_v16  ;;  %v1193_v20 = vunpack.c.1.s8 %v1122_v56  ;;  %v1194_v21 = vunpack.c.0.s8 %v1122_v56 }
  0x9b   : >> { %v1196_v22 = vunpack.c.3.s8 %v1122_v56  ;;  %v1125_v23 = vsel %vm1109_vm4, 16843009, %v3310_v16  ;;  %v1197_v24 = vunpack.c.2.s8 %v1122_v56  ;;  %v1199_v25 = vunpack.c.1.s8 %v1123_v55 }
  0x9c   : >> { %v1200_v28 = vunpack.c.0.s8 %v1123_v55  ;;  %v1126_v29 = vsel %vm1110_vm5, 16843009, %v3310_v16  ;;  %v1202_v30 = vunpack.c.3.s8 %v1123_v55  ;;  %v1203_v31 = vunpack.c.2.s8 %v1123_v55 }
  0x9d   : >> { %v1205_v34 = vunpack.c.1.s8 %v1124_v19  ;;  %v1206_v35 = vunpack.c.0.s8 %v1124_v19  ;;  %v1208_v36 = vunpack.c.3.s8 %v1124_v19  ;;  %v1209_v38 = vunpack.c.2.s8 %v1124_v19 }
  0x9e   : >> { %v1211_v0 = vunpack.c.1.s8 %v1125_v23  ;;  %v1212_v27 = vunpack.c.0.s8 %v1125_v23  ;;  %v1214_v1 = vunpack.c.3.s8 %v1125_v23  ;;  %v1215_v2 = vunpack.c.2.s8 %v1125_v23 }
  0x9f   : >> { %v1217_v3 = vunpack.c.1.s8 %v1126_v29  ;;  %v1218_v4 = vunpack.c.0.s8 %v1126_v29  ;;  %v3844_v5 = vpack.c.b16 %v1184_v49, %v1185_v53  ;;  %v3846_v6 = vpack.c.b16 %v1187_v60, %v1188_v62 }
  0xa0   : >> { %v1220_v56 = vunpack.c.3.s8 %v1126_v29  ;;  %v1221_v7 = vunpack.c.2.s8 %v1126_v29  ;;  %v3848_v8 = vpack.c.b16 %v1190_v17, %v1191_v18  ;;  %v3850_v16 = vpack.c.b16 %v1193_v20, %v1194_v21 }
  0xa1   : >> { %v3852_v55 = vpack.c.b16 %v1196_v22, %v1197_v24  ;;  %v3854_v9 = vpack.c.b16 %v1199_v25, %v1200_v28  ;;  %v3856_v10 = vpack.c.b16 %v1202_v30, %v1203_v31  ;;  %v3858_v23 = vpack.c.b16 %v1205_v34, %v1206_v35 }
  0xa2   : >> { %v3860_v11 = vpack.c.b16 %v1208_v36, %v1209_v38  ;;  %v3862_v49 = vpack.c.b16 %v1211_v0, %v1212_v27  ;;  %v3870_v17 = vpack.c.b16 %v1214_v1, %v1215_v2  ;;  %v3872_v18 = vpack.c.b16 %v1217_v3, %v1218_v4 }
  0xa3   : >> { %4708 = vst [vmem:[#allocation20_spill] sm:$0xff] %v3856_v10  ;;  %4709 = vst [vmem:[#allocation21_spill] sm:$0xff] %v3858_v23  ;;  %vm1223_vm4 = vcmp.ne.s16.totalorder %v3770_v57, 0  ;;  %v3880_v0 = vpack.c.b16 %v1220_v56, %v1221_v7  ;;  %vm1224_vm2 = vcmp.ne.s16.totalorder %v3772_v58, 0  ;;  %vm1225_vm0 = vcmp.ne.s16.totalorder %v3789_v33, 0 }
  0xa4   : >> { %4710 = vst [vmem:[#allocation22_spill] sm:$0xff] %v3860_v11  ;;  %4711 = vst [vmem:[#allocation23_spill] sm:$0xff] %v3862_v49  ;;  %vm1226_vm1 = vcmp.ne.s16.totalorder %v3791_v37, 0  ;;  %vm1227_vm8 = vcmp.ne.s16.totalorder %v3793_v40, 0  ;;  %vm1228_vm9 = vcmp.ne.s16.totalorder %v3795_v41, 0  ;;  %vm1229_vm10 = vcmp.ne.s16.totalorder %v3797_v42, 0 }
  0xa5   : >> { %4712 = vst [vmem:[#allocation24_spill] sm:$0xff] %v3870_v17  ;;  %4713 = vst [vmem:[#allocation25_spill] sm:$0xff] %v3872_v18  ;;  %vm1231_vm13 = vcmp.ne.s16.totalorder %v3801_v44, 0 }
  0xa6   : >> { %4714 = vst [vmem:[#allocation26_spill] sm:$0xff] %v3880_v0 }
  0xec   : >> { %v880_v19 = vpop.permute.xlu1 %879 }
  0xed   : >> { %v3865_v53 = vadd.bf16 %v3759_v39, %v880_v19  ;;  %v3868_v60 = vadd.bf16 %v3762_v46, %v880_v19  ;;  %v870_v62 = vpop.permute.xlu0 %869  ;;  %v3875_v20 = vadd.bf16 %v3764_v47, %v880_v19  ;;  %v3889_v3 = vadd.bf16 %v3766_v48, %v880_v19 }
  0xee   : >> { %v935_v21 = vadd.bf16 %v3759_v39, %v870_v62  ;;  %v936_v22 = vadd.bf16 %v3762_v46, %v870_v62  ;;  %v937_v1 = vadd.bf16 %v3764_v47, %v870_v62  ;;  %v3886_v2 = vadd.bf16 %v3766_v48, %v870_v62 }
  0xef   : >> { %vm975_vm11 = vcmp.gt.bf16.partialorder %v3865_v53, 0  ;;  %vm976_vm12 = vcmp.gt.bf16.partialorder %v3868_v60, 0  ;;  %vm977_vm15 = vcmp.gt.bf16.partialorder %v3875_v20, 0  ;;  %vm978_vm14 = vcmp.gt.bf16.partialorder %v3889_v3, 0 }
  0xf0   : >> { %v999_v4 = vmul.bf16 1045249613, %v935_v21  ;;  %v1000_v28 = vmul.bf16 1045249613, %v936_v22  ;;  %v885_v29 = vpop.permute.xlu1 %884  ;;  %vm967_vm5 = vcmp.gt.bf16.partialorder %v935_v21, 0  ;;  %vm968_vm3 = vcmp.gt.bf16.partialorder %v936_v22, 0 }
  0xf1   : >> { %v3893_v7 = vadd.bf16 %v3759_v39, %v885_v29  ;;  %v3896_v30 = vadd.bf16 %v3762_v46, %v885_v29  ;;  %v3899_v31 = vadd.bf16 %v3764_v47, %v885_v29  ;;  %v875_v34 = vpop.permute.xlu0 %874  ;;  %v3903_v35 = vadd.bf16 %v3766_v48, %v885_v29 }
  0xf2   : >> { %v3906_v36 = vadd.bf16 %v3759_v39, %v875_v34  ;;  %v3909_v38 = vadd.bf16 %v3762_v46, %v875_v34  ;;  %v3912_v27 = vadd.bf16 %v3764_v47, %v875_v34  ;;  %vm969_vm6 = vcmp.gt.bf16.partialorder %v937_v1, 0 }
  0xf3   : >> { %vm970_vm7 = vcmp.gt.bf16.partialorder %v3886_v2, 0  ;;  %v3919_v62 = vadd.bf16 %v3766_v48, %v875_v34  ;;  %v1001_v12 = vmul.bf16 1045249613, %v937_v1  ;;  %v1031_v15 = vsel %vm967_vm5, %v935_v21, %v999_v4 }
  0xf4   : >> { %v1003_v29 = vmul.bf16 1045249613, %v3906_v36  ;;  %v1004_v25 = vmul.bf16 1045249613, %v3909_v38  ;;  %v895_v24 = vpop.permute.xlu1 %894  ;;  %vm1230_vm5 = vcmp.ne.s16.totalorder %v3799_v43, 0  ;;  %v1032_v23 = vsel %vm968_vm3, %v936_v22, %v1000_v28 }
  0xf5   : >> { %v3924_v13 = vadd.bf16 %v3759_v39, %v895_v24  ;;  %v3927_v14 = vadd.bf16 %v3762_v46, %v895_v24  ;;  %v3930_v19 = vadd.bf16 %v3764_v47, %v895_v24  ;;  %v890_v56 = vpop.permute.xlu0 %889  ;;  %v3935_v34 = vadd.bf16 %v3766_v48, %v895_v24 }
  0xf6   : >> { %v3938_v0 = vadd.bf16 %v3759_v39, %v890_v56  ;;  %v3941_v18 = vadd.bf16 %v3762_v46, %v890_v56  ;;  %v3944_v17 = vadd.bf16 %v3764_v47, %v890_v56  ;;  %v3953_v4 = vadd.bf16 %v3766_v48, %v890_v56 }
  0xf7   : >> { %4715 = vst [vmem:[#allocation27_spill] sm:$0xff] %v3930_v19  ;;  %4716 = vst [vmem:[#allocation28_spill] sm:$0xff] %v3935_v34  ;;  %v1002_v11 = vmul.bf16 1045249613, %v3886_v2  ;;  %v1033_v10 = vsel %vm969_vm6, %v937_v1, %v1001_v12  ;;  %v3974_v49 = vsel %vm1223_vm4, %v1031_v15, 3463368302 }
  0xf8   : >> { %v905_v19 = vpop.permute.xlu1 %904  ;;  %vm972_vm4 = vcmp.gt.bf16.partialorder %v3909_v38, 0  ;;  %v1006_v58 = vmul.bf16 1045249613, %v3919_v62  ;;  %vm1236_vm3 = vcmp.ne.s16.totalorder %v3826_v32, 0  ;;  %vm1239_vm6 = vcmp.ne.s16.totalorder %v3833_v54, 0 }
  0xf9   : >> { %v3964_v56 = vadd.bf16 %v3759_v39, %v905_v19  ;;  %v3967_v24 = vadd.bf16 %v3762_v46, %v905_v19  ;;  %v3970_v21 = vadd.bf16 %v3764_v47, %v905_v19  ;;  %v900_v34 = vpop.permute.xlu0 %899  ;;  %v3977_v12 = vadd.bf16 %v3766_v48, %v905_v19 }
  0xfa   : >> { %v3980_v22 = vadd.bf16 %v3759_v39, %v900_v34  ;;  %v3983_v1 = vadd.bf16 %v3762_v46, %v900_v34  ;;  %v3986_v28 = vadd.bf16 %v3764_v47, %v900_v34  ;;  %v3992_v15 = vadd.bf16 %v3766_v48, %v900_v34 }
  0xfb   : >> { %4717 = vst [vmem:[#allocation29_spill] sm:$0xff] %v3977_v12  ;;  %v1027_v57 = vmul.bf16 1045249613, %v3964_v56  ;;  %v1034_v39 = vsel %vm970_vm7, %v3886_v2, %v1002_v11  ;;  %v3999_v46 = vsel %vm1224_vm2, %v1032_v23, 3463368302  ;;  %vm971_vm7 = vcmp.gt.bf16.partialorder %v3906_v36, 0 }
  0xfc   : >> { %v1023_v47 = vmul.bf16 1045249613, %v3980_v22  ;;  %v1024_v19 = vmul.bf16 1045249613, %v3983_v1  ;;  %v4005_v12 = vsel %vm1225_vm0, %v1033_v10, 3463368302  ;;  %v1287_v48 = vmax.bf16 %v3999_v46, %v3974_v49 }
  0xfd   : >> { %v4011_v34 = vsel %vm1226_vm1, %v1034_v39, 3463368302  ;;  %vm973_vm2 = vcmp.gt.bf16.partialorder %v3912_v27, 0  ;;  %vm974_vm0 = vcmp.gt.bf16.partialorder %v3919_v62, 0  ;;  %v1005_v10 = vmul.bf16 1045249613, %v3912_v27 }
  0xfe   : >> { %v1288_v11 = vmax.bf16 %v1287_v48, %v4005_v12  ;;  %vm1237_vm1 = vcmp.ne.s16.totalorder %v3828_v26, 0  ;;  %v1035_v33 = vsel %vm971_vm7, %v3906_v36, %v1003_v29  ;;  %v1036_v37 = vsel %vm972_vm4, %v3909_v38, %v1004_v25  ;;  %v4728_v26 = vld [vmem:[#allocation20_spill] sm:$0xff] }
  0xff   : >> { %v1037_v2 = vsel %vm973_vm2, %v3912_v27, %v1005_v10  ;;  %v1038_v39 = vsel %vm974_vm0, %v3919_v62, %v1006_v58  ;;  %v4033_v48 = vsel %vm1227_vm8, %v1035_v33, 3463368302  ;;  %v4038_v36 = vsel %vm1228_vm9, %v1036_v37, 3463368302 }
 0x100   : >> { %v1289_v23 = vmax.bf16 %v1288_v11, %v4011_v34  ;;  %v4042_v25 = vsel %vm1229_vm10, %v1037_v2, 3463368302  ;;  %v4046_v38 = vsel %vm1230_vm5, %v1038_v39, 3463368302  ;;  %v4718_v27 = vmul.bf16 1045249613, %v3865_v53 }
 0x101   : >> { %vm1240_vm8 = vcmp.ne.s16.totalorder %v3835_v61, 0  ;;  %v1292_v41 = vmax.bf16 %v4038_v36, %v4033_v48  ;;  %v1009_v42 = vmul.bf16 1045249613, %v3875_v20  ;;  %v1010_v62 = vmul.bf16 1045249613, %v3889_v3 }
 0x102   : >> { %v1039_v40 = vsel %vm975_vm11, %v3865_v53, %v4718_v27  ;;  %1290 = vmax.xlane.bf16.xlu0 %v1289_v23  ;;  %v4719_v43 = vmul.bf16 1045249613, %v3868_v60  ;;  %vm1241_vm9 = vcmp.ne.s16.totalorder %v3838_v59, 0  ;;  %vm4720_vm10 = vcmp.ne.s16.totalorder %v3803_v52, 0  ;;  %v4734_v59 = vld [vmem:[#allocation22_spill] sm:$0xff] }
 0x103   : >> { %v4066_v53 = vsel %vm1231_vm13, %v1039_v40, 3463368302  ;;  %vm979_vm11 = vcmp.gt.bf16.partialorder %v3893_v7, 0  ;;  %vm980_vm5 = vcmp.gt.bf16.partialorder %v3896_v30, 0  ;;  %vm1242_vm7 = vcmp.ne.s16.totalorder %v3844_v5, 0 }
 0x104   : >> { %v1040_v29 = vsel %vm976_vm12, %v3868_v60, %v4719_v43  ;;  %v1293_v10 = vmax.bf16 %v1292_v41, %v4042_v25  ;;  %v1041_v60 = vsel %vm977_vm15, %v3875_v20, %v1009_v42  ;;  %v1042_v44 = vsel %vm978_vm14, %v3889_v3, %v1010_v62 }
 0x105   : >> { %v4070_v11 = vsel %vm4720_vm10, %v1040_v29, 3463368302  ;;  %vm4721_vm12 = vcmp.ne.s16.totalorder %v3805_v50, 0  ;;  %vm4722_vm13 = vcmp.ne.s16.totalorder %v3807_v51, 0  ;;  %vm981_vm4 = vcmp.gt.bf16.partialorder %v3899_v31, 0 }
 0x106   : >> { %v1297_v52 = vmax.bf16 %v4070_v11, %v4066_v53  ;;  %v4086_v58 = vsel %vm4721_vm12, %v1041_v60, 3463368302  ;;  %v4090_v33 = vsel %vm4722_vm13, %v1042_v44, 3463368302  ;;  %vm982_vm2 = vcmp.gt.bf16.partialorder %v3903_v35, 0 }
 0x107   : >> { %vm1243_vm15 = vcmp.ne.s16.totalorder %v3846_v6, 0  ;;  %vm1244_vm0 = vcmp.ne.s16.totalorder %v3848_v8, 0  ;;  %v1294_v20 = vmax.bf16 %v1293_v10, %v4046_v38  ;;  %v1013_v50 = vmul.bf16 1045249613, %v3899_v31  ;;  %v4730_v10 = vld [vmem:[#allocation21_spill] sm:$0xff] }
 0x108   : >> { %v1298_v3 = vmax.bf16 %v1297_v52, %v4086_v58  ;;  %v1014_v37 = vmul.bf16 1045249613, %v3903_v35  ;;  %vm1245_vm14 = vcmp.ne.s16.totalorder %v3850_v16, 0  ;;  %v4723_v51 = vmul.bf16 1045249613, %v3893_v7 }
 0x109   : >> { %v4724_v2 = vmul.bf16 1045249613, %v3896_v30  ;;  %vm983_vm10 = vcmp.gt.bf16.partialorder %v3938_v0, 0  ;;  %vm984_vm12 = vcmp.gt.bf16.partialorder %v3941_v18, 0  ;;  %vm1246_vm13 = vcmp.ne.s16.totalorder %v3852_v55, 0  ;;  %1295 = vmax.xlane.bf16.xlu1 %v1294_v20 }
 0x10a   : >> { %v1043_v23 = vsel %vm979_vm11, %v3893_v7, %v4723_v51  ;;  %v1299_v27 = vmax.bf16 %v1298_v3, %v4090_v33  ;;  %v1045_v40 = vsel %vm981_vm4, %v3899_v31, %v1013_v50  ;;  %v1046_v7 = vsel %vm982_vm2, %v3903_v35, %v1014_v37  ;;  %v4731_v3 = vld [vmem:[#allocation27_spill] sm:$0xff]  ;;  %v4733_v37 = vld [vmem:[#allocation28_spill] sm:$0xff] }
 0x10b   : >> { %v1044_v39 = vsel %vm980_vm5, %v3896_v30, %v4724_v2  ;;  %vm4725_vm11 = vcmp.ne.s16.totalorder %v3823_v63, 0  ;;  %v4131_v42 = vsel %vm1237_vm1, %v1045_v40, 3463368302  ;;  %vm4726_vm5 = vcmp.ne.s16.totalorder %v3831_v45, 0  ;;  %v4732_v50 = vld [vmem:[#allocation23_spill] sm:$0xff]  ;;  %v4735_v51 = vld [vmem:[#allocation24_spill] sm:$0xff] }
 0x10c   : >> { %v4123_v30 = vsel %vm4725_vm11, %v1043_v23, 3463368302  ;;  %v4127_v41 = vsel %vm1236_vm3, %v1044_v39, 3463368302  ;;  %v4135_v62 = vsel %vm4726_vm5, %v1046_v7, 3463368302  ;;  %1300 = vmax.xlane.bf16.xlu0 %v1299_v27 }
 0x10d   : >> { %v4727_v31 = vmul.bf16 1045249613, %v3938_v0  ;;  %vm1247_vm4 = vcmp.ne.s16.totalorder %v3854_v9, 0  ;;  %v1302_v63 = vmax.bf16 %v4127_v41, %v4123_v30  ;;  %vm985_vm3 = vcmp.gt.bf16.partialorder %v3944_v17, 0  ;;  %v4738_v7 = vld [vmem:[#allocation25_spill] sm:$0xff] }
 0x10e   : >> { %vm986_vm2 = vcmp.gt.bf16.partialorder %v3953_v4, 0  ;;  %v1017_v32 = vmul.bf16 1045249613, %v3944_v17  ;;  %vm1248_vm1 = vcmp.ne.s16.totalorder %v4728_v26, 0  ;;  %v1018_v45 = vmul.bf16 1045249613, %v3953_v4 }
 0x10f   : >> { %v1047_v35 = vsel %vm983_vm10, %v3938_v0, %v4727_v31  ;;  %v4729_v43 = vmul.bf16 1045249613, %v3941_v18  ;;  %vm987_vm10 = vcmp.gt.bf16.partialorder %v3924_v13, 0  ;;  %vm1249_vm11 = vcmp.ne.s16.totalorder %v4730_v10, 0  ;;  %v4739_v26 = vld [vmem:[#allocation29_spill] sm:$0xff] }
 0x110   : >> { %v4155_v29 = vsel %vm1239_vm6, %v1047_v35, 3463368302  ;;  %v1303_v60 = vmax.bf16 %v1302_v63, %v4131_v42  ;;  %v1049_v44 = vsel %vm985_vm3, %v3944_v17, %v1017_v32  ;;  %vm988_vm5 = vcmp.gt.bf16.partialorder %v3927_v14, 0 }
 0x111   : >> { %v1048_v0 = vsel %vm984_vm12, %v3941_v18, %v4729_v43  ;;  %v1050_v18 = vsel %vm986_vm2, %v3953_v4, %v1018_v45  ;;  %v4169_v54 = vsel %vm1241_vm9, %v1049_v44, 3463368302  ;;  %vm989_vm6 = vcmp.gt.bf16.partialorder %v4731_v3, 0 }
 0x112   : >> { %v4163_v52 = vsel %vm1240_vm8, %v1048_v0, 3463368302  ;;  %vm1251_vm12 = vcmp.ne.s16.totalorder %v4732_v50, 0  ;;  %v1304_v17 = vmax.bf16 %v1303_v60, %v4135_v62  ;;  %v4178_v61 = vsel %vm1242_vm7, %v1050_v18, 3463368302 }
 0x113   : >> { %v1307_v20 = vmax.bf16 %v4163_v52, %v4155_v29  ;;  %vm990_vm8 = vcmp.gt.bf16.partialorder %v4733_v37, 0  ;;  %v1021_v4 = vmul.bf16 1045249613, %v4731_v3  ;;  %vm1250_vm9 = vcmp.ne.s16.totalorder %v4734_v59, 0 }
 0x114   : >> { %vm1252_vm3 = vcmp.ne.s16.totalorder %v4735_v51, 0  ;;  %v1022_v2 = vmul.bf16 1045249613, %v4733_v37  ;;  %v4736_v39 = vmul.bf16 1045249613, %v3924_v13  ;;  %vm1253_vm7 = vcmp.ne.s16.totalorder %v4738_v7, 0  ;;  %1305 = vmax.xlane.bf16.xlu1 %v1304_v17 }
 0x115   : >> { %v1308_v23 = vmax.bf16 %v1307_v20, %v4169_v54  ;;  %v4737_v27 = vmul.bf16 1045249613, %v3927_v14  ;;  %v1053_v31 = vsel %vm989_vm6, %v4731_v3, %v1021_v4  ;;  %vm991_vm2 = vcmp.gt.bf16.partialorder %v3980_v22, 0  ;;  %v3131_v3 = vld [vmem:[%s3715_s26 + $0xe0] sm:$0xff]  }
 0x116   : >> { %v1051_v5 = vsel %vm987_vm10, %v3924_v13, %v4736_v39  ;;  %v1054_v32 = vsel %vm990_vm8, %v4733_v37, %v1022_v2  ;;  %vm994_vm10 = vcmp.gt.bf16.partialorder %v3992_v15, 0  ;;  %v1025_v16 = vmul.bf16 1045249613, %v3986_v28  ;;  %v3132_v17 = vld [vmem:[%s3715_s26 + $0x20] sm:$0xff]   ;;  %3022 = vmatprep.subr.bf16.mxu1 %v3131_v3  ;;  %v4740_v39 = vld [vmem:[#allocation26_spill] sm:$0xff] }
 0x117   : >> { %v1052_v40 = vsel %vm988_vm5, %v3927_v14, %v4737_v27  ;;  %v4198_v35 = vsel %vm1243_vm15, %v1051_v5, 3463368302  ;;  %v1309_v13 = vmax.bf16 %v1308_v23, %v4178_v61  ;;  %v4209_v14 = vsel %vm1245_vm14, %v1053_v31, 3463368302  ;;  %v3135_v31 = vld [vmem:[%s3715_s26 + $0xd8] sm:$0xff]   ;;  %v3148_v3 = vld [vmem:[%s3715_s26] sm:$0xff]  }
 0x118   : >> { %v4202_v63 = vsel %vm1244_vm0, %v1052_v40, 3463368302  ;;  %v4215_v6 = vsel %vm1246_vm13, %v1054_v32, 3463368302  ;;  %vm992_vm15 = vcmp.gt.bf16.partialorder %v3983_v1, 0  ;;  %vm993_vm0 = vcmp.gt.bf16.partialorder %v3986_v28, 0 }
 0x119   : >> { %v1312_v45 = vmax.bf16 %v4202_v63, %v4198_v35  ;;  %1310 = vmax.xlane.bf16.xlu0 %v1309_v13  ;;  %v1026_v43 = vmul.bf16 1045249613, %v3992_v15  ;;  %v1055_v55 = vsel %vm991_vm2, %v3980_v22, %v1023_v47  ;;  %v1028_v0 = vmul.bf16 1045249613, %v3967_v24  ;;  %v3130_v47 = vld [vmem:[%s3715_s26 + $0x60] sm:$0xff]   ;;  %v3134_v40 = vld [vmem:[%s3715_s26 + $0x58] sm:$0xff]  }
 0x11a   : >> { %v1056_v60 = vsel %vm992_vm15, %v3983_v1, %v1024_v19  ;;  %v4232_v44 = vsel %vm1247_vm4, %v1055_v55, 3463368302  ;;  %vm995_vm14 = vcmp.gt.bf16.partialorder %v3964_v56, 0  ;;  %v1057_v20 = vsel %vm993_vm0, %v3986_v28, %v1025_v16  ;;  %v3133_v19 = vld [vmem:[%s3715_s26 + $0xa0] sm:$0xff]   ;;  %2958 = vmatprep.subr.bf16.mxu0 %v3130_v47  ;;  %v3136_v13 = vld [vmem:[%s3715_s26 + $0x18] sm:$0xff]   ;;  %v3140_v16 = vld [vmem:[%s3715_s26 + $0x10] sm:$0xff]  }
 0x11b   : >> { %v1313_v8 = vmax.bf16 %v1312_v45, %v4209_v14  ;;  %v4239_v22 = vsel %vm1248_vm1, %v1056_v60, 3463368302  ;;  %vm996_vm13 = vcmp.gt.bf16.partialorder %v3967_v24, 0  ;;  %v1058_v9 = vsel %vm994_vm10, %v3992_v15, %v1026_v43  ;;  %2959 = vmatpush3.bf16.msra.mxu0 %v3132_v17  ;;  %3023 = vmatpush3.bf16.msra.mxu1 %v3133_v19  ;;  %v3137_v32 = vld [vmem:[%s3715_s26 + $0x98] sm:$0xff]   ;;  %v3138_v45 = vld [vmem:[%s3715_s26 + $0x50] sm:$0xff]   ;;  %v3142_v55 = vld [vmem:[%s3715_s26 + $0x48] sm:$0xff]  }
 0x11c   : >> { %v4250_v1 = vsel %vm1249_vm11, %v1057_v20, 3463368302  ;;  %v1317_v28 = vmax.bf16 %v4239_v22, %v4232_v44  ;;  %vm997_vm4 = vcmp.gt.bf16.partialorder %v3970_v21, 0  ;;  %vm998_vm1 = vcmp.gt.bf16.partialorder %v4739_v26, 0  ;;  %2960 = vmatprep.subr.bf16.mxu0 %v3134_v40  ;;  %3024 = vmatprep.subr.bf16.mxu1 %v3135_v31  ;;  %v3141_v43 = vld [vmem:[%s3715_s26 + $0x90] sm:$0xff]   ;;  %v3144_v60 = vld [vmem:[%s3715_s26 + $0x8] sm:$0xff]  }
 0x11d   : >> { %v1314_v18 = vmax.bf16 %v1313_v8, %v4215_v6  ;;  %v1029_v37 = vmul.bf16 1045249613, %v3970_v21  ;;  %v1030_v4 = vmul.bf16 1045249613, %v4739_v26  ;;  %v1059_v15 = vsel %vm995_vm14, %v3964_v56, %v1027_v57  ;;  %v3139_v8 = vld [vmem:[%s3715_s26 + $0xd0] sm:$0xff]   ;;  %v3146_v20 = vld [vmem:[%s3715_s26 + $0x40] sm:$0xff]  }
 0x11e   : >> { %v1318_v10 = vmax.bf16 %v1317_v28, %v4250_v1  ;;  %v1060_v23 = vsel %vm996_vm13, %v3967_v24, %v1028_v0  ;;  %v4270_v2 = vsel %vm1251_vm12, %v1059_v15, 3463368302  ;;  %v4274_v56 = vsel %vm1250_vm9, %v1058_v9, 3463368302  ;;  %v3143_v0 = vld [vmem:[%s3715_s26 + $0xc8] sm:$0xff]   ;;  %v3147_v47 = vld [vmem:[%s3715_s26 + $0xc0] sm:$0xff]  }
 0x11f   : >> { %1315 = vmax.xlane.bf16.xlu1 %v1314_v18  ;;  %v1061_v57 = vsel %vm997_vm4, %v3970_v21, %v1029_v37  ;;  %vm1254_vm11 = vcmp.ne.s16.totalorder %v4740_v39, 0  ;;  %v4280_v5 = vsel %vm1252_vm3, %v1060_v23, 3463368302  ;;  %v1062_v50 = vsel %vm998_vm1, %v4739_v26, %v1030_v4  ;;  %2961 = vmatpush3.bf16.msra.mxu0 %v3136_v13  ;;  %v3145_v18 = vld [vmem:[%s3715_s26 + $0x88] sm:$0xff]   ;;  %v3149_v17 = vld [vmem:[%s3715_s26 + $0x80] sm:$0xff]  }
 0x120   : >> { %v1319_v24 = vmax.bf16 %v1318_v10, %v4274_v56  ;;  %v4288_v59 = vsel %vm1253_vm7, %v1061_v57, 3463368302  ;;  %v1322_v21 = vmax.bf16 %v4280_v5, %v4270_v2  ;;  %v4293_v27 = vsel %vm1254_vm11, %v1062_v50, 3463368302  ;;  %3025 = vmatpush3.bf16.msra.mxu1 %v3137_v32  ;;  %2962 = vmatprep.subr.bf16.mxu0 %v3138_v45 }
 0x121   : >> { %3026 = vmatprep.subr.bf16.mxu1 %v3139_v8  ;;  %vm2183_vm6 = vcmask 60416  }
 0x122   : >> { %1320 = vmax.xlane.bf16.xlu0 %v1319_v24  ;;  %v1323_v51 = vmax.bf16 %v1322_v21, %v4288_v59 }
 0x123   : >> { %2963 = vmatpush3.bf16.msra.mxu0 %v3140_v16 }
 0x124   : >> { %v1324_v7 = vmax.bf16 %v1323_v51, %v4293_v27  ;;  %3027 = vmatpush3.bf16.msra.mxu1 %v3141_v43  ;;  %2964 = vmatprep.subr.bf16.mxu0 %v3142_v55 }
 0x125   : >> { %3028 = vmatprep.subr.bf16.mxu1 %v3143_v0 }
 0x127   : >> { %1325 = vmax.xlane.bf16.xlu1 %v1324_v7  ;;  %2965 = vmatpush3.bf16.msra.mxu0 %v3144_v60 }
 0x128   : >> { %3029 = vmatpush3.bf16.msra.mxu1 %v3145_v18  ;;  %2966 = vmatprep.subr.bf16.mxu0 %v3146_v20 }
 0x129   : >> { %3030 = vmatprep.subr.bf16.mxu1 %v3147_v47 }
 0x12b   : >> { %2967 = vmatpush3.bf16.msra.mxu0 %v3148_v3 }
 0x12c   : >> { %3031 = vmatpush3.bf16.msra.mxu1 %v3149_v17 }
 0x18f   : >> { %v1291_v9 = vpop.xlane.xlu0 %1290 }
 0x190   : >> { %v1327_v28 = vsub.bf16 %v3974_v49, %v1291_v9  ;;  %v1328_v19 = vsub.bf16 %v3999_v46, %v1291_v9  ;;  %v1330_v7 = vsub.bf16 %v4011_v34, %v1291_v9 }
 0x192   : >> { %v1360_v26 = vmul.bf16 1069105081, %v1327_v28  ;;  %v1363_v37 = vmul.bf16 1069105081, %v1328_v19  ;;  %v1369_v8 = vmul.bf16 1069105081, %v1330_v7 }
 0x194   : >> { %3150 = vpow.bf16 %v1360_v26 }
 0x195   : >> { %3152 = vpow.bf16 %v1363_v37 }
 0x196   : >> { %v1296_v4 = vpop.xlane.xlu1 %1295 }
 0x197   : >> { %v1332_v15 = vsub.bf16 %v4038_v36, %v1296_v4  ;;  %v1331_v23 = vsub.bf16 %v4033_v48, %v1296_v4  ;;  %v1329_v48 = vsub.bf16 %v4005_v12, %v1291_v9  ;;  %v1333_v34 = vsub.bf16 %v4042_v25, %v1296_v4 }
 0x199   : >> { %v4315_v10 = vpop.xlane.xlu0 %1300  ;;  %v1375_v57 = vmul.bf16 1069105081, %v1332_v15  ;;  %v1372_v24 = vmul.bf16 1069105081, %v1331_v23  ;;  %v1366_v32 = vmul.bf16 1069105081, %v1329_v48 }
 0x19a   : >> { %v1336_v39 = vsub.bf16 %v4070_v11, %v4315_v10  ;;  %v1335_v46 = vsub.bf16 %v4066_v53, %v4315_v10  ;;  %v1334_v11 = vsub.bf16 %v4046_v38, %v1296_v4  ;;  %v1378_v18 = vmul.bf16 1069105081, %v1333_v34 }
 0x19b   : >> { %3154 = vpow.bf16 %v1375_v57  ;;  %v1337_v17 = vsub.bf16 %v4086_v58, %v4315_v10 }
 0x19c   : >> { %v1387_v49 = vmul.bf16 1069105081, %v1336_v39  ;;  %3156 = vpow.bf16 %v1372_v24  ;;  %v1384_v51 = vmul.bf16 1069105081, %v1335_v46  ;;  %v1381_v45 = vmul.bf16 1069105081, %v1334_v11 }
 0x19d   : >> { %v1390_v26 = vmul.bf16 1069105081, %v1337_v17 }
 0x19e   : >> { %3158 = vpow.bf16 %v1387_v49 }
 0x19f   : >> { %3160 = vpow.bf16 %v1384_v51 }
 0x1a1   : >> { %v4320_v50 = vpop.xlane.xlu1 %1305 }
 0x1a2   : >> { %v1340_v36 = vsub.bf16 %v4127_v41, %v4320_v50  ;;  %v3151_v21 = vpop.eup %3150  ;;  %v1339_v53 = vsub.bf16 %v4123_v30, %v4320_v50  ;;  %v1338_v30 = vsub.bf16 %v4090_v33, %v4315_v10 }
 0x1a3   : >> { %v3153_v40 = vpop.eup %3152 }
 0x1a4   : >> { %v1399_v31 = vmul.bf16 1069105081, %v1340_v36  ;;  %1746 = vmatprep.mubr.bf16.mxu0 %v3153_v40  ;;  %v1396_v38 = vmul.bf16 1069105081, %v1339_v53  ;;  %v1393_v20 = vmul.bf16 1069105081, %v1338_v30 }
 0x1a5   : >> { %1747 = vmatmul.mubr.bf16.vlgmr.msra.gmra.mxu0 %v3151_v21 }
 0x1a6   : >> { %v4328_v13 = vpop.xlane.xlu0 %1310  ;;  %3162 = vpow.bf16 %v1399_v31 }
 0x1a7   : >> { %v1344_v12 = vsub.bf16 %v4163_v52, %v4328_v13  ;;  %3164 = vpow.bf16 %v1366_v32  ;;  %v1343_v52 = vsub.bf16 %v4155_v29, %v4328_v13  ;;  %v1342_v29 = vsub.bf16 %v4135_v62, %v4320_v50 }
 0x1a8   : >> { %3166 = vpow.bf16 %v1381_v45  ;;  %v1341_v62 = vsub.bf16 %v4131_v42, %v4320_v50 }
 0x1a9   : >> { %v3155_v41 = vpop.eup %3154  ;;  %v1411_v16 = vmul.bf16 1069105081, %v1344_v12  ;;  %3168 = vpow.bf16 %v1369_v8  ;;  %v1408_v25 = vmul.bf16 1069105081, %v1343_v52  ;;  %v1405_v37 = vmul.bf16 1069105081, %v1342_v29 }
 0x1aa   : >> { %1754 = vmatprep.mubr.bf16.mxu0 %v3155_v41  ;;  %v3157_v43 = vpop.eup %3156  ;;  %3170 = vpow.bf16 %v1396_v38  ;;  %v1402_v42 = vmul.bf16 1069105081, %v1341_v62 }
 0x1ab   : >> { %3172 = vpow.bf16 %v1411_v16 }
 0x1ac   : >> { %v4336_v55 = vpop.xlane.xlu1 %1315  ;;  %v3159_v0 = vpop.eup %3158  ;;  %3174 = vpow.bf16 %v1378_v18 }
 0x1ad   : >> { %1755 = vmatmul.mubr.bf16.gmra.mxu0 %v3157_v43  ;;  %v1348_v60 = vsub.bf16 %v4202_v63, %v4336_v55  ;;  %v3161_v3 = vpop.eup %3160  ;;  %3176 = vpow.bf16 %v1393_v20  ;;  %v1347_v63 = vsub.bf16 %v4198_v35, %v4336_v55 }
 0x1ae   : >> { %1762 = vmatprep.mubr.bf16.mxu0 %v3159_v0  ;;  %3178 = vpow.bf16 %v1408_v25  ;;  %v3311_v25 = vmov 8  }
 0x1af   : >> { %v1423_v47 = vmul.bf16 1069105081, %v1348_v60  ;;  %v4346_v33 = vpop.xlane.xlu0 %1320  ;;  %v1420_v15 = vmul.bf16 1069105081, %v1347_v63  ;;  %3116 = vset.pattern.permute.xlu0 %v3311_v25  ;;  %3117 = vset.pattern.permute.xlu1 %v3311_v25 }
 0x1b0   : >> { %v1352_v28 = vsub.bf16 %v4239_v22, %v4346_v33  ;;  %v1346_v22 = vsub.bf16 %v4178_v61, %v4328_v13  ;;  %v1351_v39 = vsub.bf16 %v4232_v44, %v4346_v33  ;;  %v1345_v61 = vsub.bf16 %v4169_v54, %v4328_v13 }
 0x1b1   : >> { %3180 = vpow.bf16 %v1423_v47  ;;  %v1350_v44 = vsub.bf16 %v4215_v6, %v4336_v55  ;;  %v1349_v6 = vsub.bf16 %v4209_v14, %v4336_v55  ;;  %v1353_v16 = vsub.bf16 %v4250_v1, %v4346_v33 }
 0x1b2   : >> { %v1435_v10 = vmul.bf16 1069105081, %v1352_v28  ;;  %3182 = vpow.bf16 %v1390_v26  ;;  %v1417_v49 = vmul.bf16 1069105081, %v1346_v22  ;;  %v1432_v46 = vmul.bf16 1069105081, %v1351_v39 }
 0x1b3   : >> { %3184 = vpow.bf16 %v1405_v37  ;;  %v1414_v40 = vmul.bf16 1069105081, %v1345_v61  ;;  %v1429_v11 = vmul.bf16 1069105081, %v1350_v44  ;;  %v1426_v53 = vmul.bf16 1069105081, %v1349_v6 }
 0x1b4   : >> { %v3163_v9 = vpop.eup %3162  ;;  %v4356_v35 = vpop.xlane.xlu1 %1325  ;;  %3186 = vpow.bf16 %v1420_v15 }
 0x1b5   : >> { %1763 = vmatmul.mubr.bf16.gmra.mxu0 %v3161_v3  ;;  %v3165_v19 = vpop.eup %3164  ;;  %3188 = vpow.bf16 %v1435_v10  ;;  %v1356_v24 = vsub.bf16 %v4280_v5, %v4356_v35  ;;  %v1355_v5 = vsub.bf16 %v4270_v2, %v4356_v35  ;;  %v1354_v2 = vsub.bf16 %v4274_v56, %v4346_v33 }
 0x1b6   : >> { %1770 = vmatprep.mubr.bf16.mxu0 %v3163_v9  ;;  %v3167_v58 = vpop.eup %3166  ;;  %3190 = vpow.bf16 %v1402_v42  ;;  %v1358_v14 = vsub.bf16 %v4293_v27, %v4356_v35  ;;  %v1438_v56 = vmul.bf16 1069105081, %v1353_v16  ;;  %v1357_v30 = vsub.bf16 %v4288_v59, %v4356_v35 }
 0x1b7   : >> { %v3169_v4 = vpop.eup %3168  ;;  %v1447_v21 = vmul.bf16 1069105081, %v1356_v24  ;;  %3192 = vpow.bf16 %v1417_v49  ;;  %v1444_v7 = vmul.bf16 1069105081, %v1355_v5  ;;  %v1441_v45 = vmul.bf16 1069105081, %v1354_v2 }
 0x1b8   : >> { %1843 = vmatprep.mubr.bf16.mxu1 %v3169_v4  ;;  %v3171_v23 = vpop.eup %3170  ;;  %3194 = vpow.bf16 %v1432_v46  ;;  %v1453_v34 = vmul.bf16 1069105081, %v1358_v14  ;;  %v1450_v1 = vmul.bf16 1069105081, %v1357_v30 }
 0x1b9   : >> { %1844 = vmatmul.mubr.bf16.vlgmr.msra.gmra.mxu1 %v3165_v19  ;;  %v3173_v57 = vpop.eup %3172  ;;  %3196 = vpow.bf16 %v1447_v21 }
 0x1ba   : >> { %1851 = vmatprep.mubr.bf16.mxu1 %v3167_v58  ;;  %v3175_v50 = vpop.eup %3174  ;;  %3198 = vpow.bf16 %v1414_v40 }
 0x1bb   : >> { %v3177_v36 = vpop.eup %3176  ;;  %3200 = vpow.bf16 %v1429_v11 }
 0x1bc   : >> { %v3179_v48 = vpop.eup %3178  ;;  %3202 = vpow.bf16 %v1444_v7 }
 0x1bd   : >> { %1771 = vmatmul.mubr.bf16.gmra.mxu0 %v3171_v23  ;;  %3204 = vpow.bf16 %v1426_v53 }
 0x1be   : >> { %1778 = vmatprep.mubr.bf16.mxu0 %v3173_v57  ;;  %3206 = vpow.bf16 %v1441_v45 }
 0x1bf   : >> { %v3181_v51 = vpop.eup %3180  ;;  %3208 = vpow.bf16 %v1438_v56 }
 0x1c0   : >> { %v3183_v31 = vpop.eup %3182  ;;  %3210 = vpow.bf16 %v1453_v34 }
 0x1c1   : >> { %1852 = vmatmul.mubr.bf16.gmra.mxu1 %v3175_v50  ;;  %v3185_v32 = vpop.eup %3184  ;;  %3212 = vpow.bf16 %v1450_v1 }
 0x1c2   : >> { %1859 = vmatprep.mubr.bf16.mxu1 %v3177_v36  ;;  %v3187_v54 = vpop.eup %3186 }
 0x1c3   : >> { %v3189_v13 = vpop.eup %3188 }
 0x1c4   : >> { %v3191_v41 = vpop.eup %3190 }
 0x1c5   : >> { %1779 = vmatmul.mubr.bf16.gmra.mxu0 %v3179_v48  ;;  %v3193_v12 = vpop.eup %3192 }
 0x1c6   : >> { %1786 = vmatprep.mubr.bf16.mxu0 %v3181_v51  ;;  %v3195_v8 = vpop.eup %3194 }
 0x1c7   : >> { %v3197_v38 = vpop.eup %3196 }
 0x1c8   : >> { %v3199_v43 = vpop.eup %3198 }
 0x1c9   : >> { %1860 = vmatmul.mubr.bf16.gmra.mxu1 %v3183_v31  ;;  %v3201_v55 = vpop.eup %3200 }
 0x1ca   : >> { %1867 = vmatprep.mubr.bf16.mxu1 %v3185_v32  ;;  %v3203_v0 = vpop.eup %3202 }
 0x1cb   : >> { %v3205_v52 = vpop.eup %3204 }
 0x1cc   : >> { %v3207_v60 = vpop.eup %3206 }
 0x1cd   : >> { %1787 = vmatmul.mubr.bf16.gmra.mxu0 %v3187_v54  ;;  %v3209_v27 = vpop.eup %3208 }
 0x1ce   : >> { %1794 = vmatprep.mubr.bf16.mxu0 %v3189_v13  ;;  %v3211_v18 = vpop.eup %3210 }
 0x1cf   : >> { %v3213_v20 = vpop.eup %3212 }
 0x1d1   : >> { %1868 = vmatmul.mubr.bf16.gmra.mxu1 %v3191_v41 }
 0x1d2   : >> { %1875 = vmatprep.mubr.bf16.mxu1 %v3193_v12 }
 0x1d5   : >> { %1795 = vmatmul.mubr.bf16.gmra.mxu0 %v3195_v8 }
 0x1d6   : >> { %1802 = vmatprep.mubr.bf16.mxu0 %v3197_v38 }
 0x1d9   : >> { %1876 = vmatmul.mubr.bf16.gmra.mxu1 %v3199_v43 }
 0x1da   : >> { %1883 = vmatprep.mubr.bf16.mxu1 %v3201_v55 }
 0x1dd   : >> { %1803 = vmatmul.mubr.bf16.gmra.mxu0 %v3203_v0 }
 0x1e1   : >> { %1884 = vmatmul.mubr.bf16.gmra.mxu1 %v3205_v52 }
 0x1e2   : >> { %1891 = vmatprep.mubr.bf16.mxu1 %v3207_v60 }
 0x1e9   : >> { %1892 = vmatmul.mubr.bf16.gmra.mxu1 %v3209_v27 }
 0x1ea   : >> { %1899 = vmatprep.mubr.bf16.mxu1 %v3211_v18 }
 0x1f1   : >> { %1900 = vmatmul.mubr.bf16.gmra.mxu1 %v3213_v20 }
 0x265   : >> { %v2968_v47 = vpop.f32.mrf.mxu0 }
 0x267   : >> { %v2969_v59 = vpop.f32.mrf.mxu0 }
 0x268   : >> { %v2970_v4 = vadd.f32 %v2969_v59, %v2968_v47 }
 0x269   : >> { %v2971_v3 = vpop.f32.mrf.mxu0 }
 0x26b   : >> { %v2972_v17 = vpop.f32.mrf.mxu0 }
 0x26c   : >> { %v2973_v22 = vadd.f32 %v2972_v17, %v2971_v3 }
 0x26d   : >> { %v2974_v33 = vpop.f32.mrf.mxu0 }
 0x26f   : >> { %v2975_v9 = vpop.f32.mrf.mxu0 }
 0x270   : >> { %v2976_v36 = vadd.f32 %v2975_v9, %v2974_v33 }
 0x271   : >> { %v2977_v29 = vpop.f32.mrf.mxu0 }
 0x273   : >> { %v2978_v63 = vpop.f32.mrf.mxu0 }
 0x274   : >> { %v2979_v40 = vadd.f32 %v2978_v63, %v2977_v29 }
 0x275   : >> { %v2980_v28 = vpop.f32.mrf.mxu0 }
 0x277   : >> { %v2981_v19 = vpop.f32.mrf.mxu0 }
 0x278   : >> { %v2982_v6 = vadd.f32 %v2981_v19, %v2980_v28 }
 0x279   : >> { %v2983_v26 = vpop.f32.mrf.mxu0  ;;  %v3032_v37 = vpop.f32.mrf.mxu1 }
 0x27b   : >> { %v2984_v58 = vpop.f32.mrf.mxu0  ;;  %v3033_v10 = vpop.f32.mrf.mxu1 }
 0x27c   : >> { %v3034_v23 = vadd.f32 %v3033_v10, %v3032_v37  ;;  %v2985_v16 = vadd.f32 %v2984_v58, %v2983_v26 }
 0x27d   : >> { %v2986_v15 = vpop.f32.mrf.mxu0  ;;  %v3035_v35 = vpop.f32.mrf.mxu1 }
 0x27e   : >> { %v4380_v57 = vadd.f32 %v3034_v23, %v2970_v4 }
 0x27f   : >> { %v2987_v62 = vpop.f32.mrf.mxu0  ;;  %v3036_v24 = vpop.f32.mrf.mxu1 }
 0x280   : >> { %3214 = vrcp.f32 %v4380_v57  ;;  %v3037_v42 = vadd.f32 %v3036_v24, %v3035_v35  ;;  %v2988_v30 = vadd.f32 %v2987_v62, %v2986_v15 }
 0x281   : >> { %v2989_v39 = vpop.f32.mrf.mxu0  ;;  %v3038_v50 = vpop.f32.mrf.mxu1 }
 0x282   : >> { %v4383_v46 = vadd.f32 %v3037_v42, %v2973_v22 }
 0x283   : >> { %v2990_v49 = vpop.f32.mrf.mxu0  ;;  %v3039_v48 = vpop.f32.mrf.mxu1 }
 0x284   : >> { %3216 = vrcp.f32 %v4383_v46  ;;  %v3040_v61 = vadd.f32 %v3039_v48, %v3038_v50  ;;  %v2991_v25 = vadd.f32 %v2990_v49, %v2989_v39 }
 0x285   : >> { %v2992_v21 = vpop.f32.mrf.mxu0  ;;  %v3041_v44 = vpop.f32.mrf.mxu1 }
 0x286   : >> { %v4386_v5 = vadd.f32 %v3040_v61, %v2976_v36 }
 0x287   : >> { %v2993_v51 = vpop.f32.mrf.mxu0  ;;  %v3042_v31 = vpop.f32.mrf.mxu1 }
 0x288   : >> { %3218 = vrcp.f32 %v4386_v5  ;;  %v3043_v7 = vadd.f32 %v3042_v31, %v3041_v44  ;;  %v2994_v29 = vadd.f32 %v2993_v51, %v2992_v21 }
 0x289   : >> { %v2995_v11 = vpop.f32.mrf.mxu0  ;;  %v3044_v54 = vpop.f32.mrf.mxu1 }
 0x28a   : >> { %v4389_v13 = vadd.f32 %v3043_v7, %v2979_v40 }
 0x28b   : >> { %v2996_v32 = vpop.f32.mrf.mxu0  ;;  %v3045_v53 = vpop.f32.mrf.mxu1 }
 0x28c   : >> { %3220 = vrcp.f32 %v4389_v13  ;;  %v3046_v41 = vadd.f32 %v3045_v53, %v3044_v54  ;;  %v2997_v4 = vadd.f32 %v2996_v32, %v2995_v11 }
 0x28d   : >> { %v2998_v2 = vpop.f32.mrf.mxu0  ;;  %v3215_v12 = vpop.eup %3214 }
 0x28e   : >> { %v3047_v8 = vpop.f32.mrf.mxu1  ;;  %v4392_v38 = vadd.f32 %v3046_v41, %v2982_v6  ;;  %1926 = vperm.xlu0 %3116, %v3215_v12  }
 0x28f   : >> { %v2999_v45 = vpop.f32.mrf.mxu0 }
 0x290   : >> { %v3048_v14 = vpop.f32.mrf.mxu1  ;;  %3222 = vrcp.f32 %v4392_v38  ;;  %v3000_v39 = vadd.f32 %v2999_v45, %v2998_v2 }
 0x291   : >> { %v3001_v56 = vpop.f32.mrf.mxu0  ;;  %v3049_v43 = vadd.f32 %v3048_v14, %v3047_v8  ;;  %v3217_v34 = vpop.eup %3216 }
 0x292   : >> { %v3050_v55 = vpop.f32.mrf.mxu1  ;;  %1931 = vperm.xlu1 %3117, %v3217_v34  }
 0x293   : >> { %v4395_v0 = vadd.f32 %v3049_v43, %v2985_v16  ;;  %v3002_v52 = vpop.f32.mrf.mxu0 }
 0x294   : >> { %v3051_v1 = vpop.f32.mrf.mxu1  ;;  %v3003_v48 = vadd.f32 %v3002_v52, %v3001_v56 }
 0x295   : >> { %3224 = vrcp.f32 %v4395_v0  ;;  %v3052_v60 = vadd.f32 %v3051_v1, %v3050_v55  ;;  %v3219_v27 = vpop.eup %3218  ;;  %v3004_v59 = vpop.f32.mrf.mxu0 }
 0x296   : >> { %v3053_v18 = vpop.f32.mrf.mxu1  ;;  %1936 = vperm.xlu1 %3117, %v3219_v27  }
 0x297   : >> { %v4398_v20 = vadd.f32 %v3052_v60, %v2988_v30  ;;  %v3005_v28 = vpop.f32.mrf.mxu0 }
 0x298   : >> { %v3054_v47 = vpop.f32.mrf.mxu1  ;;  %v3006_v7 = vadd.f32 %v3005_v28, %v3004_v59 }
 0x299   : >> { %3226 = vrcp.f32 %v4398_v20  ;;  %v3055_v3 = vadd.f32 %v3054_v47, %v3053_v18  ;;  %v3221_v17 = vpop.eup %3220  ;;  %v3007_v10 = vpop.f32.mrf.mxu0 }
 0x29a   : >> { %v3056_v33 = vpop.f32.mrf.mxu1  ;;  %1941 = vperm.xlu1 %3117, %v3221_v17  }
 0x29b   : >> { %v4401_v9 = vadd.f32 %v3055_v3, %v2991_v25  ;;  %v3008_v42 = vpop.f32.mrf.mxu0 }
 0x29c   : >> { %v3057_v63 = vpop.f32.mrf.mxu1  ;;  %v3009_v45 = vadd.f32 %v3008_v42, %v3007_v10 }
 0x29d   : >> { %3228 = vrcp.f32 %v4401_v9  ;;  %v3058_v19 = vadd.f32 %v3057_v63, %v3056_v33  ;;  %v3223_v26 = vpop.eup %3222  ;;  %v3010_v51 = vpop.f32.mrf.mxu0 }
 0x29e   : >> { %v3059_v58 = vpop.f32.mrf.mxu1  ;;  %1946 = vperm.xlu1 %3117, %v3223_v26  }
 0x29f   : >> { %v4404_v37 = vadd.f32 %v3058_v19, %v2994_v29  ;;  %v3011_v54 = vpop.f32.mrf.mxu0 }
 0x2a0   : >> { %v3060_v15 = vpop.f32.mrf.mxu1  ;;  %v3012_v34 = vadd.f32 %v3011_v54, %v3010_v51 }
 0x2a1   : >> { %3230 = vrcp.f32 %v4404_v37  ;;  %v3061_v23 = vadd.f32 %v3060_v15, %v3059_v58  ;;  %v3013_v8 = vpop.f32.mrf.mxu0 }
 0x2a2   : >> { %v3225_v62 = vpop.eup %3224  ;;  %v3062_v35 = vpop.f32.mrf.mxu1 }
 0x2a3   : >> { %v4407_v22 = vadd.f32 %v3061_v23, %v2997_v4  ;;  %1951 = vperm.xlu1 %3117, %v3225_v62   ;;  %v3014_v30 = vpop.f32.mrf.mxu0 }
 0x2a4   : >> { %v3063_v24 = vpop.f32.mrf.mxu1  ;;  %v3015_v18 = vadd.f32 %v3014_v30, %v3013_v8 }
 0x2a5   : >> { %3232 = vrcp.f32 %v4407_v22  ;;  %v3064_v49 = vadd.f32 %v3063_v24, %v3062_v35 }
 0x2a6   : >> { %v3227_v50 = vpop.eup %3226  ;;  %v3065_v36 = vpop.f32.mrf.mxu1 }
 0x2a7   : >> { %v4410_v21 = vadd.f32 %v3064_v49, %v3000_v39  ;;  %1956 = vperm.xlu1 %3117, %v3227_v50  }
 0x2a8   : >> { %v3066_v61 = vpop.f32.mrf.mxu1 }
 0x2a9   : >> { %3234 = vrcp.f32 %v4410_v21  ;;  %v3067_v44 = vadd.f32 %v3066_v61, %v3065_v36 }
 0x2aa   : >> { %v3229_v40 = vpop.eup %3228  ;;  %v3068_v11 = vpop.f32.mrf.mxu1 }
 0x2ab   : >> { %v4413_v31 = vadd.f32 %v3067_v44, %v3003_v48  ;;  %1961 = vperm.xlu1 %3117, %v3229_v40  }
 0x2ac   : >> { %v3069_v32 = vpop.f32.mrf.mxu1 }
 0x2ad   : >> { %3236 = vrcp.f32 %v4413_v31  ;;  %v3070_v6 = vadd.f32 %v3069_v32, %v3068_v11 }
 0x2ae   : >> { %v3231_v2 = vpop.eup %3230  ;;  %v3071_v53 = vpop.f32.mrf.mxu1 }
 0x2af   : >> { %v4416_v41 = vadd.f32 %v3070_v6, %v3006_v7  ;;  %1966 = vperm.xlu1 %3117, %v3231_v2  }
 0x2b0   : >> { %v3072_v12 = vpop.f32.mrf.mxu1 }
 0x2b1   : >> { %3238 = vrcp.f32 %v4416_v41  ;;  %v3073_v16 = vadd.f32 %v3072_v12, %v3071_v53 }
 0x2b2   : >> { %v3233_v14 = vpop.eup %3232  ;;  %v3074_v56 = vpop.f32.mrf.mxu1 }
 0x2b3   : >> { %v4419_v43 = vadd.f32 %v3073_v16, %v3009_v45  ;;  %1971 = vperm.xlu0 %3116, %v3233_v14  }
 0x2b4   : >> { %v3075_v55 = vpop.f32.mrf.mxu1 }
 0x2b5   : >> { %3240 = vrcp.f32 %v4419_v43  ;;  %v3076_v1 = vadd.f32 %v3075_v55, %v3074_v56 }
 0x2b6   : >> { %v3235_v52 = vpop.eup %3234  ;;  %v3077_v60 = vpop.f32.mrf.mxu1 }
 0x2b7   : >> { %v4422_v27 = vadd.f32 %v3076_v1, %v3012_v34  ;;  %1976 = vperm.xlu1 %3117, %v3235_v52  }
 0x2b8   : >> { %v3078_v25 = vpop.f32.mrf.mxu1 }
 0x2b9   : >> { %3242 = vrcp.f32 %v4422_v27  ;;  %v3079_v47 = vadd.f32 %v3078_v25, %v3077_v60 }
 0x2ba   : >> { %v3237_v59 = vpop.eup %3236 }
 0x2bb   : >> { %v4425_v3 = vadd.f32 %v3079_v47, %v3015_v18  ;;  %1981 = vperm.xlu0 %3116, %v3237_v59  }
 0x2bd   : >> { %3244 = vrcp.f32 %v4425_v3 }
 0x2be   : >> { %v3239_v17 = vpop.eup %3238 }
 0x2bf   : >> { %1986 = vperm.xlu1 %3117, %v3239_v17  }
 0x2c2   : >> { %v3241_v33 = vpop.eup %3240 }
 0x2c3   : >> { %1991 = vperm.xlu0 %3116, %v3241_v33  }
 0x2c6   : >> { %v3243_v29 = vpop.eup %3242 }
 0x2c7   : >> { %1996 = vperm.xlu1 %3117, %v3243_v29  }
 0x2ca   : >> { %v3245_v63 = vpop.eup %3244 }
 0x2cb   : >> { %2001 = vperm.xlu0 %3116, %v3245_v63  }
 0x309   : >> { %v1927_v28 = vpop.permute.xlu0 %1926 }
 0x30a   : >> { %v2004_v19 = vmul.f32 %v1927_v28, %v4380_v57 }
 0x30c   : >> { %v2036_v26 = vmin.f32 %v2004_v19, 0.0  ;;  %vm2020_vm5 = vcmp.gt.f32.partialorder %v2004_v19, 0.0 }
 0x30d   : >> { %v1932_v58 = vpop.permute.xlu1 %1931 }
 0x30e   : >> { %v2052_v4 = vmul.f32 1.442695, %v2036_v26  ;;  %v2005_v15 = vmul.f32 %v1932_v58, %v4383_v46 }
 0x310   : >> { %3246 = vpow2.f32 %v2052_v4  ;;  %v2037_v10 = vmin.f32 %v2005_v15, 0.0  ;;  %vm2021_vm12 = vcmp.gt.f32.partialorder %v2005_v15, 0.0 }
 0x311   : >> { %v1937_v23 = vpop.permute.xlu1 %1936 }
 0x312   : >> { %v2054_v62 = vmul.f32 1.442695, %v2037_v10  ;;  %v2006_v35 = vmul.f32 %v1937_v23, %v4386_v5 }
 0x314   : >> { %3248 = vpow2.f32 %v2054_v62  ;;  %v2038_v39 = vmin.f32 %v2006_v35, 0.0  ;;  %vm2022_vm8 = vcmp.gt.f32.partialorder %v2006_v35, 0.0 }
 0x315   : >> { %v1942_v24 = vpop.permute.xlu1 %1941 }
 0x316   : >> { %v2056_v42 = vmul.f32 1.442695, %v2038_v39  ;;  %v2007_v49 = vmul.f32 %v1942_v24, %v4389_v13 }
 0x318   : >> { %3250 = vpow2.f32 %v2056_v42  ;;  %v2039_v57 = vmin.f32 %v2007_v49, 0.0  ;;  %vm2023_vm9 = vcmp.gt.f32.partialorder %v2007_v49, 0.0 }
 0x319   : >> { %v1947_v50 = vpop.permute.xlu1 %1946 }
 0x31a   : >> { %v2058_v36 = vmul.f32 1.442695, %v2039_v57  ;;  %v2008_v46 = vmul.f32 %v1947_v50, %v4392_v38 }
 0x31c   : >> { %3252 = vpow2.f32 %v2058_v36  ;;  %v2040_v48 = vmin.f32 %v2008_v46, 0.0  ;;  %vm2024_vm3 = vcmp.gt.f32.partialorder %v2008_v46, 0.0 }
 0x31d   : >> { %v3247_v61 = vpop.eup %3246 }
 0x31e   : >> { %v1952_v51 = vpop.permute.xlu1 %1951  ;;  %v2891_v44 = vadd.f32 -1.0, %v3247_v61  ;;  %v2060_v5 = vmul.f32 1.442695, %v2040_v48 }
 0x31f   : >> { %v2009_v40 = vmul.f32 %v1952_v51, %v4395_v0 }
 0x320   : >> { %v2100_v13 = vsel %vm2020_vm5, %v2004_v19, %v2891_v44  ;;  %3254 = vpow2.f32 %v2060_v5 }
 0x321   : >> { %v2041_v11 = vmin.f32 %v2009_v40, 0.0  ;;  %v3249_v7 = vpop.eup %3248  ;;  %v2934_v32 = vpack.c.bf16 %v2100_v13, %v2100_v13  ;;  %vm2025_vm7 = vcmp.gt.f32.partialorder %v2009_v40, 0.0 }
 0x322   : >> { %v1957_v38 = vpop.permute.xlu1 %1956  ;;  %v2892_v54 = vadd.f32 -1.0, %v3249_v7 }
 0x323   : >> { %v2062_v6 = vmul.f32 1.442695, %v2041_v11  ;;  %v2010_v2 = vmul.f32 %v1957_v38, %v4398_v20  ;;  %2184 = vst.msk [vmem:[%s4436_s10] sm:$0xf] %vm2183_vm6, %v2934_v32 }
 0x324   : >> { %v2101_v0 = vsel %vm2021_vm12, %v2005_v15, %v2892_v54 }
 0x325   : >> { %3256 = vpow2.f32 %v2062_v6  ;;  %v2042_v53 = vmin.f32 %v2010_v2, 0.0  ;;  %v3251_v45 = vpop.eup %3250  ;;  %v2935_v12 = vpack.c.bf16 %v2101_v0, %v2101_v0  ;;  %vm2026_vm2 = vcmp.gt.f32.partialorder %v2010_v2, 0.0 }
 0x326   : >> { %v1962_v8 = vpop.permute.xlu1 %1961  ;;  %v2893_v16 = vadd.f32 -1.0, %v3251_v45 }
 0x327   : >> { %v2064_v14 = vmul.f32 1.442695, %v2042_v53  ;;  %v2011_v56 = vmul.f32 %v1962_v8, %v4401_v9  ;;  %2185 = vst.msk [vmem:[%s4436_s10 + $0x4] sm:$0xf] %vm2183_vm6, %v2935_v12 }
 0x328   : >> { %v2102_v34 = vsel %vm2022_vm8, %v2006_v35, %v2893_v16 }
 0x329   : >> { %3258 = vpow2.f32 %v2064_v14  ;;  %v2043_v20 = vmin.f32 %v2011_v56, 0.0  ;;  %v3253_v55 = vpop.eup %3252  ;;  %v2936_v30 = vpack.c.bf16 %v2102_v34, %v2102_v34  ;;  %vm2027_vm15 = vcmp.gt.f32.partialorder %v2011_v56, 0.0 }
 0x32a   : >> { %v1967_v1 = vpop.permute.xlu1 %1966  ;;  %v2894_v52 = vadd.f32 -1.0, %v3253_v55 }
 0x32b   : >> { %v2066_v60 = vmul.f32 1.442695, %v2043_v20  ;;  %v2012_v18 = vmul.f32 %v1967_v1, %v4404_v37  ;;  %2186 = vst.msk [vmem:[%s4436_s10 + $0x8] sm:$0xf] %vm2183_vm6, %v2936_v30 }
 0x32c   : >> { %v2103_v25 = vsel %vm2023_vm9, %v2007_v49, %v2894_v52 }
 0x32d   : >> { %3260 = vpow2.f32 %v2066_v60  ;;  %v2044_v9 = vmin.f32 %v2012_v18, 0.0  ;;  %v3255_v47 = vpop.eup %3254  ;;  %v2937_v59 = vpack.c.bf16 %v2103_v25, %v2103_v25  ;;  %vm2028_vm0 = vcmp.gt.f32.partialorder %v2012_v18, 0.0 }
 0x32e   : >> { %v1972_v17 = vpop.permute.xlu0 %1971  ;;  %v2895_v33 = vadd.f32 -1.0, %v3255_v47 }
 0x32f   : >> { %v2068_v29 = vmul.f32 1.442695, %v2044_v9  ;;  %v2013_v63 = vmul.f32 %v1972_v17, %v4407_v22  ;;  %2187 = vst.msk [vmem:[%s4436_s10 + $0xc] sm:$0xf] %vm2183_vm6, %v2937_v59 }
 0x330   : >> { %v2104_v28 = vsel %vm2024_vm3, %v2008_v46, %v2895_v33 }
 0x331   : >> { %3262 = vpow2.f32 %v2068_v29  ;;  %v2045_v37 = vmin.f32 %v2013_v63, 0.0  ;;  %v2938_v26 = vpack.c.bf16 %v2104_v28, %v2104_v28  ;;  %vm2029_vm10 = vcmp.gt.f32.partialorder %v2013_v63, 0.0 }
 0x332   : >> { %v3257_v19 = vpop.eup %3256  ;;  %v1977_v58 = vpop.permute.xlu1 %1976 }
 0x333   : >> { %v2896_v4 = vadd.f32 -1.0, %v3257_v19  ;;  %v2070_v15 = vmul.f32 1.442695, %v2045_v37  ;;  %v2014_v10 = vmul.f32 %v1977_v58, %v4410_v21  ;;  %2188 = vst.msk [vmem:[%s4436_s10 + $0x10] sm:$0xf] %vm2183_vm6, %v2938_v26 }
 0x335   : >> { %v2105_v23 = vsel %vm2025_vm7, %v2009_v40, %v2896_v4  ;;  %3264 = vpow2.f32 %v2070_v15  ;;  %v2046_v22 = vmin.f32 %v2014_v10, 0.0  ;;  %vm2030_vm14 = vcmp.gt.f32.partialorder %v2014_v10, 0.0 }
 0x336   : >> { %v3259_v62 = vpop.eup %3258  ;;  %v2939_v35 = vpack.c.bf16 %v2105_v23, %v2105_v23  ;;  %v1982_v39 = vpop.permute.xlu0 %1981 }
 0x337   : >> { %v2897_v24 = vadd.f32 -1.0, %v3259_v62  ;;  %v2072_v42 = vmul.f32 1.442695, %v2046_v22  ;;  %v2015_v49 = vmul.f32 %v1982_v39, %v4413_v31 }
 0x338   : >> { %2189 = vst.msk [vmem:[%s4436_s10 + $0x14] sm:$0xf] %vm2183_vm6, %v2939_v35 }
 0x339   : >> { %v2106_v57 = vsel %vm2026_vm2, %v2010_v2, %v2897_v24  ;;  %3266 = vpow2.f32 %v2072_v42  ;;  %v2047_v21 = vmin.f32 %v2015_v49, 0.0  ;;  %vm2031_vm13 = vcmp.gt.f32.partialorder %v2015_v49, 0.0 }
 0x33a   : >> { %v3261_v50 = vpop.eup %3260  ;;  %v2940_v36 = vpack.c.bf16 %v2106_v57, %v2106_v57  ;;  %v1987_v46 = vpop.permute.xlu1 %1986 }
 0x33b   : >> { %v2898_v48 = vadd.f32 -1.0, %v3261_v50  ;;  %v2074_v61 = vmul.f32 1.442695, %v2047_v21  ;;  %v2016_v51 = vmul.f32 %v1987_v46, %v4416_v41 }
 0x33c   : >> { %2190 = vst.msk [vmem:[%s4436_s10 + $0x18] sm:$0xf] %vm2183_vm6, %v2940_v36 }
 0x33d   : >> { %v2107_v44 = vsel %vm2027_vm15, %v2011_v56, %v2898_v48  ;;  %3268 = vpow2.f32 %v2074_v61  ;;  %v2048_v31 = vmin.f32 %v2016_v51, 0.0  ;;  %vm2032_vm4 = vcmp.gt.f32.partialorder %v2016_v51, 0.0 }
 0x33e   : >> { %v3263_v5 = vpop.eup %3262  ;;  %v2941_v40 = vpack.c.bf16 %v2107_v44, %v2107_v44  ;;  %v1992_v13 = vpop.permute.xlu0 %1991 }
 0x33f   : >> { %v2899_v11 = vadd.f32 -1.0, %v3263_v5  ;;  %v2076_v7 = vmul.f32 1.442695, %v2048_v31  ;;  %v2017_v32 = vmul.f32 %v1992_v13, %v4419_v43 }
 0x340   : >> { %2191 = vst.msk [vmem:[%s4436_s10 + $0x1c] sm:$0xf] %vm2183_vm6, %v2941_v40 }
 0x341   : >> { %v2108_v38 = vsel %vm2028_vm0, %v2012_v18, %v2899_v11  ;;  %3270 = vpow2.f32 %v2076_v7  ;;  %v2049_v41 = vmin.f32 %v2017_v32, 0.0  ;;  %vm2033_vm1 = vcmp.gt.f32.partialorder %v2017_v32, 0.0 }
 0x342   : >> { %v3265_v54 = vpop.eup %3264  ;;  %v2942_v6 = vpack.c.bf16 %v2108_v38, %v2108_v38  ;;  %v1997_v2 = vpop.permute.xlu1 %1996 }
 0x343   : >> { %v2900_v0 = vadd.f32 -1.0, %v3265_v54  ;;  %v2078_v53 = vmul.f32 1.442695, %v2049_v41  ;;  %v2018_v45 = vmul.f32 %v1997_v2, %v4422_v27 }
 0x344   : >> { %2192 = vst.msk [vmem:[%s4436_s10 + $0x20] sm:$0xf] %vm2183_vm6, %v2942_v6 }
 0x345   : >> { %v2109_v12 = vsel %vm2029_vm10, %v2013_v63, %v2900_v0  ;;  %3272 = vpow2.f32 %v2078_v53  ;;  %v2050_v43 = vmin.f32 %v2018_v45, 0.0  ;;  %vm2034_vm11 = vcmp.gt.f32.partialorder %v2018_v45, 0.0 }
 0x346   : >> { %v3267_v8 = vpop.eup %3266  ;;  %v2943_v16 = vpack.c.bf16 %v2109_v12, %v2109_v12  ;;  %v2002_v14 = vpop.permute.xlu0 %2001 }
 0x347   : >> { %v2901_v56 = vadd.f32 -1.0, %v3267_v8  ;;  %v2080_v34 = vmul.f32 1.442695, %v2050_v43  ;;  %v2019_v20 = vmul.f32 %v2002_v14, %v4425_v3 }
 0x348   : >> { %2193 = vst.msk [vmem:[%s4436_s10 + $0x24] sm:$0xf] %vm2183_vm6, %v2943_v16 }
 0x349   : >> { %v2110_v55 = vsel %vm2030_vm14, %v2014_v10, %v2901_v56  ;;  %3274 = vpow2.f32 %v2080_v34  ;;  %v2051_v27 = vmin.f32 %v2019_v20, 0.0  ;;  %vm2035_vm5 = vcmp.gt.f32.partialorder %v2019_v20, 0.0 }
 0x34a   : >> { %v3269_v30 = vpop.eup %3268  ;;  %v2944_v1 = vpack.c.bf16 %v2110_v55, %v2110_v55 }
 0x34b   : >> { %v2902_v52 = vadd.f32 -1.0, %v3269_v30  ;;  %v2082_v60 = vmul.f32 1.442695, %v2051_v27 }
 0x34c   : >> { %2194 = vst.msk [vmem:[%s4436_s10 + $0x28] sm:$0xf] %vm2183_vm6, %v2944_v1 }
 0x34d   : >> { %v2111_v18 = vsel %vm2031_vm13, %v2015_v49, %v2902_v52  ;;  %3276 = vpow2.f32 %v2082_v60 }
 0x34e   : >> { %v3271_v25 = vpop.eup %3270  ;;  %v2945_v3 = vpack.c.bf16 %v2111_v18, %v2111_v18 }
 0x34f   : >> { %v2903_v9 = vadd.f32 -1.0, %v3271_v25 }
 0x350   : >> { %2195 = vst.msk [vmem:[%s4436_s10 + $0x2c] sm:$0xf] %vm2183_vm6, %v2945_v3 }
 0x351   : >> { %v2112_v47 = vsel %vm2032_vm4, %v2016_v51, %v2903_v9 }
 0x352   : >> { %v3273_v59 = vpop.eup %3272  ;;  %v2946_v17 = vpack.c.bf16 %v2112_v47, %v2112_v47 }
 0x353   : >> { %v2904_v33 = vadd.f32 -1.0, %v3273_v59 }
 0x354   : >> { %2196 = vst.msk [vmem:[%s4436_s10 + $0x30] sm:$0xf] %vm2183_vm6, %v2946_v17 }
 0x355   : >> { %v2113_v29 = vsel %vm2033_vm1, %v2017_v32, %v2904_v33 }
 0x356   : >> { %v3275_v63 = vpop.eup %3274  ;;  %v2947_v28 = vpack.c.bf16 %v2113_v29, %v2113_v29 }
 0x357   : >> { %v2905_v37 = vadd.f32 -1.0, %v3275_v63 }
 0x358   : >> { %2197 = vst.msk [vmem:[%s4436_s10 + $0x34] sm:$0xf] %vm2183_vm6, %v2947_v28 }
 0x359   : >> { %v2114_v19 = vsel %vm2034_vm11, %v2018_v45, %v2905_v37 }
 0x35a   : >> { %v3277_v26 = vpop.eup %3276  ;;  %v2948_v58 = vpack.c.bf16 %v2114_v19, %v2114_v19 }
 0x35b   : >> { %v2906_v4 = vadd.f32 -1.0, %v3277_v26 }
 0x35c   : >> { %2198 = vst.msk [vmem:[%s4436_s10 + $0x38] sm:$0xf] %vm2183_vm6, %v2948_v58  ;;  %805 = sbr.rel (!%p803_p11) target bundleno = 108 (0x6c), region = 164 }
 0x35d   : >> { %v2115_v15 = vsel %vm2035_vm5, %v2019_v20, %v2906_v4 }
 0x35e   : >> { %v2949_v10 = vpack.c.bf16 %v2115_v15, %v2115_v15 }
 0x360   : >> { %2199 = vst.msk [vmem:[%s4436_s10 + $0x3c] sm:$0xf] %vm2183_vm6, %v2949_v10 }
 0x361   : > { %2206 = sbr.rel (!%p3368_p5) target bundleno = 905 (0x389), region = 85  ;;  %s2951_s11 = sshll.u32 (%p3368_p5), %s3353_s18, 6 }
 0x362   : > { %s4492_s7 = scalar_lea.vmem (%p3368_p5), %s4633_s4, %s2951_s11 }
 0x367   : > { %v2226_v23 = vld [vmem:[%s3699_s14] sm:$0xff]   ;;  %v2230_v22 = vld [vmem:[%s3699_s14 + $0x8] sm:$0xff]   ;;  %v2234_v62 = vld [vmem:[%s3699_s14 + $0x10] sm:$0xff]  }
 0x368   : > { %v2238_v35 = vld [vmem:[%s3699_s14 + $0x18] sm:$0xff]   ;;  %v2242_v39 = vld [vmem:[%s3699_s14 + $0x20] sm:$0xff]   ;;  %v2246_v24 = vld [vmem:[%s3699_s14 + $0x28] sm:$0xff]   ;;  %2227 = vst [vmem:[%s4492_s7] sm:$0xff] %v2226_v23  }
 0x369   : > { %2231 = vst [vmem:[%s4492_s7 + $0x8] sm:$0xff] %v2230_v22   ;;  %2235 = vst [vmem:[%s4492_s7 + $0x10] sm:$0xff] %v2234_v62   ;;  %v2250_v42 = vld [vmem:[%s3699_s14 + $0x30] sm:$0xff]   ;;  %v2254_v49 = vld [vmem:[%s3699_s14 + $0x38] sm:$0xff]  }
 0x36a   : > { %2239 = vst [vmem:[%s4492_s7 + $0x18] sm:$0xff] %v2238_v35   ;;  %2243 = vst [vmem:[%s4492_s7 + $0x20] sm:$0xff] %v2242_v39   ;;  %v2258_v57 = vld [vmem:[%s3699_s14 + $0x40] sm:$0xff]   ;;  %v2262_v21 = vld [vmem:[%s3699_s14 + $0x48] sm:$0xff]  }
 0x36b   : > { %2247 = vst [vmem:[%s4492_s7 + $0x28] sm:$0xff] %v2246_v24   ;;  %2251 = vst [vmem:[%s4492_s7 + $0x30] sm:$0xff] %v2250_v42   ;;  %v2266_v50 = vld [vmem:[%s3699_s14 + $0x50] sm:$0xff]   ;;  %v2270_v36 = vld [vmem:[%s3699_s14 + $0x58] sm:$0xff]  }
 0x36c   : > { %2255 = vst [vmem:[%s4492_s7 + $0x38] sm:$0xff] %v2254_v49   ;;  %2259 = vst [vmem:[%s4492_s7 + $0x100] sm:$0xff] %v2258_v57   ;;  %v2274_v46 = vld [vmem:[%s3699_s14 + $0x60] sm:$0xff]   ;;  %v2278_v48 = vld [vmem:[%s3699_s14 + $0x68] sm:$0xff]  }
 0x36d   : > { %2263 = vst [vmem:[%s4492_s7 + $0x108] sm:$0xff] %v2262_v21   ;;  %2267 = vst [vmem:[%s4492_s7 + $0x110] sm:$0xff] %v2266_v50   ;;  %v2282_v61 = vld [vmem:[%s3699_s14 + $0x70] sm:$0xff]   ;;  %v2286_v51 = vld [vmem:[%s3699_s14 + $0x78] sm:$0xff]  }
 0x36e   : > { %2271 = vst [vmem:[%s4492_s7 + $0x118] sm:$0xff] %v2270_v36   ;;  %2275 = vst [vmem:[%s4492_s7 + $0x120] sm:$0xff] %v2274_v46   ;;  %v2290_v44 = vld [vmem:[%s3699_s14 + $0x80] sm:$0xff]   ;;  %v2294_v31 = vld [vmem:[%s3699_s14 + $0x88] sm:$0xff]  }
 0x36f   : > { %2279 = vst [vmem:[%s4492_s7 + $0x128] sm:$0xff] %v2278_v48   ;;  %2283 = vst [vmem:[%s4492_s7 + $0x130] sm:$0xff] %v2282_v61   ;;  %v2298_v5 = vld [vmem:[%s3699_s14 + $0x90] sm:$0xff]   ;;  %v2302_v40 = vld [vmem:[%s3699_s14 + $0x98] sm:$0xff]  }
 0x370   : > { %2287 = vst [vmem:[%s4492_s7 + $0x138] sm:$0xff] %v2286_v51   ;;  %2291 = vst [vmem:[%s4492_s7 + $0x200] sm:$0xff] %v2290_v44   ;;  %v2306_v13 = vld [vmem:[%s3699_s14 + $0xa0] sm:$0xff]   ;;  %v2310_v11 = vld [vmem:[%s3699_s14 + $0xa8] sm:$0xff]  }
 0x371   : > { %2295 = vst [vmem:[%s4492_s7 + $0x208] sm:$0xff] %v2294_v31   ;;  %2299 = vst [vmem:[%s4492_s7 + $0x210] sm:$0xff] %v2298_v5   ;;  %v2314_v7 = vld [vmem:[%s3699_s14 + $0xb0] sm:$0xff]   ;;  %v2318_v32 = vld [vmem:[%s3699_s14 + $0xb8] sm:$0xff]  }
 0x372   : > { %2303 = vst [vmem:[%s4492_s7 + $0x218] sm:$0xff] %v2302_v40   ;;  %2307 = vst [vmem:[%s4492_s7 + $0x220] sm:$0xff] %v2306_v13   ;;  %v2322_v38 = vld [vmem:[%s3699_s14 + $0xc0] sm:$0xff]   ;;  %v2326_v41 = vld [vmem:[%s3699_s14 + $0xc8] sm:$0xff]  }
 0x373   : > { %2311 = vst [vmem:[%s4492_s7 + $0x228] sm:$0xff] %v2310_v11   ;;  %2315 = vst [vmem:[%s4492_s7 + $0x230] sm:$0xff] %v2314_v7   ;;  %v2330_v54 = vld [vmem:[%s3699_s14 + $0xd0] sm:$0xff]   ;;  %v2334_v6 = vld [vmem:[%s3699_s14 + $0xd8] sm:$0xff]  }
 0x374   : > { %2319 = vst [vmem:[%s4492_s7 + $0x238] sm:$0xff] %v2318_v32   ;;  %2323 = vst [vmem:[%s4492_s7 + $0x300] sm:$0xff] %v2322_v38   ;;  %v2338_v2 = vld [vmem:[%s3699_s14 + $0xe0] sm:$0xff]   ;;  %v2342_v0 = vld [vmem:[%s3699_s14 + $0xe8] sm:$0xff]  }
 0x375   : > { %2327 = vst [vmem:[%s4492_s7 + $0x308] sm:$0xff] %v2326_v41   ;;  %2331 = vst [vmem:[%s4492_s7 + $0x310] sm:$0xff] %v2330_v54   ;;  %v2346_v53 = vld [vmem:[%s3699_s14 + $0xf0] sm:$0xff]   ;;  %v2350_v45 = vld [vmem:[%s3699_s14 + $0xf8] sm:$0xff]  }
 0x376   : > { %2335 = vst [vmem:[%s4492_s7 + $0x318] sm:$0xff] %v2334_v6   ;;  %2339 = vst [vmem:[%s4492_s7 + $0x320] sm:$0xff] %v2338_v2   ;;  %v2354_v12 = vld [vmem:[%s3699_s14 + $0x100] sm:$0xff]   ;;  %v2358_v43 = vld [vmem:[%s3699_s14 + $0x108] sm:$0xff]  }
 0x377   : > { %2343 = vst [vmem:[%s4492_s7 + $0x328] sm:$0xff] %v2342_v0   ;;  %2347 = vst [vmem:[%s4492_s7 + $0x330] sm:$0xff] %v2346_v53   ;;  %v2362_v8 = vld [vmem:[%s3699_s14 + $0x110] sm:$0xff]   ;;  %v2366_v16 = vld [vmem:[%s3699_s14 + $0x118] sm:$0xff]  }
 0x378   : > { %2351 = vst [vmem:[%s4492_s7 + $0x338] sm:$0xff] %v2350_v45   ;;  %2355 = vst [vmem:[%s4492_s7 + $0x400] sm:$0xff] %v2354_v12   ;;  %v2370_v14 = vld [vmem:[%s3699_s14 + $0x120] sm:$0xff]   ;;  %v2374_v56 = vld [vmem:[%s3699_s14 + $0x128] sm:$0xff]  }
 0x379   : > { %2359 = vst [vmem:[%s4492_s7 + $0x408] sm:$0xff] %v2358_v43   ;;  %2363 = vst [vmem:[%s4492_s7 + $0x410] sm:$0xff] %v2362_v8   ;;  %v2378_v34 = vld [vmem:[%s3699_s14 + $0x130] sm:$0xff]   ;;  %v2382_v20 = vld [vmem:[%s3699_s14 + $0x138] sm:$0xff]  }
 0x37a   : > { %2367 = vst [vmem:[%s4492_s7 + $0x418] sm:$0xff] %v2366_v16   ;;  %2371 = vst [vmem:[%s4492_s7 + $0x420] sm:$0xff] %v2370_v14   ;;  %v2386_v55 = vld [vmem:[%s3699_s14 + $0x140] sm:$0xff]   ;;  %v2390_v27 = vld [vmem:[%s3699_s14 + $0x148] sm:$0xff]  }
 0x37b   : > { %2375 = vst [vmem:[%s4492_s7 + $0x428] sm:$0xff] %v2374_v56   ;;  %2379 = vst [vmem:[%s4492_s7 + $0x430] sm:$0xff] %v2378_v34   ;;  %v2394_v30 = vld [vmem:[%s3699_s14 + $0x150] sm:$0xff]   ;;  %v2398_v1 = vld [vmem:[%s3699_s14 + $0x158] sm:$0xff]  }
 0x37c   : > { %2383 = vst [vmem:[%s4492_s7 + $0x438] sm:$0xff] %v2382_v20   ;;  %2387 = vst [vmem:[%s4492_s7 + $0x500] sm:$0xff] %v2386_v55   ;;  %v2402_v52 = vld [vmem:[%s3699_s14 + $0x160] sm:$0xff]   ;;  %v2406_v60 = vld [vmem:[%s3699_s14 + $0x168] sm:$0xff]  }
 0x37d   : > { %2391 = vst [vmem:[%s4492_s7 + $0x508] sm:$0xff] %v2390_v27   ;;  %2395 = vst [vmem:[%s4492_s7 + $0x510] sm:$0xff] %v2394_v30   ;;  %v2410_v18 = vld [vmem:[%s3699_s14 + $0x170] sm:$0xff]   ;;  %v2414_v25 = vld [vmem:[%s3699_s14 + $0x178] sm:$0xff]  }
 0x37e   : > { %2399 = vst [vmem:[%s4492_s7 + $0x518] sm:$0xff] %v2398_v1   ;;  %2403 = vst [vmem:[%s4492_s7 + $0x520] sm:$0xff] %v2402_v52   ;;  %v2418_v3 = vld [vmem:[%s3699_s14 + $0x180] sm:$0xff]   ;;  %v2422_v9 = vld [vmem:[%s3699_s14 + $0x188] sm:$0xff]  }
 0x37f   : > { %2407 = vst [vmem:[%s4492_s7 + $0x528] sm:$0xff] %v2406_v60   ;;  %2411 = vst [vmem:[%s4492_s7 + $0x530] sm:$0xff] %v2410_v18   ;;  %v2426_v47 = vld [vmem:[%s3699_s14 + $0x190] sm:$0xff]   ;;  %v2430_v59 = vld [vmem:[%s3699_s14 + $0x198] sm:$0xff]  }
 0x380   : > { %2415 = vst [vmem:[%s4492_s7 + $0x538] sm:$0xff] %v2414_v25   ;;  %2419 = vst [vmem:[%s4492_s7 + $0x600] sm:$0xff] %v2418_v3   ;;  %v2434_v17 = vld [vmem:[%s3699_s14 + $0x1a0] sm:$0xff]   ;;  %v2438_v33 = vld [vmem:[%s3699_s14 + $0x1a8] sm:$0xff]  }
 0x381   : > { %2423 = vst [vmem:[%s4492_s7 + $0x608] sm:$0xff] %v2422_v9   ;;  %2427 = vst [vmem:[%s4492_s7 + $0x610] sm:$0xff] %v2426_v47   ;;  %v2442_v29 = vld [vmem:[%s3699_s14 + $0x1b0] sm:$0xff]   ;;  %v2446_v63 = vld [vmem:[%s3699_s14 + $0x1b8] sm:$0xff]  }
 0x382   : > { %2431 = vst [vmem:[%s4492_s7 + $0x618] sm:$0xff] %v2430_v59   ;;  %2435 = vst [vmem:[%s4492_s7 + $0x620] sm:$0xff] %v2434_v17   ;;  %v2450_v28 = vld [vmem:[%s3699_s14 + $0x1c0] sm:$0xff]   ;;  %v2454_v37 = vld [vmem:[%s3699_s14 + $0x1c8] sm:$0xff]  }
 0x383   : > { %2439 = vst [vmem:[%s4492_s7 + $0x628] sm:$0xff] %v2438_v33   ;;  %2443 = vst [vmem:[%s4492_s7 + $0x630] sm:$0xff] %v2442_v29   ;;  %v2458_v19 = vld [vmem:[%s3699_s14 + $0x1d0] sm:$0xff]   ;;  %v2462_v26 = vld [vmem:[%s3699_s14 + $0x1d8] sm:$0xff]  }
 0x384   : > { %2447 = vst [vmem:[%s4492_s7 + $0x638] sm:$0xff] %v2446_v63   ;;  %2451 = vst [vmem:[%s4492_s7 + $0x700] sm:$0xff] %v2450_v28   ;;  %v2466_v58 = vld [vmem:[%s3699_s14 + $0x1e0] sm:$0xff]   ;;  %v2470_v4 = vld [vmem:[%s3699_s14 + $0x1e8] sm:$0xff]  }
 0x385   : > { %2455 = vst [vmem:[%s4492_s7 + $0x708] sm:$0xff] %v2454_v37   ;;  %2459 = vst [vmem:[%s4492_s7 + $0x710] sm:$0xff] %v2458_v19   ;;  %v2474_v15 = vld [vmem:[%s3699_s14 + $0x1f0] sm:$0xff]   ;;  %v2478_v10 = vld [vmem:[%s3699_s14 + $0x1f8] sm:$0xff]  }
 0x386   : > { %2463 = vst [vmem:[%s4492_s7 + $0x718] sm:$0xff] %v2462_v26   ;;  %2467 = vst [vmem:[%s4492_s7 + $0x720] sm:$0xff] %v2466_v58  }
 0x387   : > { %2471 = vst [vmem:[%s4492_s7 + $0x728] sm:$0xff] %v2470_v4   ;;  %2475 = vst [vmem:[%s4492_s7 + $0x730] sm:$0xff] %v2474_v15  }
 0x388   : > { %2479 = vst [vmem:[%s4492_s7 + $0x738] sm:$0xff] %v2478_v10  }
 0x389 PF: > { %p11_p12 = scmp.ge.s32.totalorder %s3356_s19, 6   ;;  %s4741_s15 = smov %s3300_s16 }
 0x38a   : > { %s4742_s16 = smov %s3366_s22  ;;  %s4743_s17 = smov %s3356_s19 }
 0x38b   :  { %13 = sbr.rel (!%p11_p12) target bundleno = 2 (0x2), region = 175 }

// kernel: net_forward.4
= control target key start
LH: loop header
LB: loop body
LE: loop exit
PB: predicated region body
PF: predicated region fallthrough
CT: control target
= control target key end

     0   :  { %s6188_s18 = smov 0   ;;  %s6190_s19 = smov 0   ;;  %s9443_s0 = inlined_call_operand.vmem [shape: bf16[512,64], index: 0, kind: input, shape index: {}]   ;;  %s9444_s1 = inlined_call_operand.vmem [shape: bf16[64,72], index: 1, kind: input, shape index: {}]   ;;  %s9445_s2 = inlined_call_operand.vmem [shape: bf16[72,16], index: 2, kind: input, shape index: {}]   ;;  %s9446_s3 = inlined_call_operand.vmem [shape: bf16[8,512,9], index: 3, kind: output, shape index: {0}]   ;;  %s9447_s4 = inlined_call_operand.vmem [shape: f32[8,512,1], index: 4, kind: output, shape index: {1}]   ;;  %s9448_s5 = inlined_call_operand.vmem [shape: f32[8,512], index: 5, kind: output, shape index: {2}]  }
   0x1   :  { %s6192_s20 = smov 0  }
   0x2 LB: > { %s6201_s21 = sadd.s32 4294967295, %s6141_s20   ;;  %s6203_s22 = sadd.s32 1, %s6141_s20   ;;  %s6141_s20 = sphi %s6192_s20, %s9594_s20   ;;  %s6137_s19 = sphi %s6190_s19, %s9593_s19   ;;  %s6133_s18 = sphi %s6188_s18, %s9592_s18  }
   0x3   : > { %s88_s23 = ssub.s32 %s6141_s20, %s6203_s22  ;;  %s91_s24 = sadd.s32 1, %s6137_s19 }
   0x4   : > { %p89_p0 = scmp.eq.s32.totalorder %s88_s23, 0  ;;  %p101_p1 = scmp.ne.s32.totalorder %s6137_s19, %s6133_s18 }
   0x5   : > { %p102_p2 = scmp.eq.s32.totalorder %s6201_s21, 1  ;;  %p5343_p3 = scmp.ge.s32.totalorder %s6141_s20, 1 }
   0x6   : > { %s6211_s25 = scalar_select %p89_p0, %s6137_s19, %s91_s24  }
   0x7   : > { %p6213_p4 = por %p102_p2, %p101_p1  ;;  %p193_p5 = scmp.lt.s32.totalorder %s6141_s20, 3 }
   0x9   : > { %p194_p6 = pnand %p5343_p3, %p193_p5 }
   0xb   : > { %197 = sbr.rel (%p194_p6) target bundleno = 1568 (0x620), region = 32 }
  0x10   : > { %v6094_v0 = vld [vmem:[%s9444_s1 + $0x18] sm:$0xff]   ;;  %s5346_s29 = sshll.u32 %s6201_s21, 5  ;;  %v6095_v1 = vld [vmem:[%s9444_s1 + $0x10] sm:$0xff]   ;;  %v6096_v2 = vld [vmem:[%s9444_s1 + $0x8] sm:$0xff]   ;;  %vm750_vm0 = vcmask 1043456   ;;  %vm388_vm1 = vcmask 523264   ;;  %v598_v26 = vlaneseq }
  0x11   : > { %p230_p7 = scmp.lt.s32.totalorder %s5346_s29, 63  ;;  %5970 = vmatprep.subr.bf16.mxu0 %v6094_v0  ;;  %v6114_v3 = vld [vmem:[%s9445_s2 + $0x20] ss:$0 sps:$4 sm:$0xff]   ;;  %v6115_v4 = vld [vmem:[%s9445_s2 + $0x18] sm:$0xff]   ;;  %v6116_v8 = vld [vmem:[%s9445_s2 + $0x10] sm:$0xff]   ;;  %s213_s6 = sand.u32 1, %s6133_s18  }
  0x12   : > { %5971 = vmatpush3.bf16.msra.mxu0 %v6094_v0  ;;  %v6097_v5 = vld [vmem:[%s9444_s1] sm:$0xff]   ;;  %6052 = vmatprep.subr.msk.bf16.mxu1 %vm750_vm0, %v6114_v3  ;;  %v752_v6 = vsel %vm750_vm0, %v6114_v3, 0  ;;  %v6117_v24 = vld [vmem:[%s9445_s2 + $0x8] sm:$0xff]   ;;  %v599_v27 = vand.u32 127, %v598_v26  ;;  %s5344_s7 = sshll.u32 %s213_s6, 10  ;;  %vm1221_vm6 = vcmask 68608  }
  0x13   : > { %s9596_s29 = smov (!%p230_p7, %s5346_s29), 63  ;;  %5972 = vmatprep.subr.bf16.mxu0 %v6095_v1  ;;  %6011 = vmatpush3.bf16.msra.mxu1 %v752_v6  ;;  %v6118_v25 = vld [vmem:[%s9445_s2] sm:$0xff]   ;;  %s6299_s8 = scalar_lea.vmem [#allocation2], %s5344_s7  ;;  %vm701_vm7 = vcmask 588800   ;;  %vm1254_vm8 = vcmask 7168  }
  0x14   : > { %s5347_s13 = sshll.u32 %s9596_s29, 2  ;;  %6012 = vmatprep.subr.bf16.mxu1 %v6115_v4  ;;  %v6282_v28 = vmul.u32.u64.low 3817748708, %v599_v27  ;;  %v6283_v29 = vmul.u32.u64.high 3817748708, %v599_v27, %v6282_v28  ;;  %s6143_s9 = smov 119  }
  0x15   : > { %s6239_s20 = scalar_lea.vmem %s9443_s0, %s5347_s13  ;;  %s6144_s10 = smov 110  }
  0x16   : > { %5973 = vmatpush3.bf16.msra.mxu0 %v6095_v1  ;;  %v6098_v7 = vld [vmem:[%s6239_s20] sm:$0xff]   ;;  %v6099_v9 = vld [vmem:[%s6239_s20 + $0x8] sm:$0xff]   ;;  %v6100_v10 = vld [vmem:[%s6239_s20 + $0x10] sm:$0xff]   ;;  %v606_v30 = vshrl.u32 %v6283_v29, 3  ;;  %s6145_s11 = smov 101   ;;  %s5345_s12 = sshll.u32 %s213_s6, 11 }
  0x17   : > { %5974 = vmatprep.subr.bf16.mxu0 %v6096_v2  ;;  %5978 = vmatprep.mubr.msk.bf16.mxu0 %vm388_vm1, %v6098_v7  ;;  %v6101_v11 = vld [vmem:[%s6239_s20 + $0x18] sm:$0xff]   ;;  %v6102_v12 = vld [vmem:[%s6239_s20 + $0x20] sm:$0xff]   ;;  %v6103_v13 = vld [vmem:[%s6239_s20 + $0x28] sm:$0xff]   ;;  %s6817_s13 = scalar_lea.vmem [#allocation3], %s5345_s12  ;;  %s6146_s18 = smov 127  }
  0x18   : > { %6013 = vmatpush3.bf16.msra.mxu1 %v6115_v4  ;;  %v6104_v14 = vld [vmem:[%s6239_s20 + $0x30] sm:$0xff]   ;;  %v6105_v15 = vld [vmem:[%s6239_s20 + $0x38] sm:$0xff]   ;;  %v6106_v16 = vld [vmem:[%s6239_s20 + $0x40] sm:$0xff]   ;;  %v607_v31 = vmul.u32 9, %v606_v30  ;;  %s6147_s14 = smov 120   ;;  %s6148_s15 = smov 126  }
  0x19   : > { %6014 = vmatprep.subr.bf16.mxu1 %v6116_v8  ;;  %v6107_v17 = vld [vmem:[%s6239_s20 + $0x48] sm:$0xff]   ;;  %v6108_v18 = vld [vmem:[%s6239_s20 + $0x50] sm:$0xff]   ;;  %v6109_v19 = vld [vmem:[%s6239_s20 + $0x58] sm:$0xff]   ;;  %s6149_s16 = smov 125   ;;  %s6150_s17 = smov 92  }
  0x1a   : > { %5975 = vmatpush3.bf16.msra.mxu0 %v6096_v2  ;;  %v6110_v20 = vld [vmem:[%s6239_s20 + $0x60] sm:$0xff]   ;;  %v6111_v21 = vld [vmem:[%s6239_s20 + $0x68] sm:$0xff]   ;;  %v6112_v22 = vld [vmem:[%s6239_s20 + $0x70] sm:$0xff]   ;;  %v608_v32 = vsub.s32 %v599_v27, %v607_v31  ;;  %s6151_s29 = smov 124   ;;  %s6152_s30 = smov 83  }
  0x1b   : > { %5976 = vmatprep.subr.bf16.mxu0 %v6097_v5  ;;  %v6113_v23 = vld [vmem:[%s6239_s20 + $0x78] sm:$0xff]   ;;  %s5348_s20 = sshll.u32 %s6201_s21, 1  ;;  %s6153_s6 = smov 123  }
  0x1c   : > { %6015 = vmatpush3.bf16.msra.mxu1 %v6116_v8  ;;  %vm611_vm2 = vcmp.ne.s32.totalorder %v608_v32, 0  ;;  %vm612_vm3 = vcmp.lt.s32.totalorder %v608_v32, 0  ;;  %v614_v33 = vadd.s32 9, %v608_v32  ;;  %p238_p8 = scmp.lt.s32.totalorder %s5348_s20, 3  ;;  %s6154_s7 = smov 74  }
  0x1d   : > { %6016 = vmatprep.subr.bf16.mxu1 %v6117_v24  ;;  %vm613_vm4 = vmand %vm612_vm3, %vm611_vm2  ;;  %s5927_s12 = sshll.u32 (%p6213_p4), %s6201_s21, 7 }
  0x1e   : > { %5977 = vmatpush3.bf16.msra.mxu0 %v6097_v5  ;;  %v615_v34 = vsel %vm613_vm4, %v614_v33, %v608_v32  ;;  %s9598_s20 = smov (!%p238_p8, %s5348_s20), 3 }
  0x1f   : > { %vm6289_vm5 = vcmp.eq.s32.totalorder %v615_v34, 8  ;;  %s5349_s23 = sshll.u32 %s9598_s20, 3 }
  0x20   : > { %6017 = vmatpush3.bf16.msra.mxu1 %v6117_v24  ;;  %s241_s28 = scalar_lea.vmem %s9448_s5, %s5349_s23 }
  0x21   : > { %5979 = vmatmul.mubr.msk.bf16.vlgmr.msra.gmra.mxu0 %vm388_vm1, %v6099_v9  ;;  %6018 = vmatprep.subr.bf16.mxu1 %v6118_v25 }
  0x22   : > { %5982 = vmatprep.mubr.msk.bf16.mxu0 %vm388_vm1, %v6100_v10 }
  0x24   : > { %6019 = vmatpush3.bf16.msra.mxu1 %v6118_v25 }
  0x29   : > { %5983 = vmatmul.mubr.msk.bf16.gmra.mxu0 %vm388_vm1, %v6101_v11 }
  0x2a   : > { %5986 = vmatprep.mubr.msk.bf16.mxu0 %vm388_vm1, %v6102_v12 }
  0x31   : > { %5987 = vmatmul.mubr.msk.bf16.gmra.mxu0 %vm388_vm1, %v6103_v13 }
  0x32   : > { %5990 = vmatprep.mubr.msk.bf16.mxu0 %vm388_vm1, %v6104_v14 }
  0x39   : > { %5991 = vmatmul.mubr.msk.bf16.gmra.mxu0 %vm388_vm1, %v6105_v15 }
  0x3a   : > { %5994 = vmatprep.mubr.msk.bf16.mxu0 %vm388_vm1, %v6106_v16 }
  0x41   : > { %5995 = vmatmul.mubr.msk.bf16.gmra.mxu0 %vm388_vm1, %v6107_v17 }
  0x42   : > { %5998 = vmatprep.mubr.msk.bf16.mxu0 %vm388_vm1, %v6108_v18 }
  0x49   : > { %5999 = vmatmul.mubr.msk.bf16.gmra.mxu0 %vm388_vm1, %v6109_v19 }
  0x4a   : > { %6002 = vmatprep.mubr.msk.bf16.mxu0 %vm388_vm1, %v6110_v20 }
  0x51   : > { %6003 = vmatmul.mubr.msk.bf16.gmra.mxu0 %vm388_vm1, %v6111_v21 }
  0x52   : > { %6006 = vmatprep.mubr.msk.bf16.mxu0 %vm388_vm1, %v6112_v22 }
  0x59   : > { %6007 = vmatmul.mubr.msk.bf16.gmra.mxu0 %vm388_vm1, %v6113_v23 }
  0xe1   : > { %v5980_v36 = vpop.f32.mrf.mxu0 }
  0xe2   : > { %v619_v37 = vsel %vm6289_vm5, 1.0, %v5980_v36 }
  0xe3   : > { %v6295_v38 = vpack.c.bf16 %v619_v37, %v619_v37  ;;  %v471_v39 = vpop.f32.mrf.mxu0 }
  0xe4   : > { %v617_v40 = vsel %vm6289_vm5, 1.0, %v471_v39 }
  0xe5   : > { %1224 = vst.msk [vmem:[%s6299_s8 + $0x8] sm:$0xf] %vm1221_vm6, %v6295_v38  ;;  %v6304_v41 = vpack.c.bf16 %v617_v40, %v617_v40  ;;  %1291 = vrot.lane.b32.xlu0 %v6295_v38, %s6143_s9  ;;  %v5981_v42 = vpop.f32.mrf.mxu0 }
  0xe6   : > { %v620_v43 = vsel %vm6289_vm5, 1.0, %v5981_v42 }
  0xe7   : > { %9519 = vst [vmem:[#allocation4_spill] sm:$0xff] %v6304_v41  ;;  %1222 = vst.msk [vmem:[%s6299_s8] sm:$0xf] %vm1221_vm6, %v6304_v41  ;;  %v6313_v44 = vpack.c.bf16 %v620_v43, %v620_v43  ;;  %v474_v45 = vpop.f32.mrf.mxu0  ;;  %v650_v50 = vpack.c.bf16 %v620_v43, %v619_v37 }
  0xe8   : > { %v618_v46 = vsel %vm6289_vm5, 1.0, %v474_v45 }
  0xe9   : > { %1225 = vst.msk [vmem:[%s6299_s8 + $0xc] sm:$0xf] %vm1221_vm6, %v6313_v44  ;;  %v6320_v47 = vpack.c.bf16 %v618_v46, %v618_v46  ;;  %1549 = vrot.lane.b32.xlu0 %v6295_v38, %s6144_s10  ;;  %1293 = vrot.lane.b32.xlu1 %v6313_v44, %s6143_s9  ;;  %v649_v48 = vpack.c.bf16 %v618_v46, %v617_v40  ;;  %v5984_v49 = vpop.f32.mrf.mxu0 }
  0xea   : > { %v623_v51 = vsel %vm6289_vm5, 1.0, %v5984_v49 }
  0xeb   : > { %9520 = vst [vmem:[#allocation5_spill] sm:$0xff] %v6320_v47  ;;  %1223 = vst.msk [vmem:[%s6299_s8 + $0x4] sm:$0xf] %vm1221_vm6, %v6320_v47  ;;  %6020 = vmatprep.mubr.msk.bf16.mxu1 %vm701_vm7, %v649_v48  ;;  %v6332_v52 = vpack.c.bf16 %v623_v51, %v623_v51  ;;  %v487_v53 = vpop.f32.mrf.mxu0 }
  0xec   : > { %6021 = vmatmul.mubr.msk.bf16.vlgmr.msra.gmra.mxu1 %vm701_vm7, %v650_v50  ;;  %v621_v54 = vsel %vm6289_vm5, 1.0, %v487_v53 }
  0xed   : > { %9521 = vst [vmem:[#allocation6_spill] sm:$0xff] %v6332_v52  ;;  %1807 = vrot.lane.b32.xlu0 %v6295_v38, %s6145_s11  ;;  %1551 = vrot.lane.b32.xlu1 %v6313_v44, %s6144_s10  ;;  %1228 = vst.msk [vmem:[%s6299_s8 + $0x18] sm:$0xf] %vm1221_vm6, %v6332_v52  ;;  %v6344_v55 = vpack.c.bf16 %v621_v54, %v621_v54  ;;  %v5985_v56 = vpop.f32.mrf.mxu0 }
  0xee   : > { %v624_v57 = vsel %vm6289_vm5, 1.0, %v5985_v56 }
  0xef   : > { %1226 = vst.msk [vmem:[%s6299_s8 + $0x10] sm:$0xf] %vm1221_vm6, %v6344_v55  ;;  %v6351_v58 = vpack.c.bf16 %v624_v57, %v624_v57  ;;  %v490_v59 = vpop.f32.mrf.mxu0  ;;  %v652_v60 = vpack.c.bf16 %v624_v57, %v623_v51 }
  0xf0   : > { %v622_v61 = vsel %vm6289_vm5, 1.0, %v490_v59 }
  0xf1   : > { %9522 = vst [vmem:[#allocation7_spill] sm:$0xff] %v6351_v58  ;;  %1287 = vrot.lane.b32.xlu0 %v6304_v41, %s6143_s9  ;;  %1809 = vrot.lane.b32.xlu1 %v6313_v44, %s6145_s11  ;;  %1229 = vst.msk [vmem:[%s6299_s8 + $0x1c] sm:$0xf] %vm1221_vm6, %v6351_v58  ;;  %v651_v62 = vpack.c.bf16 %v622_v61, %v621_v54  ;;  %v6362_v63 = vpack.c.bf16 %v622_v61, %v622_v61  ;;  %v5988_v0 = vpop.f32.mrf.mxu0 }
  0xf2   : > { %v627_v1 = vsel %vm6289_vm5, 1.0, %v5988_v0 }
  0xf3   : > { %1227 = vst.msk [vmem:[%s6299_s8 + $0x14] sm:$0xf] %vm1221_vm6, %v6362_v63  ;;  %6024 = vmatprep.mubr.msk.bf16.mxu1 %vm701_vm7, %v651_v62  ;;  %v6370_v2 = vpack.c.bf16 %v627_v1, %v627_v1  ;;  %v503_v3 = vpop.f32.mrf.mxu0 }
  0xf4   : > { %6025 = vmatmul.mubr.msk.bf16.gmra.mxu1 %vm701_vm7, %v652_v60  ;;  %v625_v4 = vsel %vm6289_vm5, 1.0, %v503_v3 }
  0xf5   : > { %9523 = vst [vmem:[#allocation8_spill] sm:$0xff] %v6370_v2  ;;  %1545 = vrot.lane.b32.xlu0 %v6304_v41, %s6144_s10  ;;  %1289 = vrot.lane.b32.xlu1 %v6320_v47, %s6143_s9  ;;  %1232 = vst.msk [vmem:[%s6299_s8 + $0x28] sm:$0xf] %vm1221_vm6, %v6370_v2  ;;  %v6382_v5 = vpack.c.bf16 %v625_v4, %v625_v4  ;;  %v5989_v6 = vpop.f32.mrf.mxu0 }
  0xf6   : > { %v628_v7 = vsel %vm6289_vm5, 1.0, %v5989_v6 }
  0xf7   : > { %9524 = vst [vmem:[#allocation9_spill] sm:$0xff] %v6382_v5  ;;  %1230 = vst.msk [vmem:[%s6299_s8 + $0x20] sm:$0xf] %vm1221_vm6, %v6382_v5  ;;  %v6389_v8 = vpack.c.bf16 %v628_v7, %v628_v7  ;;  %v506_v9 = vpop.f32.mrf.mxu0  ;;  %v654_v10 = vpack.c.bf16 %v628_v7, %v627_v1 }
  0xf8   : > { %v626_v11 = vsel %vm6289_vm5, 1.0, %v506_v9 }
  0xf9   : > { %9525 = vst [vmem:[#allocation10_spill] sm:$0xff] %v6389_v8  ;;  %1803 = vrot.lane.b32.xlu0 %v6304_v41, %s6145_s11  ;;  %1547 = vrot.lane.b32.xlu1 %v6320_v47, %s6144_s10  ;;  %1233 = vst.msk [vmem:[%s6299_s8 + $0x2c] sm:$0xf] %vm1221_vm6, %v6389_v8  ;;  %v653_v12 = vpack.c.bf16 %v626_v11, %v625_v4  ;;  %v6400_v13 = vpack.c.bf16 %v626_v11, %v626_v11  ;;  %v5992_v14 = vpop.f32.mrf.mxu0 }
  0xfa   : > { %v631_v15 = vsel %vm6289_vm5, 1.0, %v5992_v14 }
  0xfb   : > { %1231 = vst.msk [vmem:[%s6299_s8 + $0x24] sm:$0xf] %vm1221_vm6, %v6400_v13  ;;  %6028 = vmatprep.mubr.msk.bf16.mxu1 %vm701_vm7, %v653_v12  ;;  %v6408_v16 = vpack.c.bf16 %v631_v15, %v631_v15  ;;  %v519_v17 = vpop.f32.mrf.mxu0 }
  0xfc   : > { %6029 = vmatmul.mubr.msk.bf16.gmra.mxu1 %vm701_vm7, %v654_v10  ;;  %v629_v18 = vsel %vm6289_vm5, 1.0, %v519_v17 }
  0xfd   : > { %1805 = vrot.lane.b32.xlu1 %v6320_v47, %s6145_s11  ;;  %1299 = vrot.lane.b32.xlu0 %v6332_v52, %s6143_s9  ;;  %1236 = vst.msk [vmem:[%s6299_s8 + $0x38] sm:$0xf] %vm1221_vm6, %v6408_v16  ;;  %v6420_v19 = vpack.c.bf16 %v629_v18, %v629_v18  ;;  %v5993_v20 = vpop.f32.mrf.mxu0 }
  0xfe   : > { %v632_v21 = vsel %vm6289_vm5, 1.0, %v5993_v20 }
  0xff   : > { %9526 = vst [vmem:[#allocation11_spill] sm:$0xff] %v6420_v19  ;;  %1234 = vst.msk [vmem:[%s6299_s8 + $0x30] sm:$0xf] %vm1221_vm6, %v6420_v19  ;;  %v6427_v22 = vpack.c.bf16 %v632_v21, %v632_v21  ;;  %v522_v23 = vpop.f32.mrf.mxu0  ;;  %v656_v24 = vpack.c.bf16 %v632_v21, %v631_v15 }
 0x100   : > { %v630_v25 = vsel %vm6289_vm5, 1.0, %v522_v23 }
 0x101   : > { %9527 = vst [vmem:[#allocation12_spill] sm:$0xff] %v6427_v22  ;;  %1557 = vrot.lane.b32.xlu0 %v6332_v52, %s6144_s10  ;;  %1301 = vrot.lane.b32.xlu1 %v6351_v58, %s6143_s9  ;;  %1237 = vst.msk [vmem:[%s6299_s8 + $0x3c] sm:$0xf] %vm1221_vm6, %v6427_v22  ;;  %v655_v26 = vpack.c.bf16 %v630_v25, %v629_v18  ;;  %v6438_v27 = vpack.c.bf16 %v630_v25, %v630_v25  ;;  %v5996_v28 = vpop.f32.mrf.mxu0 }
 0x102   : > { %v635_v29 = vsel %vm6289_vm5, 1.0, %v5996_v28 }
 0x103   : > { %9528 = vst [vmem:[#allocation13_spill] sm:$0xff] %v6438_v27  ;;  %1235 = vst.msk [vmem:[%s6299_s8 + $0x34] sm:$0xf] %vm1221_vm6, %v6438_v27  ;;  %6032 = vmatprep.mubr.msk.bf16.mxu1 %vm701_vm7, %v655_v26  ;;  %v6446_v30 = vpack.c.bf16 %v635_v29, %v635_v29  ;;  %v535_v31 = vpop.f32.mrf.mxu0 }
 0x104   : > { %6033 = vmatmul.mubr.msk.bf16.gmra.mxu1 %vm701_vm7, %v656_v24  ;;  %v633_v32 = vsel %vm6289_vm5, 1.0, %v535_v31 }
 0x105   : > { %9529 = vst [vmem:[#allocation14_spill] sm:$0xff] %v6446_v30  ;;  %1815 = vrot.lane.b32.xlu0 %v6332_v52, %s6145_s11  ;;  %1559 = vrot.lane.b32.xlu1 %v6351_v58, %s6144_s10  ;;  %1240 = vst.msk [vmem:[%s6299_s8 + $0x48] sm:$0xf] %vm1221_vm6, %v6446_v30  ;;  %v6458_v33 = vpack.c.bf16 %v633_v32, %v633_v32  ;;  %v5997_v34 = vpop.f32.mrf.mxu0 }
 0x106   : > { %v636_v36 = vsel %vm6289_vm5, 1.0, %v5997_v34 }
 0x107   : > { %1238 = vst.msk [vmem:[%s6299_s8 + $0x40] sm:$0xf] %vm1221_vm6, %v6458_v33  ;;  %v6465_v37 = vpack.c.bf16 %v636_v36, %v636_v36  ;;  %v538_v39 = vpop.f32.mrf.mxu0  ;;  %v658_v40 = vpack.c.bf16 %v636_v36, %v635_v29 }
 0x108   : > { %v634_v42 = vsel %vm6289_vm5, 1.0, %v538_v39 }
 0x109   : > { %9530 = vst [vmem:[#allocation15_spill] sm:$0xff] %v6465_v37  ;;  %1295 = vrot.lane.b32.xlu0 %v6344_v55, %s6143_s9  ;;  %1817 = vrot.lane.b32.xlu1 %v6351_v58, %s6145_s11  ;;  %1241 = vst.msk [vmem:[%s6299_s8 + $0x4c] sm:$0xf] %vm1221_vm6, %v6465_v37  ;;  %v657_v43 = vpack.c.bf16 %v634_v42, %v633_v32  ;;  %v6476_v45 = vpack.c.bf16 %v634_v42, %v634_v42  ;;  %v6000_v46 = vpop.f32.mrf.mxu0 }
 0x10a   : > { %v639_v48 = vsel %vm6289_vm5, 1.0, %v6000_v46 }
 0x10b   : > { %9531 = vst [vmem:[#allocation16_spill] sm:$0xff] %v6476_v45  ;;  %1239 = vst.msk [vmem:[%s6299_s8 + $0x44] sm:$0xf] %vm1221_vm6, %v6476_v45  ;;  %6036 = vmatprep.mubr.msk.bf16.mxu1 %vm701_vm7, %v657_v43  ;;  %v6484_v49 = vpack.c.bf16 %v639_v48, %v639_v48  ;;  %v551_v50 = vpop.f32.mrf.mxu0 }
 0x10c   : > { %6037 = vmatmul.mubr.msk.bf16.gmra.mxu1 %vm701_vm7, %v658_v40  ;;  %v637_v51 = vsel %vm6289_vm5, 1.0, %v551_v50 }
 0x10d   : > { %1553 = vrot.lane.b32.xlu0 %v6344_v55, %s6144_s10  ;;  %1297 = vrot.lane.b32.xlu1 %v6362_v63, %s6143_s9  ;;  %1244 = vst.msk [vmem:[%s6299_s8 + $0x58] sm:$0xf] %vm1221_vm6, %v6484_v49  ;;  %v6496_v53 = vpack.c.bf16 %v637_v51, %v637_v51  ;;  %v6001_v54 = vpop.f32.mrf.mxu0 }
 0x10e   : > { %v640_v56 = vsel %vm6289_vm5, 1.0, %v6001_v54 }
 0x10f   : > { %1242 = vst.msk [vmem:[%s6299_s8 + $0x50] sm:$0xf] %vm1221_vm6, %v6496_v53  ;;  %v6503_v57 = vpack.c.bf16 %v640_v56, %v640_v56  ;;  %v554_v59 = vpop.f32.mrf.mxu0  ;;  %v660_v60 = vpack.c.bf16 %v640_v56, %v639_v48 }
 0x110   : > { %v638_v61 = vsel %vm6289_vm5, 1.0, %v554_v59 }
 0x111   : > { %1811 = vrot.lane.b32.xlu0 %v6344_v55, %s6145_s11  ;;  %1555 = vrot.lane.b32.xlu1 %v6362_v63, %s6144_s10  ;;  %1245 = vst.msk [vmem:[%s6299_s8 + $0x5c] sm:$0xf] %vm1221_vm6, %v6503_v57  ;;  %v659_v62 = vpack.c.bf16 %v638_v61, %v637_v51  ;;  %v6514_v0 = vpack.c.bf16 %v638_v61, %v638_v61  ;;  %v6004_v1 = vpop.f32.mrf.mxu0 }
 0x112   : > { %v643_v3 = vsel %vm6289_vm5, 1.0, %v6004_v1 }
 0x113   : > { %1243 = vst.msk [vmem:[%s6299_s8 + $0x54] sm:$0xf] %vm1221_vm6, %v6514_v0  ;;  %6040 = vmatprep.mubr.msk.bf16.mxu1 %vm701_vm7, %v659_v62  ;;  %v6522_v4 = vpack.c.bf16 %v643_v3, %v643_v3  ;;  %v567_v6 = vpop.f32.mrf.mxu0 }
 0x114   : > { %6041 = vmatmul.mubr.msk.bf16.gmra.mxu1 %vm701_vm7, %v660_v60  ;;  %v641_v7 = vsel %vm6289_vm5, 1.0, %v567_v6 }
 0x115   : > { %1813 = vrot.lane.b32.xlu1 %v6362_v63, %s6145_s11  ;;  %1307 = vrot.lane.b32.xlu0 %v6370_v2, %s6143_s9  ;;  %1248 = vst.msk [vmem:[%s6299_s8 + $0x68] sm:$0xf] %vm1221_vm6, %v6522_v4  ;;  %v6534_v9 = vpack.c.bf16 %v641_v7, %v641_v7  ;;  %v6005_v10 = vpop.f32.mrf.mxu0 }
 0x116   : > { %v644_v11 = vsel %vm6289_vm5, 1.0, %v6005_v10 }
 0x117   : > { %1246 = vst.msk [vmem:[%s6299_s8 + $0x60] sm:$0xf] %vm1221_vm6, %v6534_v9  ;;  %v6541_v12 = vpack.c.bf16 %v644_v11, %v644_v11  ;;  %v570_v14 = vpop.f32.mrf.mxu0  ;;  %v662_v15 = vpack.c.bf16 %v644_v11, %v643_v3 }
 0x118   : > { %v642_v17 = vsel %vm6289_vm5, 1.0, %v570_v14 }
 0x119   : > { %1565 = vrot.lane.b32.xlu0 %v6370_v2, %s6144_s10  ;;  %1309 = vrot.lane.b32.xlu1 %v6389_v8, %s6143_s9  ;;  %1249 = vst.msk [vmem:[%s6299_s8 + $0x6c] sm:$0xf] %vm1221_vm6, %v6541_v12  ;;  %v661_v18 = vpack.c.bf16 %v642_v17, %v641_v7  ;;  %v6552_v20 = vpack.c.bf16 %v642_v17, %v642_v17  ;;  %v6008_v21 = vpop.f32.mrf.mxu0 }
 0x11a   : > { %v647_v23 = vsel %vm6289_vm5, 1.0, %v6008_v21 }
 0x11b   : > { %1247 = vst.msk [vmem:[%s6299_s8 + $0x64] sm:$0xf] %vm1221_vm6, %v6552_v20  ;;  %6044 = vmatprep.mubr.msk.bf16.mxu1 %vm701_vm7, %v661_v18  ;;  %v6560_v24 = vpack.c.bf16 %v647_v23, %v647_v23  ;;  %v583_v25 = vpop.f32.mrf.mxu0 }
 0x11c   : > { %6045 = vmatmul.mubr.msk.bf16.gmra.mxu1 %vm701_vm7, %v662_v15  ;;  %v645_v26 = vsel %vm6289_vm5, 1.0, %v583_v25 }
 0x11d   : > { %1823 = vrot.lane.b32.xlu0 %v6370_v2, %s6145_s11  ;;  %1567 = vrot.lane.b32.xlu1 %v6389_v8, %s6144_s10  ;;  %1252 = vst.msk [vmem:[%s6299_s8 + $0x78] sm:$0xf] %vm1221_vm6, %v6560_v24  ;;  %v6572_v28 = vpack.c.bf16 %v645_v26, %v645_v26  ;;  %v6009_v29 = vpop.f32.mrf.mxu0 }
 0x11e   : > { %v648_v31 = vsel %vm6289_vm5, 1.0, %v6009_v29 }
 0x11f   : > { %1250 = vst.msk [vmem:[%s6299_s8 + $0x70] sm:$0xf] %vm1221_vm6, %v6572_v28  ;;  %v6579_v32 = vpack.c.bf16 %v648_v31, %v648_v31  ;;  %v586_v34 = vpop.f32.mrf.mxu0  ;;  %v664_v36 = vpack.c.bf16 %v648_v31, %v647_v23 }
 0x120   : > { %v646_v39 = vsel %vm6289_vm5, 1.0, %v586_v34 }
 0x121   : > { %1303 = vrot.lane.b32.xlu0 %v6382_v5, %s6143_s9  ;;  %1825 = vrot.lane.b32.xlu1 %v6389_v8, %s6145_s11  ;;  %1253 = vst.msk [vmem:[%s6299_s8 + $0x7c] sm:$0xf] %vm1221_vm6, %v6579_v32  ;;  %v663_v40 = vpack.c.bf16 %v646_v39, %v645_v26  ;;  %v6590_v42 = vpack.c.bf16 %v646_v39, %v646_v39 }
 0x123   : > { %1251 = vst.msk [vmem:[%s6299_s8 + $0x74] sm:$0xf] %vm1221_vm6, %v6590_v42  ;;  %6048 = vmatprep.mubr.msk.bf16.mxu1 %vm701_vm7, %v663_v40 }
 0x124   : > { %6049 = vmatmul.mubr.msk.bf16.gmra.mxu1 %vm701_vm7, %v664_v36 }
 0x125   : > { %1561 = vrot.lane.b32.xlu0 %v6382_v5, %s6144_s10  ;;  %1305 = vrot.lane.b32.xlu1 %v6400_v13, %s6143_s9 }
 0x129   : > { %1819 = vrot.lane.b32.xlu0 %v6382_v5, %s6145_s11  ;;  %1563 = vrot.lane.b32.xlu1 %v6400_v13, %s6144_s10 }
 0x12d   : > { %1821 = vrot.lane.b32.xlu1 %v6400_v13, %s6145_s11  ;;  %1315 = vrot.lane.b32.xlu0 %v6408_v16, %s6143_s9 }
 0x131   : > { %1573 = vrot.lane.b32.xlu0 %v6408_v16, %s6144_s10  ;;  %1317 = vrot.lane.b32.xlu1 %v6427_v22, %s6143_s9 }
 0x135   : > { %1831 = vrot.lane.b32.xlu0 %v6408_v16, %s6145_s11  ;;  %1575 = vrot.lane.b32.xlu1 %v6427_v22, %s6144_s10 }
 0x139   : > { %1311 = vrot.lane.b32.xlu0 %v6420_v19, %s6143_s9  ;;  %1833 = vrot.lane.b32.xlu1 %v6427_v22, %s6145_s11 }
 0x13d   : > { %1569 = vrot.lane.b32.xlu0 %v6420_v19, %s6144_s10  ;;  %1313 = vrot.lane.b32.xlu1 %v6438_v27, %s6143_s9 }
 0x141   : > { %1827 = vrot.lane.b32.xlu0 %v6420_v19, %s6145_s11  ;;  %1571 = vrot.lane.b32.xlu1 %v6438_v27, %s6144_s10 }
 0x145   : > { %1829 = vrot.lane.b32.xlu1 %v6438_v27, %s6145_s11  ;;  %1323 = vrot.lane.b32.xlu0 %v6446_v30, %s6143_s9 }
 0x149   : > { %1581 = vrot.lane.b32.xlu0 %v6446_v30, %s6144_s10  ;;  %1325 = vrot.lane.b32.xlu1 %v6465_v37, %s6143_s9 }
 0x14d   : > { %1839 = vrot.lane.b32.xlu0 %v6446_v30, %s6145_s11  ;;  %1583 = vrot.lane.b32.xlu1 %v6465_v37, %s6144_s10 }
 0x151   : > { %1319 = vrot.lane.b32.xlu0 %v6458_v33, %s6143_s9  ;;  %1841 = vrot.lane.b32.xlu1 %v6465_v37, %s6145_s11 }
 0x155   : > { %1577 = vrot.lane.b32.xlu0 %v6458_v33, %s6144_s10  ;;  %1321 = vrot.lane.b32.xlu1 %v6476_v45, %s6143_s9 }
 0x157   : > { %v1292_v35 = vpop.permute.xlu0 %1291 }
 0x158   : > { %5441 = vst.msk [vmem:[%s6299_s8 + $0x88] sm:$0xf] %vm1221_vm6, %v1292_v35 }
 0x159   : > { %1835 = vrot.lane.b32.xlu0 %v6458_v33, %s6145_s11  ;;  %1579 = vrot.lane.b32.xlu1 %v6476_v45, %s6144_s10 }
 0x15b   : > { %v1550_v43 = vpop.permute.xlu0 %1549  ;;  %v1294_v46 = vpop.permute.xlu1 %1293 }
 0x15c   : > { %5505 = vst.msk [vmem:[%s6299_s8 + $0x108] sm:$0xf] %vm1221_vm6, %v1550_v43  ;;  %5442 = vst.msk [vmem:[%s6299_s8 + $0x8c] sm:$0xf] %vm1221_vm6, %v1294_v46 }
 0x15d   : > { %1837 = vrot.lane.b32.xlu1 %v6476_v45, %s6145_s11  ;;  %1331 = vrot.lane.b32.xlu0 %v6484_v49, %s6143_s9 }
 0x15f   : > { %v1808_v48 = vpop.permute.xlu0 %1807  ;;  %v1552_v50 = vpop.permute.xlu1 %1551 }
 0x160   : > { %5569 = vst.msk [vmem:[%s6299_s8 + $0x188] sm:$0xf] %vm1221_vm6, %v1808_v48  ;;  %5506 = vst.msk [vmem:[%s6299_s8 + $0x10c] sm:$0xf] %vm1221_vm6, %v1552_v50 }
 0x161   : > { %1589 = vrot.lane.b32.xlu0 %v6484_v49, %s6144_s10  ;;  %1333 = vrot.lane.b32.xlu1 %v6503_v57, %s6143_s9 }
 0x163   : > { %v1288_v51 = vpop.permute.xlu0 %1287  ;;  %v1810_v54 = vpop.permute.xlu1 %1809 }
 0x164   : > { %5439 = vst.msk [vmem:[%s6299_s8 + $0x80] sm:$0xf] %vm1221_vm6, %v1288_v51  ;;  %5570 = vst.msk [vmem:[%s6299_s8 + $0x18c] sm:$0xf] %vm1221_vm6, %v1810_v54 }
 0x165   : > { %1847 = vrot.lane.b32.xlu0 %v6484_v49, %s6145_s11  ;;  %1591 = vrot.lane.b32.xlu1 %v6503_v57, %s6144_s10 }
 0x167   : > { %v1546_v56 = vpop.permute.xlu0 %1545  ;;  %v1290_v59 = vpop.permute.xlu1 %1289 }
 0x168   : > { %5503 = vst.msk [vmem:[%s6299_s8 + $0x100] sm:$0xf] %vm1221_vm6, %v1546_v56  ;;  %5440 = vst.msk [vmem:[%s6299_s8 + $0x84] sm:$0xf] %vm1221_vm6, %v1290_v59 }
 0x169   : > { %1327 = vrot.lane.b32.xlu0 %v6496_v53, %s6143_s9  ;;  %1849 = vrot.lane.b32.xlu1 %v6503_v57, %s6145_s11 }
 0x16b   : > { %v1804_v60 = vpop.permute.xlu0 %1803  ;;  %v1548_v61 = vpop.permute.xlu1 %1547 }
 0x16c   : > { %5567 = vst.msk [vmem:[%s6299_s8 + $0x180] sm:$0xf] %vm1221_vm6, %v1804_v60  ;;  %5504 = vst.msk [vmem:[%s6299_s8 + $0x104] sm:$0xf] %vm1221_vm6, %v1548_v61 }
 0x16d   : > { %1585 = vrot.lane.b32.xlu0 %v6496_v53, %s6144_s10  ;;  %1329 = vrot.lane.b32.xlu1 %v6514_v0, %s6143_s9 }
 0x16f   : > { %v1806_v62 = vpop.permute.xlu1 %1805  ;;  %v1300_v1 = vpop.permute.xlu0 %1299 }
 0x170   : > { %5568 = vst.msk [vmem:[%s6299_s8 + $0x184] sm:$0xf] %vm1221_vm6, %v1806_v62  ;;  %5445 = vst.msk [vmem:[%s6299_s8 + $0x98] sm:$0xf] %vm1221_vm6, %v1300_v1 }
 0x171   : > { %1843 = vrot.lane.b32.xlu0 %v6496_v53, %s6145_s11  ;;  %1587 = vrot.lane.b32.xlu1 %v6514_v0, %s6144_s10 }
 0x173   : > { %v1558_v3 = vpop.permute.xlu0 %1557  ;;  %v1302_v6 = vpop.permute.xlu1 %1301 }
 0x174   : > { %5509 = vst.msk [vmem:[%s6299_s8 + $0x118] sm:$0xf] %vm1221_vm6, %v1558_v3  ;;  %5446 = vst.msk [vmem:[%s6299_s8 + $0x9c] sm:$0xf] %vm1221_vm6, %v1302_v6 }
 0x175   : > { %1845 = vrot.lane.b32.xlu1 %v6514_v0, %s6145_s11  ;;  %1339 = vrot.lane.b32.xlu0 %v6522_v4, %s6143_s9 }
 0x177   : > { %v1816_v7 = vpop.permute.xlu0 %1815  ;;  %v1560_v10 = vpop.permute.xlu1 %1559 }
 0x178   : > { %5573 = vst.msk [vmem:[%s6299_s8 + $0x198] sm:$0xf] %vm1221_vm6, %v1816_v7  ;;  %5510 = vst.msk [vmem:[%s6299_s8 + $0x11c] sm:$0xf] %vm1221_vm6, %v1560_v10 }
 0x179   : > { %1597 = vrot.lane.b32.xlu0 %v6522_v4, %s6144_s10  ;;  %1341 = vrot.lane.b32.xlu1 %v6541_v12, %s6143_s9 }
 0x17b   : > { %v1296_v11 = vpop.permute.xlu0 %1295  ;;  %v1818_v14 = vpop.permute.xlu1 %1817 }
 0x17c   : > { %5443 = vst.msk [vmem:[%s6299_s8 + $0x90] sm:$0xf] %vm1221_vm6, %v1296_v11  ;;  %5574 = vst.msk [vmem:[%s6299_s8 + $0x19c] sm:$0xf] %vm1221_vm6, %v1818_v14 }
 0x17d   : > { %1855 = vrot.lane.b32.xlu0 %v6522_v4, %s6145_s11  ;;  %1599 = vrot.lane.b32.xlu1 %v6541_v12, %s6144_s10 }
 0x17f   : > { %v1554_v15 = vpop.permute.xlu0 %1553  ;;  %v1298_v17 = vpop.permute.xlu1 %1297 }
 0x180   : > { %5507 = vst.msk [vmem:[%s6299_s8 + $0x110] sm:$0xf] %vm1221_vm6, %v1554_v15  ;;  %5444 = vst.msk [vmem:[%s6299_s8 + $0x94] sm:$0xf] %vm1221_vm6, %v1298_v17 }
 0x181   : > { %1335 = vrot.lane.b32.xlu0 %v6534_v9, %s6143_s9  ;;  %1857 = vrot.lane.b32.xlu1 %v6541_v12, %s6145_s11 }
 0x183   : > { %v1812_v18 = vpop.permute.xlu0 %1811  ;;  %v1556_v21 = vpop.permute.xlu1 %1555 }
 0x184   : > { %5571 = vst.msk [vmem:[%s6299_s8 + $0x190] sm:$0xf] %vm1221_vm6, %v1812_v18  ;;  %5508 = vst.msk [vmem:[%s6299_s8 + $0x114] sm:$0xf] %vm1221_vm6, %v1556_v21 }
 0x185   : > { %1593 = vrot.lane.b32.xlu0 %v6534_v9, %s6144_s10  ;;  %1337 = vrot.lane.b32.xlu1 %v6552_v20, %s6143_s9 }
 0x187   : > { %v1814_v23 = vpop.permute.xlu1 %1813  ;;  %v1308_v25 = vpop.permute.xlu0 %1307 }
 0x188   : > { %5572 = vst.msk [vmem:[%s6299_s8 + $0x194] sm:$0xf] %vm1221_vm6, %v1814_v23  ;;  %5449 = vst.msk [vmem:[%s6299_s8 + $0xa8] sm:$0xf] %vm1221_vm6, %v1308_v25 }
 0x189   : > { %1851 = vrot.lane.b32.xlu0 %v6534_v9, %s6145_s11  ;;  %1595 = vrot.lane.b32.xlu1 %v6552_v20, %s6144_s10 }
 0x18b   : > { %v1566_v26 = vpop.permute.xlu0 %1565  ;;  %v1310_v29 = vpop.permute.xlu1 %1309 }
 0x18c   : > { %5513 = vst.msk [vmem:[%s6299_s8 + $0x128] sm:$0xf] %vm1221_vm6, %v1566_v26  ;;  %5450 = vst.msk [vmem:[%s6299_s8 + $0xac] sm:$0xf] %vm1221_vm6, %v1310_v29 }
 0x18d   : > { %1853 = vrot.lane.b32.xlu1 %v6552_v20, %s6145_s11  ;;  %1347 = vrot.lane.b32.xlu0 %v6560_v24, %s6143_s9 }
 0x18f   : > { %v1824_v31 = vpop.permute.xlu0 %1823  ;;  %v1568_v34 = vpop.permute.xlu1 %1567 }
 0x190   : > { %5577 = vst.msk [vmem:[%s6299_s8 + $0x1a8] sm:$0xf] %vm1221_vm6, %v1824_v31  ;;  %5514 = vst.msk [vmem:[%s6299_s8 + $0x12c] sm:$0xf] %vm1221_vm6, %v1568_v34 }
 0x191   : > { %1605 = vrot.lane.b32.xlu0 %v6560_v24, %s6144_s10  ;;  %1349 = vrot.lane.b32.xlu1 %v6579_v32, %s6143_s9 }
 0x193   : > { %v1304_v36 = vpop.permute.xlu0 %1303  ;;  %v1826_v39 = vpop.permute.xlu1 %1825 }
 0x194   : > { %5447 = vst.msk [vmem:[%s6299_s8 + $0xa0] sm:$0xf] %vm1221_vm6, %v1304_v36  ;;  %5578 = vst.msk [vmem:[%s6299_s8 + $0x1ac] sm:$0xf] %vm1221_vm6, %v1826_v39 }
 0x195   : > { %1863 = vrot.lane.b32.xlu0 %v6560_v24, %s6145_s11  ;;  %1607 = vrot.lane.b32.xlu1 %v6579_v32, %s6144_s10 }
 0x197   : > { %v1562_v40 = vpop.permute.xlu0 %1561  ;;  %v1306_v35 = vpop.permute.xlu1 %1305 }
 0x198   : > { %5511 = vst.msk [vmem:[%s6299_s8 + $0x120] sm:$0xf] %vm1221_vm6, %v1562_v40  ;;  %5448 = vst.msk [vmem:[%s6299_s8 + $0xa4] sm:$0xf] %vm1221_vm6, %v1306_v35 }
 0x199   : > { %1343 = vrot.lane.b32.xlu0 %v6572_v28, %s6143_s9  ;;  %1865 = vrot.lane.b32.xlu1 %v6579_v32, %s6145_s11 }
 0x19b   : > { %v1820_v43 = vpop.permute.xlu0 %1819  ;;  %v1564_v46 = vpop.permute.xlu1 %1563 }
 0x19c   : > { %5575 = vst.msk [vmem:[%s6299_s8 + $0x1a0] sm:$0xf] %vm1221_vm6, %v1820_v43  ;;  %5512 = vst.msk [vmem:[%s6299_s8 + $0x124] sm:$0xf] %vm1221_vm6, %v1564_v46 }
 0x19d   : > { %1601 = vrot.lane.b32.xlu0 %v6572_v28, %s6144_s10  ;;  %1345 = vrot.lane.b32.xlu1 %v6590_v42, %s6143_s9  ;;  %s6155_s9 = smov 122  }
 0x19f   : > { %v1822_v48 = vpop.permute.xlu1 %1821  ;;  %v1316_v50 = vpop.permute.xlu0 %1315 }
 0x1a0   : > { %5576 = vst.msk [vmem:[%s6299_s8 + $0x1a4] sm:$0xf] %vm1221_vm6, %v1822_v48  ;;  %5453 = vst.msk [vmem:[%s6299_s8 + $0xb8] sm:$0xf] %vm1221_vm6, %v1316_v50 }
 0x1a1   : > { %1859 = vrot.lane.b32.xlu0 %v6572_v28, %s6145_s11  ;;  %1603 = vrot.lane.b32.xlu1 %v6590_v42, %s6144_s10  ;;  %s6156_s10 = smov 65  }
 0x1a3   : > { %v1574_v51 = vpop.permute.xlu0 %1573  ;;  %v1318_v54 = vpop.permute.xlu1 %1317 }
 0x1a4   : > { %5517 = vst.msk [vmem:[%s6299_s8 + $0x138] sm:$0xf] %vm1221_vm6, %v1574_v51  ;;  %5454 = vst.msk [vmem:[%s6299_s8 + $0xbc] sm:$0xf] %vm1221_vm6, %v1318_v54 }
 0x1a5   : > { %1861 = vrot.lane.b32.xlu1 %v6590_v42, %s6145_s11  ;;  %s6157_s11 = smov 121  }
 0x1a7   : > { %v1832_v56 = vpop.permute.xlu0 %1831  ;;  %v1576_v59 = vpop.permute.xlu1 %1575 }
 0x1a8   : > { %5581 = vst.msk [vmem:[%s6299_s8 + $0x1b8] sm:$0xf] %vm1221_vm6, %v1832_v56  ;;  %5518 = vst.msk [vmem:[%s6299_s8 + $0x13c] sm:$0xf] %vm1221_vm6, %v1576_v59 }
 0x1ab   : > { %v1312_v60 = vpop.permute.xlu0 %1311  ;;  %v1834_v61 = vpop.permute.xlu1 %1833 }
 0x1ac   : > { %5451 = vst.msk [vmem:[%s6299_s8 + $0xb0] sm:$0xf] %vm1221_vm6, %v1312_v60  ;;  %5582 = vst.msk [vmem:[%s6299_s8 + $0x1bc] sm:$0xf] %vm1221_vm6, %v1834_v61  ;;  %v6815_v62 = vpop.f32.mrf.mxu1 }
 0x1ad   : > { %1257 = vst.msk [vmem:[%s6817_s13 + $0x10] sm:$0xff] %vm1254_vm8, %v6815_v62  ;;  %1420 = vrot.lane.b32.xlu0 %v6815_v62, %s6146_s18  ;;  %951 = vrot.lane.b32.xlu1 %v6815_v62, %s6147_s14 }
 0x1ae   : > { %v6826_v1 = vpop.f32.mrf.mxu1 }
 0x1af   : > { %1255 = vst.msk [vmem:[%s6817_s13] sm:$0xff] %vm1254_vm8, %v6826_v1  ;;  %v1570_v3 = vpop.permute.xlu0 %1569  ;;  %v1314_v6 = vpop.permute.xlu1 %1313 }
 0x1b0   : > { %5515 = vst.msk [vmem:[%s6299_s8 + $0x130] sm:$0xf] %vm1221_vm6, %v1570_v3  ;;  %5452 = vst.msk [vmem:[%s6299_s8 + $0xb4] sm:$0xf] %vm1221_vm6, %v1314_v6  ;;  %v6835_v7 = vpop.f32.mrf.mxu1 }
 0x1b1   : > { %9532 = vst [vmem:[#allocation17_spill] sm:$0xff] %v6835_v7  ;;  %1258 = vst.msk [vmem:[%s6817_s13 + $0x18] sm:$0xff] %vm1254_vm8, %v6835_v7  ;;  %1678 = vrot.lane.b32.xlu0 %v6815_v62, %s6148_s15  ;;  %953 = vrot.lane.b32.xlu1 %v6835_v7, %s6147_s14 }
 0x1b2   : > { %v6844_v10 = vpop.f32.mrf.mxu1 }
 0x1b3   : > { %1256 = vst.msk [vmem:[%s6817_s13 + $0x8] sm:$0xff] %vm1254_vm8, %v6844_v10  ;;  %v1828_v11 = vpop.permute.xlu0 %1827  ;;  %v1572_v14 = vpop.permute.xlu1 %1571 }
 0x1b4   : > { %5579 = vst.msk [vmem:[%s6299_s8 + $0x1b0] sm:$0xf] %vm1221_vm6, %v1828_v11  ;;  %5516 = vst.msk [vmem:[%s6299_s8 + $0x134] sm:$0xf] %vm1221_vm6, %v1572_v14  ;;  %v6853_v15 = vpop.f32.mrf.mxu1 }
 0x1b5   : > { %9533 = vst [vmem:[#allocation18_spill] sm:$0xff] %v6853_v15  ;;  %1936 = vrot.lane.b32.xlu0 %v6815_v62, %s6149_s16  ;;  %1422 = vrot.lane.b32.xlu1 %v6835_v7, %s6146_s18  ;;  %1261 = vst.msk [vmem:[%s6817_s13 + $0x30] sm:$0xff] %vm1254_vm8, %v6853_v15 }
 0x1b6   : > { %v6862_v17 = vpop.f32.mrf.mxu1 }
 0x1b7   : > { %v1830_v18 = vpop.permute.xlu1 %1829  ;;  %v1324_v21 = vpop.permute.xlu0 %1323  ;;  %1259 = vst.msk [vmem:[%s6817_s13 + $0x20] sm:$0xff] %vm1254_vm8, %v6862_v17 }
 0x1b8   : > { %5580 = vst.msk [vmem:[%s6299_s8 + $0x1b4] sm:$0xf] %vm1221_vm6, %v1830_v18  ;;  %5457 = vst.msk [vmem:[%s6299_s8 + $0xc8] sm:$0xf] %vm1221_vm6, %v1324_v21  ;;  %v6871_v23 = vpop.f32.mrf.mxu1 }
 0x1b9   : > { %9534 = vst [vmem:[#allocation19_spill] sm:$0xff] %v6871_v23  ;;  %947 = vrot.lane.b32.xlu0 %v6826_v1, %s6147_s14  ;;  %1680 = vrot.lane.b32.xlu1 %v6835_v7, %s6148_s15  ;;  %1262 = vst.msk [vmem:[%s6817_s13 + $0x38] sm:$0xff] %vm1254_vm8, %v6871_v23 }
 0x1ba   : > { %v6880_v25 = vpop.f32.mrf.mxu1 }
 0x1bb   : > { %9535 = vst [vmem:[#allocation20_spill] sm:$0xff] %v6880_v25  ;;  %v1582_v26 = vpop.permute.xlu0 %1581  ;;  %v1326_v29 = vpop.permute.xlu1 %1325  ;;  %1260 = vst.msk [vmem:[%s6817_s13 + $0x28] sm:$0xff] %vm1254_vm8, %v6880_v25 }
 0x1bc   : > { %5521 = vst.msk [vmem:[%s6299_s8 + $0x148] sm:$0xf] %vm1221_vm6, %v1582_v26  ;;  %5458 = vst.msk [vmem:[%s6299_s8 + $0xcc] sm:$0xf] %vm1221_vm6, %v1326_v29  ;;  %v6889_v31 = vpop.f32.mrf.mxu1 }
 0x1bd   : > { %1416 = vrot.lane.b32.xlu0 %v6826_v1, %s6146_s18  ;;  %1938 = vrot.lane.b32.xlu1 %v6835_v7, %s6149_s16  ;;  %1265 = vst.msk [vmem:[%s6817_s13 + $0x50] sm:$0xff] %vm1254_vm8, %v6889_v31 }
 0x1be   : > { %v6898_v34 = vpop.f32.mrf.mxu1 }
 0x1bf   : > { %v1840_v36 = vpop.permute.xlu0 %1839  ;;  %v1584_v39 = vpop.permute.xlu1 %1583  ;;  %1263 = vst.msk [vmem:[%s6817_s13 + $0x40] sm:$0xff] %vm1254_vm8, %v6898_v34 }
 0x1c0   : > { %5585 = vst.msk [vmem:[%s6299_s8 + $0x1c8] sm:$0xf] %vm1221_vm6, %v1840_v36  ;;  %5522 = vst.msk [vmem:[%s6299_s8 + $0x14c] sm:$0xf] %vm1221_vm6, %v1584_v39  ;;  %v6907_v40 = vpop.f32.mrf.mxu1 }
 0x1c1   : > { %1674 = vrot.lane.b32.xlu0 %v6826_v1, %s6148_s15  ;;  %1418 = vrot.lane.b32.xlu1 %v6844_v10, %s6146_s18  ;;  %1266 = vst.msk [vmem:[%s6817_s13 + $0x58] sm:$0xff] %vm1254_vm8, %v6907_v40 }
 0x1c2   : > { %v6916_v35 = vpop.f32.mrf.mxu1 }
 0x1c3   : > { %v1320_v43 = vpop.permute.xlu0 %1319  ;;  %v1842_v46 = vpop.permute.xlu1 %1841  ;;  %1264 = vst.msk [vmem:[%s6817_s13 + $0x48] sm:$0xff] %vm1254_vm8, %v6916_v35 }
 0x1c4   : > { %5455 = vst.msk [vmem:[%s6299_s8 + $0xc0] sm:$0xf] %vm1221_vm6, %v1320_v43  ;;  %5586 = vst.msk [vmem:[%s6299_s8 + $0x1cc] sm:$0xf] %vm1221_vm6, %v1842_v46  ;;  %v6925_v48 = vpop.f32.mrf.mxu1 }
 0x1c5   : > { %9536 = vst [vmem:[#allocation21_spill] sm:$0xff] %v6925_v48  ;;  %1932 = vrot.lane.b32.xlu0 %v6826_v1, %s6149_s16  ;;  %1676 = vrot.lane.b32.xlu1 %v6844_v10, %s6148_s15  ;;  %1269 = vst.msk [vmem:[%s6817_s13 + $0x70] sm:$0xff] %vm1254_vm8, %v6925_v48 }
 0x1c6   : > { %v6934_v50 = vpop.f32.mrf.mxu1 }
 0x1c7   : > { %9537 = vst [vmem:[#allocation22_spill] sm:$0xff] %v6934_v50  ;;  %v1578_v51 = vpop.permute.xlu0 %1577  ;;  %v1322_v54 = vpop.permute.xlu1 %1321  ;;  %1267 = vst.msk [vmem:[%s6817_s13 + $0x60] sm:$0xff] %vm1254_vm8, %v6934_v50 }
 0x1c8   : > { %5519 = vst.msk [vmem:[%s6299_s8 + $0x140] sm:$0xf] %vm1221_vm6, %v1578_v51  ;;  %5456 = vst.msk [vmem:[%s6299_s8 + $0xc4] sm:$0xf] %vm1221_vm6, %v1322_v54  ;;  %v6943_v56 = vpop.f32.mrf.mxu1 }
 0x1c9   : > { %9538 = vst [vmem:[#allocation23_spill] sm:$0xff] %v6943_v56  ;;  %949 = vrot.lane.b32.xlu0 %v6844_v10, %s6147_s14  ;;  %1934 = vrot.lane.b32.xlu1 %v6844_v10, %s6149_s16  ;;  %1270 = vst.msk [vmem:[%s6817_s13 + $0x78] sm:$0xff] %vm1254_vm8, %v6943_v56 }
 0x1ca   : > { %v6952_v59 = vpop.f32.mrf.mxu1 }
 0x1cb   : > { %9539 = vst [vmem:[#allocation24_spill] sm:$0xff] %v6952_v59  ;;  %v1836_v60 = vpop.permute.xlu0 %1835  ;;  %v1580_v61 = vpop.permute.xlu1 %1579  ;;  %1268 = vst.msk [vmem:[%s6817_s13 + $0x68] sm:$0xff] %vm1254_vm8, %v6952_v59 }
 0x1cc   : > { %5583 = vst.msk [vmem:[%s6299_s8 + $0x1c0] sm:$0xf] %vm1221_vm6, %v1836_v60  ;;  %5520 = vst.msk [vmem:[%s6299_s8 + $0x144] sm:$0xf] %vm1221_vm6, %v1580_v61  ;;  %v6961_v3 = vpop.f32.mrf.mxu1 }
 0x1cd   : > { %9540 = vst [vmem:[#allocation25_spill] sm:$0xff] %v6961_v3  ;;  %959 = vrot.lane.b32.xlu0 %v6853_v15, %s6147_s14  ;;  %961 = vrot.lane.b32.xlu1 %v6871_v23, %s6147_s14  ;;  %1273 = vst.msk [vmem:[%s6817_s13 + $0x90] sm:$0xff] %vm1254_vm8, %v6961_v3 }
 0x1ce   : > { %v6970_v6 = vpop.f32.mrf.mxu1 }
 0x1cf   : > { %9541 = vst [vmem:[#allocation26_spill] sm:$0xff] %v6970_v6  ;;  %v1838_v11 = vpop.permute.xlu1 %1837  ;;  %v1332_v14 = vpop.permute.xlu0 %1331  ;;  %1271 = vst.msk [vmem:[%s6817_s13 + $0x80] sm:$0xff] %vm1254_vm8, %v6970_v6 }
 0x1d0   : > { %5584 = vst.msk [vmem:[%s6299_s8 + $0x1c4] sm:$0xf] %vm1221_vm6, %v1838_v11  ;;  %5461 = vst.msk [vmem:[%s6299_s8 + $0xd8] sm:$0xf] %vm1221_vm6, %v1332_v14  ;;  %v6979_v18 = vpop.f32.mrf.mxu1 }
 0x1d1   : > { %9542 = vst [vmem:[#allocation27_spill] sm:$0xff] %v6979_v18  ;;  %1428 = vrot.lane.b32.xlu0 %v6853_v15, %s6146_s18  ;;  %1430 = vrot.lane.b32.xlu1 %v6871_v23, %s6146_s18  ;;  %1274 = vst.msk [vmem:[%s6817_s13 + $0x98] sm:$0xff] %vm1254_vm8, %v6979_v18 }
 0x1d2   : > { %v6988_v21 = vpop.f32.mrf.mxu1 }
 0x1d3   : > { %9543 = vst [vmem:[#allocation28_spill] sm:$0xff] %v6988_v21  ;;  %v1590_v26 = vpop.permute.xlu0 %1589  ;;  %v1334_v29 = vpop.permute.xlu1 %1333  ;;  %1272 = vst.msk [vmem:[%s6817_s13 + $0x88] sm:$0xff] %vm1254_vm8, %v6988_v21 }
 0x1d4   : > { %5525 = vst.msk [vmem:[%s6299_s8 + $0x158] sm:$0xf] %vm1221_vm6, %v1590_v26  ;;  %5462 = vst.msk [vmem:[%s6299_s8 + $0xdc] sm:$0xf] %vm1221_vm6, %v1334_v29  ;;  %v6997_v36 = vpop.f32.mrf.mxu1 }
 0x1d5   : > { %9544 = vst [vmem:[#allocation29_spill] sm:$0xff] %v6997_v36  ;;  %1686 = vrot.lane.b32.xlu0 %v6853_v15, %s6148_s15  ;;  %1688 = vrot.lane.b32.xlu1 %v6871_v23, %s6148_s15  ;;  %1277 = vst.msk [vmem:[%s6817_s13 + $0xb0] sm:$0xff] %vm1254_vm8, %v6997_v36 }
 0x1d6   : > { %v7006_v39 = vpop.f32.mrf.mxu1 }
 0x1d7   : > { %9545 = vst [vmem:[#allocation30_spill] sm:$0xff] %v7006_v39  ;;  %v1848_v43 = vpop.permute.xlu0 %1847  ;;  %v1592_v46 = vpop.permute.xlu1 %1591  ;;  %1275 = vst.msk [vmem:[%s6817_s13 + $0xa0] sm:$0xff] %vm1254_vm8, %v7006_v39 }
 0x1d8   : > { %5589 = vst.msk [vmem:[%s6299_s8 + $0x1d8] sm:$0xf] %vm1221_vm6, %v1848_v43  ;;  %5526 = vst.msk [vmem:[%s6299_s8 + $0x15c] sm:$0xf] %vm1221_vm6, %v1592_v46  ;;  %v7015_v51 = vpop.f32.mrf.mxu1 }
 0x1d9   : > { %9546 = vst [vmem:[#allocation31_spill] sm:$0xff] %v7015_v51  ;;  %1944 = vrot.lane.b32.xlu0 %v6853_v15, %s6149_s16  ;;  %1946 = vrot.lane.b32.xlu1 %v6871_v23, %s6149_s16  ;;  %1278 = vst.msk [vmem:[%s6817_s13 + $0xb8] sm:$0xff] %vm1254_vm8, %v7015_v51 }
 0x1da   : > { %v7024_v54 = vpop.f32.mrf.mxu1 }
 0x1db   : > { %9547 = vst [vmem:[#allocation32_spill] sm:$0xff] %v7024_v54  ;;  %v1328_v60 = vpop.permute.xlu0 %1327  ;;  %v1850_v61 = vpop.permute.xlu1 %1849  ;;  %1276 = vst.msk [vmem:[%s6817_s13 + $0xa8] sm:$0xff] %vm1254_vm8, %v7024_v54 }
 0x1dc   : > { %5459 = vst.msk [vmem:[%s6299_s8 + $0xd0] sm:$0xf] %vm1221_vm6, %v1328_v60  ;;  %5590 = vst.msk [vmem:[%s6299_s8 + $0x1dc] sm:$0xf] %vm1221_vm6, %v1850_v61  ;;  %v7033_v11 = vpop.f32.mrf.mxu1 }
 0x1dd   : > { %9548 = vst [vmem:[#allocation33_spill] sm:$0xff] %v7033_v11  ;;  %955 = vrot.lane.b32.xlu0 %v6862_v17, %s6147_s14  ;;  %957 = vrot.lane.b32.xlu1 %v6880_v25, %s6147_s14  ;;  %1281 = vst.msk [vmem:[%s6817_s13 + $0xd0] sm:$0xff] %vm1254_vm8, %v7033_v11 }
 0x1de   : > { %v7042_v14 = vpop.f32.mrf.mxu1 }
 0x1df   : > { %9549 = vst [vmem:[#allocation34_spill] sm:$0xff] %v7042_v14  ;;  %v1586_v26 = vpop.permute.xlu0 %1585  ;;  %v1330_v29 = vpop.permute.xlu1 %1329  ;;  %1279 = vst.msk [vmem:[%s6817_s13 + $0xc0] sm:$0xff] %vm1254_vm8, %v7042_v14 }
 0x1e0   : > { %5523 = vst.msk [vmem:[%s6299_s8 + $0x150] sm:$0xf] %vm1221_vm6, %v1586_v26  ;;  %5460 = vst.msk [vmem:[%s6299_s8 + $0xd4] sm:$0xf] %vm1221_vm6, %v1330_v29  ;;  %v7051_v43 = vpop.f32.mrf.mxu1 }
 0x1e1   : > { %9550 = vst [vmem:[#allocation35_spill] sm:$0xff] %v7051_v43  ;;  %1424 = vrot.lane.b32.xlu0 %v6862_v17, %s6146_s18  ;;  %1426 = vrot.lane.b32.xlu1 %v6880_v25, %s6146_s18  ;;  %1282 = vst.msk [vmem:[%s6817_s13 + $0xd8] sm:$0xff] %vm1254_vm8, %v7051_v43 }
 0x1e2   : > { %v7060_v46 = vpop.f32.mrf.mxu1 }
 0x1e3   : > { %9551 = vst [vmem:[#allocation36_spill] sm:$0xff] %v7060_v46  ;;  %v1844_v60 = vpop.permute.xlu0 %1843  ;;  %v1588_v61 = vpop.permute.xlu1 %1587  ;;  %1280 = vst.msk [vmem:[%s6817_s13 + $0xc8] sm:$0xff] %vm1254_vm8, %v7060_v46 }
 0x1e4   : > { %5587 = vst.msk [vmem:[%s6299_s8 + $0x1d0] sm:$0xf] %vm1221_vm6, %v1844_v60  ;;  %5524 = vst.msk [vmem:[%s6299_s8 + $0x154] sm:$0xf] %vm1221_vm6, %v1588_v61  ;;  %v7069_v26 = vpop.f32.mrf.mxu1 }
 0x1e5   : > { %9552 = vst [vmem:[#allocation37_spill] sm:$0xff] %v7069_v26  ;;  %1682 = vrot.lane.b32.xlu0 %v6862_v17, %s6148_s15  ;;  %1684 = vrot.lane.b32.xlu1 %v6880_v25, %s6148_s15  ;;  %1285 = vst.msk [vmem:[%s6817_s13 + $0xf0] sm:$0xff] %vm1254_vm8, %v7069_v26 }
 0x1e6   : > { %v7078_v29 = vpop.f32.mrf.mxu1 }
 0x1e7   : > { %v1846_v23 = vpop.permute.xlu1 %1845  ;;  %v1340_v60 = vpop.permute.xlu0 %1339  ;;  %1283 = vst.msk [vmem:[%s6817_s13 + $0xe0] sm:$0xff] %vm1254_vm8, %v7078_v29 }
 0x1e8   : > { %5588 = vst.msk [vmem:[%s6299_s8 + $0x1d4] sm:$0xf] %vm1221_vm6, %v1846_v23  ;;  %5465 = vst.msk [vmem:[%s6299_s8 + $0xe8] sm:$0xf] %vm1221_vm6, %v1340_v60  ;;  %v7087_v61 = vpop.f32.mrf.mxu1 }
 0x1e9   : > { %9553 = vst [vmem:[#allocation38_spill] sm:$0xff] %v7087_v61  ;;  %1940 = vrot.lane.b32.xlu0 %v6862_v17, %s6149_s16  ;;  %1942 = vrot.lane.b32.xlu1 %v6880_v25, %s6149_s16  ;;  %1286 = vst.msk [vmem:[%s6817_s13 + $0xf8] sm:$0xff] %vm1254_vm8, %v7087_v61 }
 0x1ea   : > { %v7096_v15 = vpop.f32.mrf.mxu1 }
 0x1eb   : > { %v1598_v7 = vpop.permute.xlu0 %1597  ;;  %v1342_v23 = vpop.permute.xlu1 %1341  ;;  %1284 = vst.msk [vmem:[%s6817_s13 + $0xe8] sm:$0xff] %vm1254_vm8, %v7096_v15 }
 0x1ec   : > { %5529 = vst.msk [vmem:[%s6299_s8 + $0x168] sm:$0xf] %vm1221_vm6, %v1598_v7  ;;  %5466 = vst.msk [vmem:[%s6299_s8 + $0xec] sm:$0xf] %vm1221_vm6, %v1342_v23 }
 0x1ed   : > { %967 = vrot.lane.b32.xlu0 %v6889_v31, %s6147_s14  ;;  %969 = vrot.lane.b32.xlu1 %v6907_v40, %s6147_s14 }
 0x1ef   : > { %v1856_v60 = vpop.permute.xlu0 %1855  ;;  %v1600_v25 = vpop.permute.xlu1 %1599 }
 0x1f0   : > { %5593 = vst.msk [vmem:[%s6299_s8 + $0x1e8] sm:$0xf] %vm1221_vm6, %v1856_v60  ;;  %5530 = vst.msk [vmem:[%s6299_s8 + $0x16c] sm:$0xf] %vm1221_vm6, %v1600_v25 }
 0x1f1   : > { %1436 = vrot.lane.b32.xlu0 %v6889_v31, %s6146_s18  ;;  %1438 = vrot.lane.b32.xlu1 %v6907_v40, %s6146_s18 }
 0x1f3   : > { %v1336_v7 = vpop.permute.xlu0 %1335  ;;  %v1858_v23 = vpop.permute.xlu1 %1857 }
 0x1f4   : > { %5463 = vst.msk [vmem:[%s6299_s8 + $0xe0] sm:$0xf] %vm1221_vm6, %v1336_v7  ;;  %5594 = vst.msk [vmem:[%s6299_s8 + $0x1ec] sm:$0xf] %vm1221_vm6, %v1858_v23 }
 0x1f5   : > { %1694 = vrot.lane.b32.xlu0 %v6889_v31, %s6148_s15  ;;  %1696 = vrot.lane.b32.xlu1 %v6907_v40, %s6148_s15 }
 0x1f7   : > { %v1594_v25 = vpop.permute.xlu0 %1593  ;;  %v1338_v60 = vpop.permute.xlu1 %1337 }
 0x1f8   : > { %5527 = vst.msk [vmem:[%s6299_s8 + $0x160] sm:$0xf] %vm1221_vm6, %v1594_v25  ;;  %5464 = vst.msk [vmem:[%s6299_s8 + $0xe4] sm:$0xf] %vm1221_vm6, %v1338_v60 }
 0x1f9   : > { %1952 = vrot.lane.b32.xlu0 %v6889_v31, %s6149_s16  ;;  %1954 = vrot.lane.b32.xlu1 %v6907_v40, %s6149_s16 }
 0x1fb   : > { %v1852_v7 = vpop.permute.xlu0 %1851  ;;  %v1596_v23 = vpop.permute.xlu1 %1595 }
 0x1fc   : > { %5591 = vst.msk [vmem:[%s6299_s8 + $0x1e0] sm:$0xf] %vm1221_vm6, %v1852_v7  ;;  %5528 = vst.msk [vmem:[%s6299_s8 + $0x164] sm:$0xf] %vm1221_vm6, %v1596_v23 }
 0x1fd   : > { %963 = vrot.lane.b32.xlu0 %v6898_v34, %s6147_s14  ;;  %965 = vrot.lane.b32.xlu1 %v6916_v35, %s6147_s14 }
 0x1ff   : > { %v1854_v25 = vpop.permute.xlu1 %1853  ;;  %v1348_v60 = vpop.permute.xlu0 %1347 }
 0x200   : > { %5592 = vst.msk [vmem:[%s6299_s8 + $0x1e4] sm:$0xf] %vm1221_vm6, %v1854_v25  ;;  %5469 = vst.msk [vmem:[%s6299_s8 + $0xf8] sm:$0xf] %vm1221_vm6, %v1348_v60 }
 0x201   : > { %1432 = vrot.lane.b32.xlu0 %v6898_v34, %s6146_s18  ;;  %1434 = vrot.lane.b32.xlu1 %v6916_v35, %s6146_s18 }
 0x203   : > { %v1606_v7 = vpop.permute.xlu0 %1605  ;;  %v1350_v23 = vpop.permute.xlu1 %1349 }
 0x204   : > { %5533 = vst.msk [vmem:[%s6299_s8 + $0x178] sm:$0xf] %vm1221_vm6, %v1606_v7  ;;  %5470 = vst.msk [vmem:[%s6299_s8 + $0xfc] sm:$0xf] %vm1221_vm6, %v1350_v23 }
 0x205   : > { %1690 = vrot.lane.b32.xlu0 %v6898_v34, %s6148_s15  ;;  %1692 = vrot.lane.b32.xlu1 %v6916_v35, %s6148_s15 }
 0x207   : > { %v1864_v25 = vpop.permute.xlu0 %1863  ;;  %v1608_v60 = vpop.permute.xlu1 %1607 }
 0x208   : > { %5597 = vst.msk [vmem:[%s6299_s8 + $0x1f8] sm:$0xf] %vm1221_vm6, %v1864_v25  ;;  %5534 = vst.msk [vmem:[%s6299_s8 + $0x17c] sm:$0xf] %vm1221_vm6, %v1608_v60 }
 0x209   : > { %1948 = vrot.lane.b32.xlu0 %v6898_v34, %s6149_s16  ;;  %1950 = vrot.lane.b32.xlu1 %v6916_v35, %s6149_s16 }
 0x20b   : > { %v1344_v7 = vpop.permute.xlu0 %1343  ;;  %v1866_v23 = vpop.permute.xlu1 %1865 }
 0x20c   : > { %5467 = vst.msk [vmem:[%s6299_s8 + $0xf0] sm:$0xf] %vm1221_vm6, %v1344_v7  ;;  %5598 = vst.msk [vmem:[%s6299_s8 + $0x1fc] sm:$0xf] %vm1221_vm6, %v1866_v23 }
 0x20d   : > { %975 = vrot.lane.b32.xlu0 %v6925_v48, %s6147_s14  ;;  %977 = vrot.lane.b32.xlu1 %v6943_v56, %s6147_s14 }
 0x20f   : > { %v1602_v25 = vpop.permute.xlu0 %1601  ;;  %v1346_v60 = vpop.permute.xlu1 %1345 }
 0x210   : > { %5531 = vst.msk [vmem:[%s6299_s8 + $0x170] sm:$0xf] %vm1221_vm6, %v1602_v25  ;;  %5468 = vst.msk [vmem:[%s6299_s8 + $0xf4] sm:$0xf] %vm1221_vm6, %v1346_v60 }
 0x211   : > { %1444 = vrot.lane.b32.xlu0 %v6925_v48, %s6146_s18  ;;  %1446 = vrot.lane.b32.xlu1 %v6943_v56, %s6146_s18 }
 0x213   : > { %v1860_v7 = vpop.permute.xlu0 %1859  ;;  %v1604_v23 = vpop.permute.xlu1 %1603 }
 0x214   : > { %5595 = vst.msk [vmem:[%s6299_s8 + $0x1f0] sm:$0xf] %vm1221_vm6, %v1860_v7  ;;  %5532 = vst.msk [vmem:[%s6299_s8 + $0x174] sm:$0xf] %vm1221_vm6, %v1604_v23 }
 0x215   : > { %1702 = vrot.lane.b32.xlu0 %v6925_v48, %s6148_s15  ;;  %1704 = vrot.lane.b32.xlu1 %v6943_v56, %s6148_s15 }
 0x217   : > { %v1862_v25 = vpop.permute.xlu1 %1861 }
 0x218   : > { %5596 = vst.msk [vmem:[%s6299_s8 + $0x1f4] sm:$0xf] %vm1221_vm6, %v1862_v25 }
 0x219   : > { %1960 = vrot.lane.b32.xlu0 %v6925_v48, %s6149_s16  ;;  %1962 = vrot.lane.b32.xlu1 %v6943_v56, %s6149_s16 }
 0x21d   : > { %971 = vrot.lane.b32.xlu0 %v6934_v50, %s6147_s14  ;;  %973 = vrot.lane.b32.xlu1 %v6952_v59, %s6147_s14 }
 0x21f   : > { %v1421_v60 = vpop.permute.xlu0 %1420  ;;  %v7199_v7 = vpop.permute.xlu1 %951 }
 0x220   : > { %5473 = vst.msk [vmem:[%s6817_s13 + $0x110] sm:$0xff] %vm1254_vm8, %v1421_v60 }
 0x221   : > { %1440 = vrot.lane.b32.xlu0 %v6934_v50, %s6146_s18  ;;  %1442 = vrot.lane.b32.xlu1 %v6952_v59, %s6146_s18 }
 0x223   : > { %v1679_v23 = vpop.permute.xlu0 %1678  ;;  %v7207_v25 = vpop.permute.xlu1 %953 }
 0x224   : > { %5537 = vst.msk [vmem:[%s6817_s13 + $0x210] sm:$0xff] %vm1254_vm8, %v1679_v23 }
 0x225   : > { %1698 = vrot.lane.b32.xlu0 %v6934_v50, %s6148_s15  ;;  %1700 = vrot.lane.b32.xlu1 %v6952_v59, %s6148_s15 }
 0x227   : > { %v1937_v60 = vpop.permute.xlu0 %1936  ;;  %v1423_v56 = vpop.permute.xlu1 %1422 }
 0x228   : > { %5601 = vst.msk [vmem:[%s6817_s13 + $0x310] sm:$0xff] %vm1254_vm8, %v1937_v60  ;;  %5474 = vst.msk [vmem:[%s6817_s13 + $0x118] sm:$0xff] %vm1254_vm8, %v1423_v56 }
 0x229   : > { %1956 = vrot.lane.b32.xlu0 %v6934_v50, %s6149_s16  ;;  %1958 = vrot.lane.b32.xlu1 %v6952_v59, %s6149_s16 }
 0x22b   : > { %v7223_v23 = vpop.permute.xlu0 %947  ;;  %v1681_v48 = vpop.permute.xlu1 %1680 }
 0x22c   : > { %5538 = vst.msk [vmem:[%s6817_s13 + $0x218] sm:$0xff] %vm1254_vm8, %v1681_v48 }
 0x22d   : > { %983 = vrot.lane.b32.xlu0 %v6961_v3, %s6147_s14  ;;  %985 = vrot.lane.b32.xlu1 %v6979_v18, %s6147_s14 }
 0x22f   : > { %v1417_v56 = vpop.permute.xlu0 %1416  ;;  %v1939_v60 = vpop.permute.xlu1 %1938 }
 0x230   : > { %5471 = vst.msk [vmem:[%s6817_s13 + $0x100] sm:$0xff] %vm1254_vm8, %v1417_v56  ;;  %5602 = vst.msk [vmem:[%s6817_s13 + $0x318] sm:$0xff] %vm1254_vm8, %v1939_v60 }
 0x231   : > { %1452 = vrot.lane.b32.xlu0 %v6961_v3, %s6146_s18  ;;  %1454 = vrot.lane.b32.xlu1 %v6979_v18, %s6146_s18 }
 0x233   : > { %v1675_v48 = vpop.permute.xlu0 %1674  ;;  %v1419_v59 = vpop.permute.xlu1 %1418 }
 0x234   : > { %5535 = vst.msk [vmem:[%s6817_s13 + $0x200] sm:$0xff] %vm1254_vm8, %v1675_v48  ;;  %5472 = vst.msk [vmem:[%s6817_s13 + $0x108] sm:$0xff] %vm1254_vm8, %v1419_v59 }
 0x235   : > { %1710 = vrot.lane.b32.xlu0 %v6961_v3, %s6148_s15  ;;  %1712 = vrot.lane.b32.xlu1 %v6979_v18, %s6148_s15 }
 0x237   : > { %v1933_v56 = vpop.permute.xlu0 %1932  ;;  %v1677_v60 = vpop.permute.xlu1 %1676 }
 0x238   : > { %5599 = vst.msk [vmem:[%s6817_s13 + $0x300] sm:$0xff] %vm1254_vm8, %v1933_v56  ;;  %5536 = vst.msk [vmem:[%s6817_s13 + $0x208] sm:$0xff] %vm1254_vm8, %v1677_v60 }
 0x239   : > { %1968 = vrot.lane.b32.xlu0 %v6961_v3, %s6149_s16  ;;  %1970 = vrot.lane.b32.xlu1 %v6979_v18, %s6149_s16 }
 0x23b   : > { %v7255_v59 = vpop.permute.xlu0 %949  ;;  %v1935_v48 = vpop.permute.xlu1 %1934 }
 0x23c   : > { %5600 = vst.msk [vmem:[%s6817_s13 + $0x308] sm:$0xff] %vm1254_vm8, %v1935_v48 }
 0x23d   : > { %979 = vrot.lane.b32.xlu0 %v6970_v6, %s6147_s14  ;;  %981 = vrot.lane.b32.xlu1 %v6988_v21, %s6147_s14 }
 0x23f   : > { %v7263_v56 = vpop.permute.xlu0 %959  ;;  %v7265_v60 = vpop.permute.xlu1 %961 }
 0x241   : > { %1448 = vrot.lane.b32.xlu0 %v6970_v6, %s6146_s18  ;;  %1450 = vrot.lane.b32.xlu1 %v6988_v21, %s6146_s18 }
 0x243   : > { %v1429_v48 = vpop.permute.xlu0 %1428  ;;  %v1431_v18 = vpop.permute.xlu1 %1430 }
 0x244   : > { %5477 = vst.msk [vmem:[%s6817_s13 + $0x130] sm:$0xff] %vm1254_vm8, %v1429_v48  ;;  %5478 = vst.msk [vmem:[%s6817_s13 + $0x138] sm:$0xff] %vm1254_vm8, %v1431_v18 }
 0x245   : > { %1706 = vrot.lane.b32.xlu0 %v6970_v6, %s6148_s15  ;;  %1708 = vrot.lane.b32.xlu1 %v6988_v21, %s6148_s15 }
 0x247   : > { %v1687_v3 = vpop.permute.xlu0 %1686  ;;  %v1689_v50 = vpop.permute.xlu1 %1688 }
 0x248   : > { %5541 = vst.msk [vmem:[%s6817_s13 + $0x230] sm:$0xff] %vm1254_vm8, %v1687_v3  ;;  %5542 = vst.msk [vmem:[%s6817_s13 + $0x238] sm:$0xff] %vm1254_vm8, %v1689_v50 }
 0x249   : > { %1964 = vrot.lane.b32.xlu0 %v6970_v6, %s6149_s16  ;;  %1966 = vrot.lane.b32.xlu1 %v6988_v21, %s6149_s16 }
 0x24b   : > { %v1945_v18 = vpop.permute.xlu0 %1944  ;;  %v1947_v48 = vpop.permute.xlu1 %1946 }
 0x24c   : > { %5605 = vst.msk [vmem:[%s6817_s13 + $0x330] sm:$0xff] %vm1254_vm8, %v1945_v18  ;;  %5606 = vst.msk [vmem:[%s6817_s13 + $0x338] sm:$0xff] %vm1254_vm8, %v1947_v48 }
 0x24d   : > { %991 = vrot.lane.b32.xlu0 %v6997_v36, %s6147_s14  ;;  %993 = vrot.lane.b32.xlu1 %v7015_v51, %s6147_s14 }
 0x24f   : > { %v7295_v50 = vpop.permute.xlu0 %955  ;;  %v7297_v3 = vpop.permute.xlu1 %957 }
 0x251   : > { %1460 = vrot.lane.b32.xlu0 %v6997_v36, %s6146_s18  ;;  %1462 = vrot.lane.b32.xlu1 %v7015_v51, %s6146_s18 }
 0x253   : > { %v1425_v18 = vpop.permute.xlu0 %1424  ;;  %v1427_v48 = vpop.permute.xlu1 %1426 }
 0x254   : > { %5475 = vst.msk [vmem:[%s6817_s13 + $0x120] sm:$0xff] %vm1254_vm8, %v1425_v18  ;;  %5476 = vst.msk [vmem:[%s6817_s13 + $0x128] sm:$0xff] %vm1254_vm8, %v1427_v48 }
 0x255   : > { %1718 = vrot.lane.b32.xlu0 %v6997_v36, %s6148_s15  ;;  %1720 = vrot.lane.b32.xlu1 %v7015_v51, %s6148_s15 }
 0x257   : > { %v1683_v21 = vpop.permute.xlu0 %1682  ;;  %v1685_v6 = vpop.permute.xlu1 %1684 }
 0x258   : > { %5539 = vst.msk [vmem:[%s6817_s13 + $0x220] sm:$0xff] %vm1254_vm8, %v1683_v21  ;;  %5540 = vst.msk [vmem:[%s6817_s13 + $0x228] sm:$0xff] %vm1254_vm8, %v1685_v6 }
 0x259   : > { %1976 = vrot.lane.b32.xlu0 %v6997_v36, %s6149_s16  ;;  %1978 = vrot.lane.b32.xlu1 %v7015_v51, %s6149_s16 }
 0x25b   : > { %v1941_v18 = vpop.permute.xlu0 %1940  ;;  %v1943_v48 = vpop.permute.xlu1 %1942 }
 0x25c   : > { %5603 = vst.msk [vmem:[%s6817_s13 + $0x320] sm:$0xff] %vm1254_vm8, %v1941_v18  ;;  %5604 = vst.msk [vmem:[%s6817_s13 + $0x328] sm:$0xff] %vm1254_vm8, %v1943_v48 }
 0x25d   : > { %987 = vrot.lane.b32.xlu0 %v7006_v39, %s6147_s14  ;;  %989 = vrot.lane.b32.xlu1 %v7024_v54, %s6147_s14 }
 0x25f   : > { %v7327_v6 = vpop.permute.xlu0 %967  ;;  %v7329_v21 = vpop.permute.xlu1 %969 }
 0x261   : > { %1456 = vrot.lane.b32.xlu0 %v7006_v39, %s6146_s18  ;;  %1458 = vrot.lane.b32.xlu1 %v7024_v54, %s6146_s18 }
 0x263   : > { %v1437_v18 = vpop.permute.xlu0 %1436  ;;  %v1439_v48 = vpop.permute.xlu1 %1438 }
 0x264   : > { %5481 = vst.msk [vmem:[%s6817_s13 + $0x150] sm:$0xff] %vm1254_vm8, %v1437_v18  ;;  %5482 = vst.msk [vmem:[%s6817_s13 + $0x158] sm:$0xff] %vm1254_vm8, %v1439_v48 }
 0x265   : > { %1714 = vrot.lane.b32.xlu0 %v7006_v39, %s6148_s15  ;;  %1716 = vrot.lane.b32.xlu1 %v7024_v54, %s6148_s15 }
 0x267   : > { %v1695_v51 = vpop.permute.xlu0 %1694  ;;  %v1697_v36 = vpop.permute.xlu1 %1696 }
 0x268   : > { %5545 = vst.msk [vmem:[%s6817_s13 + $0x250] sm:$0xff] %vm1254_vm8, %v1695_v51  ;;  %5546 = vst.msk [vmem:[%s6817_s13 + $0x258] sm:$0xff] %vm1254_vm8, %v1697_v36 }
 0x269   : > { %1972 = vrot.lane.b32.xlu0 %v7006_v39, %s6149_s16  ;;  %1974 = vrot.lane.b32.xlu1 %v7024_v54, %s6149_s16 }
 0x26b   : > { %v1953_v18 = vpop.permute.xlu0 %1952  ;;  %v1955_v48 = vpop.permute.xlu1 %1954 }
 0x26c   : > { %5609 = vst.msk [vmem:[%s6817_s13 + $0x350] sm:$0xff] %vm1254_vm8, %v1953_v18  ;;  %5610 = vst.msk [vmem:[%s6817_s13 + $0x358] sm:$0xff] %vm1254_vm8, %v1955_v48 }
 0x26d   : > { %999 = vrot.lane.b32.xlu0 %v7033_v11, %s6147_s14  ;;  %1001 = vrot.lane.b32.xlu1 %v7051_v43, %s6147_s14 }
 0x26f   : > { %v7359_v36 = vpop.permute.xlu0 %963  ;;  %v7361_v51 = vpop.permute.xlu1 %965 }
 0x271   : > { %1468 = vrot.lane.b32.xlu0 %v7033_v11, %s6146_s18  ;;  %1470 = vrot.lane.b32.xlu1 %v7051_v43, %s6146_s18 }
 0x273   : > { %v1433_v18 = vpop.permute.xlu0 %1432  ;;  %v1435_v48 = vpop.permute.xlu1 %1434 }
 0x274   : > { %5479 = vst.msk [vmem:[%s6817_s13 + $0x140] sm:$0xff] %vm1254_vm8, %v1433_v18  ;;  %5480 = vst.msk [vmem:[%s6817_s13 + $0x148] sm:$0xff] %vm1254_vm8, %v1435_v48 }
 0x275   : > { %1726 = vrot.lane.b32.xlu0 %v7033_v11, %s6148_s15  ;;  %1728 = vrot.lane.b32.xlu1 %v7051_v43, %s6148_s15 }
 0x277   : > { %v1691_v54 = vpop.permute.xlu0 %1690  ;;  %v1693_v39 = vpop.permute.xlu1 %1692 }
 0x278   : > { %5543 = vst.msk [vmem:[%s6817_s13 + $0x240] sm:$0xff] %vm1254_vm8, %v1691_v54  ;;  %5544 = vst.msk [vmem:[%s6817_s13 + $0x248] sm:$0xff] %vm1254_vm8, %v1693_v39 }
 0x279   : > { %1984 = vrot.lane.b32.xlu0 %v7033_v11, %s6149_s16  ;;  %1986 = vrot.lane.b32.xlu1 %v7051_v43, %s6149_s16 }
 0x27b   : > { %v1949_v18 = vpop.permute.xlu0 %1948  ;;  %v1951_v48 = vpop.permute.xlu1 %1950 }
 0x27c   : > { %5607 = vst.msk [vmem:[%s6817_s13 + $0x340] sm:$0xff] %vm1254_vm8, %v1949_v18  ;;  %5608 = vst.msk [vmem:[%s6817_s13 + $0x348] sm:$0xff] %vm1254_vm8, %v1951_v48 }
 0x27d   : > { %995 = vrot.lane.b32.xlu0 %v7042_v14, %s6147_s14  ;;  %997 = vrot.lane.b32.xlu1 %v7060_v46, %s6147_s14 }
 0x27f   : > { %v7391_v39 = vpop.permute.xlu0 %975  ;;  %v7393_v54 = vpop.permute.xlu1 %977 }
 0x281   : > { %1464 = vrot.lane.b32.xlu0 %v7042_v14, %s6146_s18  ;;  %1466 = vrot.lane.b32.xlu1 %v7060_v46, %s6146_s18 }
 0x283   : > { %v1445_v18 = vpop.permute.xlu0 %1444  ;;  %v1447_v48 = vpop.permute.xlu1 %1446 }
 0x284   : > { %5485 = vst.msk [vmem:[%s6817_s13 + $0x170] sm:$0xff] %vm1254_vm8, %v1445_v18  ;;  %5486 = vst.msk [vmem:[%s6817_s13 + $0x178] sm:$0xff] %vm1254_vm8, %v1447_v48 }
 0x285   : > { %1722 = vrot.lane.b32.xlu0 %v7042_v14, %s6148_s15  ;;  %1724 = vrot.lane.b32.xlu1 %v7060_v46, %s6148_s15 }
 0x287   : > { %v1703_v43 = vpop.permute.xlu0 %1702  ;;  %v1705_v11 = vpop.permute.xlu1 %1704 }
 0x288   : > { %5549 = vst.msk [vmem:[%s6817_s13 + $0x270] sm:$0xff] %vm1254_vm8, %v1703_v43  ;;  %5550 = vst.msk [vmem:[%s6817_s13 + $0x278] sm:$0xff] %vm1254_vm8, %v1705_v11 }
 0x289   : > { %1980 = vrot.lane.b32.xlu0 %v7042_v14, %s6149_s16  ;;  %1982 = vrot.lane.b32.xlu1 %v7060_v46, %s6149_s16 }
 0x28b   : > { %v1961_v18 = vpop.permute.xlu0 %1960  ;;  %v1963_v48 = vpop.permute.xlu1 %1962 }
 0x28c   : > { %5613 = vst.msk [vmem:[%s6817_s13 + $0x370] sm:$0xff] %vm1254_vm8, %v1961_v18  ;;  %5614 = vst.msk [vmem:[%s6817_s13 + $0x378] sm:$0xff] %vm1254_vm8, %v1963_v48 }
 0x28d   : > { %2063 = vrot.lane.b32.xlu1 %v6320_v47, %s6150_s17  ;;  %1007 = vrot.lane.b32.xlu0 %v7069_v26, %s6147_s14 }
 0x28f   : > { %v7423_v11 = vpop.permute.xlu0 %971  ;;  %v7425_v43 = vpop.permute.xlu1 %973 }
 0x291   : > { %1476 = vrot.lane.b32.xlu0 %v7069_v26, %s6146_s18  ;;  %1009 = vrot.lane.b32.xlu1 %v7087_v61, %s6147_s14 }
 0x293   : > { %v1441_v18 = vpop.permute.xlu0 %1440  ;;  %v1443_v48 = vpop.permute.xlu1 %1442 }
 0x294   : > { %5483 = vst.msk [vmem:[%s6817_s13 + $0x160] sm:$0xff] %vm1254_vm8, %v1441_v18  ;;  %5484 = vst.msk [vmem:[%s6817_s13 + $0x168] sm:$0xff] %vm1254_vm8, %v1443_v48 }
 0x295   : > { %1734 = vrot.lane.b32.xlu0 %v7069_v26, %s6148_s15  ;;  %1478 = vrot.lane.b32.xlu1 %v7087_v61, %s6146_s18 }
 0x297   : > { %v1699_v47 = vpop.permute.xlu0 %1698  ;;  %v1701_v46 = vpop.permute.xlu1 %1700 }
 0x298   : > { %5547 = vst.msk [vmem:[%s6817_s13 + $0x260] sm:$0xff] %vm1254_vm8, %v1699_v47  ;;  %5548 = vst.msk [vmem:[%s6817_s13 + $0x268] sm:$0xff] %vm1254_vm8, %v1701_v46 }
 0x299   : > { %1003 = vrot.lane.b32.xlu0 %v7078_v29, %s6147_s14  ;;  %1736 = vrot.lane.b32.xlu1 %v7087_v61, %s6148_s15 }
 0x29b   : > { %v1957_v18 = vpop.permute.xlu0 %1956  ;;  %v1959_v48 = vpop.permute.xlu1 %1958 }
 0x29c   : > { %5611 = vst.msk [vmem:[%s6817_s13 + $0x360] sm:$0xff] %vm1254_vm8, %v1957_v18  ;;  %5612 = vst.msk [vmem:[%s6817_s13 + $0x368] sm:$0xff] %vm1254_vm8, %v1959_v48 }
 0x29d   : > { %1472 = vrot.lane.b32.xlu0 %v7078_v29, %s6146_s18  ;;  %1994 = vrot.lane.b32.xlu1 %v7087_v61, %s6149_s16 }
 0x29f   : > { %v7455_v47 = vpop.permute.xlu0 %983  ;;  %v7457_v46 = vpop.permute.xlu1 %985 }
 0x2a1   : > { %1730 = vrot.lane.b32.xlu0 %v7078_v29, %s6148_s15  ;;  %1005 = vrot.lane.b32.xlu1 %v7096_v15, %s6147_s14 }
 0x2a3   : > { %v1453_v18 = vpop.permute.xlu0 %1452  ;;  %v1455_v48 = vpop.permute.xlu1 %1454 }
 0x2a4   : > { %5489 = vst.msk [vmem:[%s6817_s13 + $0x190] sm:$0xff] %vm1254_vm8, %v1453_v18  ;;  %5490 = vst.msk [vmem:[%s6817_s13 + $0x198] sm:$0xff] %vm1254_vm8, %v1455_v48 }
 0x2a5   : > { %1988 = vrot.lane.b32.xlu0 %v7078_v29, %s6149_s16  ;;  %1474 = vrot.lane.b32.xlu1 %v7096_v15, %s6146_s18 }
 0x2a7   : > { %v1711_v61 = vpop.permute.xlu0 %1710  ;;  %v1713_v14 = vpop.permute.xlu1 %1712 }
 0x2a8   : > { %5553 = vst.msk [vmem:[%s6817_s13 + $0x290] sm:$0xff] %vm1254_vm8, %v1711_v61  ;;  %5554 = vst.msk [vmem:[%s6817_s13 + $0x298] sm:$0xff] %vm1254_vm8, %v1713_v14 }
 0x2a9   : > { %1992 = vrot.lane.b32.xlu0 %v7069_v26, %s6149_s16  ;;  %1732 = vrot.lane.b32.xlu1 %v7096_v15, %s6148_s15  ;;  %s8658_s15 = scalar_lea.vmem (%p6213_p4), %s9446_s3, %s5927_s12 }
 0x2ab   : > { %v1969_v18 = vpop.permute.xlu0 %1968  ;;  %v1971_v48 = vpop.permute.xlu1 %1970 }
 0x2ac   : > { %5617 = vst.msk [vmem:[%s6817_s13 + $0x390] sm:$0xff] %vm1254_vm8, %v1969_v18  ;;  %5618 = vst.msk [vmem:[%s6817_s13 + $0x398] sm:$0xff] %vm1254_vm8, %v1971_v48 }
 0x2ad   : > { %2061 = vrot.lane.b32.xlu0 %v6304_v41, %s6150_s17  ;;  %1990 = vrot.lane.b32.xlu1 %v7096_v15, %s6149_s16 }
 0x2af   : > { %v7487_v14 = vpop.permute.xlu0 %979  ;;  %v7489_v61 = vpop.permute.xlu1 %981 }
 0x2b1   : > { %2065 = vrot.lane.b32.xlu0 %v6295_v38, %s6150_s17  ;;  %2067 = vrot.lane.b32.xlu1 %v6313_v44, %s6150_s17 }
 0x2b3   : > { %v1449_v18 = vpop.permute.xlu0 %1448  ;;  %v1451_v48 = vpop.permute.xlu1 %1450 }
 0x2b4   : > { %5487 = vst.msk [vmem:[%s6817_s13 + $0x180] sm:$0xff] %vm1254_vm8, %v1449_v18  ;;  %5488 = vst.msk [vmem:[%s6817_s13 + $0x188] sm:$0xff] %vm1254_vm8, %v1451_v48 }
 0x2b5   : > { %2069 = vrot.lane.b32.xlu0 %v6344_v55, %s6150_s17  ;;  %2071 = vrot.lane.b32.xlu1 %v6362_v63, %s6150_s17 }
 0x2b7   : > { %v1707_v41 = vpop.permute.xlu0 %1706  ;;  %v1709_v26 = vpop.permute.xlu1 %1708 }
 0x2b8   : > { %5551 = vst.msk [vmem:[%s6817_s13 + $0x280] sm:$0xff] %vm1254_vm8, %v1707_v41  ;;  %5552 = vst.msk [vmem:[%s6817_s13 + $0x288] sm:$0xff] %vm1254_vm8, %v1709_v26 }
 0x2b9   : > { %2073 = vrot.lane.b32.xlu0 %v6332_v52, %s6150_s17  ;;  %2075 = vrot.lane.b32.xlu1 %v6351_v58, %s6150_s17 }
 0x2bb   : > { %v1965_v18 = vpop.permute.xlu0 %1964  ;;  %v1967_v48 = vpop.permute.xlu1 %1966 }
 0x2bc   : > { %5615 = vst.msk [vmem:[%s6817_s13 + $0x380] sm:$0xff] %vm1254_vm8, %v1965_v18  ;;  %5616 = vst.msk [vmem:[%s6817_s13 + $0x388] sm:$0xff] %vm1254_vm8, %v1967_v48 }
 0x2bd   : > { %2077 = vrot.lane.b32.xlu0 %v6382_v5, %s6150_s17  ;;  %2079 = vrot.lane.b32.xlu1 %v6400_v13, %s6150_s17 }
 0x2bf   : > { %v7519_v41 = vpop.permute.xlu0 %991  ;;  %v7521_v26 = vpop.permute.xlu1 %993 }
 0x2c1   : > { %2083 = vrot.lane.b32.xlu1 %v6389_v8, %s6150_s17 }
 0x2c3   : > { %v1461_v58 = vpop.permute.xlu0 %1460  ;;  %v1463_v52 = vpop.permute.xlu1 %1462 }
 0x2c4   : > { %5493 = vst.msk [vmem:[%s6817_s13 + $0x1b0] sm:$0xff] %vm1254_vm8, %v1461_v58  ;;  %5494 = vst.msk [vmem:[%s6817_s13 + $0x1b8] sm:$0xff] %vm1254_vm8, %v1463_v52 }
 0x2c5   : > { %2087 = vrot.lane.b32.xlu1 %v6438_v27, %s6150_s17 }
 0x2c7   : > { %v1719_v18 = vpop.permute.xlu0 %1718  ;;  %v1721_v48 = vpop.permute.xlu1 %1720 }
 0x2c8   : > { %5557 = vst.msk [vmem:[%s6817_s13 + $0x2b0] sm:$0xff] %vm1254_vm8, %v1719_v18  ;;  %5558 = vst.msk [vmem:[%s6817_s13 + $0x2b8] sm:$0xff] %vm1254_vm8, %v1721_v48 }
 0x2c9   : > { %2091 = vrot.lane.b32.xlu1 %v6427_v22, %s6150_s17 }
 0x2cb   : > { %v1977_v8 = vpop.permute.xlu0 %1976  ;;  %v1979_v58 = vpop.permute.xlu1 %1978 }
 0x2cc   : > { %5621 = vst.msk [vmem:[%s6817_s13 + $0x3b0] sm:$0xff] %vm1254_vm8, %v1977_v8  ;;  %5622 = vst.msk [vmem:[%s6817_s13 + $0x3b8] sm:$0xff] %vm1254_vm8, %v1979_v58 }
 0x2cd   : > { %2095 = vrot.lane.b32.xlu1 %v6476_v45, %s6150_s17 }
 0x2cf   : > { %v7543_v52 = vpop.permute.xlu0 %987  ;;  %v7545_v18 = vpop.permute.xlu1 %989 }
 0x2d1   : > { %2099 = vrot.lane.b32.xlu1 %v6465_v37, %s6150_s17 }
 0x2d3   : > { %v1457_v48 = vpop.permute.xlu0 %1456  ;;  %v1459_v22 = vpop.permute.xlu1 %1458 }
 0x2d4   : > { %5491 = vst.msk [vmem:[%s6817_s13 + $0x1a0] sm:$0xff] %vm1254_vm8, %v1457_v48  ;;  %5492 = vst.msk [vmem:[%s6817_s13 + $0x1a8] sm:$0xff] %vm1254_vm8, %v1459_v22 }
 0x2d5   : > { %2103 = vrot.lane.b32.xlu1 %v6514_v0, %s6150_s17 }
 0x2d7   : > { %v1715_v8 = vpop.permute.xlu0 %1714  ;;  %v1717_v58 = vpop.permute.xlu1 %1716 }
 0x2d8   : > { %5555 = vst.msk [vmem:[%s6817_s13 + $0x2a0] sm:$0xff] %vm1254_vm8, %v1715_v8  ;;  %5556 = vst.msk [vmem:[%s6817_s13 + $0x2a8] sm:$0xff] %vm1254_vm8, %v1717_v58 }
 0x2d9   : > { %2107 = vrot.lane.b32.xlu1 %v6503_v57, %s6150_s17 }
 0x2db   : > { %v1973_v37 = vpop.permute.xlu0 %1972  ;;  %v1975_v45 = vpop.permute.xlu1 %1974  ;;  %1043 = vxpose.xlu0.b32.start [1/16] (narrow) %v7223_v23, 8 }
 0x2dc   : > { %5619 = vst.msk [vmem:[%s6817_s13 + $0x3a0] sm:$0xff] %vm1254_vm8, %v1973_v37  ;;  %5620 = vst.msk [vmem:[%s6817_s13 + $0x3a8] sm:$0xff] %vm1254_vm8, %v1975_v45 }
 0x2dd   : > { %2111 = vrot.lane.b32.xlu1 %v6552_v20, %s6150_s17 }
 0x2df   : > { %v7568_v22 = vpop.permute.xlu0 %999  ;;  %v7570_v48 = vpop.permute.xlu1 %1001  ;;  %1044 = vxpose.xlu0.b32.cont [2/16] (narrow) %v7255_v59, 8 }
 0x2e3   : > { %v1469_v8 = vpop.permute.xlu0 %1468  ;;  %v1471_v58 = vpop.permute.xlu1 %1470  ;;  %1045 = vxpose.xlu0.b32.cont [3/16] (narrow) %v7199_v7, 8 }
 0x2e4   : > { %5497 = vst.msk [vmem:[%s6817_s13 + $0x1d0] sm:$0xff] %vm1254_vm8, %v1469_v8  ;;  %5498 = vst.msk [vmem:[%s6817_s13 + $0x1d8] sm:$0xff] %vm1254_vm8, %v1471_v58 }
 0x2e7   : > { %v1727_v37 = vpop.permute.xlu0 %1726  ;;  %v1729_v45 = vpop.permute.xlu1 %1728  ;;  %1046 = vxpose.xlu0.b32.cont [4/16] (narrow) %v7207_v25, 8 }
 0x2e8   : > { %5561 = vst.msk [vmem:[%s6817_s13 + $0x2d0] sm:$0xff] %vm1254_vm8, %v1727_v37  ;;  %5562 = vst.msk [vmem:[%s6817_s13 + $0x2d8] sm:$0xff] %vm1254_vm8, %v1729_v45 }
 0x2eb   : > { %v1985_v23 = vpop.permute.xlu0 %1984  ;;  %v1987_v59 = vpop.permute.xlu1 %1986  ;;  %1047 = vxpose.xlu0.b32.cont [5/16] (narrow) %v7295_v50, 8 }
 0x2ec   : > { %5625 = vst.msk [vmem:[%s6817_s13 + $0x3d0] sm:$0xff] %vm1254_vm8, %v1985_v23  ;;  %5626 = vst.msk [vmem:[%s6817_s13 + $0x3d8] sm:$0xff] %vm1254_vm8, %v1987_v59 }
 0x2ef   : > { %v7588_v7 = vpop.permute.xlu0 %995  ;;  %v7590_v8 = vpop.permute.xlu1 %997  ;;  %1048 = vxpose.xlu0.b32.cont [6/16] (narrow) %v7297_v3, 8 }
 0x2f3   : > { %v1465_v25 = vpop.permute.xlu0 %1464  ;;  %v1467_v58 = vpop.permute.xlu1 %1466  ;;  %1049 = vxpose.xlu0.b32.cont [7/16] (narrow) %v7263_v56, 8 }
 0x2f4   : > { %5495 = vst.msk [vmem:[%s6817_s13 + $0x1c0] sm:$0xff] %vm1254_vm8, %v1465_v25  ;;  %5496 = vst.msk [vmem:[%s6817_s13 + $0x1c8] sm:$0xff] %vm1254_vm8, %v1467_v58 }
 0x2f7   : > { %v1723_v50 = vpop.permute.xlu0 %1722  ;;  %v1725_v37 = vpop.permute.xlu1 %1724  ;;  %1050 = vxpose.xlu0.b32.cont [8/16] (narrow) %v7265_v60, 8 }
 0x2f8   : > { %5559 = vst.msk [vmem:[%s6817_s13 + $0x2c0] sm:$0xff] %vm1254_vm8, %v1723_v50  ;;  %5560 = vst.msk [vmem:[%s6817_s13 + $0x2c8] sm:$0xff] %vm1254_vm8, %v1725_v37 }
 0x2fb   : > { %v1981_v45 = vpop.permute.xlu0 %1980  ;;  %v1983_v3 = vpop.permute.xlu1 %1982  ;;  %1051 = vxpose.xlu0.b32.cont [9/16] (narrow) %v7359_v36, 8 }
 0x2fc   : > { %5623 = vst.msk [vmem:[%s6817_s13 + $0x3c0] sm:$0xff] %vm1254_vm8, %v1981_v45  ;;  %5624 = vst.msk [vmem:[%s6817_s13 + $0x3c8] sm:$0xff] %vm1254_vm8, %v1983_v3 }
 0x2ff   : > { %v2064_v56 = vpop.permute.xlu1 %2063  ;;  %v7608_v23 = vpop.permute.xlu0 %1007  ;;  %1052 = vxpose.xlu0.b32.cont [10/16] (narrow) %v7361_v51, 8 }
 0x300   : > { %5632 = vst.msk [vmem:[%s6299_s8 + $0x204] sm:$0xf] %vm1221_vm6, %v2064_v56 }
 0x303   : > { %v1477_v60 = vpop.permute.xlu0 %1476  ;;  %1053 = vxpose.xlu0.b32.cont [11/16] (narrow) %v7327_v6, 8  ;;  %v7614_v59 = vpop.permute.xlu1 %1009 }
 0x304   : > { %5501 = vst.msk [vmem:[%s6817_s13 + $0x1f0] sm:$0xff] %vm1254_vm8, %v1477_v60 }
 0x306   : > { %1075 = vxpose.xlu1.b32.start [1/16] (narrow) %v7487_v14, 8 }
 0x307   : > { %v1735_v36 = vpop.permute.xlu0 %1734  ;;  %1054 = vxpose.xlu0.b32.cont [12/16] (narrow) %v7329_v21, 8  ;;  %v1479_v25 = vpop.permute.xlu1 %1478 }
 0x308   : > { %5565 = vst.msk [vmem:[%s6817_s13 + $0x2f0] sm:$0xff] %vm1254_vm8, %v1735_v36  ;;  %5502 = vst.msk [vmem:[%s6817_s13 + $0x1f8] sm:$0xff] %vm1254_vm8, %v1479_v25  ;;  %v9554_v25 = vld [vmem:[#allocation17_spill] sm:$0xff] }
 0x30a   : > { %1076 = vxpose.xlu1.b32.cont [2/16] (narrow) %v7489_v61, 8 }
 0x30b   : > { %1055 = vxpose.xlu0.b32.cont [13/16] (narrow) %v7423_v11, 8  ;;  %v1004_v6 = vpop.permute.xlu0 %1003  ;;  %v1737_v51 = vpop.permute.xlu1 %1736 }
 0x30c   : > { %5566 = vst.msk [vmem:[%s6817_s13 + $0x2f8] sm:$0xff] %vm1254_vm8, %v1737_v51  ;;  %v9556_v51 = vld [vmem:[#allocation18_spill] sm:$0xff] }
 0x30e   : > { %1077 = vxpose.xlu1.b32.cont [3/16] (narrow) %v7455_v47, 8 }
 0x30f   : > { %1056 = vxpose.xlu0.b32.cont [14/16] (narrow) %v7425_v43, 8  ;;  %v1473_v21 = vpop.permute.xlu0 %1472  ;;  %v1995_v14 = vpop.permute.xlu1 %1994 }
 0x310   : > { %5499 = vst.msk [vmem:[%s6817_s13 + $0x1e0] sm:$0xff] %vm1254_vm8, %v1473_v21  ;;  %5630 = vst.msk [vmem:[%s6817_s13 + $0x3f8] sm:$0xff] %vm1254_vm8, %v1995_v14  ;;  %v9557_v21 = vld [vmem:[#allocation19_spill] sm:$0xff] }
 0x312   : > { %1078 = vxpose.xlu1.b32.cont [4/16] (narrow) %v7457_v46, 8 }
 0x313   : > { %1057 = vxpose.xlu0.b32.cont [15/16] (narrow) %v7391_v39, 8  ;;  %v1731_v11 = vpop.permute.xlu0 %1730  ;;  %v1006_v61 = vpop.permute.xlu1 %1005 }
 0x314   : > { %5563 = vst.msk [vmem:[%s6817_s13 + $0x2e0] sm:$0xff] %vm1254_vm8, %v1731_v11  ;;  %v9558_v11 = vld [vmem:[#allocation22_spill] sm:$0xff] }
 0x316   : > { %1079 = vxpose.xlu1.b32.cont [5/16] (narrow) %v7543_v52, 8 }
 0x317   : > { %1058 = vxpose.xlu0.b32.end [16/16] (narrow) %v7393_v54, 8  ;;  %v1989_v43 = vpop.permute.xlu0 %1988  ;;  %v1475_v47 = vpop.permute.xlu1 %1474 }
 0x318   : > { %5627 = vst.msk [vmem:[%s6817_s13 + $0x3e0] sm:$0xff] %vm1254_vm8, %v1989_v43  ;;  %5500 = vst.msk [vmem:[%s6817_s13 + $0x1e8] sm:$0xff] %vm1254_vm8, %v1475_v47  ;;  %v9560_v43 = vld [vmem:[#allocation21_spill] sm:$0xff]  ;;  %v9561_v47 = vld [vmem:[#allocation23_spill] sm:$0xff] }
 0x31a   : > { %1080 = vxpose.xlu1.b32.cont [6/16] (narrow) %v7545_v18, 8 }
 0x31b   : > { %v1993_v39 = vpop.permute.xlu0 %1992  ;;  %v1733_v46 = vpop.permute.xlu1 %1732 }
 0x31c   : > { %5629 = vst.msk [vmem:[%s6817_s13 + $0x3f0] sm:$0xff] %vm1254_vm8, %v1993_v39  ;;  %5564 = vst.msk [vmem:[%s6817_s13 + $0x2e8] sm:$0xff] %vm1254_vm8, %v1733_v46  ;;  %v9562_v39 = vld [vmem:[#allocation26_spill] sm:$0xff]  ;;  %v9563_v46 = vld [vmem:[#allocation28_spill] sm:$0xff] }
 0x31e   : > { %1081 = vxpose.xlu1.b32.cont [7/16] (narrow) %v7519_v41, 8 }
 0x31f   : > { %v2062_v54 = vpop.permute.xlu0 %2061  ;;  %v1991_v52 = vpop.permute.xlu1 %1990 }
 0x320   : > { %5631 = vst.msk [vmem:[%s6299_s8 + $0x200] sm:$0xf] %vm1221_vm6, %v2062_v54  ;;  %v9564_v54 = vld [vmem:[#allocation25_spill] sm:$0xff] }
 0x321   : > { %5628 = vst.msk [vmem:[%s6817_s13 + $0x3e8] sm:$0xff] %vm1254_vm8, %v1991_v52  ;;  %v9565_v52 = vld [vmem:[#allocation27_spill] sm:$0xff] }
 0x322   : > { %1082 = vxpose.xlu1.b32.cont [8/16] (narrow) %v7521_v26, 8 }
 0x323   : > { %v2066_v18 = vpop.permute.xlu0 %2065  ;;  %v2068_v58 = vpop.permute.xlu1 %2067 }
 0x324   : > { %5633 = vst.msk [vmem:[%s6299_s8 + $0x208] sm:$0xf] %vm1221_vm6, %v2066_v18  ;;  %5634 = vst.msk [vmem:[%s6299_s8 + $0x20c] sm:$0xf] %vm1221_vm6, %v2068_v58  ;;  %v9566_v18 = vld [vmem:[#allocation30_spill] sm:$0xff]  ;;  %v9567_v58 = vld [vmem:[#allocation32_spill] sm:$0xff] }
 0x326   : > { %1083 = vxpose.xlu1.b32.cont [9/16] (narrow) %v7588_v7, 8 }
 0x327   : > { %v2070_v41 = vpop.permute.xlu0 %2069  ;;  %v2072_v50 = vpop.permute.xlu1 %2071 }
 0x328   : > { %5635 = vst.msk [vmem:[%s6299_s8 + $0x210] sm:$0xf] %vm1221_vm6, %v2070_v41  ;;  %5636 = vst.msk [vmem:[%s6299_s8 + $0x214] sm:$0xf] %vm1221_vm6, %v2072_v50  ;;  %v9568_v41 = vld [vmem:[#allocation29_spill] sm:$0xff]  ;;  %v9569_v50 = vld [vmem:[#allocation31_spill] sm:$0xff] }
 0x32a   : > { %1084 = vxpose.xlu1.b32.cont [10/16] (narrow) %v7590_v8, 8 }
 0x32b   : > { %v2074_v26 = vpop.permute.xlu0 %2073  ;;  %v2076_v37 = vpop.permute.xlu1 %2075 }
 0x32c   : > { %5637 = vst.msk [vmem:[%s6299_s8 + $0x218] sm:$0xf] %vm1221_vm6, %v2074_v26  ;;  %5638 = vst.msk [vmem:[%s6299_s8 + $0x21c] sm:$0xf] %vm1221_vm6, %v2076_v37  ;;  %v9570_v26 = vld [vmem:[#allocation34_spill] sm:$0xff]  ;;  %v9571_v37 = vld [vmem:[#allocation36_spill] sm:$0xff] }
 0x32e   : > { %1085 = vxpose.xlu1.b32.cont [11/16] (narrow) %v7568_v22, 8 }
 0x32f   : > { %v2078_v7 = vpop.permute.xlu0 %2077  ;;  %v2080_v45 = vpop.permute.xlu1 %2079 }
 0x330   : > { %5639 = vst.msk [vmem:[%s6299_s8 + $0x220] sm:$0xf] %vm1221_vm6, %v2078_v7  ;;  %5640 = vst.msk [vmem:[%s6299_s8 + $0x224] sm:$0xf] %vm1221_vm6, %v2080_v45  ;;  %v9572_v7 = vld [vmem:[#allocation33_spill] sm:$0xff]  ;;  %v9573_v45 = vld [vmem:[#allocation35_spill] sm:$0xff] }
 0x332   : > { %1086 = vxpose.xlu1.b32.cont [12/16] (narrow) %v7570_v48, 8 }
 0x333   : > { %v2084_v8 = vpop.permute.xlu1 %2083 }
 0x334   : > { %5642 = vst.msk [vmem:[%s6299_s8 + $0x22c] sm:$0xf] %vm1221_vm6, %v2084_v8  ;;  %v9574_v8 = vld [vmem:[#allocation37_spill] sm:$0xff] }
 0x336   : > { %1087 = vxpose.xlu1.b32.cont [13/16] (narrow) %v1004_v6, 8  ;;  %v9555_v6 = vld [vmem:[#allocation20_spill] sm:$0xff] }
 0x337   : > { %v2088_v3 = vpop.permute.xlu1 %2087 }
 0x338   : > { %5644 = vst.msk [vmem:[%s6299_s8 + $0x234] sm:$0xf] %vm1221_vm6, %v2088_v3  ;;  %v9575_v3 = vld [vmem:[#allocation38_spill] sm:$0xff] }
 0x33a   : > { %1088 = vxpose.xlu1.b32.cont [14/16] (narrow) %v1006_v61, 8  ;;  %v9559_v61 = vld [vmem:[#allocation24_spill] sm:$0xff] }
 0x33b   : > { %v2092_v22 = vpop.permute.xlu1 %2091 }
 0x33c   : > { %5646 = vst.msk [vmem:[%s6299_s8 + $0x23c] sm:$0xf] %vm1221_vm6, %v2092_v22  ;;  %v9576_v22 = vld [vmem:[#allocation4_spill] sm:$0xff] }
 0x33e   : > { %1089 = vxpose.xlu1.b32.cont [15/16] (narrow) %v7608_v23, 8 }
 0x33f   : > { %v2096_v56 = vpop.permute.xlu1 %2095 }
 0x340   : > { %5648 = vst.msk [vmem:[%s6299_s8 + $0x244] sm:$0xf] %vm1221_vm6, %v2096_v56  ;;  %2081 = vrot.lane.b32.xlu0 %v6370_v2, %s6150_s17  ;;  %v9577_v56 = vld [vmem:[#allocation5_spill] sm:$0xff] }
 0x342   : > { %1090 = vxpose.xlu1.b32.end [16/16] (narrow) %v7614_v59, 8 }
 0x343   : > { %v2100_v48 = vpop.permute.xlu1 %2099 }
 0x344   : > { %5650 = vst.msk [vmem:[%s6299_s8 + $0x24c] sm:$0xf] %vm1221_vm6, %v2100_v48  ;;  %2085 = vrot.lane.b32.xlu0 %v6420_v19, %s6150_s17 }
 0x347   : > { %v2104_v60 = vpop.permute.xlu1 %2103 }
 0x348   : > { %5652 = vst.msk [vmem:[%s6299_s8 + $0x254] sm:$0xf] %vm1221_vm6, %v2104_v60  ;;  %2089 = vrot.lane.b32.xlu0 %v6408_v16, %s6150_s17 }
 0x34b   : > { %v2108_v23 = vpop.permute.xlu1 %2107 }
 0x34c   : > { %5654 = vst.msk [vmem:[%s6299_s8 + $0x25c] sm:$0xf] %vm1221_vm6, %v2108_v23  ;;  %2093 = vrot.lane.b32.xlu0 %v6458_v33, %s6150_s17  ;;  %v9578_v23 = vld [vmem:[#allocation6_spill] sm:$0xff] }
 0x34f   : > { %v2112_v59 = vpop.permute.xlu1 %2111 }
 0x350   : > { %5656 = vst.msk [vmem:[%s6299_s8 + $0x264] sm:$0xf] %vm1221_vm6, %v2112_v59  ;;  %2097 = vrot.lane.b32.xlu0 %v6446_v30, %s6150_s17  ;;  %v9579_v59 = vld [vmem:[#allocation7_spill] sm:$0xff] }
 0x354   : > { %2101 = vrot.lane.b32.xlu0 %v6496_v53, %s6150_s17 }
 0x357   : > { %v1059_v36 = vpop.trf.xlu0 }
 0x358   : > { %2105 = vrot.lane.b32.xlu0 %v6484_v49, %s6150_s17  ;;  %1107 = vst [vmem:[%s241_s28] sm:$0xff] %v1059_v36 }
 0x35c   : > { %2109 = vrot.lane.b32.xlu0 %v6534_v9, %s6150_s17 }
 0x360   : > { %2113 = vrot.lane.b32.xlu0 %v6522_v4, %s6150_s17  ;;  %2115 = vrot.lane.b32.xlu1 %v6541_v12, %s6150_s17 }
 0x364   : > { %2117 = vrot.lane.b32.xlu0 %v6572_v28, %s6150_s17  ;;  %2119 = vrot.lane.b32.xlu1 %v6590_v42, %s6150_s17 }
 0x368   : > { %2121 = vrot.lane.b32.xlu0 %v6560_v24, %s6150_s17  ;;  %2123 = vrot.lane.b32.xlu1 %v6579_v32, %s6150_s17 }
 0x36c   : > { %2190 = vrot.lane.b32.xlu0 %v6826_v1, %s6151_s29  ;;  %2192 = vrot.lane.b32.xlu1 %v6844_v10, %s6151_s29 }
 0x370   : > { %2194 = vrot.lane.b32.xlu0 %v6815_v62, %s6151_s29  ;;  %2196 = vrot.lane.b32.xlu1 %v9554_v25, %s6151_s29 }
 0x374   : > { %2198 = vrot.lane.b32.xlu0 %v6862_v17, %s6151_s29  ;;  %2200 = vrot.lane.b32.xlu1 %v9555_v6, %s6151_s29 }
 0x378   : > { %2202 = vrot.lane.b32.xlu0 %v9556_v51, %s6151_s29  ;;  %2204 = vrot.lane.b32.xlu1 %v9557_v21, %s6151_s29 }
 0x37c   : > { %2206 = vrot.lane.b32.xlu0 %v6898_v34, %s6151_s29  ;;  %2208 = vrot.lane.b32.xlu1 %v6916_v35, %s6151_s29 }
 0x380   : > { %2210 = vrot.lane.b32.xlu0 %v6889_v31, %s6151_s29  ;;  %2212 = vrot.lane.b32.xlu1 %v6907_v40, %s6151_s29 }
 0x382   : > { %v1091_v14 = vpop.trf.xlu1 }
 0x383   : > { %1108 = vst [vmem:[%s241_s28 + $0x8] sm:$0xff] %v1091_v14 }
 0x384   : > { %2214 = vrot.lane.b32.xlu0 %v9558_v11, %s6151_s29  ;;  %2216 = vrot.lane.b32.xlu1 %v9559_v61, %s6151_s29 }
 0x388   : > { %2218 = vrot.lane.b32.xlu0 %v9560_v43, %s6151_s29  ;;  %2220 = vrot.lane.b32.xlu1 %v9561_v47, %s6151_s29 }
 0x38c   : > { %2222 = vrot.lane.b32.xlu0 %v9562_v39, %s6151_s29  ;;  %2224 = vrot.lane.b32.xlu1 %v9563_v46, %s6151_s29 }
 0x390   : > { %2226 = vrot.lane.b32.xlu0 %v9564_v54, %s6151_s29  ;;  %2228 = vrot.lane.b32.xlu1 %v9565_v52, %s6151_s29 }
 0x394   : > { %2230 = vrot.lane.b32.xlu0 %v9566_v18, %s6151_s29  ;;  %2232 = vrot.lane.b32.xlu1 %v9567_v58, %s6151_s29 }
 0x398   : > { %2234 = vrot.lane.b32.xlu0 %v9568_v41, %s6151_s29  ;;  %2236 = vrot.lane.b32.xlu1 %v9569_v50, %s6151_s29 }
 0x39c   : > { %2238 = vrot.lane.b32.xlu0 %v9570_v26, %s6151_s29  ;;  %2240 = vrot.lane.b32.xlu1 %v9571_v37, %s6151_s29 }
 0x3a0   : > { %2242 = vrot.lane.b32.xlu0 %v9572_v7, %s6151_s29  ;;  %2244 = vrot.lane.b32.xlu1 %v9573_v45, %s6151_s29 }
 0x3a4   : > { %2246 = vrot.lane.b32.xlu0 %v7078_v29, %s6151_s29  ;;  %2248 = vrot.lane.b32.xlu1 %v7096_v15, %s6151_s29 }
 0x3a8   : > { %2250 = vrot.lane.b32.xlu0 %v9574_v8, %s6151_s29  ;;  %2252 = vrot.lane.b32.xlu1 %v9575_v3, %s6151_s29 }
 0x3ac   : > { %2319 = vrot.lane.b32.xlu0 %v9576_v22, %s6152_s30  ;;  %2321 = vrot.lane.b32.xlu1 %v9577_v56, %s6152_s30 }
 0x3b0   : > { %2323 = vrot.lane.b32.xlu0 %v6295_v38, %s6152_s30  ;;  %2325 = vrot.lane.b32.xlu1 %v6313_v44, %s6152_s30 }
 0x3b2   : > { %v2082_v48 = vpop.permute.xlu0 %2081 }
 0x3b3   : > { %5641 = vst.msk [vmem:[%s6299_s8 + $0x228] sm:$0xf] %vm1221_vm6, %v2082_v48  ;;  %v9580_v48 = vld [vmem:[#allocation10_spill] sm:$0xff] }
 0x3b4   : > { %2327 = vrot.lane.b32.xlu0 %v6344_v55, %s6152_s30  ;;  %2329 = vrot.lane.b32.xlu1 %v6362_v63, %s6152_s30 }
 0x3b6   : > { %v2086_v60 = vpop.permute.xlu0 %2085 }
 0x3b7   : > { %5643 = vst.msk [vmem:[%s6299_s8 + $0x230] sm:$0xf] %vm1221_vm6, %v2086_v60 }
 0x3b8   : > { %2331 = vrot.lane.b32.xlu0 %v9578_v23, %s6152_s30  ;;  %2333 = vrot.lane.b32.xlu1 %v9579_v59, %s6152_s30 }
 0x3ba   : > { %v2090_v36 = vpop.permute.xlu0 %2089 }
 0x3bb   : > { %5645 = vst.msk [vmem:[%s6299_s8 + $0x238] sm:$0xf] %vm1221_vm6, %v2090_v36 }
 0x3bc   : > { %2335 = vrot.lane.b32.xlu0 %v6382_v5, %s6152_s30  ;;  %2337 = vrot.lane.b32.xlu1 %v6400_v13, %s6152_s30 }
 0x3be   : > { %v2094_v14 = vpop.permute.xlu0 %2093 }
 0x3bf   : > { %5647 = vst.msk [vmem:[%s6299_s8 + $0x240] sm:$0xf] %vm1221_vm6, %v2094_v14  ;;  %v9581_v14 = vld [vmem:[#allocation12_spill] sm:$0xff] }
 0x3c0   : > { %2339 = vrot.lane.b32.xlu0 %v6370_v2, %s6152_s30  ;;  %2341 = vrot.lane.b32.xlu1 %v9580_v48, %s6152_s30 }
 0x3c2   : > { %v2098_v60 = vpop.permute.xlu0 %2097 }
 0x3c3   : > { %5649 = vst.msk [vmem:[%s6299_s8 + $0x248] sm:$0xf] %vm1221_vm6, %v2098_v60  ;;  %v9582_v60 = vld [vmem:[#allocation16_spill] sm:$0xff] }
 0x3c4   : > { %2343 = vrot.lane.b32.xlu0 %v6420_v19, %s6152_s30  ;;  %2345 = vrot.lane.b32.xlu1 %v6438_v27, %s6152_s30 }
 0x3c6   : > { %v2102_v36 = vpop.permute.xlu0 %2101 }
 0x3c7   : > { %5651 = vst.msk [vmem:[%s6299_s8 + $0x250] sm:$0xf] %vm1221_vm6, %v2102_v36  ;;  %v9583_v36 = vld [vmem:[#allocation15_spill] sm:$0xff] }
 0x3c8   : > { %2347 = vrot.lane.b32.xlu0 %v6408_v16, %s6152_s30  ;;  %2349 = vrot.lane.b32.xlu1 %v9581_v14, %s6152_s30 }
 0x3ca   : > { %v2106_v48 = vpop.permute.xlu0 %2105 }
 0x3cb   : > { %5653 = vst.msk [vmem:[%s6299_s8 + $0x258] sm:$0xf] %vm1221_vm6, %v2106_v48 }
 0x3cc   : > { %2351 = vrot.lane.b32.xlu0 %v6458_v33, %s6152_s30  ;;  %2353 = vrot.lane.b32.xlu1 %v9582_v60, %s6152_s30 }
 0x3ce   : > { %v2110_v27 = vpop.permute.xlu0 %2109 }
 0x3cf   : > { %5655 = vst.msk [vmem:[%s6299_s8 + $0x260] sm:$0xf] %vm1221_vm6, %v2110_v27 }
 0x3d0   : > { %2355 = vrot.lane.b32.xlu0 %v6446_v30, %s6152_s30  ;;  %2357 = vrot.lane.b32.xlu1 %v9583_v36, %s6152_s30 }
 0x3d2   : > { %v2114_v14 = vpop.permute.xlu0 %2113  ;;  %v2116_v48 = vpop.permute.xlu1 %2115 }
 0x3d3   : > { %5657 = vst.msk [vmem:[%s6299_s8 + $0x268] sm:$0xf] %vm1221_vm6, %v2114_v14  ;;  %5658 = vst.msk [vmem:[%s6299_s8 + $0x26c] sm:$0xf] %vm1221_vm6, %v2116_v48 }
 0x3d4   : > { %2359 = vrot.lane.b32.xlu0 %v6496_v53, %s6152_s30  ;;  %2361 = vrot.lane.b32.xlu1 %v6514_v0, %s6152_s30 }
 0x3d6   : > { %v2118_v27 = vpop.permute.xlu0 %2117  ;;  %v2120_v30 = vpop.permute.xlu1 %2119 }
 0x3d7   : > { %5659 = vst.msk [vmem:[%s6299_s8 + $0x270] sm:$0xf] %vm1221_vm6, %v2118_v27  ;;  %5660 = vst.msk [vmem:[%s6299_s8 + $0x274] sm:$0xf] %vm1221_vm6, %v2120_v30 }
 0x3d8   : > { %2363 = vrot.lane.b32.xlu0 %v6484_v49, %s6152_s30  ;;  %2365 = vrot.lane.b32.xlu1 %v6503_v57, %s6152_s30 }
 0x3da   : > { %v2122_v14 = vpop.permute.xlu0 %2121  ;;  %v2124_v48 = vpop.permute.xlu1 %2123 }
 0x3db   : > { %5661 = vst.msk [vmem:[%s6299_s8 + $0x278] sm:$0xf] %vm1221_vm6, %v2122_v14  ;;  %5662 = vst.msk [vmem:[%s6299_s8 + $0x27c] sm:$0xf] %vm1221_vm6, %v2124_v48 }
 0x3dc   : > { %2367 = vrot.lane.b32.xlu0 %v6534_v9, %s6152_s30  ;;  %2369 = vrot.lane.b32.xlu1 %v6552_v20, %s6152_s30 }
 0x3de   : > { %v2191_v30 = vpop.permute.xlu0 %2190  ;;  %v2193_v27 = vpop.permute.xlu1 %2192 }
 0x3df   : > { %5663 = vst.msk [vmem:[%s6817_s13 + $0x400] sm:$0xff] %vm1254_vm8, %v2191_v30  ;;  %5664 = vst.msk [vmem:[%s6817_s13 + $0x408] sm:$0xff] %vm1254_vm8, %v2193_v27 }
 0x3e0   : > { %2371 = vrot.lane.b32.xlu0 %v6522_v4, %s6152_s30  ;;  %2373 = vrot.lane.b32.xlu1 %v6541_v12, %s6152_s30 }
 0x3e2   : > { %v2195_v14 = vpop.permute.xlu0 %2194  ;;  %v2197_v48 = vpop.permute.xlu1 %2196 }
 0x3e3   : > { %5665 = vst.msk [vmem:[%s6817_s13 + $0x410] sm:$0xff] %vm1254_vm8, %v2195_v14  ;;  %5666 = vst.msk [vmem:[%s6817_s13 + $0x418] sm:$0xff] %vm1254_vm8, %v2197_v48 }
 0x3e4   : > { %2375 = vrot.lane.b32.xlu0 %v6572_v28, %s6152_s30  ;;  %2377 = vrot.lane.b32.xlu1 %v6590_v42, %s6152_s30 }
 0x3e6   : > { %v2199_v30 = vpop.permute.xlu0 %2198  ;;  %v2201_v27 = vpop.permute.xlu1 %2200 }
 0x3e7   : > { %5667 = vst.msk [vmem:[%s6817_s13 + $0x420] sm:$0xff] %vm1254_vm8, %v2199_v30  ;;  %5668 = vst.msk [vmem:[%s6817_s13 + $0x428] sm:$0xff] %vm1254_vm8, %v2201_v27 }
 0x3e8   : > { %2379 = vrot.lane.b32.xlu0 %v6560_v24, %s6152_s30  ;;  %2381 = vrot.lane.b32.xlu1 %v6579_v32, %s6152_s30 }
 0x3ea   : > { %v2203_v14 = vpop.permute.xlu0 %2202  ;;  %v2205_v48 = vpop.permute.xlu1 %2204 }
 0x3eb   : > { %5669 = vst.msk [vmem:[%s6817_s13 + $0x430] sm:$0xff] %vm1254_vm8, %v2203_v14  ;;  %5670 = vst.msk [vmem:[%s6817_s13 + $0x438] sm:$0xff] %vm1254_vm8, %v2205_v48 }
 0x3ec   : > { %2448 = vrot.lane.b32.xlu0 %v6826_v1, %s6153_s6  ;;  %2450 = vrot.lane.b32.xlu1 %v6844_v10, %s6153_s6 }
 0x3ee   : > { %v2207_v30 = vpop.permute.xlu0 %2206  ;;  %v2209_v27 = vpop.permute.xlu1 %2208 }
 0x3ef   : > { %5671 = vst.msk [vmem:[%s6817_s13 + $0x440] sm:$0xff] %vm1254_vm8, %v2207_v30  ;;  %5672 = vst.msk [vmem:[%s6817_s13 + $0x448] sm:$0xff] %vm1254_vm8, %v2209_v27 }
 0x3f0   : > { %2452 = vrot.lane.b32.xlu0 %v6815_v62, %s6153_s6  ;;  %2454 = vrot.lane.b32.xlu1 %v9554_v25, %s6153_s6 }
 0x3f2   : > { %v2211_v14 = vpop.permute.xlu0 %2210  ;;  %v2213_v48 = vpop.permute.xlu1 %2212 }
 0x3f3   : > { %5673 = vst.msk [vmem:[%s6817_s13 + $0x450] sm:$0xff] %vm1254_vm8, %v2211_v14  ;;  %5674 = vst.msk [vmem:[%s6817_s13 + $0x458] sm:$0xff] %vm1254_vm8, %v2213_v48 }
 0x3f4   : > { %2456 = vrot.lane.b32.xlu0 %v6862_v17, %s6153_s6  ;;  %2458 = vrot.lane.b32.xlu1 %v9555_v6, %s6153_s6 }
 0x3f6   : > { %v2215_v30 = vpop.permute.xlu0 %2214  ;;  %v2217_v27 = vpop.permute.xlu1 %2216 }
 0x3f7   : > { %5675 = vst.msk [vmem:[%s6817_s13 + $0x460] sm:$0xff] %vm1254_vm8, %v2215_v30  ;;  %5676 = vst.msk [vmem:[%s6817_s13 + $0x468] sm:$0xff] %vm1254_vm8, %v2217_v27 }
 0x3f8   : > { %2460 = vrot.lane.b32.xlu0 %v9556_v51, %s6153_s6  ;;  %2462 = vrot.lane.b32.xlu1 %v9557_v21, %s6153_s6 }
 0x3fa   : > { %v2219_v14 = vpop.permute.xlu0 %2218  ;;  %v2221_v48 = vpop.permute.xlu1 %2220 }
 0x3fb   : > { %5677 = vst.msk [vmem:[%s6817_s13 + $0x470] sm:$0xff] %vm1254_vm8, %v2219_v14  ;;  %5678 = vst.msk [vmem:[%s6817_s13 + $0x478] sm:$0xff] %vm1254_vm8, %v2221_v48 }
 0x3fc   : > { %2464 = vrot.lane.b32.xlu0 %v6898_v34, %s6153_s6  ;;  %2466 = vrot.lane.b32.xlu1 %v6916_v35, %s6153_s6 }
 0x3fe   : > { %v2223_v30 = vpop.permute.xlu0 %2222  ;;  %v2225_v27 = vpop.permute.xlu1 %2224 }
 0x3ff   : > { %5679 = vst.msk [vmem:[%s6817_s13 + $0x480] sm:$0xff] %vm1254_vm8, %v2223_v30  ;;  %5680 = vst.msk [vmem:[%s6817_s13 + $0x488] sm:$0xff] %vm1254_vm8, %v2225_v27 }
 0x400   : > { %2468 = vrot.lane.b32.xlu0 %v6889_v31, %s6153_s6  ;;  %2470 = vrot.lane.b32.xlu1 %v6907_v40, %s6153_s6 }
 0x402   : > { %v2227_v14 = vpop.permute.xlu0 %2226  ;;  %v2229_v48 = vpop.permute.xlu1 %2228 }
 0x403   : > { %5681 = vst.msk [vmem:[%s6817_s13 + $0x490] sm:$0xff] %vm1254_vm8, %v2227_v14  ;;  %5682 = vst.msk [vmem:[%s6817_s13 + $0x498] sm:$0xff] %vm1254_vm8, %v2229_v48 }
 0x404   : > { %2472 = vrot.lane.b32.xlu0 %v9558_v11, %s6153_s6  ;;  %2474 = vrot.lane.b32.xlu1 %v9559_v61, %s6153_s6 }
 0x406   : > { %v2231_v30 = vpop.permute.xlu0 %2230  ;;  %v2233_v27 = vpop.permute.xlu1 %2232 }
 0x407   : > { %5683 = vst.msk [vmem:[%s6817_s13 + $0x4a0] sm:$0xff] %vm1254_vm8, %v2231_v30  ;;  %5684 = vst.msk [vmem:[%s6817_s13 + $0x4a8] sm:$0xff] %vm1254_vm8, %v2233_v27 }
 0x408   : > { %2476 = vrot.lane.b32.xlu0 %v9560_v43, %s6153_s6  ;;  %2478 = vrot.lane.b32.xlu1 %v9561_v47, %s6153_s6 }
 0x40a   : > { %v2235_v14 = vpop.permute.xlu0 %2234  ;;  %v2237_v48 = vpop.permute.xlu1 %2236 }
 0x40b   : > { %5685 = vst.msk [vmem:[%s6817_s13 + $0x4b0] sm:$0xff] %vm1254_vm8, %v2235_v14  ;;  %5686 = vst.msk [vmem:[%s6817_s13 + $0x4b8] sm:$0xff] %vm1254_vm8, %v2237_v48 }
 0x40c   : > { %2480 = vrot.lane.b32.xlu0 %v9562_v39, %s6153_s6  ;;  %2482 = vrot.lane.b32.xlu1 %v9563_v46, %s6153_s6 }
 0x40e   : > { %v2239_v30 = vpop.permute.xlu0 %2238  ;;  %v2241_v27 = vpop.permute.xlu1 %2240 }
 0x40f   : > { %5687 = vst.msk [vmem:[%s6817_s13 + $0x4c0] sm:$0xff] %vm1254_vm8, %v2239_v30  ;;  %5688 = vst.msk [vmem:[%s6817_s13 + $0x4c8] sm:$0xff] %vm1254_vm8, %v2241_v27 }
 0x410   : > { %2484 = vrot.lane.b32.xlu0 %v9564_v54, %s6153_s6  ;;  %2486 = vrot.lane.b32.xlu1 %v9565_v52, %s6153_s6 }
 0x412   : > { %v2243_v14 = vpop.permute.xlu0 %2242  ;;  %v2245_v48 = vpop.permute.xlu1 %2244 }
 0x413   : > { %5689 = vst.msk [vmem:[%s6817_s13 + $0x4d0] sm:$0xff] %vm1254_vm8, %v2243_v14  ;;  %5690 = vst.msk [vmem:[%s6817_s13 + $0x4d8] sm:$0xff] %vm1254_vm8, %v2245_v48 }
 0x414   : > { %2488 = vrot.lane.b32.xlu0 %v9566_v18, %s6153_s6  ;;  %2490 = vrot.lane.b32.xlu1 %v9567_v58, %s6153_s6 }
 0x416   : > { %v2247_v30 = vpop.permute.xlu0 %2246  ;;  %v2249_v27 = vpop.permute.xlu1 %2248 }
 0x417   : > { %5691 = vst.msk [vmem:[%s6817_s13 + $0x4e0] sm:$0xff] %vm1254_vm8, %v2247_v30  ;;  %5692 = vst.msk [vmem:[%s6817_s13 + $0x4e8] sm:$0xff] %vm1254_vm8, %v2249_v27 }
 0x418   : > { %2492 = vrot.lane.b32.xlu0 %v9568_v41, %s6153_s6  ;;  %2494 = vrot.lane.b32.xlu1 %v9569_v50, %s6153_s6 }
 0x41a   : > { %v2251_v14 = vpop.permute.xlu0 %2250  ;;  %v2253_v48 = vpop.permute.xlu1 %2252 }
 0x41b   : > { %5693 = vst.msk [vmem:[%s6817_s13 + $0x4f0] sm:$0xff] %vm1254_vm8, %v2251_v14  ;;  %5694 = vst.msk [vmem:[%s6817_s13 + $0x4f8] sm:$0xff] %vm1254_vm8, %v2253_v48 }
 0x41c   : > { %2496 = vrot.lane.b32.xlu0 %v9570_v26, %s6153_s6  ;;  %2498 = vrot.lane.b32.xlu1 %v9571_v37, %s6153_s6 }
 0x41e   : > { %v2320_v30 = vpop.permute.xlu0 %2319  ;;  %v2322_v27 = vpop.permute.xlu1 %2321 }
 0x41f   : > { %5695 = vst.msk [vmem:[%s6299_s8 + $0x280] sm:$0xf] %vm1221_vm6, %v2320_v30  ;;  %5696 = vst.msk [vmem:[%s6299_s8 + $0x284] sm:$0xf] %vm1221_vm6, %v2322_v27 }
 0x420   : > { %2500 = vrot.lane.b32.xlu0 %v9572_v7, %s6153_s6  ;;  %2502 = vrot.lane.b32.xlu1 %v9573_v45, %s6153_s6 }
 0x422   : > { %v2324_v14 = vpop.permute.xlu0 %2323  ;;  %v2326_v48 = vpop.permute.xlu1 %2325 }
 0x423   : > { %5697 = vst.msk [vmem:[%s6299_s8 + $0x288] sm:$0xf] %vm1221_vm6, %v2324_v14  ;;  %5698 = vst.msk [vmem:[%s6299_s8 + $0x28c] sm:$0xf] %vm1221_vm6, %v2326_v48 }
 0x424   : > { %2504 = vrot.lane.b32.xlu0 %v7078_v29, %s6153_s6  ;;  %2506 = vrot.lane.b32.xlu1 %v7096_v15, %s6153_s6 }
 0x426   : > { %v2328_v30 = vpop.permute.xlu0 %2327  ;;  %v2330_v27 = vpop.permute.xlu1 %2329 }
 0x427   : > { %5699 = vst.msk [vmem:[%s6299_s8 + $0x290] sm:$0xf] %vm1221_vm6, %v2328_v30  ;;  %5700 = vst.msk [vmem:[%s6299_s8 + $0x294] sm:$0xf] %vm1221_vm6, %v2330_v27 }
 0x428   : > { %2508 = vrot.lane.b32.xlu0 %v9574_v8, %s6153_s6  ;;  %2510 = vrot.lane.b32.xlu1 %v9575_v3, %s6153_s6 }
 0x42a   : > { %v2332_v14 = vpop.permute.xlu0 %2331  ;;  %v2334_v48 = vpop.permute.xlu1 %2333 }
 0x42b   : > { %5701 = vst.msk [vmem:[%s6299_s8 + $0x298] sm:$0xf] %vm1221_vm6, %v2332_v14  ;;  %5702 = vst.msk [vmem:[%s6299_s8 + $0x29c] sm:$0xf] %vm1221_vm6, %v2334_v48 }
 0x42c   : > { %2577 = vrot.lane.b32.xlu0 %v9576_v22, %s6154_s7  ;;  %2579 = vrot.lane.b32.xlu1 %v9577_v56, %s6154_s7 }
 0x42e   : > { %v2336_v30 = vpop.permute.xlu0 %2335  ;;  %v2338_v27 = vpop.permute.xlu1 %2337 }
 0x42f   : > { %5703 = vst.msk [vmem:[%s6299_s8 + $0x2a0] sm:$0xf] %vm1221_vm6, %v2336_v30  ;;  %5704 = vst.msk [vmem:[%s6299_s8 + $0x2a4] sm:$0xf] %vm1221_vm6, %v2338_v27 }
 0x430   : > { %2581 = vrot.lane.b32.xlu0 %v6295_v38, %s6154_s7  ;;  %2583 = vrot.lane.b32.xlu1 %v6313_v44, %s6154_s7 }
 0x432   : > { %v2340_v14 = vpop.permute.xlu0 %2339  ;;  %v2342_v48 = vpop.permute.xlu1 %2341 }
 0x433   : > { %5705 = vst.msk [vmem:[%s6299_s8 + $0x2a8] sm:$0xf] %vm1221_vm6, %v2340_v14  ;;  %5706 = vst.msk [vmem:[%s6299_s8 + $0x2ac] sm:$0xf] %vm1221_vm6, %v2342_v48 }
 0x434   : > { %2585 = vrot.lane.b32.xlu0 %v6344_v55, %s6154_s7  ;;  %2587 = vrot.lane.b32.xlu1 %v6362_v63, %s6154_s7 }
 0x436   : > { %v2344_v30 = vpop.permute.xlu0 %2343  ;;  %v2346_v27 = vpop.permute.xlu1 %2345 }
 0x437   : > { %5707 = vst.msk [vmem:[%s6299_s8 + $0x2b0] sm:$0xf] %vm1221_vm6, %v2344_v30  ;;  %5708 = vst.msk [vmem:[%s6299_s8 + $0x2b4] sm:$0xf] %vm1221_vm6, %v2346_v27 }
 0x438   : > { %2589 = vrot.lane.b32.xlu0 %v9578_v23, %s6154_s7  ;;  %2591 = vrot.lane.b32.xlu1 %v9579_v59, %s6154_s7 }
 0x43a   : > { %v2348_v14 = vpop.permute.xlu0 %2347  ;;  %v2350_v48 = vpop.permute.xlu1 %2349 }
 0x43b   : > { %5709 = vst.msk [vmem:[%s6299_s8 + $0x2b8] sm:$0xf] %vm1221_vm6, %v2348_v14  ;;  %5710 = vst.msk [vmem:[%s6299_s8 + $0x2bc] sm:$0xf] %vm1221_vm6, %v2350_v48  ;;  %v9584_v14 = vld [vmem:[#allocation10_spill] sm:$0xff] }
 0x43c   : > { %2593 = vrot.lane.b32.xlu0 %v6382_v5, %s6154_s7  ;;  %2595 = vrot.lane.b32.xlu1 %v6400_v13, %s6154_s7 }
 0x43e   : > { %v2352_v30 = vpop.permute.xlu0 %2351  ;;  %v2354_v27 = vpop.permute.xlu1 %2353 }
 0x43f   : > { %5711 = vst.msk [vmem:[%s6299_s8 + $0x2c0] sm:$0xf] %vm1221_vm6, %v2352_v30  ;;  %5712 = vst.msk [vmem:[%s6299_s8 + $0x2c4] sm:$0xf] %vm1221_vm6, %v2354_v27  ;;  %v9585_v30 = vld [vmem:[#allocation13_spill] sm:$0xff] }
 0x440   : > { %2597 = vrot.lane.b32.xlu0 %v6370_v2, %s6154_s7  ;;  %2599 = vrot.lane.b32.xlu1 %v9584_v14, %s6154_s7 }
 0x442   : > { %v2356_v48 = vpop.permute.xlu0 %2355  ;;  %v2358_v5 = vpop.permute.xlu1 %2357 }
 0x443   : > { %5713 = vst.msk [vmem:[%s6299_s8 + $0x2c8] sm:$0xf] %vm1221_vm6, %v2356_v48  ;;  %5714 = vst.msk [vmem:[%s6299_s8 + $0x2cc] sm:$0xf] %vm1221_vm6, %v2358_v5  ;;  %v9586_v48 = vld [vmem:[#allocation12_spill] sm:$0xff] }
 0x444   : > { %2601 = vrot.lane.b32.xlu0 %v6420_v19, %s6154_s7  ;;  %2603 = vrot.lane.b32.xlu1 %v9585_v30, %s6154_s7 }
 0x446   : > { %v2360_v27 = vpop.permute.xlu0 %2359  ;;  %v2362_v2 = vpop.permute.xlu1 %2361 }
 0x447   : > { %5715 = vst.msk [vmem:[%s6299_s8 + $0x2d0] sm:$0xf] %vm1221_vm6, %v2360_v27  ;;  %5716 = vst.msk [vmem:[%s6299_s8 + $0x2d4] sm:$0xf] %vm1221_vm6, %v2362_v2 }
 0x448   : > { %2605 = vrot.lane.b32.xlu0 %v6408_v16, %s6154_s7  ;;  %2607 = vrot.lane.b32.xlu1 %v9586_v48, %s6154_s7  ;;  %v9587_v48 = vld [vmem:[#allocation14_spill] sm:$0xff] }
 0x44a   : > { %v2364_v5 = vpop.permute.xlu0 %2363  ;;  %v2366_v19 = vpop.permute.xlu1 %2365 }
 0x44b   : > { %5717 = vst.msk [vmem:[%s6299_s8 + $0x2d8] sm:$0xf] %vm1221_vm6, %v2364_v5  ;;  %5718 = vst.msk [vmem:[%s6299_s8 + $0x2dc] sm:$0xf] %vm1221_vm6, %v2366_v19 }
 0x44c   : > { %2609 = vrot.lane.b32.xlu0 %v6458_v33, %s6154_s7  ;;  %2611 = vrot.lane.b32.xlu1 %v9582_v60, %s6154_s7 }
 0x44e   : > { %v2368_v2 = vpop.permute.xlu0 %2367  ;;  %v2370_v27 = vpop.permute.xlu1 %2369 }
 0x44f   : > { %5719 = vst.msk [vmem:[%s6299_s8 + $0x2e0] sm:$0xf] %vm1221_vm6, %v2368_v2  ;;  %5720 = vst.msk [vmem:[%s6299_s8 + $0x2e4] sm:$0xf] %vm1221_vm6, %v2370_v27 }
 0x450   : > { %2613 = vrot.lane.b32.xlu0 %v9587_v48, %s6154_s7  ;;  %2615 = vrot.lane.b32.xlu1 %v9583_v36, %s6154_s7 }
 0x452   : > { %v2372_v19 = vpop.permute.xlu0 %2371  ;;  %v2374_v5 = vpop.permute.xlu1 %2373 }
 0x453   : > { %5721 = vst.msk [vmem:[%s6299_s8 + $0x2e8] sm:$0xf] %vm1221_vm6, %v2372_v19  ;;  %5722 = vst.msk [vmem:[%s6299_s8 + $0x2ec] sm:$0xf] %vm1221_vm6, %v2374_v5 }
 0x454   : > { %2617 = vrot.lane.b32.xlu0 %v6496_v53, %s6154_s7  ;;  %2619 = vrot.lane.b32.xlu1 %v6514_v0, %s6154_s7 }
 0x456   : > { %v2376_v2 = vpop.permute.xlu0 %2375  ;;  %v2378_v27 = vpop.permute.xlu1 %2377 }
 0x457   : > { %5723 = vst.msk [vmem:[%s6299_s8 + $0x2f0] sm:$0xf] %vm1221_vm6, %v2376_v2  ;;  %5724 = vst.msk [vmem:[%s6299_s8 + $0x2f4] sm:$0xf] %vm1221_vm6, %v2378_v27 }
 0x458   : > { %2621 = vrot.lane.b32.xlu0 %v6484_v49, %s6154_s7  ;;  %2623 = vrot.lane.b32.xlu1 %v6503_v57, %s6154_s7 }
 0x45a   : > { %v2380_v19 = vpop.permute.xlu0 %2379  ;;  %v2382_v5 = vpop.permute.xlu1 %2381 }
 0x45b   : > { %5725 = vst.msk [vmem:[%s6299_s8 + $0x2f8] sm:$0xf] %vm1221_vm6, %v2380_v19  ;;  %5726 = vst.msk [vmem:[%s6299_s8 + $0x2fc] sm:$0xf] %vm1221_vm6, %v2382_v5 }
 0x45c   : > { %2625 = vrot.lane.b32.xlu0 %v6534_v9, %s6154_s7  ;;  %2627 = vrot.lane.b32.xlu1 %v6552_v20, %s6154_s7 }
 0x45e   : > { %v2449_v2 = vpop.permute.xlu0 %2448  ;;  %v2451_v27 = vpop.permute.xlu1 %2450 }
 0x45f   : > { %5727 = vst.msk [vmem:[%s6817_s13 + $0x500] sm:$0xff] %vm1254_vm8, %v2449_v2  ;;  %5728 = vst.msk [vmem:[%s6817_s13 + $0x508] sm:$0xff] %vm1254_vm8, %v2451_v27 }
 0x460   : > { %2629 = vrot.lane.b32.xlu0 %v6522_v4, %s6154_s7  ;;  %2631 = vrot.lane.b32.xlu1 %v6541_v12, %s6154_s7 }
 0x462   : > { %v2453_v19 = vpop.permute.xlu0 %2452  ;;  %v2455_v5 = vpop.permute.xlu1 %2454 }
 0x463   : > { %5729 = vst.msk [vmem:[%s6817_s13 + $0x510] sm:$0xff] %vm1254_vm8, %v2453_v19  ;;  %5730 = vst.msk [vmem:[%s6817_s13 + $0x518] sm:$0xff] %vm1254_vm8, %v2455_v5 }
 0x464   : > { %2633 = vrot.lane.b32.xlu0 %v6572_v28, %s6154_s7  ;;  %2635 = vrot.lane.b32.xlu1 %v6590_v42, %s6154_s7 }
 0x466   : > { %v2457_v2 = vpop.permute.xlu0 %2456  ;;  %v2459_v27 = vpop.permute.xlu1 %2458 }
 0x467   : > { %5731 = vst.msk [vmem:[%s6817_s13 + $0x520] sm:$0xff] %vm1254_vm8, %v2457_v2  ;;  %5732 = vst.msk [vmem:[%s6817_s13 + $0x528] sm:$0xff] %vm1254_vm8, %v2459_v27 }
 0x468   : > { %2637 = vrot.lane.b32.xlu0 %v6560_v24, %s6154_s7  ;;  %2639 = vrot.lane.b32.xlu1 %v6579_v32, %s6154_s7 }
 0x46a   : > { %v2461_v19 = vpop.permute.xlu0 %2460  ;;  %v2463_v5 = vpop.permute.xlu1 %2462 }
 0x46b   : > { %5733 = vst.msk [vmem:[%s6817_s13 + $0x530] sm:$0xff] %vm1254_vm8, %v2461_v19  ;;  %5734 = vst.msk [vmem:[%s6817_s13 + $0x538] sm:$0xff] %vm1254_vm8, %v2463_v5 }
 0x46c   : > { %2706 = vrot.lane.b32.xlu0 %v6826_v1, %s6155_s9  ;;  %2708 = vrot.lane.b32.xlu1 %v6844_v10, %s6155_s9 }
 0x46e   : > { %v2465_v2 = vpop.permute.xlu0 %2464  ;;  %v2467_v27 = vpop.permute.xlu1 %2466 }
 0x46f   : > { %5735 = vst.msk [vmem:[%s6817_s13 + $0x540] sm:$0xff] %vm1254_vm8, %v2465_v2  ;;  %5736 = vst.msk [vmem:[%s6817_s13 + $0x548] sm:$0xff] %vm1254_vm8, %v2467_v27 }
 0x470   : > { %2710 = vrot.lane.b32.xlu0 %v6815_v62, %s6155_s9  ;;  %2712 = vrot.lane.b32.xlu1 %v9554_v25, %s6155_s9 }
 0x472   : > { %v2469_v19 = vpop.permute.xlu0 %2468  ;;  %v2471_v5 = vpop.permute.xlu1 %2470 }
 0x473   : > { %5737 = vst.msk [vmem:[%s6817_s13 + $0x550] sm:$0xff] %vm1254_vm8, %v2469_v19  ;;  %5738 = vst.msk [vmem:[%s6817_s13 + $0x558] sm:$0xff] %vm1254_vm8, %v2471_v5 }
 0x474   : > { %2714 = vrot.lane.b32.xlu0 %v6862_v17, %s6155_s9  ;;  %2716 = vrot.lane.b32.xlu1 %v9555_v6, %s6155_s9 }
 0x476   : > { %v2473_v2 = vpop.permute.xlu0 %2472  ;;  %v2475_v27 = vpop.permute.xlu1 %2474 }
 0x477   : > { %5739 = vst.msk [vmem:[%s6817_s13 + $0x560] sm:$0xff] %vm1254_vm8, %v2473_v2  ;;  %5740 = vst.msk [vmem:[%s6817_s13 + $0x568] sm:$0xff] %vm1254_vm8, %v2475_v27 }
 0x478   : > { %2718 = vrot.lane.b32.xlu0 %v9556_v51, %s6155_s9  ;;  %2720 = vrot.lane.b32.xlu1 %v9557_v21, %s6155_s9 }
 0x47a   : > { %v2477_v19 = vpop.permute.xlu0 %2476  ;;  %v2479_v5 = vpop.permute.xlu1 %2478 }
 0x47b   : > { %5741 = vst.msk [vmem:[%s6817_s13 + $0x570] sm:$0xff] %vm1254_vm8, %v2477_v19  ;;  %5742 = vst.msk [vmem:[%s6817_s13 + $0x578] sm:$0xff] %vm1254_vm8, %v2479_v5 }
 0x47c   : > { %2722 = vrot.lane.b32.xlu0 %v6898_v34, %s6155_s9  ;;  %2724 = vrot.lane.b32.xlu1 %v6916_v35, %s6155_s9 }
 0x47e   : > { %v2481_v2 = vpop.permute.xlu0 %2480  ;;  %v2483_v27 = vpop.permute.xlu1 %2482 }
 0x47f   : > { %5743 = vst.msk [vmem:[%s6817_s13 + $0x580] sm:$0xff] %vm1254_vm8, %v2481_v2  ;;  %5744 = vst.msk [vmem:[%s6817_s13 + $0x588] sm:$0xff] %vm1254_vm8, %v2483_v27 }
 0x480   : > { %2726 = vrot.lane.b32.xlu0 %v6889_v31, %s6155_s9  ;;  %2728 = vrot.lane.b32.xlu1 %v6907_v40, %s6155_s9 }
 0x482   : > { %v2485_v19 = vpop.permute.xlu0 %2484  ;;  %v2487_v5 = vpop.permute.xlu1 %2486 }
 0x483   : > { %5745 = vst.msk [vmem:[%s6817_s13 + $0x590] sm:$0xff] %vm1254_vm8, %v2485_v19  ;;  %5746 = vst.msk [vmem:[%s6817_s13 + $0x598] sm:$0xff] %vm1254_vm8, %v2487_v5 }
 0x484   : > { %2730 = vrot.lane.b32.xlu0 %v9558_v11, %s6155_s9  ;;  %2732 = vrot.lane.b32.xlu1 %v9559_v61, %s6155_s9 }
 0x486   : > { %v2489_v2 = vpop.permute.xlu0 %2488  ;;  %v2491_v27 = vpop.permute.xlu1 %2490 }
 0x487   : > { %5747 = vst.msk [vmem:[%s6817_s13 + $0x5a0] sm:$0xff] %vm1254_vm8, %v2489_v2  ;;  %5748 = vst.msk [vmem:[%s6817_s13 + $0x5a8] sm:$0xff] %vm1254_vm8, %v2491_v27 }
 0x488   : > { %2734 = vrot.lane.b32.xlu0 %v9560_v43, %s6155_s9  ;;  %2736 = vrot.lane.b32.xlu1 %v9561_v47, %s6155_s9 }
 0x48a   : > { %v2493_v19 = vpop.permute.xlu0 %2492  ;;  %v2495_v5 = vpop.permute.xlu1 %2494 }
 0x48b   : > { %5749 = vst.msk [vmem:[%s6817_s13 + $0x5b0] sm:$0xff] %vm1254_vm8, %v2493_v19  ;;  %5750 = vst.msk [vmem:[%s6817_s13 + $0x5b8] sm:$0xff] %vm1254_vm8, %v2495_v5 }
 0x48c   : > { %2738 = vrot.lane.b32.xlu0 %v9562_v39, %s6155_s9  ;;  %2740 = vrot.lane.b32.xlu1 %v9563_v46, %s6155_s9 }
 0x48e   : > { %v2497_v2 = vpop.permute.xlu0 %2496  ;;  %v2499_v27 = vpop.permute.xlu1 %2498 }
 0x48f   : > { %5751 = vst.msk [vmem:[%s6817_s13 + $0x5c0] sm:$0xff] %vm1254_vm8, %v2497_v2  ;;  %5752 = vst.msk [vmem:[%s6817_s13 + $0x5c8] sm:$0xff] %vm1254_vm8, %v2499_v27 }
 0x490   : > { %2742 = vrot.lane.b32.xlu0 %v9564_v54, %s6155_s9  ;;  %2744 = vrot.lane.b32.xlu1 %v9565_v52, %s6155_s9 }
 0x492   : > { %v2501_v19 = vpop.permute.xlu0 %2500  ;;  %v2503_v5 = vpop.permute.xlu1 %2502 }
 0x493   : > { %5753 = vst.msk [vmem:[%s6817_s13 + $0x5d0] sm:$0xff] %vm1254_vm8, %v2501_v19  ;;  %5754 = vst.msk [vmem:[%s6817_s13 + $0x5d8] sm:$0xff] %vm1254_vm8, %v2503_v5 }
 0x494   : > { %2746 = vrot.lane.b32.xlu0 %v9566_v18, %s6155_s9  ;;  %2748 = vrot.lane.b32.xlu1 %v9567_v58, %s6155_s9 }
 0x496   : > { %v2505_v2 = vpop.permute.xlu0 %2504  ;;  %v2507_v27 = vpop.permute.xlu1 %2506 }
 0x497   : > { %5755 = vst.msk [vmem:[%s6817_s13 + $0x5e0] sm:$0xff] %vm1254_vm8, %v2505_v2  ;;  %5756 = vst.msk [vmem:[%s6817_s13 + $0x5e8] sm:$0xff] %vm1254_vm8, %v2507_v27 }
 0x498   : > { %2750 = vrot.lane.b32.xlu0 %v9568_v41, %s6155_s9  ;;  %2752 = vrot.lane.b32.xlu1 %v9569_v50, %s6155_s9 }
 0x49a   : > { %v2509_v19 = vpop.permute.xlu0 %2508  ;;  %v2511_v5 = vpop.permute.xlu1 %2510 }
 0x49b   : > { %5757 = vst.msk [vmem:[%s6817_s13 + $0x5f0] sm:$0xff] %vm1254_vm8, %v2509_v19  ;;  %5758 = vst.msk [vmem:[%s6817_s13 + $0x5f8] sm:$0xff] %vm1254_vm8, %v2511_v5 }
 0x49c   : > { %2754 = vrot.lane.b32.xlu0 %v9570_v26, %s6155_s9  ;;  %2756 = vrot.lane.b32.xlu1 %v9571_v37, %s6155_s9 }
 0x49e   : > { %v2578_v2 = vpop.permute.xlu0 %2577  ;;  %v2580_v27 = vpop.permute.xlu1 %2579 }
 0x49f   : > { %5759 = vst.msk [vmem:[%s6299_s8 + $0x300] sm:$0xf] %vm1221_vm6, %v2578_v2  ;;  %5760 = vst.msk [vmem:[%s6299_s8 + $0x304] sm:$0xf] %vm1221_vm6, %v2580_v27 }
 0x4a0   : > { %2758 = vrot.lane.b32.xlu0 %v9572_v7, %s6155_s9  ;;  %2760 = vrot.lane.b32.xlu1 %v9573_v45, %s6155_s9 }
 0x4a2   : > { %v2582_v19 = vpop.permute.xlu0 %2581  ;;  %v2584_v5 = vpop.permute.xlu1 %2583 }
 0x4a3   : > { %5761 = vst.msk [vmem:[%s6299_s8 + $0x308] sm:$0xf] %vm1221_vm6, %v2582_v19  ;;  %5762 = vst.msk [vmem:[%s6299_s8 + $0x30c] sm:$0xf] %vm1221_vm6, %v2584_v5 }
 0x4a4   : > { %2762 = vrot.lane.b32.xlu0 %v7078_v29, %s6155_s9  ;;  %2764 = vrot.lane.b32.xlu1 %v7096_v15, %s6155_s9 }
 0x4a6   : > { %v2586_v2 = vpop.permute.xlu0 %2585  ;;  %v2588_v27 = vpop.permute.xlu1 %2587 }
 0x4a7   : > { %5763 = vst.msk [vmem:[%s6299_s8 + $0x310] sm:$0xf] %vm1221_vm6, %v2586_v2  ;;  %5764 = vst.msk [vmem:[%s6299_s8 + $0x314] sm:$0xf] %vm1221_vm6, %v2588_v27 }
 0x4a8   : > { %2766 = vrot.lane.b32.xlu0 %v9574_v8, %s6155_s9  ;;  %2768 = vrot.lane.b32.xlu1 %v9575_v3, %s6155_s9 }
 0x4aa   : > { %v2590_v19 = vpop.permute.xlu0 %2589  ;;  %v2592_v5 = vpop.permute.xlu1 %2591 }
 0x4ab   : > { %5765 = vst.msk [vmem:[%s6299_s8 + $0x318] sm:$0xf] %vm1221_vm6, %v2590_v19  ;;  %5766 = vst.msk [vmem:[%s6299_s8 + $0x31c] sm:$0xf] %vm1221_vm6, %v2592_v5 }
 0x4ac   : > { %2835 = vrot.lane.b32.xlu0 %v9576_v22, %s6156_s10  ;;  %2837 = vrot.lane.b32.xlu1 %v9577_v56, %s6156_s10 }
 0x4ae   : > { %v2594_v2 = vpop.permute.xlu0 %2593  ;;  %v2596_v27 = vpop.permute.xlu1 %2595 }
 0x4af   : > { %5767 = vst.msk [vmem:[%s6299_s8 + $0x320] sm:$0xf] %vm1221_vm6, %v2594_v2  ;;  %5768 = vst.msk [vmem:[%s6299_s8 + $0x324] sm:$0xf] %vm1221_vm6, %v2596_v27 }
 0x4b0   : > { %2839 = vrot.lane.b32.xlu0 %v6295_v38, %s6156_s10  ;;  %2841 = vrot.lane.b32.xlu1 %v6313_v44, %s6156_s10 }
 0x4b2   : > { %v2598_v22 = vpop.permute.xlu0 %2597  ;;  %v2600_v19 = vpop.permute.xlu1 %2599 }
 0x4b3   : > { %5769 = vst.msk [vmem:[%s6299_s8 + $0x328] sm:$0xf] %vm1221_vm6, %v2598_v22  ;;  %5770 = vst.msk [vmem:[%s6299_s8 + $0x32c] sm:$0xf] %vm1221_vm6, %v2600_v19 }
 0x4b4   : > { %2843 = vrot.lane.b32.xlu0 %v6344_v55, %s6156_s10  ;;  %2845 = vrot.lane.b32.xlu1 %v6362_v63, %s6156_s10  ;;  %v9588_v63 = vld [vmem:[#allocation9_spill] sm:$0xff] }
 0x4b6   : > { %v2602_v38 = vpop.permute.xlu0 %2601  ;;  %v2604_v56 = vpop.permute.xlu1 %2603 }
 0x4b7   : > { %5771 = vst.msk [vmem:[%s6299_s8 + $0x330] sm:$0xf] %vm1221_vm6, %v2602_v38  ;;  %5772 = vst.msk [vmem:[%s6299_s8 + $0x334] sm:$0xf] %vm1221_vm6, %v2604_v56 }
 0x4b8   : > { %2847 = vrot.lane.b32.xlu0 %v9578_v23, %s6156_s10  ;;  %2849 = vrot.lane.b32.xlu1 %v9579_v59, %s6156_s10  ;;  %v9589_v59 = vld [vmem:[#allocation8_spill] sm:$0xff] }
 0x4ba   : > { %v2606_v44 = vpop.permute.xlu0 %2605  ;;  %v2608_v55 = vpop.permute.xlu1 %2607 }
 0x4bb   : > { %5773 = vst.msk [vmem:[%s6299_s8 + $0x338] sm:$0xf] %vm1221_vm6, %v2606_v44  ;;  %5774 = vst.msk [vmem:[%s6299_s8 + $0x33c] sm:$0xf] %vm1221_vm6, %v2608_v55 }
 0x4bc   : > { %2851 = vrot.lane.b32.xlu0 %v9588_v63, %s6156_s10  ;;  %2853 = vrot.lane.b32.xlu1 %v6400_v13, %s6156_s10  ;;  %v9590_v13 = vld [vmem:[#allocation11_spill] sm:$0xff] }
 0x4be   : > { %v2610_v23 = vpop.permute.xlu0 %2609  ;;  %v2612_v5 = vpop.permute.xlu1 %2611 }
 0x4bf   : > { %5775 = vst.msk [vmem:[%s6299_s8 + $0x340] sm:$0xf] %vm1221_vm6, %v2610_v23  ;;  %5776 = vst.msk [vmem:[%s6299_s8 + $0x344] sm:$0xf] %vm1221_vm6, %v2612_v5 }
 0x4c0   : > { %2855 = vrot.lane.b32.xlu0 %v9589_v59, %s6156_s10  ;;  %2857 = vrot.lane.b32.xlu1 %v9584_v14, %s6156_s10  ;;  %v9591_v14 = vld [vmem:[#allocation12_spill] sm:$0xff] }
 0x4c2   : > { %v2614_v2 = vpop.permute.xlu0 %2613  ;;  %v2616_v27 = vpop.permute.xlu1 %2615 }
 0x4c3   : > { %5777 = vst.msk [vmem:[%s6299_s8 + $0x348] sm:$0xf] %vm1221_vm6, %v2614_v2  ;;  %5778 = vst.msk [vmem:[%s6299_s8 + $0x34c] sm:$0xf] %vm1221_vm6, %v2616_v27 }
 0x4c4   : > { %2859 = vrot.lane.b32.xlu0 %v9590_v13, %s6156_s10  ;;  %2861 = vrot.lane.b32.xlu1 %v9585_v30, %s6156_s10 }
 0x4c6   : > { %v2618_v22 = vpop.permute.xlu0 %2617  ;;  %v2620_v19 = vpop.permute.xlu1 %2619 }
 0x4c7   : > { %5779 = vst.msk [vmem:[%s6299_s8 + $0x350] sm:$0xf] %vm1221_vm6, %v2618_v22  ;;  %5780 = vst.msk [vmem:[%s6299_s8 + $0x354] sm:$0xf] %vm1221_vm6, %v2620_v19 }
 0x4c8   : > { %2863 = vrot.lane.b32.xlu0 %v6408_v16, %s6156_s10  ;;  %2865 = vrot.lane.b32.xlu1 %v9591_v14, %s6156_s10 }
 0x4ca   : > { %v2622_v38 = vpop.permute.xlu0 %2621  ;;  %v2624_v56 = vpop.permute.xlu1 %2623 }
 0x4cb   : > { %5781 = vst.msk [vmem:[%s6299_s8 + $0x358] sm:$0xf] %vm1221_vm6, %v2622_v38  ;;  %5782 = vst.msk [vmem:[%s6299_s8 + $0x35c] sm:$0xf] %vm1221_vm6, %v2624_v56 }
 0x4cc   : > { %2867 = vrot.lane.b32.xlu0 %v6458_v33, %s6156_s10  ;;  %2869 = vrot.lane.b32.xlu1 %v9582_v60, %s6156_s10 }
 0x4ce   : > { %v2626_v16 = vpop.permute.xlu0 %2625  ;;  %v2628_v30 = vpop.permute.xlu1 %2627 }
 0x4cf   : > { %5783 = vst.msk [vmem:[%s6299_s8 + $0x360] sm:$0xf] %vm1221_vm6, %v2626_v16  ;;  %5784 = vst.msk [vmem:[%s6299_s8 + $0x364] sm:$0xf] %vm1221_vm6, %v2628_v30 }
 0x4d0   : > { %2871 = vrot.lane.b32.xlu0 %v9587_v48, %s6156_s10  ;;  %2873 = vrot.lane.b32.xlu1 %v9583_v36, %s6156_s10 }
 0x4d2   : > { %v2630_v33 = vpop.permute.xlu0 %2629  ;;  %v2632_v44 = vpop.permute.xlu1 %2631 }
 0x4d3   : > { %5785 = vst.msk [vmem:[%s6299_s8 + $0x368] sm:$0xf] %vm1221_vm6, %v2630_v33  ;;  %5786 = vst.msk [vmem:[%s6299_s8 + $0x36c] sm:$0xf] %vm1221_vm6, %v2632_v44 }
 0x4d4   : > { %2875 = vrot.lane.b32.xlu0 %v6496_v53, %s6156_s10  ;;  %2877 = vrot.lane.b32.xlu1 %v6514_v0, %s6156_s10 }
 0x4d6   : > { %v2634_v60 = vpop.permute.xlu0 %2633  ;;  %v2636_v48 = vpop.permute.xlu1 %2635 }
 0x4d7   : > { %5787 = vst.msk [vmem:[%s6299_s8 + $0x370] sm:$0xf] %vm1221_vm6, %v2634_v60  ;;  %5788 = vst.msk [vmem:[%s6299_s8 + $0x374] sm:$0xf] %vm1221_vm6, %v2636_v48 }
 0x4d8   : > { %2879 = vrot.lane.b32.xlu0 %v6484_v49, %s6156_s10  ;;  %2881 = vrot.lane.b32.xlu1 %v6503_v57, %s6156_s10 }
 0x4da   : > { %v2638_v53 = vpop.permute.xlu0 %2637  ;;  %v2640_v36 = vpop.permute.xlu1 %2639 }
 0x4db   : > { %5789 = vst.msk [vmem:[%s6299_s8 + $0x378] sm:$0xf] %vm1221_vm6, %v2638_v53  ;;  %5790 = vst.msk [vmem:[%s6299_s8 + $0x37c] sm:$0xf] %vm1221_vm6, %v2640_v36 }
 0x4dc   : > { %2883 = vrot.lane.b32.xlu0 %v6534_v9, %s6156_s10  ;;  %2885 = vrot.lane.b32.xlu1 %v6552_v20, %s6156_s10 }
 0x4de   : > { %v2707_v49 = vpop.permute.xlu0 %2706  ;;  %v2709_v0 = vpop.permute.xlu1 %2708 }
 0x4df   : > { %5791 = vst.msk [vmem:[%s6817_s13 + $0x600] sm:$0xff] %vm1254_vm8, %v2707_v49  ;;  %5792 = vst.msk [vmem:[%s6817_s13 + $0x608] sm:$0xff] %vm1254_vm8, %v2709_v0 }
 0x4e0   : > { %2887 = vrot.lane.b32.xlu0 %v6522_v4, %s6156_s10  ;;  %2889 = vrot.lane.b32.xlu1 %v6541_v12, %s6156_s10 }
 0x4e2   : > { %v2711_v57 = vpop.permute.xlu0 %2710  ;;  %v2713_v9 = vpop.permute.xlu1 %2712 }
 0x4e3   : > { %5793 = vst.msk [vmem:[%s6817_s13 + $0x610] sm:$0xff] %vm1254_vm8, %v2711_v57  ;;  %5794 = vst.msk [vmem:[%s6817_s13 + $0x618] sm:$0xff] %vm1254_vm8, %v2713_v9 }
 0x4e4   : > { %2891 = vrot.lane.b32.xlu0 %v6572_v28, %s6156_s10  ;;  %2893 = vrot.lane.b32.xlu1 %v6590_v42, %s6156_s10 }
 0x4e6   : > { %v2715_v20 = vpop.permute.xlu0 %2714  ;;  %v2717_v4 = vpop.permute.xlu1 %2716 }
 0x4e7   : > { %5795 = vst.msk [vmem:[%s6817_s13 + $0x620] sm:$0xff] %vm1254_vm8, %v2715_v20  ;;  %5796 = vst.msk [vmem:[%s6817_s13 + $0x628] sm:$0xff] %vm1254_vm8, %v2717_v4 }
 0x4e8   : > { %2895 = vrot.lane.b32.xlu0 %v6560_v24, %s6156_s10  ;;  %2897 = vrot.lane.b32.xlu1 %v6579_v32, %s6156_s10 }
 0x4ea   : > { %v2719_v12 = vpop.permute.xlu0 %2718  ;;  %v2721_v28 = vpop.permute.xlu1 %2720 }
 0x4eb   : > { %5797 = vst.msk [vmem:[%s6817_s13 + $0x630] sm:$0xff] %vm1254_vm8, %v2719_v12  ;;  %5798 = vst.msk [vmem:[%s6817_s13 + $0x638] sm:$0xff] %vm1254_vm8, %v2721_v28 }
 0x4ec   : > { %2964 = vrot.lane.b32.xlu0 %v6826_v1, %s6157_s11  ;;  %2966 = vrot.lane.b32.xlu1 %v6844_v10, %s6157_s11 }
 0x4ee   : > { %v2723_v24 = vpop.permute.xlu0 %2722  ;;  %v2725_v42 = vpop.permute.xlu1 %2724 }
 0x4ef   : > { %5799 = vst.msk [vmem:[%s6817_s13 + $0x640] sm:$0xff] %vm1254_vm8, %v2723_v24  ;;  %5800 = vst.msk [vmem:[%s6817_s13 + $0x648] sm:$0xff] %vm1254_vm8, %v2725_v42 }
 0x4f0   : > { %2968 = vrot.lane.b32.xlu0 %v6815_v62, %s6157_s11  ;;  %2970 = vrot.lane.b32.xlu1 %v9554_v25, %s6157_s11 }
 0x4f2   : > { %v2727_v32 = vpop.permute.xlu0 %2726  ;;  %v2729_v1 = vpop.permute.xlu1 %2728 }
 0x4f3   : > { %5801 = vst.msk [vmem:[%s6817_s13 + $0x650] sm:$0xff] %vm1254_vm8, %v2727_v32  ;;  %5802 = vst.msk [vmem:[%s6817_s13 + $0x658] sm:$0xff] %vm1254_vm8, %v2729_v1 }
 0x4f4   : > { %2972 = vrot.lane.b32.xlu0 %v6862_v17, %s6157_s11  ;;  %2974 = vrot.lane.b32.xlu1 %v9555_v6, %s6157_s11 }
 0x4f6   : > { %v2731_v62 = vpop.permute.xlu0 %2730  ;;  %v2733_v10 = vpop.permute.xlu1 %2732 }
 0x4f7   : > { %5803 = vst.msk [vmem:[%s6817_s13 + $0x660] sm:$0xff] %vm1254_vm8, %v2731_v62  ;;  %5804 = vst.msk [vmem:[%s6817_s13 + $0x668] sm:$0xff] %vm1254_vm8, %v2733_v10 }
 0x4f8   : > { %2976 = vrot.lane.b32.xlu0 %v9556_v51, %s6157_s11  ;;  %2978 = vrot.lane.b32.xlu1 %v9557_v21, %s6157_s11 }
 0x4fa   : > { %v2735_v17 = vpop.permute.xlu0 %2734  ;;  %v2737_v25 = vpop.permute.xlu1 %2736 }
 0x4fb   : > { %5805 = vst.msk [vmem:[%s6817_s13 + $0x670] sm:$0xff] %vm1254_vm8, %v2735_v17  ;;  %5806 = vst.msk [vmem:[%s6817_s13 + $0x678] sm:$0xff] %vm1254_vm8, %v2737_v25 }
 0x4fc   : > { %2980 = vrot.lane.b32.xlu0 %v6898_v34, %s6157_s11  ;;  %2982 = vrot.lane.b32.xlu1 %v6916_v35, %s6157_s11 }
 0x4fe   : > { %v2739_v6 = vpop.permute.xlu0 %2738  ;;  %v2741_v51 = vpop.permute.xlu1 %2740 }
 0x4ff   : > { %5807 = vst.msk [vmem:[%s6817_s13 + $0x680] sm:$0xff] %vm1254_vm8, %v2739_v6  ;;  %5808 = vst.msk [vmem:[%s6817_s13 + $0x688] sm:$0xff] %vm1254_vm8, %v2741_v51 }
 0x500   : > { %2984 = vrot.lane.b32.xlu0 %v6889_v31, %s6157_s11  ;;  %2986 = vrot.lane.b32.xlu1 %v6907_v40, %s6157_s11 }
 0x502   : > { %v2743_v34 = vpop.permute.xlu0 %2742  ;;  %v2745_v21 = vpop.permute.xlu1 %2744 }
 0x503   : > { %5809 = vst.msk [vmem:[%s6817_s13 + $0x690] sm:$0xff] %vm1254_vm8, %v2743_v34  ;;  %5810 = vst.msk [vmem:[%s6817_s13 + $0x698] sm:$0xff] %vm1254_vm8, %v2745_v21 }
 0x504   : > { %2988 = vrot.lane.b32.xlu0 %v9558_v11, %s6157_s11  ;;  %2990 = vrot.lane.b32.xlu1 %v9559_v61, %s6157_s11 }
 0x506   : > { %v2747_v31 = vpop.permute.xlu0 %2746  ;;  %v2749_v35 = vpop.permute.xlu1 %2748 }
 0x507   : > { %5811 = vst.msk [vmem:[%s6817_s13 + $0x6a0] sm:$0xff] %vm1254_vm8, %v2747_v31  ;;  %5812 = vst.msk [vmem:[%s6817_s13 + $0x6a8] sm:$0xff] %vm1254_vm8, %v2749_v35 }
 0x508   : > { %2992 = vrot.lane.b32.xlu0 %v9560_v43, %s6157_s11  ;;  %2994 = vrot.lane.b32.xlu1 %v9561_v47, %s6157_s11 }
 0x50a   : > { %v2751_v40 = vpop.permute.xlu0 %2750  ;;  %v2753_v11 = vpop.permute.xlu1 %2752 }
 0x50b   : > { %5813 = vst.msk [vmem:[%s6817_s13 + $0x6b0] sm:$0xff] %vm1254_vm8, %v2751_v40  ;;  %5814 = vst.msk [vmem:[%s6817_s13 + $0x6b8] sm:$0xff] %vm1254_vm8, %v2753_v11 }
 0x50c   : > { %2996 = vrot.lane.b32.xlu0 %v9562_v39, %s6157_s11  ;;  %2998 = vrot.lane.b32.xlu1 %v9563_v46, %s6157_s11 }
 0x50e   : > { %v2755_v61 = vpop.permute.xlu0 %2754  ;;  %v2757_v43 = vpop.permute.xlu1 %2756 }
 0x50f   : > { %5815 = vst.msk [vmem:[%s6817_s13 + $0x6c0] sm:$0xff] %vm1254_vm8, %v2755_v61  ;;  %5816 = vst.msk [vmem:[%s6817_s13 + $0x6c8] sm:$0xff] %vm1254_vm8, %v2757_v43 }
 0x510   : > { %3000 = vrot.lane.b32.xlu0 %v9564_v54, %s6157_s11  ;;  %3002 = vrot.lane.b32.xlu1 %v9565_v52, %s6157_s11 }
 0x512   : > { %v2759_v47 = vpop.permute.xlu0 %2758  ;;  %v2761_v39 = vpop.permute.xlu1 %2760 }
 0x513   : > { %5817 = vst.msk [vmem:[%s6817_s13 + $0x6d0] sm:$0xff] %vm1254_vm8, %v2759_v47  ;;  %5818 = vst.msk [vmem:[%s6817_s13 + $0x6d8] sm:$0xff] %vm1254_vm8, %v2761_v39 }
 0x514   : > { %3004 = vrot.lane.b32.xlu0 %v9566_v18, %s6157_s11  ;;  %3006 = vrot.lane.b32.xlu1 %v9567_v58, %s6157_s11 }
 0x516   : > { %v2763_v46 = vpop.permute.xlu0 %2762  ;;  %v2765_v54 = vpop.permute.xlu1 %2764 }
 0x517   : > { %5819 = vst.msk [vmem:[%s6817_s13 + $0x6e0] sm:$0xff] %vm1254_vm8, %v2763_v46  ;;  %5820 = vst.msk [vmem:[%s6817_s13 + $0x6e8] sm:$0xff] %vm1254_vm8, %v2765_v54 }
 0x518   : > { %3008 = vrot.lane.b32.xlu0 %v9568_v41, %s6157_s11  ;;  %3010 = vrot.lane.b32.xlu1 %v9569_v50, %s6157_s11 }
 0x51a   : > { %v2767_v52 = vpop.permute.xlu0 %2766  ;;  %v2769_v18 = vpop.permute.xlu1 %2768 }
 0x51b   : > { %5821 = vst.msk [vmem:[%s6817_s13 + $0x6f0] sm:$0xff] %vm1254_vm8, %v2767_v52  ;;  %5822 = vst.msk [vmem:[%s6817_s13 + $0x6f8] sm:$0xff] %vm1254_vm8, %v2769_v18 }
 0x51c   : > { %3012 = vrot.lane.b32.xlu0 %v9570_v26, %s6157_s11  ;;  %3014 = vrot.lane.b32.xlu1 %v9571_v37, %s6157_s11 }
 0x51e   : > { %v2836_v58 = vpop.permute.xlu0 %2835  ;;  %v2838_v41 = vpop.permute.xlu1 %2837 }
 0x51f   : > { %5823 = vst.msk [vmem:[%s6299_s8 + $0x380] sm:$0xf] %vm1221_vm6, %v2836_v58  ;;  %5824 = vst.msk [vmem:[%s6299_s8 + $0x384] sm:$0xf] %vm1221_vm6, %v2838_v41  ;;  %v3128_v58 = vld [vmem:[%s6299_s8] sm:$0xff] (%p6213_p4)   ;;  %v3132_v41 = vld [vmem:[%s6299_s8 + $0x8] sm:$0xff] (%p6213_p4)  }
 0x520   : > { %3016 = vrot.lane.b32.xlu0 %v9572_v7, %s6157_s11  ;;  %3018 = vrot.lane.b32.xlu1 %v9573_v45, %s6157_s11  ;;  %3129 = vst [vmem:[%s8658_s15] sm:$0xff] (%p6213_p4), %v3128_v58   ;;  %3133 = vst [vmem:[%s8658_s15 + $0x8] sm:$0xff] (%p6213_p4), %v3132_v41  }
 0x521   : > { %v3384_v58 = vld [vmem:[%s6299_s8 + $0x200] sm:$0xff] (%p6213_p4)   ;;  %v3388_v41 = vld [vmem:[%s6299_s8 + $0x208] sm:$0xff] (%p6213_p4)  }
 0x522   : > { %v2840_v50 = vpop.permute.xlu0 %2839  ;;  %v2842_v26 = vpop.permute.xlu1 %2841  ;;  %3385 = vst [vmem:[%s8658_s15 + $0x400] sm:$0xff] (%p6213_p4), %v3384_v58   ;;  %3389 = vst [vmem:[%s8658_s15 + $0x408] sm:$0xff] (%p6213_p4), %v3388_v41  }
 0x523   : > { %5825 = vst.msk [vmem:[%s6299_s8 + $0x388] sm:$0xf] %vm1221_vm6, %v2840_v50  ;;  %5826 = vst.msk [vmem:[%s6299_s8 + $0x38c] sm:$0xf] %vm1221_vm6, %v2842_v26  ;;  %v3136_v50 = vld [vmem:[%s6299_s8 + $0x10] sm:$0xff] (%p6213_p4)   ;;  %v3140_v26 = vld [vmem:[%s6299_s8 + $0x18] sm:$0xff] (%p6213_p4)  }
 0x524   : > { %3020 = vrot.lane.b32.xlu0 %v7078_v29, %s6157_s11  ;;  %3022 = vrot.lane.b32.xlu1 %v7096_v15, %s6157_s11  ;;  %3137 = vst [vmem:[%s8658_s15 + $0x10] sm:$0xff] (%p6213_p4), %v3136_v50   ;;  %3141 = vst [vmem:[%s8658_s15 + $0x18] sm:$0xff] (%p6213_p4), %v3140_v26  }
 0x525   : > { %v3392_v50 = vld [vmem:[%s6299_s8 + $0x210] sm:$0xff] (%p6213_p4)   ;;  %v3396_v26 = vld [vmem:[%s6299_s8 + $0x218] sm:$0xff] (%p6213_p4)  }
 0x526   : > { %v2844_v37 = vpop.permute.xlu0 %2843  ;;  %v2846_v7 = vpop.permute.xlu1 %2845  ;;  %3393 = vst [vmem:[%s8658_s15 + $0x410] sm:$0xff] (%p6213_p4), %v3392_v50   ;;  %3397 = vst [vmem:[%s8658_s15 + $0x418] sm:$0xff] (%p6213_p4), %v3396_v26  }
 0x527   : > { %5827 = vst.msk [vmem:[%s6299_s8 + $0x390] sm:$0xf] %vm1221_vm6, %v2844_v37  ;;  %5828 = vst.msk [vmem:[%s6299_s8 + $0x394] sm:$0xf] %vm1221_vm6, %v2846_v7  ;;  %v3144_v37 = vld [vmem:[%s6299_s8 + $0x20] sm:$0xff] (%p6213_p4)   ;;  %v3148_v7 = vld [vmem:[%s6299_s8 + $0x28] sm:$0xff] (%p6213_p4)  }
 0x528   : > { %3024 = vrot.lane.b32.xlu0 %v9574_v8, %s6157_s11  ;;  %3026 = vrot.lane.b32.xlu1 %v9575_v3, %s6157_s11  ;;  %3145 = vst [vmem:[%s8658_s15 + $0x20] sm:$0xff] (%p6213_p4), %v3144_v37   ;;  %3149 = vst [vmem:[%s8658_s15 + $0x28] sm:$0xff] (%p6213_p4), %v3148_v7  }
 0x529   : > { %v3400_v37 = vld [vmem:[%s6299_s8 + $0x220] sm:$0xff] (%p6213_p4)   ;;  %v3404_v7 = vld [vmem:[%s6299_s8 + $0x228] sm:$0xff] (%p6213_p4)  }
 0x52a   : > { %v2848_v29 = vpop.permute.xlu0 %2847  ;;  %v2850_v45 = vpop.permute.xlu1 %2849  ;;  %3401 = vst [vmem:[%s8658_s15 + $0x420] sm:$0xff] (%p6213_p4), %v3400_v37   ;;  %3405 = vst [vmem:[%s8658_s15 + $0x428] sm:$0xff] (%p6213_p4), %v3404_v7  }
 0x52b   : > { %5829 = vst.msk [vmem:[%s6299_s8 + $0x398] sm:$0xf] %vm1221_vm6, %v2848_v29  ;;  %5830 = vst.msk [vmem:[%s6299_s8 + $0x39c] sm:$0xf] %vm1221_vm6, %v2850_v45  ;;  %v3152_v29 = vld [vmem:[%s6299_s8 + $0x30] sm:$0xff] (%p6213_p4)   ;;  %v3156_v45 = vld [vmem:[%s6299_s8 + $0x38] sm:$0xff] (%p6213_p4)  }
 0x52c   : > { %3153 = vst [vmem:[%s8658_s15 + $0x30] sm:$0xff] (%p6213_p4), %v3152_v29   ;;  %3157 = vst [vmem:[%s8658_s15 + $0x38] sm:$0xff] (%p6213_p4), %v3156_v45   ;;  %v3408_v29 = vld [vmem:[%s6299_s8 + $0x230] sm:$0xff] (%p6213_p4)   ;;  %v3412_v45 = vld [vmem:[%s6299_s8 + $0x238] sm:$0xff] (%p6213_p4)  }
 0x52d   : > { %3409 = vst [vmem:[%s8658_s15 + $0x430] sm:$0xff] (%p6213_p4), %v3408_v29   ;;  %3413 = vst [vmem:[%s8658_s15 + $0x438] sm:$0xff] (%p6213_p4), %v3412_v45  }
 0x52e   : > { %v2852_v15 = vpop.permute.xlu0 %2851  ;;  %v2854_v55 = vpop.permute.xlu1 %2853 }
 0x52f   : > { %5831 = vst.msk [vmem:[%s6299_s8 + $0x3a0] sm:$0xf] %vm1221_vm6, %v2852_v15  ;;  %5832 = vst.msk [vmem:[%s6299_s8 + $0x3a4] sm:$0xf] %vm1221_vm6, %v2854_v55  ;;  %v3160_v15 = vld [vmem:[%s6299_s8 + $0x40] sm:$0xff] (%p6213_p4)   ;;  %v3164_v55 = vld [vmem:[%s6299_s8 + $0x48] sm:$0xff] (%p6213_p4)  }
 0x530   : > { %3161 = vst [vmem:[%s8658_s15 + $0x40] sm:$0xff] (%p6213_p4), %v3160_v15   ;;  %3165 = vst [vmem:[%s8658_s15 + $0x48] sm:$0xff] (%p6213_p4), %v3164_v55   ;;  %v3416_v15 = vld [vmem:[%s6299_s8 + $0x240] sm:$0xff] (%p6213_p4)   ;;  %v3420_v55 = vld [vmem:[%s6299_s8 + $0x248] sm:$0xff] (%p6213_p4)  }
 0x531   : > { %3417 = vst [vmem:[%s8658_s15 + $0x440] sm:$0xff] (%p6213_p4), %v3416_v15   ;;  %3421 = vst [vmem:[%s8658_s15 + $0x448] sm:$0xff] (%p6213_p4), %v3420_v55  }
 0x532   : > { %v2856_v8 = vpop.permute.xlu0 %2855  ;;  %v2858_v63 = vpop.permute.xlu1 %2857 }
 0x533   : > { %5833 = vst.msk [vmem:[%s6299_s8 + $0x3a8] sm:$0xf] %vm1221_vm6, %v2856_v8  ;;  %5834 = vst.msk [vmem:[%s6299_s8 + $0x3ac] sm:$0xf] %vm1221_vm6, %v2858_v63  ;;  %v3168_v8 = vld [vmem:[%s6299_s8 + $0x50] sm:$0xff] (%p6213_p4)   ;;  %v3172_v63 = vld [vmem:[%s6299_s8 + $0x58] sm:$0xff] (%p6213_p4)  }
 0x534   : > { %3169 = vst [vmem:[%s8658_s15 + $0x50] sm:$0xff] (%p6213_p4), %v3168_v8   ;;  %3173 = vst [vmem:[%s8658_s15 + $0x58] sm:$0xff] (%p6213_p4), %v3172_v63   ;;  %v3424_v8 = vld [vmem:[%s6299_s8 + $0x250] sm:$0xff] (%p6213_p4)   ;;  %v3428_v63 = vld [vmem:[%s6299_s8 + $0x258] sm:$0xff] (%p6213_p4)  }
 0x535   : > { %3425 = vst [vmem:[%s8658_s15 + $0x450] sm:$0xff] (%p6213_p4), %v3424_v8   ;;  %3429 = vst [vmem:[%s8658_s15 + $0x458] sm:$0xff] (%p6213_p4), %v3428_v63  }
 0x536   : > { %v2860_v3 = vpop.permute.xlu0 %2859  ;;  %v2862_v23 = vpop.permute.xlu1 %2861 }
 0x537   : > { %5835 = vst.msk [vmem:[%s6299_s8 + $0x3b0] sm:$0xf] %vm1221_vm6, %v2860_v3  ;;  %5836 = vst.msk [vmem:[%s6299_s8 + $0x3b4] sm:$0xf] %vm1221_vm6, %v2862_v23  ;;  %v3176_v3 = vld [vmem:[%s6299_s8 + $0x60] sm:$0xff] (%p6213_p4)   ;;  %v3180_v23 = vld [vmem:[%s6299_s8 + $0x68] sm:$0xff] (%p6213_p4)  }
 0x538   : > { %3177 = vst [vmem:[%s8658_s15 + $0x60] sm:$0xff] (%p6213_p4), %v3176_v3   ;;  %3181 = vst [vmem:[%s8658_s15 + $0x68] sm:$0xff] (%p6213_p4), %v3180_v23   ;;  %v3432_v3 = vld [vmem:[%s6299_s8 + $0x260] sm:$0xff] (%p6213_p4)   ;;  %v3436_v23 = vld [vmem:[%s6299_s8 + $0x268] sm:$0xff] (%p6213_p4)  }
 0x539   : > { %3433 = vst [vmem:[%s8658_s15 + $0x460] sm:$0xff] (%p6213_p4), %v3432_v3   ;;  %3437 = vst [vmem:[%s8658_s15 + $0x468] sm:$0xff] (%p6213_p4), %v3436_v23  }
 0x53a   : > { %v2864_v5 = vpop.permute.xlu0 %2863  ;;  %v2866_v59 = vpop.permute.xlu1 %2865 }
 0x53b   : > { %5837 = vst.msk [vmem:[%s6299_s8 + $0x3b8] sm:$0xf] %vm1221_vm6, %v2864_v5  ;;  %5838 = vst.msk [vmem:[%s6299_s8 + $0x3bc] sm:$0xf] %vm1221_vm6, %v2866_v59  ;;  %v3184_v5 = vld [vmem:[%s6299_s8 + $0x70] sm:$0xff] (%p6213_p4)   ;;  %v3188_v59 = vld [vmem:[%s6299_s8 + $0x78] sm:$0xff] (%p6213_p4)  }
 0x53c   : > { %3185 = vst [vmem:[%s8658_s15 + $0x70] sm:$0xff] (%p6213_p4), %v3184_v5   ;;  %3189 = vst [vmem:[%s8658_s15 + $0x78] sm:$0xff] (%p6213_p4), %v3188_v59   ;;  %v3440_v5 = vld [vmem:[%s6299_s8 + $0x270] sm:$0xff] (%p6213_p4)   ;;  %v3444_v59 = vld [vmem:[%s6299_s8 + $0x278] sm:$0xff] (%p6213_p4)  }
 0x53d   : > { %3441 = vst [vmem:[%s8658_s15 + $0x470] sm:$0xff] (%p6213_p4), %v3440_v5   ;;  %3445 = vst [vmem:[%s8658_s15 + $0x478] sm:$0xff] (%p6213_p4), %v3444_v59  }
 0x53e   : > { %v2868_v2 = vpop.permute.xlu0 %2867  ;;  %v2870_v27 = vpop.permute.xlu1 %2869 }
 0x53f   : > { %5839 = vst.msk [vmem:[%s6299_s8 + $0x3c0] sm:$0xf] %vm1221_vm6, %v2868_v2  ;;  %5840 = vst.msk [vmem:[%s6299_s8 + $0x3c4] sm:$0xf] %vm1221_vm6, %v2870_v27  ;;  %v3192_v2 = vld [vmem:[%s6299_s8 + $0x80] sm:$0xff] (%p6213_p4)   ;;  %v3196_v27 = vld [vmem:[%s6299_s8 + $0x88] sm:$0xff] (%p6213_p4)  }
 0x540   : > { %3193 = vst [vmem:[%s8658_s15 + $0x100] sm:$0xff] (%p6213_p4), %v3192_v2   ;;  %3197 = vst [vmem:[%s8658_s15 + $0x108] sm:$0xff] (%p6213_p4), %v3196_v27   ;;  %v3448_v2 = vld [vmem:[%s6299_s8 + $0x280] sm:$0xff] (%p6213_p4)   ;;  %v3452_v27 = vld [vmem:[%s6299_s8 + $0x288] sm:$0xff] (%p6213_p4)  }
 0x541   : > { %3449 = vst [vmem:[%s8658_s15 + $0x500] sm:$0xff] (%p6213_p4), %v3448_v2   ;;  %3453 = vst [vmem:[%s8658_s15 + $0x508] sm:$0xff] (%p6213_p4), %v3452_v27  }
 0x542   : > { %v2872_v13 = vpop.permute.xlu0 %2871  ;;  %v2874_v22 = vpop.permute.xlu1 %2873 }
 0x543   : > { %5841 = vst.msk [vmem:[%s6299_s8 + $0x3c8] sm:$0xf] %vm1221_vm6, %v2872_v13  ;;  %5842 = vst.msk [vmem:[%s6299_s8 + $0x3cc] sm:$0xf] %vm1221_vm6, %v2874_v22  ;;  %v3200_v13 = vld [vmem:[%s6299_s8 + $0x90] sm:$0xff] (%p6213_p4)   ;;  %v3204_v22 = vld [vmem:[%s6299_s8 + $0x98] sm:$0xff] (%p6213_p4)  }
 0x544   : > { %3201 = vst [vmem:[%s8658_s15 + $0x110] sm:$0xff] (%p6213_p4), %v3200_v13   ;;  %3205 = vst [vmem:[%s8658_s15 + $0x118] sm:$0xff] (%p6213_p4), %v3204_v22   ;;  %v3456_v13 = vld [vmem:[%s6299_s8 + $0x290] sm:$0xff] (%p6213_p4)   ;;  %v3460_v22 = vld [vmem:[%s6299_s8 + $0x298] sm:$0xff] (%p6213_p4)  }
 0x545   : > { %3457 = vst [vmem:[%s8658_s15 + $0x510] sm:$0xff] (%p6213_p4), %v3456_v13   ;;  %3461 = vst [vmem:[%s8658_s15 + $0x518] sm:$0xff] (%p6213_p4), %v3460_v22  }
 0x546   : > { %v2876_v19 = vpop.permute.xlu0 %2875  ;;  %v2878_v14 = vpop.permute.xlu1 %2877 }
 0x547   : > { %5843 = vst.msk [vmem:[%s6299_s8 + $0x3d0] sm:$0xf] %vm1221_vm6, %v2876_v19  ;;  %5844 = vst.msk [vmem:[%s6299_s8 + $0x3d4] sm:$0xf] %vm1221_vm6, %v2878_v14  ;;  %v3208_v19 = vld [vmem:[%s6299_s8 + $0xa0] sm:$0xff] (%p6213_p4)   ;;  %v3212_v14 = vld [vmem:[%s6299_s8 + $0xa8] sm:$0xff] (%p6213_p4)  }
 0x548   : > { %3209 = vst [vmem:[%s8658_s15 + $0x120] sm:$0xff] (%p6213_p4), %v3208_v19   ;;  %3213 = vst [vmem:[%s8658_s15 + $0x128] sm:$0xff] (%p6213_p4), %v3212_v14   ;;  %v3464_v19 = vld [vmem:[%s6299_s8 + $0x2a0] sm:$0xff] (%p6213_p4)   ;;  %v3468_v14 = vld [vmem:[%s6299_s8 + $0x2a8] sm:$0xff] (%p6213_p4)  }
 0x549   : > { %3465 = vst [vmem:[%s8658_s15 + $0x520] sm:$0xff] (%p6213_p4), %v3464_v19   ;;  %3469 = vst [vmem:[%s8658_s15 + $0x528] sm:$0xff] (%p6213_p4), %v3468_v14  }
 0x54a   : > { %v2880_v38 = vpop.permute.xlu0 %2879  ;;  %v2882_v56 = vpop.permute.xlu1 %2881 }
 0x54b   : > { %5845 = vst.msk [vmem:[%s6299_s8 + $0x3d8] sm:$0xf] %vm1221_vm6, %v2880_v38  ;;  %5846 = vst.msk [vmem:[%s6299_s8 + $0x3dc] sm:$0xf] %vm1221_vm6, %v2882_v56  ;;  %v3216_v38 = vld [vmem:[%s6299_s8 + $0xb0] sm:$0xff] (%p6213_p4)   ;;  %v3220_v56 = vld [vmem:[%s6299_s8 + $0xb8] sm:$0xff] (%p6213_p4)  }
 0x54c   : > { %3217 = vst [vmem:[%s8658_s15 + $0x130] sm:$0xff] (%p6213_p4), %v3216_v38   ;;  %3221 = vst [vmem:[%s8658_s15 + $0x138] sm:$0xff] (%p6213_p4), %v3220_v56   ;;  %v3472_v38 = vld [vmem:[%s6299_s8 + $0x2b0] sm:$0xff] (%p6213_p4)   ;;  %v3476_v56 = vld [vmem:[%s6299_s8 + $0x2b8] sm:$0xff] (%p6213_p4)  }
 0x54d   : > { %3473 = vst [vmem:[%s8658_s15 + $0x530] sm:$0xff] (%p6213_p4), %v3472_v38   ;;  %3477 = vst [vmem:[%s8658_s15 + $0x538] sm:$0xff] (%p6213_p4), %v3476_v56  }
 0x54e   : > { %v2884_v16 = vpop.permute.xlu0 %2883  ;;  %v2886_v30 = vpop.permute.xlu1 %2885 }
 0x54f   : > { %5847 = vst.msk [vmem:[%s6299_s8 + $0x3e0] sm:$0xf] %vm1221_vm6, %v2884_v16  ;;  %5848 = vst.msk [vmem:[%s6299_s8 + $0x3e4] sm:$0xf] %vm1221_vm6, %v2886_v30  ;;  %v3224_v16 = vld [vmem:[%s6299_s8 + $0xc0] sm:$0xff] (%p6213_p4)   ;;  %v3228_v30 = vld [vmem:[%s6299_s8 + $0xc8] sm:$0xff] (%p6213_p4)  }
 0x550   : > { %3225 = vst [vmem:[%s8658_s15 + $0x140] sm:$0xff] (%p6213_p4), %v3224_v16   ;;  %3229 = vst [vmem:[%s8658_s15 + $0x148] sm:$0xff] (%p6213_p4), %v3228_v30   ;;  %v3480_v16 = vld [vmem:[%s6299_s8 + $0x2c0] sm:$0xff] (%p6213_p4)   ;;  %v3484_v30 = vld [vmem:[%s6299_s8 + $0x2c8] sm:$0xff] (%p6213_p4)  }
 0x551   : > { %3481 = vst [vmem:[%s8658_s15 + $0x540] sm:$0xff] (%p6213_p4), %v3480_v16   ;;  %3485 = vst [vmem:[%s8658_s15 + $0x548] sm:$0xff] (%p6213_p4), %v3484_v30  }
 0x552   : > { %v2888_v33 = vpop.permute.xlu0 %2887  ;;  %v2890_v44 = vpop.permute.xlu1 %2889 }
 0x553   : > { %5849 = vst.msk [vmem:[%s6299_s8 + $0x3e8] sm:$0xf] %vm1221_vm6, %v2888_v33  ;;  %5850 = vst.msk [vmem:[%s6299_s8 + $0x3ec] sm:$0xf] %vm1221_vm6, %v2890_v44  ;;  %v3232_v33 = vld [vmem:[%s6299_s8 + $0xd0] sm:$0xff] (%p6213_p4)   ;;  %v3236_v44 = vld [vmem:[%s6299_s8 + $0xd8] sm:$0xff] (%p6213_p4)  }
 0x554   : > { %3233 = vst [vmem:[%s8658_s15 + $0x150] sm:$0xff] (%p6213_p4), %v3232_v33   ;;  %3237 = vst [vmem:[%s8658_s15 + $0x158] sm:$0xff] (%p6213_p4), %v3236_v44   ;;  %v3488_v33 = vld [vmem:[%s6299_s8 + $0x2d0] sm:$0xff] (%p6213_p4)   ;;  %v3492_v44 = vld [vmem:[%s6299_s8 + $0x2d8] sm:$0xff] (%p6213_p4)  }
 0x555   : > { %3489 = vst [vmem:[%s8658_s15 + $0x550] sm:$0xff] (%p6213_p4), %v3488_v33   ;;  %3493 = vst [vmem:[%s8658_s15 + $0x558] sm:$0xff] (%p6213_p4), %v3492_v44  }
 0x556   : > { %v2892_v60 = vpop.permute.xlu0 %2891  ;;  %v2894_v48 = vpop.permute.xlu1 %2893 }
 0x557   : > { %5851 = vst.msk [vmem:[%s6299_s8 + $0x3f0] sm:$0xf] %vm1221_vm6, %v2892_v60  ;;  %5852 = vst.msk [vmem:[%s6299_s8 + $0x3f4] sm:$0xf] %vm1221_vm6, %v2894_v48  ;;  %v3240_v60 = vld [vmem:[%s6299_s8 + $0xe0] sm:$0xff] (%p6213_p4)   ;;  %v3244_v48 = vld [vmem:[%s6299_s8 + $0xe8] sm:$0xff] (%p6213_p4)  }
 0x558   : > { %3241 = vst [vmem:[%s8658_s15 + $0x160] sm:$0xff] (%p6213_p4), %v3240_v60   ;;  %3245 = vst [vmem:[%s8658_s15 + $0x168] sm:$0xff] (%p6213_p4), %v3244_v48   ;;  %v3496_v60 = vld [vmem:[%s6299_s8 + $0x2e0] sm:$0xff] (%p6213_p4)   ;;  %v3500_v48 = vld [vmem:[%s6299_s8 + $0x2e8] sm:$0xff] (%p6213_p4)  }
 0x559   : > { %3497 = vst [vmem:[%s8658_s15 + $0x560] sm:$0xff] (%p6213_p4), %v3496_v60   ;;  %3501 = vst [vmem:[%s8658_s15 + $0x568] sm:$0xff] (%p6213_p4), %v3500_v48  }
 0x55a   : > { %v2896_v53 = vpop.permute.xlu0 %2895  ;;  %v2898_v36 = vpop.permute.xlu1 %2897 }
 0x55b   : > { %5853 = vst.msk [vmem:[%s6299_s8 + $0x3f8] sm:$0xf] %vm1221_vm6, %v2896_v53  ;;  %5854 = vst.msk [vmem:[%s6299_s8 + $0x3fc] sm:$0xf] %vm1221_vm6, %v2898_v36  ;;  %v3248_v53 = vld [vmem:[%s6299_s8 + $0xf0] sm:$0xff] (%p6213_p4)   ;;  %v3252_v36 = vld [vmem:[%s6299_s8 + $0xf8] sm:$0xff] (%p6213_p4)  }
 0x55c   : > { %3249 = vst [vmem:[%s8658_s15 + $0x170] sm:$0xff] (%p6213_p4), %v3248_v53   ;;  %3253 = vst [vmem:[%s8658_s15 + $0x178] sm:$0xff] (%p6213_p4), %v3252_v36   ;;  %v3504_v53 = vld [vmem:[%s6299_s8 + $0x2f0] sm:$0xff] (%p6213_p4)   ;;  %v3508_v36 = vld [vmem:[%s6299_s8 + $0x2f8] sm:$0xff] (%p6213_p4)  }
 0x55d   : > { %3505 = vst [vmem:[%s8658_s15 + $0x570] sm:$0xff] (%p6213_p4), %v3504_v53   ;;  %3509 = vst [vmem:[%s8658_s15 + $0x578] sm:$0xff] (%p6213_p4), %v3508_v36  }
 0x55e   : > { %v2965_v49 = vpop.permute.xlu0 %2964  ;;  %v2967_v0 = vpop.permute.xlu1 %2966 }
 0x55f   : > { %5855 = vst.msk [vmem:[%s6817_s13 + $0x700] sm:$0xff] %vm1254_vm8, %v2965_v49  ;;  %5856 = vst.msk [vmem:[%s6817_s13 + $0x708] sm:$0xff] %vm1254_vm8, %v2967_v0  ;;  %v3256_v49 = vld [vmem:[%s6299_s8 + $0x100] sm:$0xff] (%p6213_p4)   ;;  %v3260_v0 = vld [vmem:[%s6299_s8 + $0x108] sm:$0xff] (%p6213_p4)  }
 0x560   : > { %3257 = vst [vmem:[%s8658_s15 + $0x200] sm:$0xff] (%p6213_p4), %v3256_v49   ;;  %3261 = vst [vmem:[%s8658_s15 + $0x208] sm:$0xff] (%p6213_p4), %v3260_v0   ;;  %v3512_v49 = vld [vmem:[%s6299_s8 + $0x300] sm:$0xff] (%p6213_p4)   ;;  %v3516_v0 = vld [vmem:[%s6299_s8 + $0x308] sm:$0xff] (%p6213_p4)  }
 0x561   : > { %3513 = vst [vmem:[%s8658_s15 + $0x600] sm:$0xff] (%p6213_p4), %v3512_v49   ;;  %3517 = vst [vmem:[%s8658_s15 + $0x608] sm:$0xff] (%p6213_p4), %v3516_v0  }
 0x562   : > { %v2969_v57 = vpop.permute.xlu0 %2968  ;;  %v2971_v9 = vpop.permute.xlu1 %2970 }
 0x563   : > { %5857 = vst.msk [vmem:[%s6817_s13 + $0x710] sm:$0xff] %vm1254_vm8, %v2969_v57  ;;  %5858 = vst.msk [vmem:[%s6817_s13 + $0x718] sm:$0xff] %vm1254_vm8, %v2971_v9  ;;  %v3264_v57 = vld [vmem:[%s6299_s8 + $0x110] sm:$0xff] (%p6213_p4)   ;;  %v3268_v9 = vld [vmem:[%s6299_s8 + $0x118] sm:$0xff] (%p6213_p4)  }
 0x564   : > { %3265 = vst [vmem:[%s8658_s15 + $0x210] sm:$0xff] (%p6213_p4), %v3264_v57   ;;  %3269 = vst [vmem:[%s8658_s15 + $0x218] sm:$0xff] (%p6213_p4), %v3268_v9   ;;  %v3520_v57 = vld [vmem:[%s6299_s8 + $0x310] sm:$0xff] (%p6213_p4)   ;;  %v3524_v9 = vld [vmem:[%s6299_s8 + $0x318] sm:$0xff] (%p6213_p4)  }
 0x565   : > { %3521 = vst [vmem:[%s8658_s15 + $0x610] sm:$0xff] (%p6213_p4), %v3520_v57   ;;  %3525 = vst [vmem:[%s8658_s15 + $0x618] sm:$0xff] (%p6213_p4), %v3524_v9  }
 0x566   : > { %v2973_v20 = vpop.permute.xlu0 %2972  ;;  %v2975_v4 = vpop.permute.xlu1 %2974 }
 0x567   : > { %5859 = vst.msk [vmem:[%s6817_s13 + $0x720] sm:$0xff] %vm1254_vm8, %v2973_v20  ;;  %5860 = vst.msk [vmem:[%s6817_s13 + $0x728] sm:$0xff] %vm1254_vm8, %v2975_v4  ;;  %v3272_v20 = vld [vmem:[%s6299_s8 + $0x120] sm:$0xff] (%p6213_p4)   ;;  %v3276_v4 = vld [vmem:[%s6299_s8 + $0x128] sm:$0xff] (%p6213_p4)  }
 0x568   : > { %3273 = vst [vmem:[%s8658_s15 + $0x220] sm:$0xff] (%p6213_p4), %v3272_v20   ;;  %3277 = vst [vmem:[%s8658_s15 + $0x228] sm:$0xff] (%p6213_p4), %v3276_v4   ;;  %v3528_v20 = vld [vmem:[%s6299_s8 + $0x320] sm:$0xff] (%p6213_p4)   ;;  %v3532_v4 = vld [vmem:[%s6299_s8 + $0x328] sm:$0xff] (%p6213_p4)  }
 0x569   : > { %3529 = vst [vmem:[%s8658_s15 + $0x620] sm:$0xff] (%p6213_p4), %v3528_v20   ;;  %3533 = vst [vmem:[%s8658_s15 + $0x628] sm:$0xff] (%p6213_p4), %v3532_v4  }
 0x56a   : > { %v2977_v12 = vpop.permute.xlu0 %2976  ;;  %v2979_v28 = vpop.permute.xlu1 %2978 }
 0x56b   : > { %5861 = vst.msk [vmem:[%s6817_s13 + $0x730] sm:$0xff] %vm1254_vm8, %v2977_v12  ;;  %5862 = vst.msk [vmem:[%s6817_s13 + $0x738] sm:$0xff] %vm1254_vm8, %v2979_v28  ;;  %v3280_v12 = vld [vmem:[%s6299_s8 + $0x130] sm:$0xff] (%p6213_p4)   ;;  %v3284_v28 = vld [vmem:[%s6299_s8 + $0x138] sm:$0xff] (%p6213_p4)  }
 0x56c   : > { %3281 = vst [vmem:[%s8658_s15 + $0x230] sm:$0xff] (%p6213_p4), %v3280_v12   ;;  %3285 = vst [vmem:[%s8658_s15 + $0x238] sm:$0xff] (%p6213_p4), %v3284_v28   ;;  %v3536_v12 = vld [vmem:[%s6299_s8 + $0x330] sm:$0xff] (%p6213_p4)   ;;  %v3540_v28 = vld [vmem:[%s6299_s8 + $0x338] sm:$0xff] (%p6213_p4)  }
 0x56d   : > { %3537 = vst [vmem:[%s8658_s15 + $0x630] sm:$0xff] (%p6213_p4), %v3536_v12   ;;  %3541 = vst [vmem:[%s8658_s15 + $0x638] sm:$0xff] (%p6213_p4), %v3540_v28  }
 0x56e   : > { %v2981_v24 = vpop.permute.xlu0 %2980  ;;  %v2983_v42 = vpop.permute.xlu1 %2982 }
 0x56f   : > { %5863 = vst.msk [vmem:[%s6817_s13 + $0x740] sm:$0xff] %vm1254_vm8, %v2981_v24  ;;  %5864 = vst.msk [vmem:[%s6817_s13 + $0x748] sm:$0xff] %vm1254_vm8, %v2983_v42  ;;  %v3288_v24 = vld [vmem:[%s6299_s8 + $0x140] sm:$0xff] (%p6213_p4)   ;;  %v3292_v42 = vld [vmem:[%s6299_s8 + $0x148] sm:$0xff] (%p6213_p4)  }
 0x570   : > { %3289 = vst [vmem:[%s8658_s15 + $0x240] sm:$0xff] (%p6213_p4), %v3288_v24   ;;  %3293 = vst [vmem:[%s8658_s15 + $0x248] sm:$0xff] (%p6213_p4), %v3292_v42   ;;  %v3544_v24 = vld [vmem:[%s6299_s8 + $0x340] sm:$0xff] (%p6213_p4)   ;;  %v3548_v42 = vld [vmem:[%s6299_s8 + $0x348] sm:$0xff] (%p6213_p4)  }
 0x571   : > { %3545 = vst [vmem:[%s8658_s15 + $0x640] sm:$0xff] (%p6213_p4), %v3544_v24   ;;  %3549 = vst [vmem:[%s8658_s15 + $0x648] sm:$0xff] (%p6213_p4), %v3548_v42  }
 0x572   : > { %v2985_v32 = vpop.permute.xlu0 %2984  ;;  %v2987_v1 = vpop.permute.xlu1 %2986 }
 0x573   : > { %5865 = vst.msk [vmem:[%s6817_s13 + $0x750] sm:$0xff] %vm1254_vm8, %v2985_v32  ;;  %5866 = vst.msk [vmem:[%s6817_s13 + $0x758] sm:$0xff] %vm1254_vm8, %v2987_v1  ;;  %v3296_v32 = vld [vmem:[%s6299_s8 + $0x150] sm:$0xff] (%p6213_p4)   ;;  %v3300_v1 = vld [vmem:[%s6299_s8 + $0x158] sm:$0xff] (%p6213_p4)  }
 0x574   : > { %3297 = vst [vmem:[%s8658_s15 + $0x250] sm:$0xff] (%p6213_p4), %v3296_v32   ;;  %3301 = vst [vmem:[%s8658_s15 + $0x258] sm:$0xff] (%p6213_p4), %v3300_v1   ;;  %v3552_v32 = vld [vmem:[%s6299_s8 + $0x350] sm:$0xff] (%p6213_p4)   ;;  %v3556_v1 = vld [vmem:[%s6299_s8 + $0x358] sm:$0xff] (%p6213_p4)  }
 0x575   : > { %3553 = vst [vmem:[%s8658_s15 + $0x650] sm:$0xff] (%p6213_p4), %v3552_v32   ;;  %3557 = vst [vmem:[%s8658_s15 + $0x658] sm:$0xff] (%p6213_p4), %v3556_v1  }
 0x576   : > { %v2989_v62 = vpop.permute.xlu0 %2988  ;;  %v2991_v10 = vpop.permute.xlu1 %2990 }
 0x577   : > { %5867 = vst.msk [vmem:[%s6817_s13 + $0x760] sm:$0xff] %vm1254_vm8, %v2989_v62  ;;  %5868 = vst.msk [vmem:[%s6817_s13 + $0x768] sm:$0xff] %vm1254_vm8, %v2991_v10  ;;  %v3304_v62 = vld [vmem:[%s6299_s8 + $0x160] sm:$0xff] (%p6213_p4)   ;;  %v3308_v10 = vld [vmem:[%s6299_s8 + $0x168] sm:$0xff] (%p6213_p4)  }
 0x578   : > { %3305 = vst [vmem:[%s8658_s15 + $0x260] sm:$0xff] (%p6213_p4), %v3304_v62   ;;  %3309 = vst [vmem:[%s8658_s15 + $0x268] sm:$0xff] (%p6213_p4), %v3308_v10   ;;  %v3560_v62 = vld [vmem:[%s6299_s8 + $0x360] sm:$0xff] (%p6213_p4)   ;;  %v3564_v10 = vld [vmem:[%s6299_s8 + $0x368] sm:$0xff] (%p6213_p4)  }
 0x579   : > { %3561 = vst [vmem:[%s8658_s15 + $0x660] sm:$0xff] (%p6213_p4), %v3560_v62   ;;  %3565 = vst [vmem:[%s8658_s15 + $0x668] sm:$0xff] (%p6213_p4), %v3564_v10  }
 0x57a   : > { %v2993_v17 = vpop.permute.xlu0 %2992  ;;  %v2995_v25 = vpop.permute.xlu1 %2994 }
 0x57b   : > { %5869 = vst.msk [vmem:[%s6817_s13 + $0x770] sm:$0xff] %vm1254_vm8, %v2993_v17  ;;  %5870 = vst.msk [vmem:[%s6817_s13 + $0x778] sm:$0xff] %vm1254_vm8, %v2995_v25  ;;  %v3312_v17 = vld [vmem:[%s6299_s8 + $0x170] sm:$0xff] (%p6213_p4)   ;;  %v3316_v25 = vld [vmem:[%s6299_s8 + $0x178] sm:$0xff] (%p6213_p4)  }
 0x57c   : > { %3313 = vst [vmem:[%s8658_s15 + $0x270] sm:$0xff] (%p6213_p4), %v3312_v17   ;;  %3317 = vst [vmem:[%s8658_s15 + $0x278] sm:$0xff] (%p6213_p4), %v3316_v25   ;;  %v3568_v17 = vld [vmem:[%s6299_s8 + $0x370] sm:$0xff] (%p6213_p4)   ;;  %v3572_v25 = vld [vmem:[%s6299_s8 + $0x378] sm:$0xff] (%p6213_p4)  }
 0x57d   : > { %3569 = vst [vmem:[%s8658_s15 + $0x670] sm:$0xff] (%p6213_p4), %v3568_v17   ;;  %3573 = vst [vmem:[%s8658_s15 + $0x678] sm:$0xff] (%p6213_p4), %v3572_v25  }
 0x57e   : > { %v2997_v6 = vpop.permute.xlu0 %2996  ;;  %v2999_v51 = vpop.permute.xlu1 %2998 }
 0x57f   : > { %5871 = vst.msk [vmem:[%s6817_s13 + $0x780] sm:$0xff] %vm1254_vm8, %v2997_v6  ;;  %5872 = vst.msk [vmem:[%s6817_s13 + $0x788] sm:$0xff] %vm1254_vm8, %v2999_v51  ;;  %v3320_v6 = vld [vmem:[%s6299_s8 + $0x180] sm:$0xff] (%p6213_p4)   ;;  %v3324_v51 = vld [vmem:[%s6299_s8 + $0x188] sm:$0xff] (%p6213_p4)  }
 0x580   : > { %3321 = vst [vmem:[%s8658_s15 + $0x300] sm:$0xff] (%p6213_p4), %v3320_v6   ;;  %3325 = vst [vmem:[%s8658_s15 + $0x308] sm:$0xff] (%p6213_p4), %v3324_v51   ;;  %v3576_v6 = vld [vmem:[%s6299_s8 + $0x380] sm:$0xff] (%p6213_p4)   ;;  %v3580_v51 = vld [vmem:[%s6299_s8 + $0x388] sm:$0xff] (%p6213_p4)  }
 0x581   : > { %3577 = vst [vmem:[%s8658_s15 + $0x700] sm:$0xff] (%p6213_p4), %v3576_v6   ;;  %3581 = vst [vmem:[%s8658_s15 + $0x708] sm:$0xff] (%p6213_p4), %v3580_v51  }
 0x582   : > { %v3001_v34 = vpop.permute.xlu0 %3000  ;;  %v3003_v21 = vpop.permute.xlu1 %3002 }
 0x583   : > { %5873 = vst.msk [vmem:[%s6817_s13 + $0x790] sm:$0xff] %vm1254_vm8, %v3001_v34  ;;  %5874 = vst.msk [vmem:[%s6817_s13 + $0x798] sm:$0xff] %vm1254_vm8, %v3003_v21  ;;  %v3328_v34 = vld [vmem:[%s6299_s8 + $0x190] sm:$0xff] (%p6213_p4)   ;;  %v3332_v21 = vld [vmem:[%s6299_s8 + $0x198] sm:$0xff] (%p6213_p4)  }
 0x584   : > { %3329 = vst [vmem:[%s8658_s15 + $0x310] sm:$0xff] (%p6213_p4), %v3328_v34   ;;  %3333 = vst [vmem:[%s8658_s15 + $0x318] sm:$0xff] (%p6213_p4), %v3332_v21   ;;  %v3584_v34 = vld [vmem:[%s6299_s8 + $0x390] sm:$0xff] (%p6213_p4)   ;;  %v3588_v21 = vld [vmem:[%s6299_s8 + $0x398] sm:$0xff] (%p6213_p4)  }
 0x585   : > { %3585 = vst [vmem:[%s8658_s15 + $0x710] sm:$0xff] (%p6213_p4), %v3584_v34   ;;  %3589 = vst [vmem:[%s8658_s15 + $0x718] sm:$0xff] (%p6213_p4), %v3588_v21  }
 0x586   : > { %v3005_v31 = vpop.permute.xlu0 %3004  ;;  %v3007_v35 = vpop.permute.xlu1 %3006 }
 0x587   : > { %5875 = vst.msk [vmem:[%s6817_s13 + $0x7a0] sm:$0xff] %vm1254_vm8, %v3005_v31  ;;  %5876 = vst.msk [vmem:[%s6817_s13 + $0x7a8] sm:$0xff] %vm1254_vm8, %v3007_v35  ;;  %v3336_v31 = vld [vmem:[%s6299_s8 + $0x1a0] sm:$0xff] (%p6213_p4)   ;;  %v3340_v35 = vld [vmem:[%s6299_s8 + $0x1a8] sm:$0xff] (%p6213_p4)  }
 0x588   : > { %3337 = vst [vmem:[%s8658_s15 + $0x320] sm:$0xff] (%p6213_p4), %v3336_v31   ;;  %3341 = vst [vmem:[%s8658_s15 + $0x328] sm:$0xff] (%p6213_p4), %v3340_v35   ;;  %v3592_v31 = vld [vmem:[%s6299_s8 + $0x3a0] sm:$0xff] (%p6213_p4)   ;;  %v3596_v35 = vld [vmem:[%s6299_s8 + $0x3a8] sm:$0xff] (%p6213_p4)  }
 0x589   : > { %3593 = vst [vmem:[%s8658_s15 + $0x720] sm:$0xff] (%p6213_p4), %v3592_v31   ;;  %3597 = vst [vmem:[%s8658_s15 + $0x728] sm:$0xff] (%p6213_p4), %v3596_v35  }
 0x58a   : > { %v3009_v40 = vpop.permute.xlu0 %3008  ;;  %v3011_v11 = vpop.permute.xlu1 %3010 }
 0x58b   : > { %5877 = vst.msk [vmem:[%s6817_s13 + $0x7b0] sm:$0xff] %vm1254_vm8, %v3009_v40  ;;  %5878 = vst.msk [vmem:[%s6817_s13 + $0x7b8] sm:$0xff] %vm1254_vm8, %v3011_v11  ;;  %v3344_v40 = vld [vmem:[%s6299_s8 + $0x1b0] sm:$0xff] (%p6213_p4)   ;;  %v3348_v11 = vld [vmem:[%s6299_s8 + $0x1b8] sm:$0xff] (%p6213_p4)  }
 0x58c   : > { %3345 = vst [vmem:[%s8658_s15 + $0x330] sm:$0xff] (%p6213_p4), %v3344_v40   ;;  %3349 = vst [vmem:[%s8658_s15 + $0x338] sm:$0xff] (%p6213_p4), %v3348_v11   ;;  %v3600_v40 = vld [vmem:[%s6299_s8 + $0x3b0] sm:$0xff] (%p6213_p4)   ;;  %v3604_v11 = vld [vmem:[%s6299_s8 + $0x3b8] sm:$0xff] (%p6213_p4)  }
 0x58d   : > { %3601 = vst [vmem:[%s8658_s15 + $0x730] sm:$0xff] (%p6213_p4), %v3600_v40   ;;  %3605 = vst [vmem:[%s8658_s15 + $0x738] sm:$0xff] (%p6213_p4), %v3604_v11  }
 0x58e   : > { %v3013_v61 = vpop.permute.xlu0 %3012  ;;  %v3015_v43 = vpop.permute.xlu1 %3014 }
 0x58f   : > { %5879 = vst.msk [vmem:[%s6817_s13 + $0x7c0] sm:$0xff] %vm1254_vm8, %v3013_v61  ;;  %5880 = vst.msk [vmem:[%s6817_s13 + $0x7c8] sm:$0xff] %vm1254_vm8, %v3015_v43  ;;  %v3352_v61 = vld [vmem:[%s6299_s8 + $0x1c0] sm:$0xff] (%p6213_p4)   ;;  %v3356_v43 = vld [vmem:[%s6299_s8 + $0x1c8] sm:$0xff] (%p6213_p4)  }
 0x590   : > { %3353 = vst [vmem:[%s8658_s15 + $0x340] sm:$0xff] (%p6213_p4), %v3352_v61   ;;  %3357 = vst [vmem:[%s8658_s15 + $0x348] sm:$0xff] (%p6213_p4), %v3356_v43   ;;  %v3608_v61 = vld [vmem:[%s6299_s8 + $0x3c0] sm:$0xff] (%p6213_p4)   ;;  %v3612_v43 = vld [vmem:[%s6299_s8 + $0x3c8] sm:$0xff] (%p6213_p4)  }
 0x591   : > { %3609 = vst [vmem:[%s8658_s15 + $0x740] sm:$0xff] (%p6213_p4), %v3608_v61   ;;  %3613 = vst [vmem:[%s8658_s15 + $0x748] sm:$0xff] (%p6213_p4), %v3612_v43  }
 0x592   : > { %v3017_v47 = vpop.permute.xlu0 %3016  ;;  %v3019_v39 = vpop.permute.xlu1 %3018 }
 0x593   : > { %5881 = vst.msk [vmem:[%s6817_s13 + $0x7d0] sm:$0xff] %vm1254_vm8, %v3017_v47  ;;  %5882 = vst.msk [vmem:[%s6817_s13 + $0x7d8] sm:$0xff] %vm1254_vm8, %v3019_v39  ;;  %v3360_v47 = vld [vmem:[%s6299_s8 + $0x1d0] sm:$0xff] (%p6213_p4)   ;;  %v3364_v39 = vld [vmem:[%s6299_s8 + $0x1d8] sm:$0xff] (%p6213_p4)  }
 0x594   : > { %3361 = vst [vmem:[%s8658_s15 + $0x350] sm:$0xff] (%p6213_p4), %v3360_v47   ;;  %3365 = vst [vmem:[%s8658_s15 + $0x358] sm:$0xff] (%p6213_p4), %v3364_v39   ;;  %v3616_v47 = vld [vmem:[%s6299_s8 + $0x3d0] sm:$0xff] (%p6213_p4)   ;;  %v3620_v39 = vld [vmem:[%s6299_s8 + $0x3d8] sm:$0xff] (%p6213_p4)  }
 0x595   : > { %3617 = vst [vmem:[%s8658_s15 + $0x750] sm:$0xff] (%p6213_p4), %v3616_v47   ;;  %3621 = vst [vmem:[%s8658_s15 + $0x758] sm:$0xff] (%p6213_p4), %v3620_v39  }
 0x596   : > { %v3021_v46 = vpop.permute.xlu0 %3020  ;;  %v3023_v54 = vpop.permute.xlu1 %3022 }
 0x597   : > { %5883 = vst.msk [vmem:[%s6817_s13 + $0x7e0] sm:$0xff] %vm1254_vm8, %v3021_v46  ;;  %5884 = vst.msk [vmem:[%s6817_s13 + $0x7e8] sm:$0xff] %vm1254_vm8, %v3023_v54  ;;  %3108 = sbr.rel (!%p6213_p4) target bundleno = 1438 (0x59e), region = 36  ;;  %v3368_v46 = vld [vmem:[%s6299_s8 + $0x1e0] sm:$0xff] (%p6213_p4)   ;;  %v3372_v54 = vld [vmem:[%s6299_s8 + $0x1e8] sm:$0xff] (%p6213_p4)  }
 0x598   : > { %3369 = vst [vmem:[%s8658_s15 + $0x360] sm:$0xff] (%p6213_p4), %v3368_v46   ;;  %3373 = vst [vmem:[%s8658_s15 + $0x368] sm:$0xff] (%p6213_p4), %v3372_v54   ;;  %v3624_v46 = vld [vmem:[%s6299_s8 + $0x3e0] sm:$0xff] (%p6213_p4)   ;;  %v3628_v54 = vld [vmem:[%s6299_s8 + $0x3e8] sm:$0xff] (%p6213_p4)  }
 0x599   : > { %3625 = vst [vmem:[%s8658_s15 + $0x760] sm:$0xff] (%p6213_p4), %v3624_v46   ;;  %3629 = vst [vmem:[%s8658_s15 + $0x768] sm:$0xff] (%p6213_p4), %v3628_v54  }
 0x59a   : > { %v3025_v52 = vpop.permute.xlu0 %3024  ;;  %v3027_v18 = vpop.permute.xlu1 %3026 }
 0x59b   : > { %5885 = vst.msk [vmem:[%s6817_s13 + $0x7f0] sm:$0xff] %vm1254_vm8, %v3025_v52  ;;  %5886 = vst.msk [vmem:[%s6817_s13 + $0x7f8] sm:$0xff] %vm1254_vm8, %v3027_v18  ;;  %v3376_v52 = vld [vmem:[%s6299_s8 + $0x1f0] sm:$0xff] (%p6213_p4)   ;;  %v3380_v18 = vld [vmem:[%s6299_s8 + $0x1f8] sm:$0xff] (%p6213_p4)  }
 0x59c   : > { %3377 = vst [vmem:[%s8658_s15 + $0x370] sm:$0xff] %v3376_v52   ;;  %3381 = vst [vmem:[%s8658_s15 + $0x378] sm:$0xff] %v3380_v18   ;;  %v3632_v52 = vld [vmem:[%s6299_s8 + $0x3f0] sm:$0xff]   ;;  %v3636_v18 = vld [vmem:[%s6299_s8 + $0x3f8] sm:$0xff]  }
 0x59d   : > { %3633 = vst [vmem:[%s8658_s15 + $0x770] sm:$0xff] %v3632_v52   ;;  %3637 = vst [vmem:[%s8658_s15 + $0x778] sm:$0xff] %v3636_v18  }
 0x59e PF: > { %4175 = sbr.rel (!%p6213_p4) target bundleno = 1568 (0x620), region = 77  ;;  %s5928_s16 = sshll.u32 (%p6213_p4), %s6201_s21, 8  ;;  %v4717_v58 = vld [vmem:[%s6817_s13] sm:$0xff] (%p6213_p4)  ;;  %v4719_v41 = vld [vmem:[%s6817_s13 + $0x8] sm:$0xff] (%p6213_p4)  ;;  %v4721_v50 = vld [vmem:[%s6817_s13 + $0x10] sm:$0xff] (%p6213_p4) }
 0x59f   : > { %s8922_s20 = scalar_lea.vmem (%p6213_p4), %s9447_s4, %s5928_s16  ;;  %v4723_v26 = vld [vmem:[%s6817_s13 + $0x18] sm:$0xff] (%p6213_p4)  ;;  %v4725_v37 = vld [vmem:[%s6817_s13 + $0x20] sm:$0xff] (%p6213_p4)  ;;  %v4727_v7 = vld [vmem:[%s6817_s13 + $0x28] sm:$0xff] (%p6213_p4) }
 0x5a0   : > { %4718 = vst [vmem:[%s8922_s20] sm:$0xff] (%p6213_p4), %v4717_v58  ;;  %4720 = vst [vmem:[%s8922_s20 + $0x8] sm:$0xff] (%p6213_p4), %v4719_v41  ;;  %v4729_v29 = vld [vmem:[%s6817_s13 + $0x30] sm:$0xff] (%p6213_p4)  ;;  %v4731_v45 = vld [vmem:[%s6817_s13 + $0x38] sm:$0xff] (%p6213_p4) }
 0x5a1   : > { %4722 = vst [vmem:[%s8922_s20 + $0x10] sm:$0xff] (%p6213_p4), %v4721_v50  ;;  %4724 = vst [vmem:[%s8922_s20 + $0x18] sm:$0xff] (%p6213_p4), %v4723_v26  ;;  %v4733_v15 = vld [vmem:[%s6817_s13 + $0x40] sm:$0xff] (%p6213_p4)  ;;  %v4735_v55 = vld [vmem:[%s6817_s13 + $0x48] sm:$0xff] (%p6213_p4) }
 0x5a2   : > { %4726 = vst [vmem:[%s8922_s20 + $0x20] sm:$0xff] (%p6213_p4), %v4725_v37  ;;  %4728 = vst [vmem:[%s8922_s20 + $0x28] sm:$0xff] (%p6213_p4), %v4727_v7  ;;  %v4737_v8 = vld [vmem:[%s6817_s13 + $0x50] sm:$0xff] (%p6213_p4)  ;;  %v4739_v63 = vld [vmem:[%s6817_s13 + $0x58] sm:$0xff] (%p6213_p4) }
 0x5a3   : > { %4730 = vst [vmem:[%s8922_s20 + $0x30] sm:$0xff] %v4729_v29  ;;  %4732 = vst [vmem:[%s8922_s20 + $0x38] sm:$0xff] %v4731_v45  ;;  %v4741_v3 = vld [vmem:[%s6817_s13 + $0x60] sm:$0xff]  ;;  %v4743_v23 = vld [vmem:[%s6817_s13 + $0x68] sm:$0xff] }
 0x5a4   : > { %4734 = vst [vmem:[%s8922_s20 + $0x40] sm:$0xff] %v4733_v15  ;;  %4736 = vst [vmem:[%s8922_s20 + $0x48] sm:$0xff] %v4735_v55  ;;  %v4745_v5 = vld [vmem:[%s6817_s13 + $0x70] sm:$0xff]  ;;  %v4747_v59 = vld [vmem:[%s6817_s13 + $0x78] sm:$0xff] }
 0x5a5   : > { %4738 = vst [vmem:[%s8922_s20 + $0x50] sm:$0xff] %v4737_v8  ;;  %4740 = vst [vmem:[%s8922_s20 + $0x58] sm:$0xff] %v4739_v63  ;;  %v4749_v2 = vld [vmem:[%s6817_s13 + $0x80] sm:$0xff]  ;;  %v4751_v27 = vld [vmem:[%s6817_s13 + $0x88] sm:$0xff] }
 0x5a6   : > { %4742 = vst [vmem:[%s8922_s20 + $0x60] sm:$0xff] %v4741_v3  ;;  %4744 = vst [vmem:[%s8922_s20 + $0x68] sm:$0xff] %v4743_v23  ;;  %v4753_v13 = vld [vmem:[%s6817_s13 + $0x90] sm:$0xff]  ;;  %v4755_v22 = vld [vmem:[%s6817_s13 + $0x98] sm:$0xff] }
 0x5a7   : > { %4746 = vst [vmem:[%s8922_s20 + $0x70] sm:$0xff] %v4745_v5  ;;  %4748 = vst [vmem:[%s8922_s20 + $0x78] sm:$0xff] %v4747_v59  ;;  %v4757_v19 = vld [vmem:[%s6817_s13 + $0xa0] sm:$0xff]  ;;  %v4759_v14 = vld [vmem:[%s6817_s13 + $0xa8] sm:$0xff] }
 0x5a8   : > { %4750 = vst [vmem:[%s8922_s20 + $0x80] sm:$0xff] %v4749_v2  ;;  %4752 = vst [vmem:[%s8922_s20 + $0x88] sm:$0xff] %v4751_v27  ;;  %v4761_v38 = vld [vmem:[%s6817_s13 + $0xb0] sm:$0xff]  ;;  %v4763_v56 = vld [vmem:[%s6817_s13 + $0xb8] sm:$0xff] }
 0x5a9   : > { %4754 = vst [vmem:[%s8922_s20 + $0x90] sm:$0xff] %v4753_v13  ;;  %4756 = vst [vmem:[%s8922_s20 + $0x98] sm:$0xff] %v4755_v22  ;;  %v4765_v16 = vld [vmem:[%s6817_s13 + $0xc0] sm:$0xff]  ;;  %v4767_v30 = vld [vmem:[%s6817_s13 + $0xc8] sm:$0xff] }
 0x5aa   : > { %4758 = vst [vmem:[%s8922_s20 + $0xa0] sm:$0xff] %v4757_v19  ;;  %4760 = vst [vmem:[%s8922_s20 + $0xa8] sm:$0xff] %v4759_v14  ;;  %v4769_v33 = vld [vmem:[%s6817_s13 + $0xd0] sm:$0xff]  ;;  %v4771_v44 = vld [vmem:[%s6817_s13 + $0xd8] sm:$0xff] }
 0x5ab   : > { %4762 = vst [vmem:[%s8922_s20 + $0xb0] sm:$0xff] %v4761_v38  ;;  %4764 = vst [vmem:[%s8922_s20 + $0xb8] sm:$0xff] %v4763_v56  ;;  %v4773_v60 = vld [vmem:[%s6817_s13 + $0xe0] sm:$0xff]  ;;  %v4775_v48 = vld [vmem:[%s6817_s13 + $0xe8] sm:$0xff] }
 0x5ac   : > { %4766 = vst [vmem:[%s8922_s20 + $0xc0] sm:$0xff] %v4765_v16  ;;  %4768 = vst [vmem:[%s8922_s20 + $0xc8] sm:$0xff] %v4767_v30  ;;  %v4777_v53 = vld [vmem:[%s6817_s13 + $0xf0] sm:$0xff]  ;;  %v4779_v36 = vld [vmem:[%s6817_s13 + $0xf8] sm:$0xff] }
 0x5ad   : > { %4770 = vst [vmem:[%s8922_s20 + $0xd0] sm:$0xff] %v4769_v33  ;;  %4772 = vst [vmem:[%s8922_s20 + $0xd8] sm:$0xff] %v4771_v44  ;;  %v4781_v49 = vld [vmem:[%s6817_s13 + $0x100] sm:$0xff]  ;;  %v4783_v0 = vld [vmem:[%s6817_s13 + $0x108] sm:$0xff] }
 0x5ae   : > { %4774 = vst [vmem:[%s8922_s20 + $0xe0] sm:$0xff] %v4773_v60  ;;  %4776 = vst [vmem:[%s8922_s20 + $0xe8] sm:$0xff] %v4775_v48  ;;  %v4785_v57 = vld [vmem:[%s6817_s13 + $0x110] sm:$0xff]  ;;  %v4787_v9 = vld [vmem:[%s6817_s13 + $0x118] sm:$0xff] }
 0x5af   : > { %4778 = vst [vmem:[%s8922_s20 + $0xf0] sm:$0xff] %v4777_v53  ;;  %4780 = vst [vmem:[%s8922_s20 + $0xf8] sm:$0xff] %v4779_v36  ;;  %v4789_v20 = vld [vmem:[%s6817_s13 + $0x120] sm:$0xff]  ;;  %v4791_v4 = vld [vmem:[%s6817_s13 + $0x128] sm:$0xff] }
 0x5b0   : > { %4782 = vst [vmem:[%s8922_s20 + $0x200] sm:$0xff] %v4781_v49  ;;  %4784 = vst [vmem:[%s8922_s20 + $0x208] sm:$0xff] %v4783_v0  ;;  %v4793_v12 = vld [vmem:[%s6817_s13 + $0x130] sm:$0xff]  ;;  %v4795_v28 = vld [vmem:[%s6817_s13 + $0x138] sm:$0xff] }
 0x5b1   : > { %4786 = vst [vmem:[%s8922_s20 + $0x210] sm:$0xff] %v4785_v57  ;;  %4788 = vst [vmem:[%s8922_s20 + $0x218] sm:$0xff] %v4787_v9  ;;  %v4797_v24 = vld [vmem:[%s6817_s13 + $0x140] sm:$0xff]  ;;  %v4799_v42 = vld [vmem:[%s6817_s13 + $0x148] sm:$0xff] }
 0x5b2   : > { %4790 = vst [vmem:[%s8922_s20 + $0x220] sm:$0xff] %v4789_v20  ;;  %4792 = vst [vmem:[%s8922_s20 + $0x228] sm:$0xff] %v4791_v4  ;;  %v4801_v32 = vld [vmem:[%s6817_s13 + $0x150] sm:$0xff]  ;;  %v4803_v1 = vld [vmem:[%s6817_s13 + $0x158] sm:$0xff] }
 0x5b3   : > { %4794 = vst [vmem:[%s8922_s20 + $0x230] sm:$0xff] %v4793_v12  ;;  %4796 = vst [vmem:[%s8922_s20 + $0x238] sm:$0xff] %v4795_v28  ;;  %v4805_v62 = vld [vmem:[%s6817_s13 + $0x160] sm:$0xff]  ;;  %v4807_v10 = vld [vmem:[%s6817_s13 + $0x168] sm:$0xff] }
 0x5b4   : > { %4798 = vst [vmem:[%s8922_s20 + $0x240] sm:$0xff] %v4797_v24  ;;  %4800 = vst [vmem:[%s8922_s20 + $0x248] sm:$0xff] %v4799_v42  ;;  %v4809_v17 = vld [vmem:[%s6817_s13 + $0x170] sm:$0xff]  ;;  %v4811_v25 = vld [vmem:[%s6817_s13 + $0x178] sm:$0xff] }
 0x5b5   : > { %4802 = vst [vmem:[%s8922_s20 + $0x250] sm:$0xff] %v4801_v32  ;;  %4804 = vst [vmem:[%s8922_s20 + $0x258] sm:$0xff] %v4803_v1  ;;  %v4813_v6 = vld [vmem:[%s6817_s13 + $0x180] sm:$0xff]  ;;  %v4815_v51 = vld [vmem:[%s6817_s13 + $0x188] sm:$0xff] }
 0x5b6   : > { %4806 = vst [vmem:[%s8922_s20 + $0x260] sm:$0xff] %v4805_v62  ;;  %4808 = vst [vmem:[%s8922_s20 + $0x268] sm:$0xff] %v4807_v10  ;;  %v4817_v34 = vld [vmem:[%s6817_s13 + $0x190] sm:$0xff]  ;;  %v4819_v21 = vld [vmem:[%s6817_s13 + $0x198] sm:$0xff] }
 0x5b7   : > { %4810 = vst [vmem:[%s8922_s20 + $0x270] sm:$0xff] %v4809_v17  ;;  %4812 = vst [vmem:[%s8922_s20 + $0x278] sm:$0xff] %v4811_v25  ;;  %v4821_v31 = vld [vmem:[%s6817_s13 + $0x1a0] sm:$0xff]  ;;  %v4823_v35 = vld [vmem:[%s6817_s13 + $0x1a8] sm:$0xff] }
 0x5b8   : > { %4814 = vst [vmem:[%s8922_s20 + $0x280] sm:$0xff] %v4813_v6  ;;  %4816 = vst [vmem:[%s8922_s20 + $0x288] sm:$0xff] %v4815_v51  ;;  %v4825_v40 = vld [vmem:[%s6817_s13 + $0x1b0] sm:$0xff]  ;;  %v4827_v11 = vld [vmem:[%s6817_s13 + $0x1b8] sm:$0xff] }
 0x5b9   : > { %4818 = vst [vmem:[%s8922_s20 + $0x290] sm:$0xff] %v4817_v34  ;;  %4820 = vst [vmem:[%s8922_s20 + $0x298] sm:$0xff] %v4819_v21  ;;  %v4829_v61 = vld [vmem:[%s6817_s13 + $0x1c0] sm:$0xff]  ;;  %v4831_v43 = vld [vmem:[%s6817_s13 + $0x1c8] sm:$0xff] }
 0x5ba   : > { %4822 = vst [vmem:[%s8922_s20 + $0x2a0] sm:$0xff] %v4821_v31  ;;  %4824 = vst [vmem:[%s8922_s20 + $0x2a8] sm:$0xff] %v4823_v35  ;;  %v4833_v47 = vld [vmem:[%s6817_s13 + $0x1d0] sm:$0xff]  ;;  %v4835_v39 = vld [vmem:[%s6817_s13 + $0x1d8] sm:$0xff] }
 0x5bb   : > { %4826 = vst [vmem:[%s8922_s20 + $0x2b0] sm:$0xff] %v4825_v40  ;;  %4828 = vst [vmem:[%s8922_s20 + $0x2b8] sm:$0xff] %v4827_v11  ;;  %v4837_v46 = vld [vmem:[%s6817_s13 + $0x1e0] sm:$0xff]  ;;  %v4839_v54 = vld [vmem:[%s6817_s13 + $0x1e8] sm:$0xff] }
 0x5bc   : > { %4830 = vst [vmem:[%s8922_s20 + $0x2c0] sm:$0xff] %v4829_v61  ;;  %4832 = vst [vmem:[%s8922_s20 + $0x2c8] sm:$0xff] %v4831_v43  ;;  %v4841_v52 = vld [vmem:[%s6817_s13 + $0x1f0] sm:$0xff]  ;;  %v4843_v18 = vld [vmem:[%s6817_s13 + $0x1f8] sm:$0xff] }
 0x5bd   : > { %4834 = vst [vmem:[%s8922_s20 + $0x2d0] sm:$0xff] %v4833_v47  ;;  %4836 = vst [vmem:[%s8922_s20 + $0x2d8] sm:$0xff] %v4835_v39  ;;  %v4845_v58 = vld [vmem:[%s6817_s13 + $0x200] sm:$0xff]  ;;  %v4847_v41 = vld [vmem:[%s6817_s13 + $0x208] sm:$0xff] }
 0x5be   : > { %4838 = vst [vmem:[%s8922_s20 + $0x2e0] sm:$0xff] %v4837_v46  ;;  %4840 = vst [vmem:[%s8922_s20 + $0x2e8] sm:$0xff] %v4839_v54  ;;  %v4849_v50 = vld [vmem:[%s6817_s13 + $0x210] sm:$0xff]  ;;  %v4851_v26 = vld [vmem:[%s6817_s13 + $0x218] sm:$0xff] }
 0x5bf   : > { %4842 = vst [vmem:[%s8922_s20 + $0x2f0] sm:$0xff] %v4841_v52  ;;  %4844 = vst [vmem:[%s8922_s20 + $0x2f8] sm:$0xff] %v4843_v18  ;;  %v4853_v37 = vld [vmem:[%s6817_s13 + $0x220] sm:$0xff]  ;;  %v4855_v7 = vld [vmem:[%s6817_s13 + $0x228] sm:$0xff] }
 0x5c0   : > { %4846 = vst [vmem:[%s8922_s20 + $0x400] sm:$0xff] %v4845_v58  ;;  %4848 = vst [vmem:[%s8922_s20 + $0x408] sm:$0xff] %v4847_v41  ;;  %v4857_v29 = vld [vmem:[%s6817_s13 + $0x230] sm:$0xff]  ;;  %v4859_v45 = vld [vmem:[%s6817_s13 + $0x238] sm:$0xff] }
 0x5c1   : > { %4850 = vst [vmem:[%s8922_s20 + $0x410] sm:$0xff] %v4849_v50  ;;  %4852 = vst [vmem:[%s8922_s20 + $0x418] sm:$0xff] %v4851_v26  ;;  %v4861_v15 = vld [vmem:[%s6817_s13 + $0x240] sm:$0xff]  ;;  %v4863_v55 = vld [vmem:[%s6817_s13 + $0x248] sm:$0xff] }
 0x5c2   : > { %4854 = vst [vmem:[%s8922_s20 + $0x420] sm:$0xff] %v4853_v37  ;;  %4856 = vst [vmem:[%s8922_s20 + $0x428] sm:$0xff] %v4855_v7  ;;  %v4865_v8 = vld [vmem:[%s6817_s13 + $0x250] sm:$0xff]  ;;  %v4867_v63 = vld [vmem:[%s6817_s13 + $0x258] sm:$0xff] }
 0x5c3   : > { %4858 = vst [vmem:[%s8922_s20 + $0x430] sm:$0xff] %v4857_v29  ;;  %4860 = vst [vmem:[%s8922_s20 + $0x438] sm:$0xff] %v4859_v45  ;;  %v4869_v3 = vld [vmem:[%s6817_s13 + $0x260] sm:$0xff]  ;;  %v4871_v23 = vld [vmem:[%s6817_s13 + $0x268] sm:$0xff] }
 0x5c4   : > { %4862 = vst [vmem:[%s8922_s20 + $0x440] sm:$0xff] %v4861_v15  ;;  %4864 = vst [vmem:[%s8922_s20 + $0x448] sm:$0xff] %v4863_v55  ;;  %v4873_v5 = vld [vmem:[%s6817_s13 + $0x270] sm:$0xff]  ;;  %v4875_v59 = vld [vmem:[%s6817_s13 + $0x278] sm:$0xff] }
 0x5c5   : > { %4866 = vst [vmem:[%s8922_s20 + $0x450] sm:$0xff] %v4865_v8  ;;  %4868 = vst [vmem:[%s8922_s20 + $0x458] sm:$0xff] %v4867_v63  ;;  %v4877_v2 = vld [vmem:[%s6817_s13 + $0x280] sm:$0xff]  ;;  %v4879_v27 = vld [vmem:[%s6817_s13 + $0x288] sm:$0xff] }
 0x5c6   : > { %4870 = vst [vmem:[%s8922_s20 + $0x460] sm:$0xff] %v4869_v3  ;;  %4872 = vst [vmem:[%s8922_s20 + $0x468] sm:$0xff] %v4871_v23  ;;  %v4881_v13 = vld [vmem:[%s6817_s13 + $0x290] sm:$0xff]  ;;  %v4883_v22 = vld [vmem:[%s6817_s13 + $0x298] sm:$0xff] }
 0x5c7   : > { %4874 = vst [vmem:[%s8922_s20 + $0x470] sm:$0xff] %v4873_v5  ;;  %4876 = vst [vmem:[%s8922_s20 + $0x478] sm:$0xff] %v4875_v59  ;;  %v4885_v19 = vld [vmem:[%s6817_s13 + $0x2a0] sm:$0xff]  ;;  %v4887_v14 = vld [vmem:[%s6817_s13 + $0x2a8] sm:$0xff] }
 0x5c8   : > { %4878 = vst [vmem:[%s8922_s20 + $0x480] sm:$0xff] %v4877_v2  ;;  %4880 = vst [vmem:[%s8922_s20 + $0x488] sm:$0xff] %v4879_v27  ;;  %v4889_v38 = vld [vmem:[%s6817_s13 + $0x2b0] sm:$0xff]  ;;  %v4891_v56 = vld [vmem:[%s6817_s13 + $0x2b8] sm:$0xff] }
 0x5c9   : > { %4882 = vst [vmem:[%s8922_s20 + $0x490] sm:$0xff] %v4881_v13  ;;  %4884 = vst [vmem:[%s8922_s20 + $0x498] sm:$0xff] %v4883_v22  ;;  %v4893_v16 = vld [vmem:[%s6817_s13 + $0x2c0] sm:$0xff]  ;;  %v4895_v30 = vld [vmem:[%s6817_s13 + $0x2c8] sm:$0xff] }
 0x5ca   : > { %4886 = vst [vmem:[%s8922_s20 + $0x4a0] sm:$0xff] %v4885_v19  ;;  %4888 = vst [vmem:[%s8922_s20 + $0x4a8] sm:$0xff] %v4887_v14  ;;  %v4897_v33 = vld [vmem:[%s6817_s13 + $0x2d0] sm:$0xff]  ;;  %v4899_v44 = vld [vmem:[%s6817_s13 + $0x2d8] sm:$0xff] }
 0x5cb   : > { %4890 = vst [vmem:[%s8922_s20 + $0x4b0] sm:$0xff] %v4889_v38  ;;  %4892 = vst [vmem:[%s8922_s20 + $0x4b8] sm:$0xff] %v4891_v56  ;;  %v4901_v60 = vld [vmem:[%s6817_s13 + $0x2e0] sm:$0xff]  ;;  %v4903_v48 = vld [vmem:[%s6817_s13 + $0x2e8] sm:$0xff] }
 0x5cc   : > { %4894 = vst [vmem:[%s8922_s20 + $0x4c0] sm:$0xff] %v4893_v16  ;;  %4896 = vst [vmem:[%s8922_s20 + $0x4c8] sm:$0xff] %v4895_v30  ;;  %v4905_v53 = vld [vmem:[%s6817_s13 + $0x2f0] sm:$0xff]  ;;  %v4907_v36 = vld [vmem:[%s6817_s13 + $0x2f8] sm:$0xff] }
 0x5cd   : > { %4898 = vst [vmem:[%s8922_s20 + $0x4d0] sm:$0xff] %v4897_v33  ;;  %4900 = vst [vmem:[%s8922_s20 + $0x4d8] sm:$0xff] %v4899_v44  ;;  %v4909_v49 = vld [vmem:[%s6817_s13 + $0x300] sm:$0xff]  ;;  %v4911_v0 = vld [vmem:[%s6817_s13 + $0x308] sm:$0xff] }
 0x5ce   : > { %4902 = vst [vmem:[%s8922_s20 + $0x4e0] sm:$0xff] %v4901_v60  ;;  %4904 = vst [vmem:[%s8922_s20 + $0x4e8] sm:$0xff] %v4903_v48  ;;  %v4913_v57 = vld [vmem:[%s6817_s13 + $0x310] sm:$0xff]  ;;  %v4915_v9 = vld [vmem:[%s6817_s13 + $0x318] sm:$0xff] }
 0x5cf   : > { %4906 = vst [vmem:[%s8922_s20 + $0x4f0] sm:$0xff] %v4905_v53  ;;  %4908 = vst [vmem:[%s8922_s20 + $0x4f8] sm:$0xff] %v4907_v36  ;;  %v4917_v20 = vld [vmem:[%s6817_s13 + $0x320] sm:$0xff]  ;;  %v4919_v4 = vld [vmem:[%s6817_s13 + $0x328] sm:$0xff] }
 0x5d0   : > { %4910 = vst [vmem:[%s8922_s20 + $0x600] sm:$0xff] %v4909_v49  ;;  %4912 = vst [vmem:[%s8922_s20 + $0x608] sm:$0xff] %v4911_v0  ;;  %v4921_v12 = vld [vmem:[%s6817_s13 + $0x330] sm:$0xff]  ;;  %v4923_v28 = vld [vmem:[%s6817_s13 + $0x338] sm:$0xff] }
 0x5d1   : > { %4914 = vst [vmem:[%s8922_s20 + $0x610] sm:$0xff] %v4913_v57  ;;  %4916 = vst [vmem:[%s8922_s20 + $0x618] sm:$0xff] %v4915_v9  ;;  %v4925_v24 = vld [vmem:[%s6817_s13 + $0x340] sm:$0xff]  ;;  %v4927_v42 = vld [vmem:[%s6817_s13 + $0x348] sm:$0xff] }
 0x5d2   : > { %4918 = vst [vmem:[%s8922_s20 + $0x620] sm:$0xff] %v4917_v20  ;;  %4920 = vst [vmem:[%s8922_s20 + $0x628] sm:$0xff] %v4919_v4  ;;  %v4929_v32 = vld [vmem:[%s6817_s13 + $0x350] sm:$0xff]  ;;  %v4931_v1 = vld [vmem:[%s6817_s13 + $0x358] sm:$0xff] }
 0x5d3   : > { %4922 = vst [vmem:[%s8922_s20 + $0x630] sm:$0xff] %v4921_v12  ;;  %4924 = vst [vmem:[%s8922_s20 + $0x638] sm:$0xff] %v4923_v28  ;;  %v4933_v62 = vld [vmem:[%s6817_s13 + $0x360] sm:$0xff]  ;;  %v4935_v10 = vld [vmem:[%s6817_s13 + $0x368] sm:$0xff] }
 0x5d4   : > { %4926 = vst [vmem:[%s8922_s20 + $0x640] sm:$0xff] %v4925_v24  ;;  %4928 = vst [vmem:[%s8922_s20 + $0x648] sm:$0xff] %v4927_v42  ;;  %v4937_v17 = vld [vmem:[%s6817_s13 + $0x370] sm:$0xff]  ;;  %v4939_v25 = vld [vmem:[%s6817_s13 + $0x378] sm:$0xff] }
 0x5d5   : > { %4930 = vst [vmem:[%s8922_s20 + $0x650] sm:$0xff] %v4929_v32  ;;  %4932 = vst [vmem:[%s8922_s20 + $0x658] sm:$0xff] %v4931_v1  ;;  %v4941_v6 = vld [vmem:[%s6817_s13 + $0x380] sm:$0xff]  ;;  %v4943_v51 = vld [vmem:[%s6817_s13 + $0x388] sm:$0xff] }
 0x5d6   : > { %4934 = vst [vmem:[%s8922_s20 + $0x660] sm:$0xff] %v4933_v62  ;;  %4936 = vst [vmem:[%s8922_s20 + $0x668] sm:$0xff] %v4935_v10  ;;  %v4945_v34 = vld [vmem:[%s6817_s13 + $0x390] sm:$0xff]  ;;  %v4947_v21 = vld [vmem:[%s6817_s13 + $0x398] sm:$0xff] }
 0x5d7   : > { %4938 = vst [vmem:[%s8922_s20 + $0x670] sm:$0xff] %v4937_v17  ;;  %4940 = vst [vmem:[%s8922_s20 + $0x678] sm:$0xff] %v4939_v25  ;;  %v4949_v31 = vld [vmem:[%s6817_s13 + $0x3a0] sm:$0xff]  ;;  %v4951_v35 = vld [vmem:[%s6817_s13 + $0x3a8] sm:$0xff] }
 0x5d8   : > { %4942 = vst [vmem:[%s8922_s20 + $0x680] sm:$0xff] %v4941_v6  ;;  %4944 = vst [vmem:[%s8922_s20 + $0x688] sm:$0xff] %v4943_v51  ;;  %v4953_v40 = vld [vmem:[%s6817_s13 + $0x3b0] sm:$0xff]  ;;  %v4955_v11 = vld [vmem:[%s6817_s13 + $0x3b8] sm:$0xff] }
 0x5d9   : > { %4946 = vst [vmem:[%s8922_s20 + $0x690] sm:$0xff] %v4945_v34  ;;  %4948 = vst [vmem:[%s8922_s20 + $0x698] sm:$0xff] %v4947_v21  ;;  %v4957_v61 = vld [vmem:[%s6817_s13 + $0x3c0] sm:$0xff]  ;;  %v4959_v43 = vld [vmem:[%s6817_s13 + $0x3c8] sm:$0xff] }
 0x5da   : > { %4950 = vst [vmem:[%s8922_s20 + $0x6a0] sm:$0xff] %v4949_v31  ;;  %4952 = vst [vmem:[%s8922_s20 + $0x6a8] sm:$0xff] %v4951_v35  ;;  %v4961_v47 = vld [vmem:[%s6817_s13 + $0x3d0] sm:$0xff]  ;;  %v4963_v39 = vld [vmem:[%s6817_s13 + $0x3d8] sm:$0xff] }
 0x5db   : > { %4954 = vst [vmem:[%s8922_s20 + $0x6b0] sm:$0xff] %v4953_v40  ;;  %4956 = vst [vmem:[%s8922_s20 + $0x6b8] sm:$0xff] %v4955_v11  ;;  %v4965_v46 = vld [vmem:[%s6817_s13 + $0x3e0] sm:$0xff]  ;;  %v4967_v54 = vld [vmem:[%s6817_s13 + $0x3e8] sm:$0xff] }
 0x5dc   : > { %4958 = vst [vmem:[%s8922_s20 + $0x6c0] sm:$0xff] %v4957_v61  ;;  %4960 = vst [vmem:[%s8922_s20 + $0x6c8] sm:$0xff] %v4959_v43  ;;  %v4969_v52 = vld [vmem:[%s6817_s13 + $0x3f0] sm:$0xff]  ;;  %v4971_v18 = vld [vmem:[%s6817_s13 + $0x3f8] sm:$0xff] }
 0x5dd   : > { %4962 = vst [vmem:[%s8922_s20 + $0x6d0] sm:$0xff] %v4961_v47  ;;  %4964 = vst [vmem:[%s8922_s20 + $0x6d8] sm:$0xff] %v4963_v39  ;;  %v4973_v58 = vld [vmem:[%s6817_s13 + $0x400] sm:$0xff]  ;;  %v4975_v41 = vld [vmem:[%s6817_s13 + $0x408] sm:$0xff] }
 0x5de   : > { %4966 = vst [vmem:[%s8922_s20 + $0x6e0] sm:$0xff] %v4965_v46  ;;  %4968 = vst [vmem:[%s8922_s20 + $0x6e8] sm:$0xff] %v4967_v54  ;;  %v4977_v50 = vld [vmem:[%s6817_s13 + $0x410] sm:$0xff]  ;;  %v4979_v26 = vld [vmem:[%s6817_s13 + $0x418] sm:$0xff] }
 0x5df   : > { %4970 = vst [vmem:[%s8922_s20 + $0x6f0] sm:$0xff] %v4969_v52  ;;  %4972 = vst [vmem:[%s8922_s20 + $0x6f8] sm:$0xff] %v4971_v18  ;;  %v4981_v37 = vld [vmem:[%s6817_s13 + $0x420] sm:$0xff]  ;;  %v4983_v7 = vld [vmem:[%s6817_s13 + $0x428] sm:$0xff] }
 0x5e0   : > { %4974 = vst [vmem:[%s8922_s20 + $0x800] sm:$0xff] %v4973_v58  ;;  %4976 = vst [vmem:[%s8922_s20 + $0x808] sm:$0xff] %v4975_v41  ;;  %v4985_v29 = vld [vmem:[%s6817_s13 + $0x430] sm:$0xff]  ;;  %v4987_v45 = vld [vmem:[%s6817_s13 + $0x438] sm:$0xff] }
 0x5e1   : > { %4978 = vst [vmem:[%s8922_s20 + $0x810] sm:$0xff] %v4977_v50  ;;  %4980 = vst [vmem:[%s8922_s20 + $0x818] sm:$0xff] %v4979_v26  ;;  %v4989_v15 = vld [vmem:[%s6817_s13 + $0x440] sm:$0xff]  ;;  %v4991_v55 = vld [vmem:[%s6817_s13 + $0x448] sm:$0xff] }
 0x5e2   : > { %4982 = vst [vmem:[%s8922_s20 + $0x820] sm:$0xff] %v4981_v37  ;;  %4984 = vst [vmem:[%s8922_s20 + $0x828] sm:$0xff] %v4983_v7  ;;  %v4993_v8 = vld [vmem:[%s6817_s13 + $0x450] sm:$0xff]  ;;  %v4995_v63 = vld [vmem:[%s6817_s13 + $0x458] sm:$0xff] }
 0x5e3   : > { %4986 = vst [vmem:[%s8922_s20 + $0x830] sm:$0xff] %v4985_v29  ;;  %4988 = vst [vmem:[%s8922_s20 + $0x838] sm:$0xff] %v4987_v45  ;;  %v4997_v3 = vld [vmem:[%s6817_s13 + $0x460] sm:$0xff]  ;;  %v4999_v23 = vld [vmem:[%s6817_s13 + $0x468] sm:$0xff] }
 0x5e4   : > { %4990 = vst [vmem:[%s8922_s20 + $0x840] sm:$0xff] %v4989_v15  ;;  %4992 = vst [vmem:[%s8922_s20 + $0x848] sm:$0xff] %v4991_v55  ;;  %v5001_v5 = vld [vmem:[%s6817_s13 + $0x470] sm:$0xff]  ;;  %v5003_v59 = vld [vmem:[%s6817_s13 + $0x478] sm:$0xff] }
 0x5e5   : > { %4994 = vst [vmem:[%s8922_s20 + $0x850] sm:$0xff] %v4993_v8  ;;  %4996 = vst [vmem:[%s8922_s20 + $0x858] sm:$0xff] %v4995_v63  ;;  %v5005_v2 = vld [vmem:[%s6817_s13 + $0x480] sm:$0xff]  ;;  %v5007_v27 = vld [vmem:[%s6817_s13 + $0x488] sm:$0xff] }
 0x5e6   : > { %4998 = vst [vmem:[%s8922_s20 + $0x860] sm:$0xff] %v4997_v3  ;;  %5000 = vst [vmem:[%s8922_s20 + $0x868] sm:$0xff] %v4999_v23  ;;  %v5009_v13 = vld [vmem:[%s6817_s13 + $0x490] sm:$0xff]  ;;  %v5011_v22 = vld [vmem:[%s6817_s13 + $0x498] sm:$0xff] }
 0x5e7   : > { %5002 = vst [vmem:[%s8922_s20 + $0x870] sm:$0xff] %v5001_v5  ;;  %5004 = vst [vmem:[%s8922_s20 + $0x878] sm:$0xff] %v5003_v59  ;;  %v5013_v19 = vld [vmem:[%s6817_s13 + $0x4a0] sm:$0xff]  ;;  %v5015_v14 = vld [vmem:[%s6817_s13 + $0x4a8] sm:$0xff] }
 0x5e8   : > { %5006 = vst [vmem:[%s8922_s20 + $0x880] sm:$0xff] %v5005_v2  ;;  %5008 = vst [vmem:[%s8922_s20 + $0x888] sm:$0xff] %v5007_v27  ;;  %v5017_v38 = vld [vmem:[%s6817_s13 + $0x4b0] sm:$0xff]  ;;  %v5019_v56 = vld [vmem:[%s6817_s13 + $0x4b8] sm:$0xff] }
 0x5e9   : > { %5010 = vst [vmem:[%s8922_s20 + $0x890] sm:$0xff] %v5009_v13  ;;  %5012 = vst [vmem:[%s8922_s20 + $0x898] sm:$0xff] %v5011_v22  ;;  %v5021_v16 = vld [vmem:[%s6817_s13 + $0x4c0] sm:$0xff]  ;;  %v5023_v30 = vld [vmem:[%s6817_s13 + $0x4c8] sm:$0xff] }
 0x5ea   : > { %5014 = vst [vmem:[%s8922_s20 + $0x8a0] sm:$0xff] %v5013_v19  ;;  %5016 = vst [vmem:[%s8922_s20 + $0x8a8] sm:$0xff] %v5015_v14  ;;  %v5025_v33 = vld [vmem:[%s6817_s13 + $0x4d0] sm:$0xff]  ;;  %v5027_v44 = vld [vmem:[%s6817_s13 + $0x4d8] sm:$0xff] }
 0x5eb   : > { %5018 = vst [vmem:[%s8922_s20 + $0x8b0] sm:$0xff] %v5017_v38  ;;  %5020 = vst [vmem:[%s8922_s20 + $0x8b8] sm:$0xff] %v5019_v56  ;;  %v5029_v60 = vld [vmem:[%s6817_s13 + $0x4e0] sm:$0xff]  ;;  %v5031_v48 = vld [vmem:[%s6817_s13 + $0x4e8] sm:$0xff] }
 0x5ec   : > { %5022 = vst [vmem:[%s8922_s20 + $0x8c0] sm:$0xff] %v5021_v16  ;;  %5024 = vst [vmem:[%s8922_s20 + $0x8c8] sm:$0xff] %v5023_v30  ;;  %v5033_v53 = vld [vmem:[%s6817_s13 + $0x4f0] sm:$0xff]  ;;  %v5035_v36 = vld [vmem:[%s6817_s13 + $0x4f8] sm:$0xff] }
 0x5ed   : > { %5026 = vst [vmem:[%s8922_s20 + $0x8d0] sm:$0xff] %v5025_v33  ;;  %5028 = vst [vmem:[%s8922_s20 + $0x8d8] sm:$0xff] %v5027_v44  ;;  %v5037_v49 = vld [vmem:[%s6817_s13 + $0x500] sm:$0xff]  ;;  %v5039_v0 = vld [vmem:[%s6817_s13 + $0x508] sm:$0xff] }
 0x5ee   : > { %5030 = vst [vmem:[%s8922_s20 + $0x8e0] sm:$0xff] %v5029_v60  ;;  %5032 = vst [vmem:[%s8922_s20 + $0x8e8] sm:$0xff] %v5031_v48  ;;  %v5041_v57 = vld [vmem:[%s6817_s13 + $0x510] sm:$0xff]  ;;  %v5043_v9 = vld [vmem:[%s6817_s13 + $0x518] sm:$0xff] }
 0x5ef   : > { %5034 = vst [vmem:[%s8922_s20 + $0x8f0] sm:$0xff] %v5033_v53  ;;  %5036 = vst [vmem:[%s8922_s20 + $0x8f8] sm:$0xff] %v5035_v36  ;;  %v5045_v20 = vld [vmem:[%s6817_s13 + $0x520] sm:$0xff]  ;;  %v5047_v4 = vld [vmem:[%s6817_s13 + $0x528] sm:$0xff] }
 0x5f0   : > { %5038 = vst [vmem:[%s8922_s20 + $0xa00] sm:$0xff] %v5037_v49  ;;  %5040 = vst [vmem:[%s8922_s20 + $0xa08] sm:$0xff] %v5039_v0  ;;  %v5049_v12 = vld [vmem:[%s6817_s13 + $0x530] sm:$0xff]  ;;  %v5051_v28 = vld [vmem:[%s6817_s13 + $0x538] sm:$0xff] }
 0x5f1   : > { %5042 = vst [vmem:[%s8922_s20 + $0xa10] sm:$0xff] %v5041_v57  ;;  %5044 = vst [vmem:[%s8922_s20 + $0xa18] sm:$0xff] %v5043_v9  ;;  %v5053_v24 = vld [vmem:[%s6817_s13 + $0x540] sm:$0xff]  ;;  %v5055_v42 = vld [vmem:[%s6817_s13 + $0x548] sm:$0xff] }
 0x5f2   : > { %5046 = vst [vmem:[%s8922_s20 + $0xa20] sm:$0xff] %v5045_v20  ;;  %5048 = vst [vmem:[%s8922_s20 + $0xa28] sm:$0xff] %v5047_v4  ;;  %v5057_v32 = vld [vmem:[%s6817_s13 + $0x550] sm:$0xff]  ;;  %v5059_v1 = vld [vmem:[%s6817_s13 + $0x558] sm:$0xff] }
 0x5f3   : > { %5050 = vst [vmem:[%s8922_s20 + $0xa30] sm:$0xff] %v5049_v12  ;;  %5052 = vst [vmem:[%s8922_s20 + $0xa38] sm:$0xff] %v5051_v28  ;;  %v5061_v62 = vld [vmem:[%s6817_s13 + $0x560] sm:$0xff]  ;;  %v5063_v10 = vld [vmem:[%s6817_s13 + $0x568] sm:$0xff] }
 0x5f4   : > { %5054 = vst [vmem:[%s8922_s20 + $0xa40] sm:$0xff] %v5053_v24  ;;  %5056 = vst [vmem:[%s8922_s20 + $0xa48] sm:$0xff] %v5055_v42  ;;  %v5065_v17 = vld [vmem:[%s6817_s13 + $0x570] sm:$0xff]  ;;  %v5067_v25 = vld [vmem:[%s6817_s13 + $0x578] sm:$0xff] }
 0x5f5   : > { %5058 = vst [vmem:[%s8922_s20 + $0xa50] sm:$0xff] %v5057_v32  ;;  %5060 = vst [vmem:[%s8922_s20 + $0xa58] sm:$0xff] %v5059_v1  ;;  %v5069_v6 = vld [vmem:[%s6817_s13 + $0x580] sm:$0xff]  ;;  %v5071_v51 = vld [vmem:[%s6817_s13 + $0x588] sm:$0xff] }
 0x5f6   : > { %5062 = vst [vmem:[%s8922_s20 + $0xa60] sm:$0xff] %v5061_v62  ;;  %5064 = vst [vmem:[%s8922_s20 + $0xa68] sm:$0xff] %v5063_v10  ;;  %v5073_v34 = vld [vmem:[%s6817_s13 + $0x590] sm:$0xff]  ;;  %v5075_v21 = vld [vmem:[%s6817_s13 + $0x598] sm:$0xff] }
 0x5f7   : > { %5066 = vst [vmem:[%s8922_s20 + $0xa70] sm:$0xff] %v5065_v17  ;;  %5068 = vst [vmem:[%s8922_s20 + $0xa78] sm:$0xff] %v5067_v25  ;;  %v5077_v31 = vld [vmem:[%s6817_s13 + $0x5a0] sm:$0xff]  ;;  %v5079_v35 = vld [vmem:[%s6817_s13 + $0x5a8] sm:$0xff] }
 0x5f8   : > { %5070 = vst [vmem:[%s8922_s20 + $0xa80] sm:$0xff] %v5069_v6  ;;  %5072 = vst [vmem:[%s8922_s20 + $0xa88] sm:$0xff] %v5071_v51  ;;  %v5081_v40 = vld [vmem:[%s6817_s13 + $0x5b0] sm:$0xff]  ;;  %v5083_v11 = vld [vmem:[%s6817_s13 + $0x5b8] sm:$0xff] }
 0x5f9   : > { %5074 = vst [vmem:[%s8922_s20 + $0xa90] sm:$0xff] %v5073_v34  ;;  %5076 = vst [vmem:[%s8922_s20 + $0xa98] sm:$0xff] %v5075_v21  ;;  %v5085_v61 = vld [vmem:[%s6817_s13 + $0x5c0] sm:$0xff]  ;;  %v5087_v43 = vld [vmem:[%s6817_s13 + $0x5c8] sm:$0xff] }
 0x5fa   : > { %5078 = vst [vmem:[%s8922_s20 + $0xaa0] sm:$0xff] %v5077_v31  ;;  %5080 = vst [vmem:[%s8922_s20 + $0xaa8] sm:$0xff] %v5079_v35  ;;  %v5089_v47 = vld [vmem:[%s6817_s13 + $0x5d0] sm:$0xff]  ;;  %v5091_v39 = vld [vmem:[%s6817_s13 + $0x5d8] sm:$0xff] }
 0x5fb   : > { %5082 = vst [vmem:[%s8922_s20 + $0xab0] sm:$0xff] %v5081_v40  ;;  %5084 = vst [vmem:[%s8922_s20 + $0xab8] sm:$0xff] %v5083_v11  ;;  %v5093_v46 = vld [vmem:[%s6817_s13 + $0x5e0] sm:$0xff]  ;;  %v5095_v54 = vld [vmem:[%s6817_s13 + $0x5e8] sm:$0xff] }
 0x5fc   : > { %5086 = vst [vmem:[%s8922_s20 + $0xac0] sm:$0xff] %v5085_v61  ;;  %5088 = vst [vmem:[%s8922_s20 + $0xac8] sm:$0xff] %v5087_v43  ;;  %v5097_v52 = vld [vmem:[%s6817_s13 + $0x5f0] sm:$0xff]  ;;  %v5099_v18 = vld [vmem:[%s6817_s13 + $0x5f8] sm:$0xff] }
 0x5fd   : > { %5090 = vst [vmem:[%s8922_s20 + $0xad0] sm:$0xff] %v5089_v47  ;;  %5092 = vst [vmem:[%s8922_s20 + $0xad8] sm:$0xff] %v5091_v39  ;;  %v5101_v58 = vld [vmem:[%s6817_s13 + $0x600] sm:$0xff]  ;;  %v5103_v41 = vld [vmem:[%s6817_s13 + $0x608] sm:$0xff] }
 0x5fe   : > { %5094 = vst [vmem:[%s8922_s20 + $0xae0] sm:$0xff] %v5093_v46  ;;  %5096 = vst [vmem:[%s8922_s20 + $0xae8] sm:$0xff] %v5095_v54  ;;  %v5105_v50 = vld [vmem:[%s6817_s13 + $0x610] sm:$0xff]  ;;  %v5107_v26 = vld [vmem:[%s6817_s13 + $0x618] sm:$0xff] }
 0x5ff   : > { %5098 = vst [vmem:[%s8922_s20 + $0xaf0] sm:$0xff] %v5097_v52  ;;  %5100 = vst [vmem:[%s8922_s20 + $0xaf8] sm:$0xff] %v5099_v18  ;;  %v5109_v37 = vld [vmem:[%s6817_s13 + $0x620] sm:$0xff]  ;;  %v5111_v7 = vld [vmem:[%s6817_s13 + $0x628] sm:$0xff] }
 0x600   : > { %5102 = vst [vmem:[%s8922_s20 + $0xc00] sm:$0xff] %v5101_v58  ;;  %5104 = vst [vmem:[%s8922_s20 + $0xc08] sm:$0xff] %v5103_v41  ;;  %v5113_v29 = vld [vmem:[%s6817_s13 + $0x630] sm:$0xff]  ;;  %v5115_v45 = vld [vmem:[%s6817_s13 + $0x638] sm:$0xff] }
 0x601   : > { %5106 = vst [vmem:[%s8922_s20 + $0xc10] sm:$0xff] %v5105_v50  ;;  %5108 = vst [vmem:[%s8922_s20 + $0xc18] sm:$0xff] %v5107_v26  ;;  %v5117_v15 = vld [vmem:[%s6817_s13 + $0x640] sm:$0xff]  ;;  %v5119_v55 = vld [vmem:[%s6817_s13 + $0x648] sm:$0xff] }
 0x602   : > { %5110 = vst [vmem:[%s8922_s20 + $0xc20] sm:$0xff] %v5109_v37  ;;  %5112 = vst [vmem:[%s8922_s20 + $0xc28] sm:$0xff] %v5111_v7  ;;  %v5121_v8 = vld [vmem:[%s6817_s13 + $0x650] sm:$0xff]  ;;  %v5123_v63 = vld [vmem:[%s6817_s13 + $0x658] sm:$0xff] }
 0x603   : > { %5114 = vst [vmem:[%s8922_s20 + $0xc30] sm:$0xff] %v5113_v29  ;;  %5116 = vst [vmem:[%s8922_s20 + $0xc38] sm:$0xff] %v5115_v45  ;;  %v5125_v3 = vld [vmem:[%s6817_s13 + $0x660] sm:$0xff]  ;;  %v5127_v23 = vld [vmem:[%s6817_s13 + $0x668] sm:$0xff] }
 0x604   : > { %5118 = vst [vmem:[%s8922_s20 + $0xc40] sm:$0xff] %v5117_v15  ;;  %5120 = vst [vmem:[%s8922_s20 + $0xc48] sm:$0xff] %v5119_v55  ;;  %v5129_v5 = vld [vmem:[%s6817_s13 + $0x670] sm:$0xff]  ;;  %v5131_v59 = vld [vmem:[%s6817_s13 + $0x678] sm:$0xff] }
 0x605   : > { %5122 = vst [vmem:[%s8922_s20 + $0xc50] sm:$0xff] %v5121_v8  ;;  %5124 = vst [vmem:[%s8922_s20 + $0xc58] sm:$0xff] %v5123_v63  ;;  %v5133_v2 = vld [vmem:[%s6817_s13 + $0x680] sm:$0xff]  ;;  %v5135_v27 = vld [vmem:[%s6817_s13 + $0x688] sm:$0xff] }
 0x606   : > { %5126 = vst [vmem:[%s8922_s20 + $0xc60] sm:$0xff] %v5125_v3  ;;  %5128 = vst [vmem:[%s8922_s20 + $0xc68] sm:$0xff] %v5127_v23  ;;  %v5137_v13 = vld [vmem:[%s6817_s13 + $0x690] sm:$0xff]  ;;  %v5139_v22 = vld [vmem:[%s6817_s13 + $0x698] sm:$0xff] }
 0x607   : > { %5130 = vst [vmem:[%s8922_s20 + $0xc70] sm:$0xff] %v5129_v5  ;;  %5132 = vst [vmem:[%s8922_s20 + $0xc78] sm:$0xff] %v5131_v59  ;;  %v5141_v19 = vld [vmem:[%s6817_s13 + $0x6a0] sm:$0xff]  ;;  %v5143_v14 = vld [vmem:[%s6817_s13 + $0x6a8] sm:$0xff] }
 0x608   : > { %5134 = vst [vmem:[%s8922_s20 + $0xc80] sm:$0xff] %v5133_v2  ;;  %5136 = vst [vmem:[%s8922_s20 + $0xc88] sm:$0xff] %v5135_v27  ;;  %v5145_v38 = vld [vmem:[%s6817_s13 + $0x6b0] sm:$0xff]  ;;  %v5147_v56 = vld [vmem:[%s6817_s13 + $0x6b8] sm:$0xff] }
 0x609   : > { %5138 = vst [vmem:[%s8922_s20 + $0xc90] sm:$0xff] %v5137_v13  ;;  %5140 = vst [vmem:[%s8922_s20 + $0xc98] sm:$0xff] %v5139_v22  ;;  %v5149_v16 = vld [vmem:[%s6817_s13 + $0x6c0] sm:$0xff]  ;;  %v5151_v30 = vld [vmem:[%s6817_s13 + $0x6c8] sm:$0xff] }
 0x60a   : > { %5142 = vst [vmem:[%s8922_s20 + $0xca0] sm:$0xff] %v5141_v19  ;;  %5144 = vst [vmem:[%s8922_s20 + $0xca8] sm:$0xff] %v5143_v14  ;;  %v5153_v33 = vld [vmem:[%s6817_s13 + $0x6d0] sm:$0xff]  ;;  %v5155_v44 = vld [vmem:[%s6817_s13 + $0x6d8] sm:$0xff] }
 0x60b   : > { %5146 = vst [vmem:[%s8922_s20 + $0xcb0] sm:$0xff] %v5145_v38  ;;  %5148 = vst [vmem:[%s8922_s20 + $0xcb8] sm:$0xff] %v5147_v56  ;;  %v5157_v60 = vld [vmem:[%s6817_s13 + $0x6e0] sm:$0xff]  ;;  %v5159_v48 = vld [vmem:[%s6817_s13 + $0x6e8] sm:$0xff] }
 0x60c   : > { %5150 = vst [vmem:[%s8922_s20 + $0xcc0] sm:$0xff] %v5149_v16  ;;  %5152 = vst [vmem:[%s8922_s20 + $0xcc8] sm:$0xff] %v5151_v30  ;;  %v5161_v53 = vld [vmem:[%s6817_s13 + $0x6f0] sm:$0xff]  ;;  %v5163_v36 = vld [vmem:[%s6817_s13 + $0x6f8] sm:$0xff] }
 0x60d   : > { %5154 = vst [vmem:[%s8922_s20 + $0xcd0] sm:$0xff] %v5153_v33  ;;  %5156 = vst [vmem:[%s8922_s20 + $0xcd8] sm:$0xff] %v5155_v44  ;;  %v5165_v49 = vld [vmem:[%s6817_s13 + $0x700] sm:$0xff]  ;;  %v5167_v0 = vld [vmem:[%s6817_s13 + $0x708] sm:$0xff] }
 0x60e   : > { %5158 = vst [vmem:[%s8922_s20 + $0xce0] sm:$0xff] %v5157_v60  ;;  %5160 = vst [vmem:[%s8922_s20 + $0xce8] sm:$0xff] %v5159_v48  ;;  %v5169_v57 = vld [vmem:[%s6817_s13 + $0x710] sm:$0xff]  ;;  %v5171_v9 = vld [vmem:[%s6817_s13 + $0x718] sm:$0xff] }
 0x60f   : > { %5162 = vst [vmem:[%s8922_s20 + $0xcf0] sm:$0xff] %v5161_v53  ;;  %5164 = vst [vmem:[%s8922_s20 + $0xcf8] sm:$0xff] %v5163_v36  ;;  %v5173_v20 = vld [vmem:[%s6817_s13 + $0x720] sm:$0xff]  ;;  %v5175_v4 = vld [vmem:[%s6817_s13 + $0x728] sm:$0xff] }
 0x610   : > { %5166 = vst [vmem:[%s8922_s20 + $0xe00] sm:$0xff] %v5165_v49  ;;  %5168 = vst [vmem:[%s8922_s20 + $0xe08] sm:$0xff] %v5167_v0  ;;  %v5177_v12 = vld [vmem:[%s6817_s13 + $0x730] sm:$0xff]  ;;  %v5179_v28 = vld [vmem:[%s6817_s13 + $0x738] sm:$0xff] }
 0x611   : > { %5170 = vst [vmem:[%s8922_s20 + $0xe10] sm:$0xff] %v5169_v57  ;;  %5172 = vst [vmem:[%s8922_s20 + $0xe18] sm:$0xff] %v5171_v9  ;;  %v5181_v24 = vld [vmem:[%s6817_s13 + $0x740] sm:$0xff]  ;;  %v5183_v42 = vld [vmem:[%s6817_s13 + $0x748] sm:$0xff] }
 0x612   : > { %5174 = vst [vmem:[%s8922_s20 + $0xe20] sm:$0xff] %v5173_v20  ;;  %5176 = vst [vmem:[%s8922_s20 + $0xe28] sm:$0xff] %v5175_v4  ;;  %v5185_v32 = vld [vmem:[%s6817_s13 + $0x750] sm:$0xff]  ;;  %v5187_v1 = vld [vmem:[%s6817_s13 + $0x758] sm:$0xff] }
 0x613   : > { %5178 = vst [vmem:[%s8922_s20 + $0xe30] sm:$0xff] %v5177_v12  ;;  %5180 = vst [vmem:[%s8922_s20 + $0xe38] sm:$0xff] %v5179_v28  ;;  %v5189_v62 = vld [vmem:[%s6817_s13 + $0x760] sm:$0xff]  ;;  %v5191_v10 = vld [vmem:[%s6817_s13 + $0x768] sm:$0xff] }
 0x614   : > { %5182 = vst [vmem:[%s8922_s20 + $0xe40] sm:$0xff] %v5181_v24  ;;  %5184 = vst [vmem:[%s8922_s20 + $0xe48] sm:$0xff] %v5183_v42  ;;  %v5193_v17 = vld [vmem:[%s6817_s13 + $0x770] sm:$0xff]  ;;  %v5195_v25 = vld [vmem:[%s6817_s13 + $0x778] sm:$0xff] }
 0x615   : > { %5186 = vst [vmem:[%s8922_s20 + $0xe50] sm:$0xff] %v5185_v32  ;;  %5188 = vst [vmem:[%s8922_s20 + $0xe58] sm:$0xff] %v5187_v1  ;;  %v5197_v6 = vld [vmem:[%s6817_s13 + $0x780] sm:$0xff]  ;;  %v5199_v51 = vld [vmem:[%s6817_s13 + $0x788] sm:$0xff] }
 0x616   : > { %5190 = vst [vmem:[%s8922_s20 + $0xe60] sm:$0xff] %v5189_v62  ;;  %5192 = vst [vmem:[%s8922_s20 + $0xe68] sm:$0xff] %v5191_v10  ;;  %v5201_v34 = vld [vmem:[%s6817_s13 + $0x790] sm:$0xff]  ;;  %v5203_v21 = vld [vmem:[%s6817_s13 + $0x798] sm:$0xff] }
 0x617   : > { %5194 = vst [vmem:[%s8922_s20 + $0xe70] sm:$0xff] %v5193_v17  ;;  %5196 = vst [vmem:[%s8922_s20 + $0xe78] sm:$0xff] %v5195_v25  ;;  %v5205_v31 = vld [vmem:[%s6817_s13 + $0x7a0] sm:$0xff]  ;;  %v5207_v35 = vld [vmem:[%s6817_s13 + $0x7a8] sm:$0xff] }
 0x618   : > { %5198 = vst [vmem:[%s8922_s20 + $0xe80] sm:$0xff] %v5197_v6  ;;  %5200 = vst [vmem:[%s8922_s20 + $0xe88] sm:$0xff] %v5199_v51  ;;  %v5209_v40 = vld [vmem:[%s6817_s13 + $0x7b0] sm:$0xff]  ;;  %v5211_v11 = vld [vmem:[%s6817_s13 + $0x7b8] sm:$0xff] }
 0x619   : > { %5202 = vst [vmem:[%s8922_s20 + $0xe90] sm:$0xff] %v5201_v34  ;;  %5204 = vst [vmem:[%s8922_s20 + $0xe98] sm:$0xff] %v5203_v21  ;;  %v5213_v61 = vld [vmem:[%s6817_s13 + $0x7c0] sm:$0xff]  ;;  %v5215_v43 = vld [vmem:[%s6817_s13 + $0x7c8] sm:$0xff] }
 0x61a   : > { %5206 = vst [vmem:[%s8922_s20 + $0xea0] sm:$0xff] %v5205_v31  ;;  %5208 = vst [vmem:[%s8922_s20 + $0xea8] sm:$0xff] %v5207_v35  ;;  %v5217_v47 = vld [vmem:[%s6817_s13 + $0x7d0] sm:$0xff]  ;;  %v5219_v39 = vld [vmem:[%s6817_s13 + $0x7d8] sm:$0xff] }
 0x61b   : > { %5210 = vst [vmem:[%s8922_s20 + $0xeb0] sm:$0xff] %v5209_v40  ;;  %5212 = vst [vmem:[%s8922_s20 + $0xeb8] sm:$0xff] %v5211_v11  ;;  %v5221_v46 = vld [vmem:[%s6817_s13 + $0x7e0] sm:$0xff]  ;;  %v5223_v54 = vld [vmem:[%s6817_s13 + $0x7e8] sm:$0xff] }
 0x61c   : > { %5214 = vst [vmem:[%s8922_s20 + $0xec0] sm:$0xff] %v5213_v61  ;;  %5216 = vst [vmem:[%s8922_s20 + $0xec8] sm:$0xff] %v5215_v43  ;;  %v5225_v52 = vld [vmem:[%s6817_s13 + $0x7f0] sm:$0xff]  ;;  %v5227_v18 = vld [vmem:[%s6817_s13 + $0x7f8] sm:$0xff] }
 0x61d   : > { %5218 = vst [vmem:[%s8922_s20 + $0xed0] sm:$0xff] %v5217_v47  ;;  %5220 = vst [vmem:[%s8922_s20 + $0xed8] sm:$0xff] %v5219_v39 }
 0x61e   : > { %5222 = vst [vmem:[%s8922_s20 + $0xee0] sm:$0xff] %v5221_v46  ;;  %5224 = vst [vmem:[%s8922_s20 + $0xee8] sm:$0xff] %v5223_v54 }
 0x61f   : > { %5226 = vst [vmem:[%s8922_s20 + $0xef0] sm:$0xff] %v5225_v52  ;;  %5228 = vst [vmem:[%s8922_s20 + $0xef8] sm:$0xff] %v5227_v18 }
 0x620 PF: > { %p13_p9 = scmp.ge.s32.totalorder %s6203_s22, 4   ;;  %s9592_s18 = smov %s6137_s19 }
 0x621   : > { %s9593_s19 = smov %s6211_s25  ;;  %s9594_s20 = smov %s6203_s22 }
 0x622   :  { %15 = sbr.rel (!%p13_p9) target bundleno = 2 (0x2), region = 179 }

// kernel: net_forward.6
= control target key start
LH: loop header
LB: loop body
LE: loop exit
PB: predicated region body
PF: predicated region fallthrough
CT: control target
= control target key end

     0   :  { %s1709_s18 = smov 0   ;;  %s2044_s0 = inlined_call_operand.vmem [shape: bf16[512,64], index: 0, kind: input, shape index: {}]   ;;  %s2045_s1 = inlined_call_operand.vmem [shape: bf16[64,8], index: 1, kind: input, shape index: {}]   ;;  %s2046_s2 = inlined_call_operand.vmem [shape: bf16[8,2], index: 2, kind: input, shape index: {}]   ;;  %s2047_s3 = inlined_call_operand.vmem [shape: bf16[1,512,8], index: 3, kind: output, shape index: {0}]   ;;  %s2048_s4 = inlined_call_operand.vmem [shape: f32[1,512,1], index: 4, kind: output, shape index: {1}]   ;;  %s2049_s5 = inlined_call_operand.vmem [shape: f32[1,512], index: 5, kind: output, shape index: {2}]  }
   0x1 LB: > { %s1397_s19 = sadd.s32 4294967295, %s1675_s18   ;;  %p1401_p0 = scmp.ge.s32.totalorder %s1675_s18, 1  ;;  %s1675_s18 = sphi %s1709_s18, %s16_s18  }
   0x2   : > { %p193_p1 = scmp.lt.s32.totalorder %s1675_s18, 3 }
   0x4   : > { %p194_p2 = pnand %p1401_p0, %p193_p1 }
   0x5   : > { %s1402_s22 = sshll.u32 (!%p194_p2), %s1397_s19, 5  ;;  %s1677_s17 = smov (!%p194_p2), 127  }
   0x6   : > { %197 = sbr.rel (%p194_p2) target bundleno = 725 (0x2d5), region = 32  ;;  %p231_p3 = scmp.lt.s32.totalorder (!%p194_p2), %s1402_s22, 63 }
   0x7   : > { %s1408_s20 = sshll.u32 (!%p194_p2), %s1397_s19, 1 }
   0x8   : > { %p249_p4 = scmp.lt.s32.totalorder (!%p194_p2), %s1408_s20, 3 }
   0xb   : > { %v1649_v0 = vld [vmem:[%s2045_s1 + $0x18] sm:$0xff]   ;;  %v1650_v1 = vld [vmem:[%s2045_s1 + $0x10] sm:$0xff]   ;;  %s2053_s22 = smov (!%p231_p3, %s1402_s22), 63  ;;  %v1651_v2 = vld [vmem:[%s2045_s1 + $0x8] sm:$0xff]   ;;  %vm398_vm0 = vcmask 523264   ;;  %vm721_vm1 = vcmask 1043456   ;;  %v608_v22 = vlaneseq }
   0xc   : > { %1564 = vmatprep.subr.bf16.mxu0 %v1649_v0  ;;  %s1403_s27 = sshll.u32 %s2053_s22, 2  ;;  %v1652_v4 = vld [vmem:[%s2045_s1] sm:$0xff]   ;;  %vm1213_vm3 = vcmask 60416   ;;  %vm672_vm4 = vcmask 64512   ;;  %s1407_s13 = sshll.u32 %s2053_s22, 3  ;;  %vm1246_vm5 = vcmask 7168  }
   0xd   : > { %1565 = vmatpush3.bf16.msra.mxu0 %v1649_v0  ;;  %s1736_s30 = scalar_lea.vmem %s2044_s0, %s1403_s27  ;;  %v671_v20 = vld [vmem:[%s2046_s2] sm:$0xf]  ;;  %v609_v23 = vand.u32 127, %v608_v22  ;;  %s1786_s12 = scalar_lea.vmem %s2047_s3, %s1403_s27  ;;  %vm1098_vm6 = vcmp.lt.s32.totalorder %v608_v22, 256 }
   0xe   : > { %1566 = vmatprep.subr.bf16.mxu0 %v1650_v1  ;;  %v1653_v3 = vld [vmem:[%s1736_s30] sm:$0xff]   ;;  %v1654_v5 = vld [vmem:[%s1736_s30 + $0x8] sm:$0xff]   ;;  %v1655_v6 = vld [vmem:[%s1736_s30 + $0x10] sm:$0xff]   ;;  %1638 = vmatprep.subr.msk.bf16.mxu1 %vm721_vm1, %v671_v20  ;;  %v723_v21 = vsel %vm721_vm1, %v671_v20, 0  ;;  %s1936_s16 = scalar_lea.vmem %s2048_s4, %s1407_s13  ;;  %s2055_s20 = smov (!%p249_p4, %s1408_s20), 3 }
   0xf   : > { %1572 = vmatprep.mubr.msk.bf16.mxu0 %vm398_vm0, %v1653_v3  ;;  %v1656_v7 = vld [vmem:[%s1736_s30 + $0x18] sm:$0xff]   ;;  %v1657_v8 = vld [vmem:[%s1736_s30 + $0x20] sm:$0xff]   ;;  %v1658_v9 = vld [vmem:[%s1736_s30 + $0x28] sm:$0xff]   ;;  %1605 = vmatpush3.bf16.msra.mxu1 %v723_v21  ;;  %v614_v24 = vand.u32 7, %v609_v23  ;;  %s251_s23 = scalar_lea.vmem %s2049_s5, %s2055_s20 }
  0x10   : > { %v1659_v10 = vld [vmem:[%s1736_s30 + $0x30] sm:$0xff]   ;;  %v1660_v11 = vld [vmem:[%s1736_s30 + $0x38] sm:$0xff]   ;;  %v1661_v12 = vld [vmem:[%s1736_s30 + $0x40] sm:$0xff]  }
  0x11   : > { %1567 = vmatpush3.bf16.msra.mxu0 %v1650_v1  ;;  %v1662_v13 = vld [vmem:[%s1736_s30 + $0x48] sm:$0xff]   ;;  %v1663_v14 = vld [vmem:[%s1736_s30 + $0x50] sm:$0xff]   ;;  %v1664_v15 = vld [vmem:[%s1736_s30 + $0x58] sm:$0xff]   ;;  %vm1777_vm2 = vcmp.eq.s32.totalorder %v614_v24, 7 }
  0x12   : > { %1568 = vmatprep.subr.bf16.mxu0 %v1651_v2  ;;  %v1665_v16 = vld [vmem:[%s1736_s30 + $0x60] sm:$0xff]   ;;  %v1666_v17 = vld [vmem:[%s1736_s30 + $0x68] sm:$0xff]   ;;  %v1667_v18 = vld [vmem:[%s1736_s30 + $0x70] sm:$0xff]  }
  0x13   : > { %v1668_v19 = vld [vmem:[%s1736_s30 + $0x78] sm:$0xff]  }
  0x15   : > { %1569 = vmatpush3.bf16.msra.mxu0 %v1651_v2 }
  0x16   : > { %1570 = vmatprep.subr.bf16.mxu0 %v1652_v4 }
  0x19   : > { %1571 = vmatpush3.bf16.msra.mxu0 %v1652_v4 }
  0x1c   : > { %1573 = vmatmul.mubr.msk.bf16.vlgmr.msra.gmra.mxu0 %vm398_vm0, %v1654_v5 }
  0x1d   : > { %1576 = vmatprep.mubr.msk.bf16.mxu0 %vm398_vm0, %v1655_v6 }
  0x24   : > { %1577 = vmatmul.mubr.msk.bf16.gmra.mxu0 %vm398_vm0, %v1656_v7 }
  0x25   : > { %1580 = vmatprep.mubr.msk.bf16.mxu0 %vm398_vm0, %v1657_v8 }
  0x2c   : > { %1581 = vmatmul.mubr.msk.bf16.gmra.mxu0 %vm398_vm0, %v1658_v9 }
  0x2d   : > { %1584 = vmatprep.mubr.msk.bf16.mxu0 %vm398_vm0, %v1659_v10 }
  0x34   : > { %1585 = vmatmul.mubr.msk.bf16.gmra.mxu0 %vm398_vm0, %v1660_v11 }
  0x35   : > { %1588 = vmatprep.mubr.msk.bf16.mxu0 %vm398_vm0, %v1661_v12 }
  0x3c   : > { %1589 = vmatmul.mubr.msk.bf16.gmra.mxu0 %vm398_vm0, %v1662_v13 }
  0x3d   : > { %1592 = vmatprep.mubr.msk.bf16.mxu0 %vm398_vm0, %v1663_v14 }
  0x44   : > { %1593 = vmatmul.mubr.msk.bf16.gmra.mxu0 %vm398_vm0, %v1664_v15 }
  0x45   : > { %1596 = vmatprep.mubr.msk.bf16.mxu0 %vm398_vm0, %v1665_v16 }
  0x4c   : > { %1597 = vmatmul.mubr.msk.bf16.gmra.mxu0 %vm398_vm0, %v1666_v17 }
  0x4d   : > { %1600 = vmatprep.mubr.msk.bf16.mxu0 %vm398_vm0, %v1667_v18 }
  0x54   : > { %1601 = vmatmul.mubr.msk.bf16.gmra.mxu0 %vm398_vm0, %v1668_v19 }
  0xdc   : > { %v1574_v26 = vpop.f32.mrf.mxu0 }
  0xdd   : > { %v625_v27 = vsel %vm1777_vm2, 1.0, %v1574_v26 }
  0xde   : > { %v1497_v28 = vpack.c.bf16 %v625_v27, %v625_v27  ;;  %v481_v29 = vpop.f32.mrf.mxu0 }
  0xdf   : > { %v623_v30 = vsel %vm1777_vm2, 1.0, %v481_v29 }
  0xe0   : > { %1216 = vst.msk [vmem:[%s1786_s12 + $0x8] sm:$0xf] %vm1213_vm3, %v1497_v28  ;;  %v1495_v31 = vpack.c.bf16 %v623_v30, %v623_v30  ;;  %v1575_v32 = vpop.f32.mrf.mxu0 }
  0xe1   : > { %v626_v33 = vsel %vm1777_vm2, 1.0, %v1575_v32 }
  0xe2   : > { %1214 = vst.msk [vmem:[%s1786_s12] sm:$0xf] %vm1213_vm3, %v1495_v31  ;;  %v1498_v34 = vpack.c.bf16 %v626_v33, %v626_v33  ;;  %v484_v35 = vpop.f32.mrf.mxu0  ;;  %v656_v40 = vpack.c.bf16 %v626_v33, %v625_v27 }
  0xe3   : > { %v624_v36 = vsel %vm1777_vm2, 1.0, %v484_v35 }
  0xe4   : > { %1217 = vst.msk [vmem:[%s1786_s12 + $0xc] sm:$0xf] %vm1213_vm3, %v1498_v34  ;;  %v1496_v37 = vpack.c.bf16 %v624_v36, %v624_v36  ;;  %v1578_v38 = vpop.f32.mrf.mxu0  ;;  %v655_v39 = vpack.c.bf16 %v624_v36, %v623_v30 }
  0xe5   : > { %v629_v41 = vsel %vm1777_vm2, 1.0, %v1578_v38 }
  0xe6   : > { %1215 = vst.msk [vmem:[%s1786_s12 + $0x4] sm:$0xf] %vm1213_vm3, %v1496_v37  ;;  %v1501_v42 = vpack.c.bf16 %v629_v41, %v629_v41  ;;  %v497_v43 = vpop.f32.mrf.mxu0  ;;  %1606 = vmatprep.mubr.msk.bf16.mxu1 %vm672_vm4, %v655_v39 }
  0xe7   : > { %v627_v44 = vsel %vm1777_vm2, 1.0, %v497_v43  ;;  %1607 = vmatmul.mubr.msk.bf16.vlgmr.msra.gmra.mxu1 %vm672_vm4, %v656_v40 }
  0xe8   : > { %1220 = vst.msk [vmem:[%s1786_s12 + $0x18] sm:$0xf] %vm1213_vm3, %v1501_v42  ;;  %v1499_v45 = vpack.c.bf16 %v627_v44, %v627_v44  ;;  %v1579_v46 = vpop.f32.mrf.mxu0 }
  0xe9   : > { %v630_v47 = vsel %vm1777_vm2, 1.0, %v1579_v46 }
  0xea   : > { %1218 = vst.msk [vmem:[%s1786_s12 + $0x10] sm:$0xf] %vm1213_vm3, %v1499_v45  ;;  %v1502_v48 = vpack.c.bf16 %v630_v47, %v630_v47  ;;  %v500_v49 = vpop.f32.mrf.mxu0  ;;  %v658_v54 = vpack.c.bf16 %v630_v47, %v629_v41 }
  0xeb   : > { %v628_v50 = vsel %vm1777_vm2, 1.0, %v500_v49 }
  0xec   : > { %1221 = vst.msk [vmem:[%s1786_s12 + $0x1c] sm:$0xf] %vm1213_vm3, %v1502_v48  ;;  %v657_v51 = vpack.c.bf16 %v628_v50, %v627_v44  ;;  %v1500_v52 = vpack.c.bf16 %v628_v50, %v628_v50  ;;  %v1582_v53 = vpop.f32.mrf.mxu0 }
  0xed   : > { %v633_v55 = vsel %vm1777_vm2, 1.0, %v1582_v53 }
  0xee   : > { %1219 = vst.msk [vmem:[%s1786_s12 + $0x14] sm:$0xf] %vm1213_vm3, %v1500_v52  ;;  %v1505_v56 = vpack.c.bf16 %v633_v55, %v633_v55  ;;  %v513_v57 = vpop.f32.mrf.mxu0  ;;  %1610 = vmatprep.mubr.msk.bf16.mxu1 %vm672_vm4, %v657_v51 }
  0xef   : > { %v631_v58 = vsel %vm1777_vm2, 1.0, %v513_v57  ;;  %1611 = vmatmul.mubr.msk.bf16.gmra.mxu1 %vm672_vm4, %v658_v54 }
  0xf0   : > { %1224 = vst.msk [vmem:[%s1786_s12 + $0x28] sm:$0xf] %vm1213_vm3, %v1505_v56  ;;  %v1503_v59 = vpack.c.bf16 %v631_v58, %v631_v58  ;;  %v1583_v60 = vpop.f32.mrf.mxu0 }
  0xf1   : > { %v634_v61 = vsel %vm1777_vm2, 1.0, %v1583_v60 }
  0xf2   : > { %1222 = vst.msk [vmem:[%s1786_s12 + $0x20] sm:$0xf] %vm1213_vm3, %v1503_v59  ;;  %v1506_v62 = vpack.c.bf16 %v634_v61, %v634_v61  ;;  %v516_v63 = vpop.f32.mrf.mxu0  ;;  %v660_v0 = vpack.c.bf16 %v634_v61, %v633_v55 }
  0xf3   : > { %v632_v1 = vsel %vm1777_vm2, 1.0, %v516_v63 }
  0xf4   : > { %1225 = vst.msk [vmem:[%s1786_s12 + $0x2c] sm:$0xf] %vm1213_vm3, %v1506_v62  ;;  %v659_v2 = vpack.c.bf16 %v632_v1, %v631_v58  ;;  %v1504_v3 = vpack.c.bf16 %v632_v1, %v632_v1  ;;  %v1586_v4 = vpop.f32.mrf.mxu0 }
  0xf5   : > { %v637_v5 = vsel %vm1777_vm2, 1.0, %v1586_v4 }
  0xf6   : > { %1223 = vst.msk [vmem:[%s1786_s12 + $0x24] sm:$0xf] %vm1213_vm3, %v1504_v3  ;;  %v1509_v6 = vpack.c.bf16 %v637_v5, %v637_v5  ;;  %1614 = vmatprep.mubr.msk.bf16.mxu1 %vm672_vm4, %v659_v2  ;;  %v529_v7 = vpop.f32.mrf.mxu0 }
  0xf7   : > { %v635_v8 = vsel %vm1777_vm2, 1.0, %v529_v7  ;;  %1615 = vmatmul.mubr.msk.bf16.gmra.mxu1 %vm672_vm4, %v660_v0 }
  0xf8   : > { %1228 = vst.msk [vmem:[%s1786_s12 + $0x38] sm:$0xf] %vm1213_vm3, %v1509_v6  ;;  %v1507_v9 = vpack.c.bf16 %v635_v8, %v635_v8  ;;  %v1587_v10 = vpop.f32.mrf.mxu0 }
  0xf9   : > { %v638_v11 = vsel %vm1777_vm2, 1.0, %v1587_v10 }
  0xfa   : > { %1226 = vst.msk [vmem:[%s1786_s12 + $0x30] sm:$0xf] %vm1213_vm3, %v1507_v9  ;;  %v1510_v12 = vpack.c.bf16 %v638_v11, %v638_v11  ;;  %v532_v13 = vpop.f32.mrf.mxu0  ;;  %v662_v14 = vpack.c.bf16 %v638_v11, %v637_v5 }
  0xfb   : > { %v636_v15 = vsel %vm1777_vm2, 1.0, %v532_v13 }
  0xfc   : > { %1229 = vst.msk [vmem:[%s1786_s12 + $0x3c] sm:$0xf] %vm1213_vm3, %v1510_v12  ;;  %v661_v16 = vpack.c.bf16 %v636_v15, %v635_v8  ;;  %v1508_v17 = vpack.c.bf16 %v636_v15, %v636_v15  ;;  %v1590_v18 = vpop.f32.mrf.mxu0 }
  0xfd   : > { %v641_v19 = vsel %vm1777_vm2, 1.0, %v1590_v18 }
  0xfe   : > { %1227 = vst.msk [vmem:[%s1786_s12 + $0x34] sm:$0xf] %vm1213_vm3, %v1508_v17  ;;  %1618 = vmatprep.mubr.msk.bf16.mxu1 %vm672_vm4, %v661_v16  ;;  %v1513_v20 = vpack.c.bf16 %v641_v19, %v641_v19  ;;  %v545_v21 = vpop.f32.mrf.mxu0 }
  0xff   : > { %1619 = vmatmul.mubr.msk.bf16.gmra.mxu1 %vm672_vm4, %v662_v14  ;;  %v639_v23 = vsel %vm1777_vm2, 1.0, %v545_v21 }
 0x100   : > { %1232 = vst.msk [vmem:[%s1786_s12 + $0x48] sm:$0xf] %vm1213_vm3, %v1513_v20  ;;  %v1511_v24 = vpack.c.bf16 %v639_v23, %v639_v23  ;;  %v1591_v26 = vpop.f32.mrf.mxu0 }
 0x101   : > { %v642_v27 = vsel %vm1777_vm2, 1.0, %v1591_v26 }
 0x102   : > { %1230 = vst.msk [vmem:[%s1786_s12 + $0x40] sm:$0xf] %vm1213_vm3, %v1511_v24  ;;  %v1514_v28 = vpack.c.bf16 %v642_v27, %v642_v27  ;;  %v548_v29 = vpop.f32.mrf.mxu0  ;;  %v664_v30 = vpack.c.bf16 %v642_v27, %v641_v19 }
 0x103   : > { %v640_v31 = vsel %vm1777_vm2, 1.0, %v548_v29 }
 0x104   : > { %1233 = vst.msk [vmem:[%s1786_s12 + $0x4c] sm:$0xf] %vm1213_vm3, %v1514_v28  ;;  %v663_v32 = vpack.c.bf16 %v640_v31, %v639_v23  ;;  %v1512_v33 = vpack.c.bf16 %v640_v31, %v640_v31  ;;  %v1594_v34 = vpop.f32.mrf.mxu0 }
 0x105   : > { %v645_v35 = vsel %vm1777_vm2, 1.0, %v1594_v34 }
 0x106   : > { %1231 = vst.msk [vmem:[%s1786_s12 + $0x44] sm:$0xf] %vm1213_vm3, %v1512_v33  ;;  %v1517_v36 = vpack.c.bf16 %v645_v35, %v645_v35  ;;  %1622 = vmatprep.mubr.msk.bf16.mxu1 %vm672_vm4, %v663_v32  ;;  %v561_v37 = vpop.f32.mrf.mxu0 }
 0x107   : > { %1623 = vmatmul.mubr.msk.bf16.gmra.mxu1 %vm672_vm4, %v664_v30  ;;  %v643_v38 = vsel %vm1777_vm2, 1.0, %v561_v37 }
 0x108   : > { %1236 = vst.msk [vmem:[%s1786_s12 + $0x58] sm:$0xf] %vm1213_vm3, %v1517_v36  ;;  %v1515_v39 = vpack.c.bf16 %v643_v38, %v643_v38  ;;  %v1595_v40 = vpop.f32.mrf.mxu0 }
 0x109   : > { %v646_v41 = vsel %vm1777_vm2, 1.0, %v1595_v40 }
 0x10a   : > { %1234 = vst.msk [vmem:[%s1786_s12 + $0x50] sm:$0xf] %vm1213_vm3, %v1515_v39  ;;  %v1518_v42 = vpack.c.bf16 %v646_v41, %v646_v41  ;;  %v564_v43 = vpop.f32.mrf.mxu0  ;;  %v666_v44 = vpack.c.bf16 %v646_v41, %v645_v35 }
 0x10b   : > { %v644_v45 = vsel %vm1777_vm2, 1.0, %v564_v43 }
 0x10c   : > { %1237 = vst.msk [vmem:[%s1786_s12 + $0x5c] sm:$0xf] %vm1213_vm3, %v1518_v42  ;;  %v665_v46 = vpack.c.bf16 %v644_v45, %v643_v38  ;;  %v1516_v47 = vpack.c.bf16 %v644_v45, %v644_v45  ;;  %v1598_v48 = vpop.f32.mrf.mxu0 }
 0x10d   : > { %v649_v49 = vsel %vm1777_vm2, 1.0, %v1598_v48 }
 0x10e   : > { %1235 = vst.msk [vmem:[%s1786_s12 + $0x54] sm:$0xf] %vm1213_vm3, %v1516_v47  ;;  %1626 = vmatprep.mubr.msk.bf16.mxu1 %vm672_vm4, %v665_v46  ;;  %v1521_v50 = vpack.c.bf16 %v649_v49, %v649_v49  ;;  %v577_v51 = vpop.f32.mrf.mxu0 }
 0x10f   : > { %1627 = vmatmul.mubr.msk.bf16.gmra.mxu1 %vm672_vm4, %v666_v44  ;;  %v647_v52 = vsel %vm1777_vm2, 1.0, %v577_v51 }
 0x110   : > { %1240 = vst.msk [vmem:[%s1786_s12 + $0x68] sm:$0xf] %vm1213_vm3, %v1521_v50  ;;  %v1519_v53 = vpack.c.bf16 %v647_v52, %v647_v52  ;;  %v1599_v54 = vpop.f32.mrf.mxu0 }
 0x111   : > { %v650_v55 = vsel %vm1777_vm2, 1.0, %v1599_v54 }
 0x112   : > { %1238 = vst.msk [vmem:[%s1786_s12 + $0x60] sm:$0xf] %vm1213_vm3, %v1519_v53  ;;  %v1522_v56 = vpack.c.bf16 %v650_v55, %v650_v55  ;;  %v580_v57 = vpop.f32.mrf.mxu0  ;;  %v668_v58 = vpack.c.bf16 %v650_v55, %v649_v49 }
 0x113   : > { %v648_v59 = vsel %vm1777_vm2, 1.0, %v580_v57 }
 0x114   : > { %1241 = vst.msk [vmem:[%s1786_s12 + $0x6c] sm:$0xf] %vm1213_vm3, %v1522_v56  ;;  %v667_v60 = vpack.c.bf16 %v648_v59, %v647_v52  ;;  %v1520_v61 = vpack.c.bf16 %v648_v59, %v648_v59  ;;  %v1602_v62 = vpop.f32.mrf.mxu0 }
 0x115   : > { %v653_v63 = vsel %vm1777_vm2, 1.0, %v1602_v62 }
 0x116   : > { %1239 = vst.msk [vmem:[%s1786_s12 + $0x64] sm:$0xf] %vm1213_vm3, %v1520_v61  ;;  %1630 = vmatprep.mubr.msk.bf16.mxu1 %vm672_vm4, %v667_v60  ;;  %v1525_v0 = vpack.c.bf16 %v653_v63, %v653_v63  ;;  %v593_v1 = vpop.f32.mrf.mxu0 }
 0x117   : > { %1631 = vmatmul.mubr.msk.bf16.gmra.mxu1 %vm672_vm4, %v668_v58  ;;  %v651_v2 = vsel %vm1777_vm2, 1.0, %v593_v1 }
 0x118   : > { %1244 = vst.msk [vmem:[%s1786_s12 + $0x78] sm:$0xf] %vm1213_vm3, %v1525_v0  ;;  %v1523_v3 = vpack.c.bf16 %v651_v2, %v651_v2  ;;  %v1603_v4 = vpop.f32.mrf.mxu0 }
 0x119   : > { %v654_v5 = vsel %vm1777_vm2, 1.0, %v1603_v4 }
 0x11a   : > { %1242 = vst.msk [vmem:[%s1786_s12 + $0x70] sm:$0xf] %vm1213_vm3, %v1523_v3  ;;  %v1526_v6 = vpack.c.bf16 %v654_v5, %v654_v5  ;;  %v596_v7 = vpop.f32.mrf.mxu0  ;;  %v670_v8 = vpack.c.bf16 %v654_v5, %v653_v63 }
 0x11b   : > { %v652_v9 = vsel %vm1777_vm2, 1.0, %v596_v7 }
 0x11c   : > { %1245 = vst.msk [vmem:[%s1786_s12 + $0x7c] sm:$0xf] %vm1213_vm3, %v1526_v6  ;;  %v669_v10 = vpack.c.bf16 %v652_v9, %v651_v2  ;;  %v1524_v11 = vpack.c.bf16 %v652_v9, %v652_v9 }
 0x11e   : > { %1243 = vst.msk [vmem:[%s1786_s12 + $0x74] sm:$0xf] %vm1213_vm3, %v1524_v11  ;;  %1634 = vmatprep.mubr.msk.bf16.mxu1 %vm672_vm4, %v669_v10 }
 0x11f   : > { %1635 = vmatmul.mubr.msk.bf16.gmra.mxu1 %vm672_vm4, %v670_v8 }
 0x1a7   : > { %v1608_v25 = vpop.f32.mrf.mxu1 }
 0x1a8   : > { %1249 = vst.msk [vmem:[%s1936_s16 + $0x10] sm:$0xff] %vm1246_vm5, %v1608_v25  ;;  %922 = vrot.lane.b32.xlu1 %v1608_v25, %s1677_s17 }
 0x1a9   : > { %v759_v12 = vpop.f32.mrf.mxu1 }
 0x1aa   : > { %1247 = vst.msk [vmem:[%s1936_s16] sm:$0xff] %vm1246_vm5, %v759_v12  ;;  %918 = vrot.lane.b32.xlu0 %v759_v12, %s1677_s17  ;;  %v1678_v12 = vmov 1966171168  }
 0x1ab   : > { %v1609_v13 = vpop.f32.mrf.mxu1 }
 0x1ac   : > { %1250 = vst.msk [vmem:[%s1936_s16 + $0x18] sm:$0xff] %vm1246_vm5, %v1609_v13  ;;  %924 = vrot.lane.b32.xlu1 %v1609_v13, %s1677_s17  ;;  %v1082_v13 = vunpack.c.l.s4 %v1678_v12 }
 0x1ad   : > { %v762_v14 = vpop.f32.mrf.mxu1 }
 0x1ae   : > { %1248 = vst.msk [vmem:[%s1936_s16 + $0x8] sm:$0xff] %vm1246_vm5, %v762_v14  ;;  %920 = vrot.lane.b32.xlu0 %v762_v14, %s1677_s17  ;;  %v1083_v14 = vunpack.c.0.s8 %v1082_v13 }
 0x1af   : > { %v1612_v15 = vpop.f32.mrf.mxu1 }
 0x1b0   : > { %1253 = vst.msk [vmem:[%s1936_s16 + $0x30] sm:$0xff] %vm1246_vm5, %v1612_v15 }
 0x1b1   : > { %v775_v16 = vpop.f32.mrf.mxu1 }
 0x1b2   : > { %1251 = vst.msk [vmem:[%s1936_s16 + $0x20] sm:$0xff] %vm1246_vm5, %v775_v16  ;;  %930 = vrot.lane.b32.xlu0 %v1612_v15, %s1677_s17  ;;  %v1085_v15 = vshrl.u32 %v608_v22, 7 }
 0x1b3   : > { %v1613_v17 = vpop.f32.mrf.mxu1 }
 0x1b4   : > { %1254 = vst.msk [vmem:[%s1936_s16 + $0x38] sm:$0xff] %vm1246_vm5, %v1613_v17 }
 0x1b5   : > { %v778_v18 = vpop.f32.mrf.mxu1 }
 0x1b6   : > { %1252 = vst.msk [vmem:[%s1936_s16 + $0x28] sm:$0xff] %vm1246_vm5, %v778_v18  ;;  %926 = vrot.lane.b32.xlu0 %v775_v16, %s1677_s17  ;;  %928 = vrot.lane.b32.xlu1 %v778_v18, %s1677_s17 }
 0x1b7   : > { %v1616_v19 = vpop.f32.mrf.mxu1 }
 0x1b8   : > { %1257 = vst.msk [vmem:[%s1936_s16 + $0x50] sm:$0xff] %vm1246_vm5, %v1616_v19 }
 0x1b9   : > { %v791_v20 = vpop.f32.mrf.mxu1 }
 0x1ba   : > { %1255 = vst.msk [vmem:[%s1936_s16 + $0x40] sm:$0xff] %vm1246_vm5, %v791_v20  ;;  %932 = vrot.lane.b32.xlu0 %v1613_v17, %s1677_s17  ;;  %v1086_v17 = vsub.s32 %v1083_v14, %v1085_v15 }
 0x1bb   : > { %v1617_v21 = vpop.f32.mrf.mxu1 }
 0x1bc   : > { %1258 = vst.msk [vmem:[%s1936_s16 + $0x58] sm:$0xff] %vm1246_vm5, %v1617_v21 }
 0x1bd   : > { %v794_v23 = vpop.f32.mrf.mxu1 }
 0x1be   : > { %1256 = vst.msk [vmem:[%s1936_s16 + $0x48] sm:$0xff] %vm1246_vm5, %v794_v23  ;;  %938 = vrot.lane.b32.xlu0 %v1616_v19, %s1677_s17 }
 0x1bf   : > { %v1620_v24 = vpop.f32.mrf.mxu1 }
 0x1c0   : > { %1261 = vst.msk [vmem:[%s1936_s16 + $0x70] sm:$0xff] %vm1246_vm5, %v1620_v24 }
 0x1c1   : > { %v807_v26 = vpop.f32.mrf.mxu1 }
 0x1c2   : > { %934 = vrot.lane.b32.xlu0 %v791_v20, %s1677_s17  ;;  %1259 = vst.msk [vmem:[%s1936_s16 + $0x60] sm:$0xff] %vm1246_vm5, %v807_v26 }
 0x1c3   : > { %v1621_v27 = vpop.f32.mrf.mxu1 }
 0x1c4   : > { %1262 = vst.msk [vmem:[%s1936_s16 + $0x78] sm:$0xff] %vm1246_vm5, %v1621_v27 }
 0x1c5   : > { %v810_v28 = vpop.f32.mrf.mxu1 }
 0x1c6   : > { %940 = vrot.lane.b32.xlu0 %v1617_v21, %s1677_s17  ;;  %1260 = vst.msk [vmem:[%s1936_s16 + $0x68] sm:$0xff] %vm1246_vm5, %v810_v28 }
 0x1c7   : > { %v1624_v29 = vpop.f32.mrf.mxu1 }
 0x1c8   : > { %1265 = vst.msk [vmem:[%s1936_s16 + $0x90] sm:$0xff] %vm1246_vm5, %v1624_v29  ;;  %954 = vrot.lane.b32.xlu1 %v1624_v29, %s1677_s17 }
 0x1c9   : > { %v823_v30 = vpop.f32.mrf.mxu1 }
 0x1ca   : > { %936 = vrot.lane.b32.xlu0 %v794_v23, %s1677_s17  ;;  %1263 = vst.msk [vmem:[%s1936_s16 + $0x80] sm:$0xff] %vm1246_vm5, %v823_v30 }
 0x1cb   : > { %v1625_v31 = vpop.f32.mrf.mxu1 }
 0x1cc   : > { %1266 = vst.msk [vmem:[%s1936_s16 + $0x98] sm:$0xff] %vm1246_vm5, %v1625_v31  ;;  %950 = vrot.lane.b32.xlu1 %v823_v30, %s1677_s17 }
 0x1cd   : > { %v826_v32 = vpop.f32.mrf.mxu1 }
 0x1ce   : > { %946 = vrot.lane.b32.xlu0 %v1620_v24, %s1677_s17  ;;  %1264 = vst.msk [vmem:[%s1936_s16 + $0x88] sm:$0xff] %vm1246_vm5, %v826_v32 }
 0x1cf   : > { %v1628_v33 = vpop.f32.mrf.mxu1 }
 0x1d0   : > { %1269 = vst.msk [vmem:[%s1936_s16 + $0xb0] sm:$0xff] %vm1246_vm5, %v1628_v33  ;;  %962 = vrot.lane.b32.xlu1 %v1628_v33, %s1677_s17 }
 0x1d1   : > { %v839_v34 = vpop.f32.mrf.mxu1 }
 0x1d2   : > { %942 = vrot.lane.b32.xlu0 %v807_v26, %s1677_s17  ;;  %1267 = vst.msk [vmem:[%s1936_s16 + $0xa0] sm:$0xff] %vm1246_vm5, %v839_v34 }
 0x1d3   : > { %v1629_v35 = vpop.f32.mrf.mxu1 }
 0x1d4   : > { %958 = vrot.lane.b32.xlu1 %v839_v34, %s1677_s17  ;;  %1270 = vst.msk [vmem:[%s1936_s16 + $0xb8] sm:$0xff] %vm1246_vm5, %v1629_v35 }
 0x1d5   : > { %v842_v36 = vpop.f32.mrf.mxu1 }
 0x1d6   : > { %948 = vrot.lane.b32.xlu0 %v1621_v27, %s1677_s17  ;;  %1268 = vst.msk [vmem:[%s1936_s16 + $0xa8] sm:$0xff] %vm1246_vm5, %v842_v36 }
 0x1d7   : > { %v1632_v37 = vpop.f32.mrf.mxu1 }
 0x1d8   : > { %964 = vrot.lane.b32.xlu1 %v1629_v35, %s1677_s17  ;;  %1273 = vst.msk [vmem:[%s1936_s16 + $0xd0] sm:$0xff] %vm1246_vm5, %v1632_v37 }
 0x1d9   : > { %v855_v38 = vpop.f32.mrf.mxu1 }
 0x1da   : > { %944 = vrot.lane.b32.xlu0 %v810_v28, %s1677_s17  ;;  %1271 = vst.msk [vmem:[%s1936_s16 + $0xc0] sm:$0xff] %vm1246_vm5, %v855_v38 }
 0x1db   : > { %v1633_v39 = vpop.f32.mrf.mxu1 }
 0x1dc   : > { %970 = vrot.lane.b32.xlu1 %v1632_v37, %s1677_s17  ;;  %1274 = vst.msk [vmem:[%s1936_s16 + $0xd8] sm:$0xff] %vm1246_vm5, %v1633_v39 }
 0x1dd   : > { %v858_v40 = vpop.f32.mrf.mxu1 }
 0x1de   : > { %956 = vrot.lane.b32.xlu0 %v1625_v31, %s1677_s17  ;;  %1272 = vst.msk [vmem:[%s1936_s16 + $0xc8] sm:$0xff] %vm1246_vm5, %v858_v40 }
 0x1df   : > { %v1636_v41 = vpop.f32.mrf.mxu1 }
 0x1e0   : > { %966 = vrot.lane.b32.xlu1 %v855_v38, %s1677_s17  ;;  %1277 = vst.msk [vmem:[%s1936_s16 + $0xf0] sm:$0xff] %vm1246_vm5, %v1636_v41 }
 0x1e1   : > { %v871_v42 = vpop.f32.mrf.mxu1 }
 0x1e2   : > { %952 = vrot.lane.b32.xlu0 %v826_v32, %s1677_s17  ;;  %1275 = vst.msk [vmem:[%s1936_s16 + $0xe0] sm:$0xff] %vm1246_vm5, %v871_v42 }
 0x1e3   : > { %v1637_v43 = vpop.f32.mrf.mxu1 }
 0x1e4   : > { %972 = vrot.lane.b32.xlu1 %v1633_v39, %s1677_s17  ;;  %1278 = vst.msk [vmem:[%s1936_s16 + $0xf8] sm:$0xff] %vm1246_vm5, %v1637_v43 }
 0x1e5   : > { %v874_v44 = vpop.f32.mrf.mxu1 }
 0x1e6   : > { %960 = vrot.lane.b32.xlu0 %v842_v36, %s1677_s17  ;;  %1276 = vst.msk [vmem:[%s1936_s16 + $0xe8] sm:$0xff] %vm1246_vm5, %v874_v44 }
 0x1e8   : > { %968 = vrot.lane.b32.xlu1 %v858_v40, %s1677_s17 }
 0x1ec   : > { %978 = vrot.lane.b32.xlu1 %v1636_v41, %s1677_s17 }
 0x1f0   : > { %974 = vrot.lane.b32.xlu1 %v871_v42, %s1677_s17 }
 0x1f4   : > { %980 = vrot.lane.b32.xlu1 %v1637_v43, %s1677_s17 }
 0x1f8   : > { %976 = vrot.lane.b32.xlu1 %v874_v44, %s1677_s17 }
 0x21a   : > { %v923_v47 = vpop.permute.xlu1 %922 }
 0x21c   : > { %v919_v45 = vpop.permute.xlu0 %918 }
 0x21d   : > { %1014 = vxpose.xlu0.b32.start [1/16] (narrow) %v919_v45, 8 }
 0x21e   : > { %v925_v49 = vpop.permute.xlu1 %924 }
 0x220   : > { %v921_v46 = vpop.permute.xlu0 %920 }
 0x221   : > { %1015 = vxpose.xlu0.b32.cont [2/16] (narrow) %v921_v46, 8 }
 0x224   : > { %v931_v48 = vpop.permute.xlu0 %930 }
 0x225   : > { %1016 = vxpose.xlu0.b32.cont [3/16] (narrow) %v923_v47, 8 }
 0x228   : > { %v927_v50 = vpop.permute.xlu0 %926  ;;  %v929_v52 = vpop.permute.xlu1 %928 }
 0x229   : > { %1017 = vxpose.xlu0.b32.cont [4/16] (narrow) %v925_v49, 8 }
 0x22c   : > { %v933_v51 = vpop.permute.xlu0 %932 }
 0x22d   : > { %1018 = vxpose.xlu0.b32.cont [5/16] (narrow) %v927_v50, 8 }
 0x230   : > { %v939_v53 = vpop.permute.xlu0 %938 }
 0x231   : > { %1019 = vxpose.xlu0.b32.cont [6/16] (narrow) %v929_v52, 8 }
 0x234   : > { %v935_v54 = vpop.permute.xlu0 %934 }
 0x235   : > { %1020 = vxpose.xlu0.b32.cont [7/16] (narrow) %v931_v48, 8 }
 0x238   : > { %v941_v55 = vpop.permute.xlu0 %940 }
 0x239   : > { %1021 = vxpose.xlu0.b32.cont [8/16] (narrow) %v933_v51, 8 }
 0x23a   : > { %v955_v56 = vpop.permute.xlu1 %954 }
 0x23c   : > { %v937_v57 = vpop.permute.xlu0 %936 }
 0x23d   : > { %1022 = vxpose.xlu0.b32.cont [9/16] (narrow) %v935_v54, 8 }
 0x23e   : > { %v951_v58 = vpop.permute.xlu1 %950 }
 0x23f   : > { %1046 = vxpose.xlu1.b32.start [1/16] (narrow) %v951_v58, 8 }
 0x240   : > { %v947_v59 = vpop.permute.xlu0 %946 }
 0x241   : > { %1023 = vxpose.xlu0.b32.cont [10/16] (narrow) %v937_v57, 8 }
 0x242   : > { %v963_v62 = vpop.permute.xlu1 %962 }
 0x244   : > { %v943_v60 = vpop.permute.xlu0 %942 }
 0x245   : > { %1024 = vxpose.xlu0.b32.cont [11/16] (narrow) %v939_v53, 8 }
 0x246   : > { %v959_v0 = vpop.permute.xlu1 %958 }
 0x248   : > { %v949_v61 = vpop.permute.xlu0 %948 }
 0x249   : > { %1025 = vxpose.xlu0.b32.cont [12/16] (narrow) %v941_v55, 8 }
 0x24a   : > { %v965_v2 = vpop.permute.xlu1 %964 }
 0x24c   : > { %v945_v63 = vpop.permute.xlu0 %944 }
 0x24d   : > { %1026 = vxpose.xlu0.b32.cont [13/16] (narrow) %v943_v60, 8 }
 0x24e   : > { %v971_v4 = vpop.permute.xlu1 %970 }
 0x250   : > { %v957_v1 = vpop.permute.xlu0 %956 }
 0x251   : > { %1027 = vxpose.xlu0.b32.cont [14/16] (narrow) %v945_v63, 8 }
 0x252   : > { %v967_v5 = vpop.permute.xlu1 %966 }
 0x254   : > { %v953_v3 = vpop.permute.xlu0 %952 }
 0x255   : > { %1028 = vxpose.xlu0.b32.cont [15/16] (narrow) %v947_v59, 8  ;;  %1047 = vxpose.xlu1.b32.cont [2/16] (narrow) %v953_v3, 8 }
 0x256   : > { %v973_v7 = vpop.permute.xlu1 %972 }
 0x258   : > { %v961_v6 = vpop.permute.xlu0 %960 }
 0x259   : > { %1029 = vxpose.xlu0.b32.end [16/16] (narrow) %v949_v61, 8  ;;  %1048 = vxpose.xlu1.b32.cont [3/16] (narrow) %v955_v56, 8 }
 0x25a   : > { %v969_v8 = vpop.permute.xlu1 %968 }
 0x25d   : > { %1049 = vxpose.xlu1.b32.cont [4/16] (narrow) %v957_v1, 8 }
 0x25e   : > { %v979_v9 = vpop.permute.xlu1 %978 }
 0x261   : > { %1050 = vxpose.xlu1.b32.cont [5/16] (narrow) %v959_v0, 8 }
 0x262   : > { %v975_v10 = vpop.permute.xlu1 %974 }
 0x265   : > { %1051 = vxpose.xlu1.b32.cont [6/16] (narrow) %v961_v6, 8 }
 0x266   : > { %v981_v11 = vpop.permute.xlu1 %980 }
 0x269   : > { %1052 = vxpose.xlu1.b32.cont [7/16] (narrow) %v963_v62, 8 }
 0x26a   : > { %v977_v25 = vpop.permute.xlu1 %976 }
 0x26d   : > { %1053 = vxpose.xlu1.b32.cont [8/16] (narrow) %v965_v2, 8 }
 0x271   : > { %1054 = vxpose.xlu1.b32.cont [9/16] (narrow) %v967_v5, 8 }
 0x275   : > { %1055 = vxpose.xlu1.b32.cont [10/16] (narrow) %v969_v8, 8 }
 0x279   : > { %1056 = vxpose.xlu1.b32.cont [11/16] (narrow) %v971_v4, 8 }
 0x27d   : > { %1057 = vxpose.xlu1.b32.cont [12/16] (narrow) %v973_v7, 8 }
 0x281   : > { %1058 = vxpose.xlu1.b32.cont [13/16] (narrow) %v975_v10, 8 }
 0x285   : > { %1059 = vxpose.xlu1.b32.cont [14/16] (narrow) %v977_v25, 8 }
 0x289   : > { %1060 = vxpose.xlu1.b32.cont [15/16] (narrow) %v979_v9, 8 }
 0x28d   : > { %1061 = vxpose.xlu1.b32.end [16/16] (narrow) %v981_v11, 8 }
 0x299   : > { %v1030_v16 = vpop.trf.xlu0 }
 0x2cd   : > { %v1062_v18 = vpop.trf.xlu1 }
 0x2ce   : > { %v1080_v19 = vcombine.low %v1030_v16, %v1062_v18 }
 0x2d0   : > { %v1087_v20 = vrot.slane %v1080_v19, %v1086_v17 }
 0x2d2   : > { %v1094_v21 = vrot.slane %v1087_v20, %v1086_v17 }
 0x2d4   : > { %1100 = vst.msk [vmem:[%s251_s23] sm:$0x3] %vm1098_vm6, %v1094_v21 }
 0x2d5 PF: > { %s16_s18 = sadd.s32 1, %s1675_s18  }
 0x2d6   : > { %p13_p5 = scmp.ge.s32.totalorder %s16_s18, 4  }
 0x2d8   :  { %15 = sbr.rel (!%p13_p5) target bundleno = 1 (0x1), region = 86 }

// kernel: net_forward.7
= control target key start
LH: loop header
LB: loop body
LE: loop exit
PB: predicated region body
PF: predicated region fallthrough
CT: control target
= control target key end

     0   :  { %s2157_s15 = smov 0   ;;  %s3165_s0 = inlined_call_operand.vmem [shape: f32[1,512,1], index: 0, kind: input, shape index: {}]   ;;  %s3166_s1 = inlined_call_operand.vmem [shape: f32[1,512], index: 1, kind: input, shape index: {}]   ;;  %s3167_s2 = inlined_call_operand.vmem [shape: bf16[1,512,8], index: 2, kind: input, shape index: {}]   ;;  %s3168_s3 = inlined_call_operand.vmem [shape: s8[512,512], index: 3, kind: input, shape index: {}]   ;;  %s3169_s4 = inlined_call_operand.vmem [shape: f32[1,512,7], index: 4, kind: output, shape index: {}]  }
   0x1 LB: > { %s1741_s16 = sadd.s32 4294967295, %s2128_s15   ;;  %p1745_p0 = scmp.ge.s32.totalorder %s2128_s15, 1  ;;  %s2128_s15 = sphi %s2157_s15, %s14_s15  }
   0x2   : > { %p175_p1 = scmp.lt.s32.totalorder %s2128_s15, 5 }
   0x4   : > { %p176_p2 = pnand %p1745_p0, %p175_p1 }
   0x6   : > { %179 = sbr.rel (%p176_p2) target bundleno = 1063 (0x427), region = 36 }
   0xb   : > { %s1746_s17 = sshll.u32 %s1741_s16, 4  ;;  %v2130_v0 = vmov 0   ;;  %v1930_v25 = vld [vmem:[%s3167_s2 + $0x78] sm:$0xff]   ;;  %s1748_s28 = sshll.u32 %s1741_s16, 2  ;;  %v1934_v29 = vld [vmem:[%s3167_s2 + $0x70] sm:$0xff]   ;;  %v1938_v33 = vld [vmem:[%s3167_s2 + $0x68] sm:$0xff]   ;;  %v290_v37 = vlaneseq }
   0xc   : > { %1927 = vset.pattern.permute.xlu1 %v2130_v0  ;;  %1926 = vset.pattern.permute.xlu0 %v2130_v0  ;;  %p208_p3 = scmp.lt.s32.totalorder %s1746_s17, 63  ;;  %v1931_v26 = vld [vmem:[%s3167_s2 + $0xf8] sm:$0xff]   ;;  %v1935_v30 = vld [vmem:[%s3167_s2 + $0xf0] sm:$0xff]   ;;  %p214_p4 = scmp.lt.s32.totalorder %s1748_s28, 15  ;;  %v1939_v34 = vld [vmem:[%s3167_s2 + $0xe8] sm:$0xff]  }
   0xd   : > { %v1932_v27 = vld [vmem:[%s3167_s2 + $0x38] sm:$0xff]   ;;  %1788 = vmatprep.subr.bf16.mxu0 %v1930_v25  ;;  %1852 = vmatprep.subr.bf16.mxu1 %v1931_v26  ;;  %v1936_v31 = vld [vmem:[%s3167_s2 + $0x30] sm:$0xff]   ;;  %v1940_v35 = vld [vmem:[%s3167_s2 + $0x28] sm:$0xff]   ;;  %v291_v40 = vshrl.u32 %v290_v37, 7 }
   0xe   : > { %s3215_s17 = smov (!%p208_p3, %s1746_s17), 63  ;;  %v1933_v28 = vld [vmem:[%s3167_s2 + $0xb8] sm:$0xff]   ;;  %1789 = vmatpush3.bf16.msra.mxu0 %v1932_v27  ;;  %v1937_v32 = vld [vmem:[%s3167_s2 + $0xb0] sm:$0xff]   ;;  %v1941_v36 = vld [vmem:[%s3167_s2 + $0xa8] sm:$0xff]   ;;  %s3217_s28 = smov (!%p214_p4, %s1748_s28), 15 }
   0xf   : > { %s1747_s18 = sshll.u32 %s3215_s17, 3  ;;  %1853 = vmatpush3.bf16.msra.mxu1 %v1933_v28  ;;  %1790 = vmatprep.subr.bf16.mxu0 %v1934_v29  ;;  %s1787_s24 = sshll.u32 %s3217_s28, 5  ;;  %v288_v43 = vld [vmem:[%s3166_s1] sm:$0xf]  ;;  %v292_v44 = vsub.s32 0, %v291_v40  ;;  %v296_v45 = vsub.s32 1, %v291_v40 }
  0x10   : > { %s211_s21 = scalar_lea.vmem %s3165_s0, %s1747_s18  ;;  %1854 = vmatprep.subr.bf16.mxu1 %v1935_v30  ;;  %s2218_s27 = scalar_lea.vmem %s3168_s3, %s1787_s24  ;;  %v300_v48 = vsub.s32 2, %v291_v40  ;;  %v304_v49 = vsub.s32 3, %v291_v40 }
  0x11   : > { %v268_v1 = vld [vmem:[%s211_s21 + $0x20] sm:$0xff]  ;;  %v269_v2 = vld [vmem:[%s211_s21 + $0x28] sm:$0xff]  ;;  %v270_v6 = vld [vmem:[%s211_s21 + $0x30] sm:$0xff]  ;;  %v293_v52 = vrot.slane %v288_v43, %v292_v44  ;;  %v297_v54 = vrot.slane %v288_v43, %v296_v45  ;;  %s3112_s26 = scalar_lea.vmem %s3169_s4, %s1747_s18 }
  0x12   : > { %v264_v3 = vld [vmem:[%s211_s21] sm:$0xff]  ;;  %v282_v4 = vpack.c.bf16 %v269_v2, %v268_v1  ;;  %v265_v5 = vld [vmem:[%s211_s21 + $0x8] sm:$0xff]  ;;  %v271_v7 = vld [vmem:[%s211_s21 + $0x38] sm:$0xff]  ;;  %1791 = vmatpush3.bf16.msra.mxu0 %v1936_v31  ;;  %v301_v56 = vrot.slane %v288_v43, %v300_v48  ;;  %v305_v57 = vrot.slane %v288_v43, %v304_v49 }
  0x13   : > { %v280_v8 = vpack.c.bf16 %v265_v5, %v264_v3  ;;  %v266_v9 = vld [vmem:[%s211_s21 + $0x10] sm:$0xff]  ;;  %v267_v10 = vld [vmem:[%s211_s21 + $0x18] sm:$0xff]  ;;  %v283_v11 = vpack.c.bf16 %v271_v7, %v270_v6  ;;  %v272_v15 = vld [vmem:[%s211_s21 + $0x40] sm:$0xff]  ;;  %1855 = vmatpush3.bf16.msra.mxu1 %v1937_v32  ;;  %1792 = vmatprep.subr.bf16.mxu0 %v1938_v33  ;;  %v310_v60 = vpack.c.bf16 %v293_v52, %v293_v52 }
  0x14   : > { %326 = vperm.xlu1 %1927, %v282_v4   ;;  %v281_v12 = vpack.c.bf16 %v267_v10, %v266_v9  ;;  %v274_v13 = vld [vmem:[%s211_s21 + $0x50] sm:$0xff]  ;;  %v275_v14 = vld [vmem:[%s211_s21 + $0x58] sm:$0xff]  ;;  %v273_v16 = vld [vmem:[%s211_s21 + $0x48] sm:$0xff]  ;;  %1856 = vmatprep.subr.bf16.mxu1 %v1939_v34  ;;  %v311_v61 = vpack.c.bf16 %v297_v54, %v297_v54  ;;  %v312_v62 = vpack.c.bf16 %v301_v56, %v301_v56 }
  0x15   : > { %316 = vperm.xlu0 %1926, %v280_v8   ;;  %v285_v17 = vpack.c.bf16 %v275_v14, %v274_v13  ;;  %v278_v18 = vld [vmem:[%s211_s21 + $0x70] sm:$0xff]  ;;  %v279_v19 = vld [vmem:[%s211_s21 + $0x78] sm:$0xff]  ;;  %v284_v20 = vpack.c.bf16 %v273_v16, %v272_v15  ;;  %v276_v21 = vld [vmem:[%s211_s21 + $0x60] sm:$0xff]  ;;  %v313_v63 = vpack.c.bf16 %v305_v57, %v305_v57  ;;  %v355_v5 = vpack.i.b16 %v310_v60, %v310_v60 }
  0x16   : > { %v277_v22 = vld [vmem:[%s211_s21 + $0x68] sm:$0xff]  ;;  %v287_v23 = vpack.c.bf16 %v279_v19, %v278_v18  ;;  %1793 = vmatpush3.bf16.msra.mxu0 %v1940_v35  ;;  %v232_v38 = vld [vmem:[%s2218_s27] sm:$0xff]  ;;  %v234_v41 = vld [vmem:[%s2218_s27 + $0x10] sm:$0xff]  ;;  %v362_v10 = vpack.i.b16 %v311_v61, %v311_v61 }
  0x17   : > { %v286_v24 = vpack.c.bf16 %v277_v22, %v276_v21  ;;  %1857 = vmatpush3.bf16.msra.mxu1 %v1941_v36  ;;  %v233_v39 = vld [vmem:[%s2218_s27 + $0x8] sm:$0xff]  ;;  %v235_v42 = vld [vmem:[%s2218_s27 + $0x18] sm:$0xff]  ;;  %vm248_vm0 = vnez %v232_v38  ;;  %vm250_vm2 = vnez %v234_v41  ;;  %v236_v58 = vld [vmem:[%s2218_s27 + $0x20] sm:$0xff] }
  0x18   : > { %331 = vperm.xlu1 %1927, %v283_v11   ;;  %vm249_vm1 = vnez %v233_v39  ;;  %vm251_vm3 = vnez %v235_v42  ;;  %v510_v46 = vsel %vm248_vm0, 16843009, %v2130_v0  ;;  %v512_v50 = vsel %vm250_vm2, 16843009, %v2130_v0  ;;  %v237_v59 = vld [vmem:[%s2218_s27 + $0x28] sm:$0xff]  ;;  %v238_v1 = vld [vmem:[%s2218_s27 + $0x30] sm:$0xff] }
  0x19   : > { %321 = vperm.xlu0 %1926, %v281_v12   ;;  %v511_v47 = vsel %vm249_vm1, 16843009, %v2130_v0  ;;  %v513_v51 = vsel %vm251_vm3, 16843009, %v2130_v0  ;;  %v239_v2 = vld [vmem:[%s2218_s27 + $0x38] sm:$0xff]  ;;  %vm252_vm6 = vnez %v236_v58  ;;  %vm253_vm7 = vnez %v237_v59  ;;  %v240_v30 = vld [vmem:[%s2218_s27 + $0x40] sm:$0xff] }
  0x1a   : > { %v526_v53 = vcombine.low %v510_v46, %v511_v47  ;;  %v528_v55 = vcombine.low %v512_v50, %v513_v51  ;;  %v527_v4 = vcombine.high %v510_v46, %v511_v47  ;;  %v529_v7 = vcombine.high %v512_v50, %v513_v51  ;;  %v241_v31 = vld [vmem:[%s2218_s27 + $0x48] sm:$0xff]  ;;  %v242_v39 = vld [vmem:[%s2218_s27 + $0x50] sm:$0xff]  ;;  %v243_v40 = vld [vmem:[%s2218_s27 + $0x58] sm:$0xff] }
  0x1b   : > { %vm254_vm8 = vnez %v238_v1  ;;  %vm255_vm9 = vnez %v239_v2  ;;  %v514_v8 = vsel %vm252_vm6, 16843009, %v2130_v0  ;;  %v515_v9 = vsel %vm253_vm7, 16843009, %v2130_v0  ;;  %v245_v1 = vld [vmem:[%s2218_s27 + $0x68] sm:$0xff] }
  0x1c   : > { %341 = vperm.xlu1 %1927, %v285_v17   ;;  %vm542_vm4 = vnez %v526_v53  ;;  %vm543_vm5 = vnez %v528_v55  ;;  %v369_v11 = vpack.i.b16 %v312_v62, %v312_v62  ;;  %v376_v12 = vpack.i.b16 %v313_v63, %v313_v63  ;;  %v244_v63 = vld [vmem:[%s2218_s27 + $0x60] sm:$0xff] }
  0x1d   : > { %336 = vperm.xlu0 %1926, %v284_v20   ;;  %v558_v3 = vsel %vm542_vm4, 16843009, %v2130_v0  ;;  %v559_v6 = vsel %vm543_vm5, 16843009, %v2130_v0  ;;  %vm544_vm10 = vnez %v527_v4  ;;  %v516_v18 = vsel %vm254_vm8, 16843009, %v2130_v0 }
  0x1e   : > { %v574_v13 = vunpack.c.1.s8 %v558_v3  ;;  %v575_v14 = vunpack.c.0.s8 %v558_v3  ;;  %v577_v15 = vunpack.c.3.s8 %v558_v3  ;;  %v578_v16 = vunpack.c.2.s8 %v558_v3 }
  0x1f   : > { %v580_v17 = vunpack.c.1.s8 %v559_v6  ;;  %v517_v19 = vsel %vm255_vm9, 16843009, %v2130_v0  ;;  %v530_v20 = vcombine.low %v514_v8, %v515_v9  ;;  %v581_v21 = vunpack.c.0.s8 %v559_v6 }
  0x20   : > { %351 = vperm.xlu1 %1927, %v287_v23   ;;  %v583_v22 = vunpack.c.3.s8 %v559_v6  ;;  %v584_v23 = vunpack.c.2.s8 %v559_v6  ;;  %vm545_vm11 = vnez %v529_v7  ;;  %v560_v25 = vsel %vm544_vm10, 16843009, %v2130_v0  ;;  %v246_v6 = vld [vmem:[%s2218_s27 + $0x70] sm:$0xff]  ;;  %v247_v7 = vld [vmem:[%s2218_s27 + $0x78] sm:$0xff] }
  0x21   : > { %346 = vperm.xlu0 %1926, %v286_v24   ;;  %v2241_v24 = vrot.slane %v355_v5, %v292_v44  ;;  %v2244_v26 = vrot.slane %v362_v10, %v292_v44  ;;  %v2246_v27 = vrot.slane %v369_v11, %v292_v44  ;;  %v2248_v28 = vrot.slane %v376_v12, %v292_v44 }
  0x22   : > { %v532_v29 = vcombine.low %v516_v18, %v517_v19  ;;  %v2252_v32 = vpack.c.b16 %v574_v13, %v575_v14  ;;  %v2254_v33 = vpack.c.b16 %v577_v15, %v578_v16  ;;  %v561_v34 = vsel %vm545_vm11, 16843009, %v2130_v0 }
  0x23   : > { %vm546_vm12 = vnez %v530_v20  ;;  %v2257_v35 = vpack.c.b16 %v580_v17, %v581_v21  ;;  %v2259_v36 = vpack.c.b16 %v583_v22, %v584_v23  ;;  %v586_v37 = vunpack.c.1.s8 %v560_v25 }
  0x24   : > { %v531_v38 = vcombine.high %v514_v8, %v515_v9  ;;  %v587_v41 = vunpack.c.0.s8 %v560_v25  ;;  %v589_v42 = vunpack.c.3.s8 %v560_v25  ;;  %vm256_vm13 = vnez %v240_v30 }
  0x25   : > { %vm257_vm14 = vnez %v241_v31  ;;  %v590_v43 = vunpack.c.2.s8 %v560_v25  ;;  %v592_v44 = vunpack.c.1.s8 %v561_v34  ;;  %vm547_vm15 = vnez %v532_v29 }
  0x26   : > { %v562_v45 = vsel %vm546_vm12, 16843009, %v2130_v0  ;;  %v593_v46 = vunpack.c.0.s8 %v561_v34  ;;  %v533_v47 = vcombine.high %v516_v18, %v517_v19  ;;  %vm258_vm0 = vnez %v242_v39 }
  0x27   : > { %vm259_vm1 = vnez %v243_v40  ;;  %v595_v48 = vunpack.c.3.s8 %v561_v34  ;;  %vm548_vm2 = vnez %v531_v38  ;;  %v518_v49 = vsel %vm256_vm13, 16843009, %v2130_v0 }
  0x28   : > { %v519_v50 = vsel %vm257_vm14, 16843009, %v2130_v0  ;;  %v596_v51 = vunpack.c.2.s8 %v561_v34  ;;  %v563_v52 = vsel %vm547_vm15, 16843009, %v2130_v0  ;;  %v598_v53 = vunpack.c.1.s8 %v562_v45 }
  0x29   : > { %v599_v54 = vunpack.c.0.s8 %v562_v45  ;;  %v2267_v55 = vpack.c.b16 %v586_v37, %v587_v41  ;;  %v2269_v56 = vpack.c.b16 %v589_v42, %v590_v43  ;;  %v520_v57 = vsel %vm258_vm0, 16843009, %v2130_v0 }
  0x2a   : > { %v521_v58 = vsel %vm259_vm1, 16843009, %v2130_v0  ;;  %v2273_v59 = vpack.c.b16 %v592_v44, %v593_v46  ;;  %vm2275_vm3 = vnez %v533_v47  ;;  %v564_v61 = vsel %vm548_vm2, 16843009, %v2130_v0 }
  0x2b   : > { %v534_v62 = vcombine.low %v518_v49, %v519_v50  ;;  %v601_v2 = vunpack.c.3.s8 %v562_v45  ;;  %v602_v3 = vunpack.c.2.s8 %v562_v45  ;;  %v604_v4 = vunpack.c.1.s8 %v563_v52 }
  0x2c   : > { %v605_v5 = vunpack.c.0.s8 %v563_v52  ;;  %v2284_v8 = vpack.c.b16 %v595_v48, %v596_v51  ;;  %v2286_v9 = vpack.c.b16 %v598_v53, %v599_v54  ;;  %v607_v10 = vunpack.c.3.s8 %v563_v52 }
  0x2d   : > { %v536_v11 = vcombine.low %v520_v57, %v521_v58  ;;  %v608_v12 = vunpack.c.2.s8 %v563_v52  ;;  %v565_v13 = vsel %vm2275_vm3, 16843009, %v2130_v0  ;;  %vm260_vm4 = vnez %v244_v63 }
  0x2e   : > { %vm261_vm5 = vnez %v245_v1  ;;  %v610_v14 = vunpack.c.1.s8 %v564_v61  ;;  %vm550_vm6 = vnez %v534_v62  ;;  %vm262_vm7 = vnez %v246_v6 }
  0x2f   : > { %vm263_vm8 = vnez %v247_v7  ;;  %v2291_v15 = vpack.c.b16 %v601_v2, %v602_v3  ;;  %v2293_v16 = vpack.c.b16 %v604_v4, %v605_v5  ;;  %v611_v17 = vunpack.c.0.s8 %v564_v61 }
  0x30   : > { %v613_v18 = vunpack.c.3.s8 %v564_v61  ;;  %vm551_vm9 = vnez %v536_v11  ;;  %v535_v19 = vcombine.high %v518_v49, %v519_v50  ;;  %v522_v20 = vsel %vm260_vm4, 16843009, %v2130_v0 }
  0x31   : > { %v523_v21 = vsel %vm261_vm5, 16843009, %v2130_v0  ;;  %v2297_v22 = vpack.c.b16 %v607_v10, %v608_v12  ;;  %v566_v23 = vsel %vm550_vm6, 16843009, %v2130_v0  ;;  %v524_v25 = vsel %vm262_vm7, 16843009, %v2130_v0 }
  0x32   : > { %v525_v29 = vsel %vm263_vm8, 16843009, %v2130_v0  ;;  %v614_v30 = vunpack.c.2.s8 %v564_v61  ;;  %v616_v31 = vunpack.c.1.s8 %v565_v13  ;;  %v617_v34 = vunpack.c.0.s8 %v565_v13 }
  0x33   : > { %v537_v37 = vcombine.high %v520_v57, %v521_v58  ;;  %v619_v38 = vunpack.c.3.s8 %v565_v13  ;;  %v620_v39 = vunpack.c.2.s8 %v565_v13  ;;  %v567_v40 = vsel %vm551_vm9, 16843009, %v2130_v0 }
  0x34   : > { %v538_v41 = vcombine.low %v522_v20, %v523_v21  ;;  %v622_v42 = vunpack.c.1.s8 %v566_v23  ;;  %v623_v43 = vunpack.c.0.s8 %v566_v23  ;;  %vm552_vm10 = vnez %v535_v19 }
  0x35   : > { %v540_v44 = vcombine.low %v524_v25, %v525_v29  ;;  %v2303_v45 = vpack.c.b16 %v610_v14, %v611_v17  ;;  %v625_v46 = vunpack.c.3.s8 %v566_v23  ;;  %v626_v47 = vunpack.c.2.s8 %v566_v23 }
  0x36   : > { %v539_v48 = vcombine.high %v522_v20, %v523_v21  ;;  %v628_v49 = vunpack.c.1.s8 %v567_v40  ;;  %v629_v50 = vunpack.c.0.s8 %v567_v40  ;;  %vm553_vm11 = vnez %v537_v37 }
  0x37   : > { %v541_v51 = vcombine.high %v524_v25, %v525_v29  ;;  %v2305_v52 = vpack.c.b16 %v613_v18, %v614_v30  ;;  %v2307_v53 = vpack.c.b16 %v616_v31, %v617_v34  ;;  %v568_v54 = vsel %vm552_vm10, 16843009, %v2130_v0 }
  0x38   : > { %vm554_vm12 = vnez %v538_v41  ;;  %v2310_v57 = vpack.c.b16 %v619_v38, %v620_v39  ;;  %v2312_v58 = vpack.c.b16 %v622_v42, %v623_v43  ;;  %v631_v60 = vunpack.c.3.s8 %v567_v40 }
  0x39   : > { %vm555_vm13 = vnez %v540_v44  ;;  %v2314_v61 = vpack.c.b16 %v625_v46, %v626_v47  ;;  %v632_v62 = vunpack.c.2.s8 %v567_v40  ;;  %v569_v63 = vsel %vm553_vm11, 16843009, %v2130_v0 }
  0x3a   : > { %vm556_vm14 = vnez %v539_v48  ;;  %v2317_v1 = vpack.c.b16 %v628_v49, %v629_v50  ;;  %v634_v2 = vunpack.c.1.s8 %v568_v54  ;;  %v570_v3 = vsel %vm554_vm12, 16843009, %v2130_v0 }
  0x3b   : > { %vm557_vm15 = vnez %v541_v51  ;;  %v635_v4 = vunpack.c.0.s8 %v568_v54  ;;  %v637_v5 = vunpack.c.3.s8 %v568_v54  ;;  %v638_v6 = vunpack.c.2.s8 %v568_v54 }
  0x3c   : > { %v571_v7 = vsel %vm555_vm13, 16843009, %v2130_v0  ;;  %v640_v10 = vunpack.c.1.s8 %v569_v63  ;;  %v641_v11 = vunpack.c.0.s8 %v569_v63  ;;  %v643_v12 = vunpack.c.3.s8 %v569_v63 }
  0x3d   : > { %v572_v13 = vsel %vm556_vm14, 16843009, %v2130_v0  ;;  %v644_v14 = vunpack.c.2.s8 %v569_v63  ;;  %v646_v17 = vunpack.c.1.s8 %v570_v3  ;;  %v647_v18 = vunpack.c.0.s8 %v570_v3 }
  0x3e   : > { %v573_v19 = vsel %vm557_vm15, 16843009, %v2130_v0  ;;  %v649_v20 = vunpack.c.3.s8 %v570_v3  ;;  %v650_v21 = vunpack.c.2.s8 %v570_v3  ;;  %v652_v23 = vunpack.c.1.s8 %v571_v7 }
  0x3f   : > { %v653_v25 = vunpack.c.0.s8 %v571_v7  ;;  %v655_v29 = vunpack.c.3.s8 %v571_v7  ;;  %v656_v30 = vunpack.c.2.s8 %v571_v7  ;;  %v658_v31 = vunpack.c.1.s8 %v572_v13 }
  0x40   : > { %v659_v34 = vunpack.c.0.s8 %v572_v13  ;;  %v661_v37 = vunpack.c.3.s8 %v572_v13  ;;  %v662_v38 = vunpack.c.2.s8 %v572_v13  ;;  %v664_v39 = vunpack.c.1.s8 %v573_v19 }
  0x41   : > { %v665_v40 = vunpack.c.0.s8 %v573_v19  ;;  %v2323_v41 = vpack.c.b16 %v631_v60, %v632_v62  ;;  %v2325_v42 = vpack.c.b16 %v634_v2, %v635_v4  ;;  %v667_v43 = vunpack.c.3.s8 %v573_v19 }
  0x42   : > { %v668_v44 = vunpack.c.2.s8 %v573_v19  ;;  %v2327_v46 = vpack.c.b16 %v637_v5, %v638_v6  ;;  %v2329_v0 = vpack.c.b16 %v640_v10, %v641_v11  ;;  %v2331_v47 = vpack.c.b16 %v643_v12, %v644_v14 }
  0x43   : > { %v2333_v48 = vpack.c.b16 %v646_v17, %v647_v18  ;;  %v2335_v50 = vpack.c.b16 %v649_v20, %v650_v21  ;;  %v2337_v51 = vpack.c.b16 %v652_v23, %v653_v25  ;;  %v2339_v54 = vpack.c.b16 %v655_v29, %v656_v30 }
  0x44   : > { %v2341_v60 = vpack.c.b16 %v658_v31, %v659_v34  ;;  %v2349_v3 = vpack.c.b16 %v661_v37, %v662_v38  ;;  %v2351_v4 = vpack.c.b16 %v664_v39, %v665_v40  ;;  %vm670_vm0 = vcmp.ne.s16.totalorder %v2252_v32, 0 }
  0x45   : > { %3181 = vst [vmem:[#allocation2_spill] sm:$0xff] %v2335_v50  ;;  %3182 = vst [vmem:[#allocation3_spill] sm:$0xff] %v2337_v51  ;;  %v2359_v10 = vpack.c.b16 %v667_v43, %v668_v44  ;;  %vm671_vm2 = vcmp.ne.s16.totalorder %v2254_v33, 0  ;;  %vm672_vm4 = vcmp.ne.s16.totalorder %v2257_v35, 0  ;;  %vm673_vm5 = vcmp.ne.s16.totalorder %v2259_v36, 0 }
  0x46   : > { %3183 = vst [vmem:[#allocation4_spill] sm:$0xff] %v2339_v54  ;;  %3184 = vst [vmem:[#allocation5_spill] sm:$0xff] %v2341_v60  ;;  %vm674_vm8 = vcmp.ne.s16.totalorder %v2267_v55, 0  ;;  %vm675_vm9 = vcmp.ne.s16.totalorder %v2269_v56, 0  ;;  %vm676_vm10 = vcmp.ne.s16.totalorder %v2273_v59, 0  ;;  %vm677_vm11 = vcmp.ne.s16.totalorder %v2284_v8, 0 }
  0x47   : > { %3185 = vst [vmem:[#allocation6_spill] sm:$0xff] %v2349_v3  ;;  %3186 = vst [vmem:[#allocation7_spill] sm:$0xff] %v2351_v4  ;;  %vm678_vm14 = vcmp.ne.s16.totalorder %v2286_v9, 0 }
  0x48   : > { %3187 = vst [vmem:[#allocation8_spill] sm:$0xff] %v2359_v10 }
  0x8f   : > { %v327_v49 = vpop.permute.xlu1 %326 }
  0x90   : > { %v2344_v62 = vadd.bf16 %v2241_v24, %v327_v49  ;;  %v2347_v63 = vadd.bf16 %v2244_v26, %v327_v49  ;;  %v317_v2 = vpop.permute.xlu0 %316  ;;  %v2354_v5 = vadd.bf16 %v2246_v27, %v327_v49  ;;  %v2368_v17 = vadd.bf16 %v2248_v28, %v327_v49 }
  0x91   : > { %v382_v6 = vadd.bf16 %v2241_v24, %v317_v2  ;;  %v383_v7 = vadd.bf16 %v2244_v26, %v317_v2  ;;  %v384_v13 = vadd.bf16 %v2246_v27, %v317_v2  ;;  %v2365_v14 = vadd.bf16 %v2248_v28, %v317_v2 }
  0x92   : > { %vm422_vm12 = vcmp.gt.bf16.partialorder %v2344_v62, 0  ;;  %vm423_vm13 = vcmp.gt.bf16.partialorder %v2347_v63, 0  ;;  %vm425_vm15 = vcmp.gt.bf16.partialorder %v2368_v17, 0  ;;  %v456_v59 = vmul.bf16 1045249613, %v2354_v5 }
  0x93   : > { %v446_v18 = vmul.bf16 1045249613, %v382_v6  ;;  %v447_v19 = vmul.bf16 1045249613, %v383_v7  ;;  %v332_v20 = vpop.permute.xlu1 %331  ;;  %vm414_vm1 = vcmp.gt.bf16.partialorder %v382_v6, 0  ;;  %vm415_vm3 = vcmp.gt.bf16.partialorder %v383_v7, 0 }
  0x94   : > { %v2372_v21 = vadd.bf16 %v2241_v24, %v332_v20  ;;  %v2375_v23 = vadd.bf16 %v2244_v26, %v332_v20  ;;  %v2378_v25 = vadd.bf16 %v2246_v27, %v332_v20  ;;  %v322_v29 = vpop.permute.xlu0 %321  ;;  %v2382_v30 = vadd.bf16 %v2248_v28, %v332_v20 }
  0x95   : > { %v2385_v31 = vadd.bf16 %v2241_v24, %v322_v29  ;;  %v2388_v34 = vadd.bf16 %v2244_v26, %v322_v29  ;;  %v2391_v37 = vadd.bf16 %v2246_v27, %v322_v29  ;;  %vm416_vm6 = vcmp.gt.bf16.partialorder %v384_v13, 0 }
  0x96   : > { %vm417_vm7 = vcmp.gt.bf16.partialorder %v2365_v14, 0  ;;  %v2398_v40 = vadd.bf16 %v2248_v28, %v322_v29  ;;  %v448_v2 = vmul.bf16 1045249613, %v384_v13  ;;  %v478_v11 = vsel %vm414_vm1, %v382_v6, %v446_v18 }
  0x97   : > { %v450_v43 = vmul.bf16 1045249613, %v2385_v31  ;;  %v451_v44 = vmul.bf16 1045249613, %v2388_v34  ;;  %v342_v49 = vpop.permute.xlu1 %341  ;;  %v449_v54 = vmul.bf16 1045249613, %v2365_v14  ;;  %v479_v51 = vsel %vm415_vm3, %v383_v7, %v447_v19 }
  0x98   : > { %v2403_v20 = vadd.bf16 %v2241_v24, %v342_v49  ;;  %v2406_v12 = vadd.bf16 %v2244_v26, %v342_v49  ;;  %v2409_v39 = vadd.bf16 %v2246_v27, %v342_v49  ;;  %v337_v38 = vpop.permute.xlu0 %336  ;;  %v2414_v29 = vadd.bf16 %v2248_v28, %v342_v49 }
  0x99   : > { %v2417_v10 = vadd.bf16 %v2241_v24, %v337_v38  ;;  %v2420_v4 = vadd.bf16 %v2244_v26, %v337_v38  ;;  %v2423_v3 = vadd.bf16 %v2246_v27, %v337_v38  ;;  %v2432_v49 = vadd.bf16 %v2248_v28, %v337_v38 }
  0x9a   : > { %3188 = vst [vmem:[#allocation9_spill] sm:$0xff] %v2409_v39  ;;  %3189 = vst [vmem:[#allocation10_spill] sm:$0xff] %v2414_v29  ;;  %v480_v50 = vsel %vm416_vm6, %v384_v13, %v448_v2  ;;  %v2453_v60 = vsel %vm670_vm0, %v478_v11, 3463368302  ;;  %vm418_vm0 = vcmp.gt.bf16.partialorder %v2385_v31, 0  ;;  %vm420_vm6 = vcmp.gt.bf16.partialorder %v2391_v37, 0 }
  0x9b   : > { %v352_v39 = vpop.permute.xlu1 %351  ;;  %v452_v35 = vmul.bf16 1045249613, %v2391_v37  ;;  %vm683_vm3 = vcmp.ne.s16.totalorder %v2305_v52, 0  ;;  %v482_v36 = vsel %vm418_vm0, %v2385_v31, %v450_v43  ;;  %vm686_vm1 = vcmp.ne.s16.totalorder %v2312_v58, 0 }
  0x9c   : > { %v2443_v38 = vadd.bf16 %v2241_v24, %v352_v39  ;;  %v2446_v18 = vadd.bf16 %v2244_v26, %v352_v39  ;;  %v2449_v6 = vadd.bf16 %v2246_v27, %v352_v39  ;;  %v347_v29 = vpop.permute.xlu0 %346  ;;  %v2456_v7 = vadd.bf16 %v2248_v28, %v352_v39 }
  0x9d   : > { %v2459_v13 = vadd.bf16 %v2241_v24, %v347_v29  ;;  %v2462_v19 = vadd.bf16 %v2244_v26, %v347_v29  ;;  %v2465_v2 = vadd.bf16 %v2246_v27, %v347_v29  ;;  %v2471_v11 = vadd.bf16 %v2248_v28, %v347_v29 }
  0x9e   : > { %3190 = vst [vmem:[#allocation11_spill] sm:$0xff] %v2456_v7  ;;  %v474_v32 = vmul.bf16 1045249613, %v2443_v38  ;;  %v481_v24 = vsel %vm417_vm7, %v2365_v14, %v449_v54  ;;  %v2478_v26 = vsel %vm671_vm2, %v479_v51, 3463368302  ;;  %vm419_vm2 = vcmp.gt.bf16.partialorder %v2388_v34, 0 }
  0x9f   : > { %v470_v27 = vmul.bf16 1045249613, %v2459_v13  ;;  %v471_v39 = vmul.bf16 1045249613, %v2462_v19  ;;  %v2484_v7 = vsel %vm672_vm4, %v480_v50, 3463368302  ;;  %v734_v28 = vmax.bf16 %v2478_v26, %v2453_v60 }
  0xa0   : > { %v2490_v29 = vsel %vm673_vm5, %v481_v24, 3463368302  ;;  %vm421_vm4 = vcmp.gt.bf16.partialorder %v2398_v40, 0  ;;  %v453_v50 = vmul.bf16 1045249613, %v2398_v40  ;;  %vm684_vm5 = vcmp.ne.s16.totalorder %v2307_v53, 0 }
  0xa1   : > { %v735_v33 = vmax.bf16 %v734_v28, %v2484_v7  ;;  %v483_v51 = vsel %vm419_vm2, %v2388_v34, %v451_v44  ;;  %vm424_vm7 = vcmp.gt.bf16.partialorder %v2354_v5, 0  ;;  %v484_v14 = vsel %vm420_vm6, %v2391_v37, %v452_v35  ;;  %v3201_v53 = vld [vmem:[#allocation2_spill] sm:$0xff] }
  0xa2   : > { %v485_v24 = vsel %vm421_vm4, %v2398_v40, %v453_v50  ;;  %v2512_v28 = vsel %vm674_vm8, %v482_v36, 3463368302  ;;  %v2517_v31 = vsel %vm675_vm9, %v483_v51, 3463368302  ;;  %v2521_v34 = vsel %vm676_vm10, %v484_v14, 3463368302 }
  0xa3   : > { %v736_v54 = vmax.bf16 %v735_v33, %v2490_v29  ;;  %v2525_v43 = vsel %vm677_vm11, %v485_v24, 3463368302  ;;  %v3191_v37 = vmul.bf16 1045249613, %v2344_v62  ;;  %vm687_vm8 = vcmp.ne.s16.totalorder %v2314_v61, 0 }
  0xa4   : > { %v739_v56 = vmax.bf16 %v2517_v31, %v2512_v28  ;;  %v457_v40 = vmul.bf16 1045249613, %v2368_v17  ;;  %v3192_v8 = vmul.bf16 1045249613, %v2347_v63  ;;  %vm688_vm9 = vcmp.ne.s16.totalorder %v2317_v1, 0  ;;  %v3207_v1 = vld [vmem:[#allocation4_spill] sm:$0xff] }
  0xa5   : > { %v486_v55 = vsel %vm422_vm12, %v2344_v62, %v3191_v37  ;;  %737 = vmax.xlane.bf16.xlu0 %v736_v54  ;;  %vm3193_vm10 = vcmp.ne.s16.totalorder %v2291_v15, 0  ;;  %vm426_vm11 = vcmp.gt.bf16.partialorder %v2372_v21, 0  ;;  %vm427_vm12 = vcmp.gt.bf16.partialorder %v2375_v23, 0 }
  0xa6   : > { %v487_v44 = vsel %vm423_vm13, %v2347_v63, %v3192_v8  ;;  %v2545_v62 = vsel %vm678_vm14, %v486_v55, 3463368302  ;;  %vm689_vm0 = vcmp.ne.s16.totalorder %v2323_v41, 0  ;;  %v740_v35 = vmax.bf16 %v739_v56, %v2521_v34 }
  0xa7   : > { %v2549_v33 = vsel %vm3193_vm10, %v487_v44, 3463368302  ;;  %v488_v63 = vsel %vm424_vm7, %v2354_v5, %v456_v59  ;;  %v489_v9 = vsel %vm425_vm15, %v2368_v17, %v457_v40  ;;  %vm3194_vm13 = vcmp.ne.s16.totalorder %v2293_v16, 0 }
  0xa8   : > { %v744_v15 = vmax.bf16 %v2549_v33, %v2545_v62  ;;  %v2565_v50 = vsel %vm3194_vm13, %v488_v63, 3463368302  ;;  %vm3195_vm14 = vcmp.ne.s16.totalorder %v2297_v22, 0  ;;  %vm428_vm2 = vcmp.gt.bf16.partialorder %v2378_v25, 0 }
  0xa9   : > { %v2569_v36 = vsel %vm3195_vm14, %v489_v9, 3463368302  ;;  %vm429_vm6 = vcmp.gt.bf16.partialorder %v2382_v30, 0  ;;  %vm690_vm7 = vcmp.ne.s16.totalorder %v2325_v42, 0  ;;  %vm691_vm4 = vcmp.ne.s16.totalorder %v2327_v46, 0 }
  0xaa   : > { %v741_v5 = vmax.bf16 %v740_v35, %v2525_v43  ;;  %v745_v17 = vmax.bf16 %v744_v15, %v2565_v50  ;;  %v460_v16 = vmul.bf16 1045249613, %v2378_v25  ;;  %v461_v51 = vmul.bf16 1045249613, %v2382_v30  ;;  %v3203_v35 = vld [vmem:[#allocation3_spill] sm:$0xff] }
  0xab   : > { %vm692_vm15 = vcmp.ne.s16.totalorder %v2329_v0, 0  ;;  %v3196_v22 = vmul.bf16 1045249613, %v2372_v21  ;;  %v3197_v14 = vmul.bf16 1045249613, %v2375_v23  ;;  %vm430_vm10 = vcmp.gt.bf16.partialorder %v2417_v10, 0 }
  0xac   : > { %vm431_vm13 = vcmp.gt.bf16.partialorder %v2420_v4, 0  ;;  %vm693_vm14 = vcmp.ne.s16.totalorder %v2331_v47, 0  ;;  %742 = vmax.xlane.bf16.xlu1 %v741_v5  ;;  %v746_v37 = vmax.bf16 %v745_v17, %v2569_v36  ;;  %v492_v55 = vsel %vm428_vm2, %v2378_v25, %v460_v16  ;;  %v3204_v17 = vld [vmem:[#allocation9_spill] sm:$0xff] }
  0xad   : > { %v490_v54 = vsel %vm426_vm11, %v2372_v21, %v3196_v22  ;;  %v491_v24 = vsel %vm427_vm12, %v2375_v23, %v3197_v14  ;;  %v493_v21 = vsel %vm429_vm6, %v2382_v30, %v461_v51  ;;  %vm3198_vm11 = vcmp.ne.s16.totalorder %v2303_v45, 0  ;;  %v3205_v16 = vld [vmem:[#allocation5_spill] sm:$0xff]  ;;  %v3206_v51 = vld [vmem:[#allocation10_spill] sm:$0xff] }
  0xae   : > { %v2602_v23 = vsel %vm3198_vm11, %v490_v54, 3463368302  ;;  %v2606_v56 = vsel %vm683_vm3, %v491_v24, 3463368302  ;;  %v2610_v59 = vsel %vm684_vm5, %v492_v55, 3463368302  ;;  %747 = vmax.xlane.bf16.xlu0 %v746_v37 }
  0xaf   : > { %vm3199_vm12 = vcmp.ne.s16.totalorder %v2310_v57, 0  ;;  %v3200_v25 = vmul.bf16 1045249613, %v2417_v10  ;;  %vm694_vm2 = vcmp.ne.s16.totalorder %v2333_v48, 0  ;;  %v749_v45 = vmax.bf16 %v2606_v56, %v2602_v23  ;;  %v3208_v22 = vld [vmem:[#allocation6_spill] sm:$0xff] }
  0xb0   : > { %v2614_v40 = vsel %vm3199_vm12, %v493_v21, 3463368302  ;;  %vm432_vm3 = vcmp.gt.bf16.partialorder %v2423_v3, 0  ;;  %vm433_vm6 = vcmp.gt.bf16.partialorder %v2432_v49, 0  ;;  %v464_v52 = vmul.bf16 1045249613, %v2423_v3 }
  0xb1   : > { %v494_v30 = vsel %vm430_vm10, %v2417_v10, %v3200_v25  ;;  %vm695_vm5 = vcmp.ne.s16.totalorder %v3201_v53, 0  ;;  %v465_v57 = vmul.bf16 1045249613, %v2432_v49  ;;  %v3202_v8 = vmul.bf16 1045249613, %v2420_v4  ;;  %v3211_v21 = vld [vmem:[#allocation7_spill] sm:$0xff] }
  0xb2   : > { %v2634_v44 = vsel %vm686_vm1, %v494_v30, 3463368302  ;;  %vm434_vm10 = vcmp.gt.bf16.partialorder %v2403_v20, 0  ;;  %vm696_vm11 = vcmp.ne.s16.totalorder %v3203_v35, 0  ;;  %v750_v63 = vmax.bf16 %v749_v45, %v2610_v59  ;;  %v1943_v48 = vld [vmem:[%s3167_s2 + $0xe0] sm:$0xff]  }
  0xb3   : > { %v495_v10 = vsel %vm431_vm13, %v2420_v4, %v3202_v8  ;;  %v496_v9 = vsel %vm432_vm3, %v2423_v3, %v464_v52  ;;  %vm435_vm12 = vcmp.gt.bf16.partialorder %v2406_v12, 0  ;;  %v497_v4 = vsel %vm433_vm6, %v2432_v49, %v465_v57  ;;  %v1945_v53 = vld [vmem:[%s3167_s2 + $0xa0] sm:$0xff]   ;;  %1858 = vmatprep.subr.bf16.mxu1 %v1943_v48 }
  0xb4   : > { %v2642_v15 = vsel %vm687_vm8, %v495_v10, 3463368302  ;;  %v2648_v58 = vsel %vm688_vm9, %v496_v9, 3463368302  ;;  %vm436_vm1 = vcmp.gt.bf16.partialorder %v3204_v17, 0  ;;  %vm698_vm13 = vcmp.ne.s16.totalorder %v3205_v16, 0  ;;  %1859 = vmatpush3.bf16.msra.mxu1 %v1945_v53 }
  0xb5   : > { %v754_v5 = vmax.bf16 %v2642_v15, %v2634_v44  ;;  %v751_v3 = vmax.bf16 %v750_v63, %v2614_v40  ;;  %v2657_v61 = vsel %vm689_vm0, %v497_v4, 3463368302  ;;  %vm437_vm8 = vcmp.gt.bf16.partialorder %v3206_v51, 0  ;;  %v1960_v48 = vld [vmem:[%s3167_s2] sm:$0xff]  }
  0xb6   : > { %v468_v49 = vmul.bf16 1045249613, %v3204_v17  ;;  %vm697_vm9 = vcmp.ne.s16.totalorder %v3207_v1, 0  ;;  %vm699_vm3 = vcmp.ne.s16.totalorder %v3208_v22, 0  ;;  %v469_v14 = vmul.bf16 1045249613, %v3206_v51 }
  0xb7   : > { %v755_v54 = vmax.bf16 %v754_v5, %v2648_v58  ;;  %v3209_v24 = vmul.bf16 1045249613, %v2403_v20  ;;  %v3210_v37 = vmul.bf16 1045249613, %v2406_v12  ;;  %vm700_vm0 = vcmp.ne.s16.totalorder %v3211_v21, 0  ;;  %752 = vmax.xlane.bf16.xlu1 %v751_v3  ;;  %v3212_v3 = vld [vmem:[#allocation11_spill] sm:$0xff] }
  0xb8   : > { %v500_v25 = vsel %vm436_vm1, %v3204_v17, %v468_v49  ;;  %vm438_vm6 = vcmp.gt.bf16.partialorder %v2459_v13, 0  ;;  %v501_v52 = vsel %vm437_vm8, %v3206_v51, %v469_v14  ;;  %v472_v0 = vmul.bf16 1045249613, %v2465_v2  ;;  %v1948_v21 = vld [vmem:[%s3167_s2 + $0x18] sm:$0xff]  }
  0xb9   : > { %v498_v41 = vsel %vm434_vm10, %v2403_v20, %v3209_v24  ;;  %v499_v55 = vsel %vm435_vm12, %v2406_v12, %v3210_v37  ;;  %v756_v20 = vmax.bf16 %v755_v54, %v2657_v61  ;;  %v2688_v12 = vsel %vm692_vm15, %v500_v25, 3463368302  ;;  %v1947_v25 = vld [vmem:[%s3167_s2 + $0xd8] sm:$0xff]  }
  0xba   : > { %v2677_v30 = vsel %vm690_vm7, %v498_v41, 3463368302  ;;  %v2681_v45 = vsel %vm691_vm4, %v499_v55, 3463368302  ;;  %v2694_v42 = vsel %vm693_vm14, %v501_v52, 3463368302  ;;  %v502_v10 = vsel %vm438_vm6, %v2459_v13, %v470_v27  ;;  %1860 = vmatprep.subr.bf16.mxu1 %v1947_v25 }
  0xbb   : > { %v759_v57 = vmax.bf16 %v2681_v45, %v2677_v30  ;;  %vm439_vm7 = vcmp.gt.bf16.partialorder %v2462_v19, 0  ;;  %vm440_vm4 = vcmp.gt.bf16.partialorder %v2465_v2, 0  ;;  %vm441_vm10 = vcmp.gt.bf16.partialorder %v2471_v11, 0  ;;  %757 = vmax.xlane.bf16.xlu0 %v756_v20  ;;  %v1942_v13 = vld [vmem:[%s3167_s2 + $0x60] sm:$0xff]   ;;  %v1946_v55 = vld [vmem:[%s3167_s2 + $0x58] sm:$0xff]  }
  0xbc   : > { %v473_v8 = vmul.bf16 1045249613, %v2471_v11  ;;  %v475_v47 = vmul.bf16 1045249613, %v2446_v18  ;;  %v503_v63 = vsel %vm439_vm7, %v2462_v19, %v471_v39  ;;  %v2711_v9 = vsel %vm694_vm2, %v502_v10, 3463368302  ;;  %1794 = vmatprep.subr.bf16.mxu0 %v1942_v13 }
  0xbd   : > { %v760_v46 = vmax.bf16 %v759_v57, %v2688_v12  ;;  %vm442_vm15 = vcmp.gt.bf16.partialorder %v2443_v38, 0  ;;  %v504_v5 = vsel %vm440_vm4, %v2465_v2, %v472_v0  ;;  %v2718_v17 = vsel %vm695_vm5, %v503_v63, 3463368302  ;;  %v1944_v19 = vld [vmem:[%s3167_s2 + $0x20] sm:$0xff]   ;;  %v1949_v52 = vld [vmem:[%s3167_s2 + $0x98] sm:$0xff]   ;;  %v1950_v57 = vld [vmem:[%s3167_s2 + $0x50] sm:$0xff]  }
  0xbe   : > { %vm443_vm14 = vcmp.gt.bf16.partialorder %v2446_v18, 0  ;;  %v505_v2 = vsel %vm441_vm10, %v2471_v11, %v473_v8  ;;  %v2735_v27 = vsel %vm696_vm11, %v504_v5, 3463368302  ;;  %v764_v39 = vmax.bf16 %v2718_v17, %v2711_v9  ;;  %1795 = vmatpush3.bf16.msra.mxu0 %v1944_v19  ;;  %1861 = vmatpush3.bf16.msra.mxu1 %v1949_v52  ;;  %v1952_v0 = vld [vmem:[%s3167_s2 + $0x10] sm:$0xff]   ;;  %v1954_v10 = vld [vmem:[%s3167_s2 + $0x48] sm:$0xff]   ;;  %v1958_v5 = vld [vmem:[%s3167_s2 + $0x40] sm:$0xff]  }
  0xbf   : > { %v761_v4 = vmax.bf16 %v760_v46, %v2694_v42  ;;  %vm444_vm2 = vcmp.gt.bf16.partialorder %v2449_v6, 0  ;;  %vm445_vm5 = vcmp.gt.bf16.partialorder %v3212_v3, 0  ;;  %v476_v51 = vmul.bf16 1045249613, %v2449_v6  ;;  %1796 = vmatprep.subr.bf16.mxu0 %v1946_v55  ;;  %v1951_v46 = vld [vmem:[%s3167_s2 + $0xd0] sm:$0xff]   ;;  %v1956_v63 = vld [vmem:[%s3167_s2 + $0x8] sm:$0xff]  }
  0xc0   : > { %v477_v49 = vmul.bf16 1045249613, %v3212_v3  ;;  %v506_v11 = vsel %vm442_vm15, %v2443_v38, %v474_v32  ;;  %v765_v35 = vmax.bf16 %v764_v39, %v2735_v27  ;;  %v507_v54 = vsel %vm443_vm14, %v2446_v18, %v475_v47  ;;  %v3213_v32 = vld [vmem:[#allocation8_spill] sm:$0xff]  ;;  %1862 = vmatprep.subr.bf16.mxu1 %v1951_v46  ;;  %v1955_v47 = vld [vmem:[%s3167_s2 + $0xc8] sm:$0xff]   ;;  %v1959_v13 = vld [vmem:[%s3167_s2 + $0xc0] sm:$0xff]  }
  0xc1   : > { %762 = vmax.xlane.bf16.xlu1 %v761_v4  ;;  %v2757_v14 = vsel %vm698_vm13, %v506_v11, 3463368302  ;;  %v2761_v24 = vsel %vm697_vm9, %v505_v2, 3463368302  ;;  %v508_v38 = vsel %vm444_vm2, %v2449_v6, %v476_v51  ;;  %vm701_vm11 = vcmp.ne.s16.totalorder %v3213_v32, 0  ;;  %v1953_v8 = vld [vmem:[%s3167_s2 + $0x90] sm:$0xff]  }
  0xc2   : > { %v2767_v41 = vsel %vm699_vm3, %v507_v54, 3463368302  ;;  %v766_v18 = vmax.bf16 %v765_v35, %v2761_v24  ;;  %v509_v16 = vsel %vm445_vm5, %v3212_v3, %v477_v49  ;;  %v2775_v1 = vsel %vm700_vm0, %v508_v38, 3463368302  ;;  %1797 = vmatpush3.bf16.msra.mxu0 %v1948_v21  ;;  %1863 = vmatpush3.bf16.msra.mxu1 %v1953_v8  ;;  %v1957_v4 = vld [vmem:[%s3167_s2 + $0x88] sm:$0xff]   ;;  %v1961_v19 = vld [vmem:[%s3167_s2 + $0x80] sm:$0xff]  }
  0xc3   : > { %v769_v6 = vmax.bf16 %v2767_v41, %v2757_v14  ;;  %v2780_v22 = vsel %vm701_vm11, %v509_v16, 3463368302  ;;  %1798 = vmatprep.subr.bf16.mxu0 %v1950_v57  ;;  %1864 = vmatprep.subr.bf16.mxu1 %v1955_v47  ;;  %vm1464_vm12 = vcmask 56320  }
  0xc4   : > { %767 = vmax.xlane.bf16.xlu0 %v766_v18 }
  0xc5   : > { %v770_v37 = vmax.bf16 %v769_v6, %v2775_v1 }
  0xc6   : > { %1799 = vmatpush3.bf16.msra.mxu0 %v1952_v0  ;;  %1865 = vmatpush3.bf16.msra.mxu1 %v1957_v4 }
  0xc7   : > { %v771_v20 = vmax.bf16 %v770_v37, %v2780_v22  ;;  %1800 = vmatprep.subr.bf16.mxu0 %v1954_v10  ;;  %1866 = vmatprep.subr.bf16.mxu1 %v1959_v13 }
  0xc9   : > { %772 = vmax.xlane.bf16.xlu1 %v771_v20 }
  0xca   : > { %1801 = vmatpush3.bf16.msra.mxu0 %v1956_v63  ;;  %1867 = vmatpush3.bf16.msra.mxu1 %v1961_v19 }
  0xcb   : > { %1802 = vmatprep.subr.bf16.mxu0 %v1958_v5 }
  0xce   : > { %1803 = vmatpush3.bf16.msra.mxu0 %v1960_v48 }
 0x132   : > { %v738_v2 = vpop.xlane.xlu0 %737 }
 0x133   : > { %v774_v39 = vsub.bf16 %v2453_v60, %v738_v2  ;;  %v775_v53 = vsub.bf16 %v2478_v26, %v738_v2  ;;  %v777_v20 = vsub.bf16 %v2490_v29, %v738_v2 }
 0x135   : > { %v807_v3 = vmul.bf16 1069105081, %v774_v39  ;;  %v810_v51 = vmul.bf16 1069105081, %v775_v53  ;;  %v816_v46 = vmul.bf16 1069105081, %v777_v20 }
 0x137   : > { %1962 = vpow.bf16 %v807_v3 }
 0x138   : > { %1964 = vpow.bf16 %v810_v51 }
 0x139   : > { %v743_v49 = vpop.xlane.xlu1 %742 }
 0x13a   : > { %v779_v11 = vsub.bf16 %v2517_v31, %v743_v49  ;;  %v778_v54 = vsub.bf16 %v2512_v28, %v743_v49  ;;  %v776_v28 = vsub.bf16 %v2484_v7, %v738_v2  ;;  %v780_v29 = vsub.bf16 %v2521_v34, %v743_v49 }
 0x13b   : > { %v2834_v35 = vpop.xlane.xlu0 %747 }
 0x13c   : > { %v822_v38 = vmul.bf16 1069105081, %v779_v11  ;;  %v783_v32 = vsub.bf16 %v2549_v33, %v2834_v35  ;;  %v819_v18 = vmul.bf16 1069105081, %v778_v54  ;;  %v782_v26 = vsub.bf16 %v2545_v62, %v2834_v35 }
 0x13d   : > { %v781_v33 = vsub.bf16 %v2525_v43, %v743_v49  ;;  %v813_v52 = vmul.bf16 1069105081, %v776_v28  ;;  %v825_v4 = vmul.bf16 1069105081, %v780_v29  ;;  %v784_v19 = vsub.bf16 %v2565_v50, %v2834_v35 }
 0x13e   : > { %1966 = vpow.bf16 %v822_v38  ;;  %v834_v60 = vmul.bf16 1069105081, %v783_v32  ;;  %v831_v37 = vmul.bf16 1069105081, %v782_v26 }
 0x13f   : > { %1968 = vpow.bf16 %v819_v18  ;;  %v828_v57 = vmul.bf16 1069105081, %v781_v33  ;;  %v837_v3 = vmul.bf16 1069105081, %v784_v19 }
 0x140   : > { %1970 = vpow.bf16 %v834_v60 }
 0x141   : > { %1972 = vpow.bf16 %v831_v37 }
 0x144   : > { %v2839_v16 = vpop.xlane.xlu1 %752 }
 0x145   : > { %v787_v31 = vsub.bf16 %v2606_v56, %v2839_v16  ;;  %v1963_v6 = vpop.eup %1962  ;;  %v786_v62 = vsub.bf16 %v2602_v23, %v2839_v16  ;;  %v785_v23 = vsub.bf16 %v2569_v36, %v2834_v35 }
 0x146   : > { %v1965_v55 = vpop.eup %1964 }
 0x147   : > { %v846_v25 = vmul.bf16 1069105081, %v787_v31  ;;  %1190 = vmatprep.mubr.bf16.mxu0 %v1965_v55  ;;  %v843_v43 = vmul.bf16 1069105081, %v786_v62  ;;  %v840_v5 = vmul.bf16 1069105081, %v785_v23 }
 0x148   : > { %v2847_v21 = vpop.xlane.xlu0 %757  ;;  %1191 = vmatmul.mubr.bf16.vlgmr.msra.gmra.mxu0 %v1963_v6 }
 0x149   : > { %1974 = vpow.bf16 %v846_v25  ;;  %v791_v7 = vsub.bf16 %v2642_v15, %v2847_v21  ;;  %v790_v15 = vsub.bf16 %v2634_v44, %v2847_v21  ;;  %v789_v44 = vsub.bf16 %v2614_v40, %v2839_v16 }
 0x14a   : > { %1976 = vpow.bf16 %v813_v52  ;;  %v788_v40 = vsub.bf16 %v2610_v59, %v2839_v16 }
 0x14b   : > { %1978 = vpow.bf16 %v828_v57  ;;  %v858_v0 = vmul.bf16 1069105081, %v791_v7  ;;  %v855_v34 = vmul.bf16 1069105081, %v790_v15  ;;  %v852_v51 = vmul.bf16 1069105081, %v789_v44 }
 0x14c   : > { %v1967_v56 = vpop.eup %1966  ;;  %1980 = vpow.bf16 %v816_v46  ;;  %v849_v59 = vmul.bf16 1069105081, %v788_v40 }
 0x14d   : > { %1198 = vmatprep.mubr.bf16.mxu0 %v1967_v56  ;;  %v1969_v8 = vpop.eup %1968  ;;  %1982 = vpow.bf16 %v843_v43 }
 0x14e   : > { %v2855_v10 = vpop.xlane.xlu1 %762  ;;  %v1971_v47 = vpop.eup %1970  ;;  %1984 = vpow.bf16 %v858_v0 }
 0x14f   : > { %v795_v63 = vsub.bf16 %v2681_v45, %v2855_v10  ;;  %v1973_v48 = vpop.eup %1972  ;;  %1986 = vpow.bf16 %v825_v4  ;;  %v794_v45 = vsub.bf16 %v2677_v30, %v2855_v10 }
 0x150   : > { %1199 = vmatmul.mubr.bf16.gmra.mxu0 %v1969_v8  ;;  %1988 = vpow.bf16 %v840_v5 }
 0x151   : > { %1206 = vmatprep.mubr.bf16.mxu0 %v1971_v47  ;;  %v870_v13 = vmul.bf16 1069105081, %v795_v63  ;;  %v2865_v36 = vpop.xlane.xlu0 %767  ;;  %1990 = vpow.bf16 %v855_v34  ;;  %v867_v11 = vmul.bf16 1069105081, %v794_v45  ;;  %v2131_v34 = vmov 7  }
 0x152   : > { %v799_v39 = vsub.bf16 %v2718_v17, %v2865_v36  ;;  %v793_v17 = vsub.bf16 %v2657_v61, %v2847_v21  ;;  %v798_v32 = vsub.bf16 %v2711_v9, %v2865_v36  ;;  %v792_v61 = vsub.bf16 %v2648_v58, %v2847_v21  ;;  %1928 = vset.pattern.permute.xlu0 %v2131_v34 }
 0x153   : > { %1992 = vpow.bf16 %v870_v13  ;;  %v797_v9 = vsub.bf16 %v2694_v42, %v2855_v10  ;;  %v796_v42 = vsub.bf16 %v2688_v12, %v2855_v10  ;;  %v800_v0 = vsub.bf16 %v2735_v27, %v2865_v36  ;;  %1929 = vset.pattern.permute.xlu1 %v2131_v34 }
 0x154   : > { %v882_v35 = vmul.bf16 1069105081, %v799_v39  ;;  %1994 = vpow.bf16 %v837_v3  ;;  %v864_v60 = vmul.bf16 1069105081, %v793_v17  ;;  %v879_v26 = vmul.bf16 1069105081, %v798_v32 }
 0x155   : > { %1996 = vpow.bf16 %v852_v51  ;;  %v861_v55 = vmul.bf16 1069105081, %v792_v61  ;;  %v876_v33 = vmul.bf16 1069105081, %v797_v9  ;;  %v873_v62 = vmul.bf16 1069105081, %v796_v42 }
 0x156   : > { %v2875_v30 = vpop.xlane.xlu1 %772  ;;  %1998 = vpow.bf16 %v867_v11 }
 0x157   : > { %v1975_v2 = vpop.eup %1974  ;;  %2000 = vpow.bf16 %v882_v35  ;;  %v803_v18 = vsub.bf16 %v2767_v41, %v2875_v30  ;;  %v802_v41 = vsub.bf16 %v2757_v14, %v2875_v30  ;;  %v801_v14 = vsub.bf16 %v2761_v24, %v2865_v36 }
 0x158   : > { %1207 = vmatmul.mubr.bf16.gmra.mxu0 %v1973_v48  ;;  %v1977_v53 = vpop.eup %1976  ;;  %2002 = vpow.bf16 %v849_v59  ;;  %v805_v12 = vsub.bf16 %v2780_v22, %v2875_v30  ;;  %v885_v24 = vmul.bf16 1069105081, %v800_v0  ;;  %v804_v23 = vsub.bf16 %v2775_v1, %v2875_v30 }
 0x159   : > { %1214 = vmatprep.mubr.bf16.mxu0 %v1975_v2  ;;  %v1979_v50 = vpop.eup %1978  ;;  %v894_v6 = vmul.bf16 1069105081, %v803_v18  ;;  %2004 = vpow.bf16 %v864_v60  ;;  %v891_v20 = vmul.bf16 1069105081, %v802_v41  ;;  %v888_v57 = vmul.bf16 1069105081, %v801_v14 }
 0x15a   : > { %v1981_v49 = vpop.eup %1980  ;;  %2006 = vpow.bf16 %v879_v26  ;;  %v900_v29 = vmul.bf16 1069105081, %v805_v12  ;;  %v897_v27 = vmul.bf16 1069105081, %v804_v23 }
 0x15b   : > { %1287 = vmatprep.mubr.bf16.mxu1 %v1981_v49  ;;  %v1983_v54 = vpop.eup %1982  ;;  %2008 = vpow.bf16 %v894_v6 }
 0x15c   : > { %1288 = vmatmul.mubr.bf16.vlgmr.msra.gmra.mxu1 %v1977_v53  ;;  %v1985_v38 = vpop.eup %1984  ;;  %2010 = vpow.bf16 %v861_v55 }
 0x15d   : > { %1295 = vmatprep.mubr.bf16.mxu1 %v1979_v50  ;;  %v1987_v16 = vpop.eup %1986  ;;  %2012 = vpow.bf16 %v876_v33 }
 0x15e   : > { %v1989_v31 = vpop.eup %1988  ;;  %2014 = vpow.bf16 %v891_v20 }
 0x15f   : > { %v1991_v28 = vpop.eup %1990  ;;  %2016 = vpow.bf16 %v873_v62 }
 0x160   : > { %1215 = vmatmul.mubr.bf16.gmra.mxu0 %v1983_v54  ;;  %2018 = vpow.bf16 %v888_v57 }
 0x161   : > { %1222 = vmatprep.mubr.bf16.mxu0 %v1985_v38  ;;  %v1993_v37 = vpop.eup %1992  ;;  %2020 = vpow.bf16 %v885_v24 }
 0x162   : > { %v1995_v25 = vpop.eup %1994  ;;  %2022 = vpow.bf16 %v900_v29 }
 0x163   : > { %v1997_v52 = vpop.eup %1996  ;;  %2024 = vpow.bf16 %v897_v27 }
 0x164   : > { %1296 = vmatmul.mubr.bf16.gmra.mxu1 %v1987_v16  ;;  %v1999_v58 = vpop.eup %1998 }
 0x165   : > { %1303 = vmatprep.mubr.bf16.mxu1 %v1989_v31  ;;  %v2001_v21 = vpop.eup %2000 }
 0x166   : > { %v2003_v56 = vpop.eup %2002 }
 0x167   : > { %v2005_v7 = vpop.eup %2004 }
 0x168   : > { %1223 = vmatmul.mubr.bf16.gmra.mxu0 %v1991_v28  ;;  %v2007_v46 = vpop.eup %2006 }
 0x169   : > { %1230 = vmatprep.mubr.bf16.mxu0 %v1993_v37  ;;  %v2009_v43 = vpop.eup %2008 }
 0x16a   : > { %v2011_v8 = vpop.eup %2010 }
 0x16b   : > { %v2013_v10 = vpop.eup %2012 }
 0x16c   : > { %1304 = vmatmul.mubr.bf16.gmra.mxu1 %v1995_v25  ;;  %v2015_v47 = vpop.eup %2014 }
 0x16d   : > { %1311 = vmatprep.mubr.bf16.mxu1 %v1997_v52  ;;  %v2017_v15 = vpop.eup %2016 }
 0x16e   : > { %v2019_v63 = vpop.eup %2018 }
 0x16f   : > { %v2021_v22 = vpop.eup %2020 }
 0x170   : > { %1231 = vmatmul.mubr.bf16.gmra.mxu0 %v1999_v58  ;;  %v2023_v4 = vpop.eup %2022 }
 0x171   : > { %1238 = vmatprep.mubr.bf16.mxu0 %v2001_v21  ;;  %v2025_v5 = vpop.eup %2024 }
 0x174   : > { %1312 = vmatmul.mubr.bf16.gmra.mxu1 %v2003_v56 }
 0x175   : > { %1319 = vmatprep.mubr.bf16.mxu1 %v2005_v7 }
 0x178   : > { %1239 = vmatmul.mubr.bf16.gmra.mxu0 %v2007_v46 }
 0x179   : > { %1246 = vmatprep.mubr.bf16.mxu0 %v2009_v43 }
 0x17c   : > { %1320 = vmatmul.mubr.bf16.gmra.mxu1 %v2011_v8 }
 0x17d   : > { %1327 = vmatprep.mubr.bf16.mxu1 %v2013_v10 }
 0x180   : > { %1247 = vmatmul.mubr.bf16.gmra.mxu0 %v2015_v47 }
 0x184   : > { %1328 = vmatmul.mubr.bf16.gmra.mxu1 %v2017_v15 }
 0x185   : > { %1335 = vmatprep.mubr.bf16.mxu1 %v2019_v63 }
 0x18c   : > { %1336 = vmatmul.mubr.bf16.gmra.mxu1 %v2021_v22 }
 0x18d   : > { %1343 = vmatprep.mubr.bf16.mxu1 %v2023_v4 }
 0x194   : > { %1344 = vmatmul.mubr.bf16.gmra.mxu1 %v2025_v5 }
 0x208   : > { %v1804_v13 = vpop.f32.mrf.mxu0 }
 0x20a   : > { %v1805_v1 = vpop.f32.mrf.mxu0 }
 0x20b   : > { %v1806_v49 = vadd.f32 %v1805_v1, %v1804_v13 }
 0x20c   : > { %v1807_v48 = vpop.f32.mrf.mxu0 }
 0x20e   : > { %v1808_v19 = vpop.f32.mrf.mxu0 }
 0x20f   : > { %v1809_v17 = vadd.f32 %v1808_v19, %v1807_v48 }
 0x210   : > { %v1810_v36 = vpop.f32.mrf.mxu0 }
 0x212   : > { %v1811_v2 = vpop.f32.mrf.mxu0 }
 0x213   : > { %v1812_v31 = vadd.f32 %v1811_v2, %v1810_v36 }
 0x214   : > { %v1813_v44 = vpop.f32.mrf.mxu0 }
 0x216   : > { %v1814_v45 = vpop.f32.mrf.mxu0 }
 0x217   : > { %v1815_v55 = vadd.f32 %v1814_v45, %v1813_v44 }
 0x218   : > { %v1816_v39 = vpop.f32.mrf.mxu0 }
 0x21a   : > { %v1817_v53 = vpop.f32.mrf.mxu0 }
 0x21b   : > { %v1818_v42 = vadd.f32 %v1817_v53, %v1816_v39 }
 0x21c   : > { %v1819_v3 = vpop.f32.mrf.mxu0  ;;  %v1868_v51 = vpop.f32.mrf.mxu1 }
 0x21e   : > { %v1820_v50 = vpop.f32.mrf.mxu0  ;;  %v1869_v35 = vpop.f32.mrf.mxu1 }
 0x21f   : > { %v1870_v54 = vadd.f32 %v1869_v35, %v1868_v51  ;;  %v1821_v0 = vadd.f32 %v1820_v50, %v1819_v3 }
 0x220   : > { %v1822_v11 = vpop.f32.mrf.mxu0  ;;  %v1871_v30 = vpop.f32.mrf.mxu1 }
 0x221   : > { %v2899_v38 = vadd.f32 %v1870_v54, %v1806_v49 }
 0x222   : > { %v1823_v40 = vpop.f32.mrf.mxu0  ;;  %v1872_v18 = vpop.f32.mrf.mxu1 }
 0x223   : > { %2026 = vrcp.f32 %v2899_v38  ;;  %v1873_v59 = vadd.f32 %v1872_v18, %v1871_v30  ;;  %v1824_v23 = vadd.f32 %v1823_v40, %v1822_v11 }
 0x224   : > { %v1825_v32 = vpop.f32.mrf.mxu0  ;;  %v1874_v16 = vpop.f32.mrf.mxu1 }
 0x225   : > { %v2902_v26 = vadd.f32 %v1873_v59, %v1809_v17 }
 0x226   : > { %v1826_v60 = vpop.f32.mrf.mxu0  ;;  %v1875_v28 = vpop.f32.mrf.mxu1 }
 0x227   : > { %2028 = vrcp.f32 %v2902_v26  ;;  %v1876_v61 = vadd.f32 %v1875_v28, %v1874_v16  ;;  %v1827_v34 = vadd.f32 %v1826_v60, %v1825_v32 }
 0x228   : > { %v1828_v6 = vpop.f32.mrf.mxu0  ;;  %v1877_v9 = vpop.f32.mrf.mxu1 }
 0x229   : > { %v2905_v41 = vadd.f32 %v1876_v61, %v1812_v31 }
 0x22a   : > { %v1829_v37 = vpop.f32.mrf.mxu0  ;;  %v1878_v25 = vpop.f32.mrf.mxu1 }
 0x22b   : > { %2030 = vrcp.f32 %v2905_v41  ;;  %v1879_v20 = vadd.f32 %v1878_v25, %v1877_v9  ;;  %v1830_v44 = vadd.f32 %v1829_v37, %v1828_v6 }
 0x22c   : > { %v1831_v33 = vpop.f32.mrf.mxu0  ;;  %v1880_v58 = vpop.f32.mrf.mxu1 }
 0x22d   : > { %v2908_v21 = vadd.f32 %v1879_v20, %v1815_v55 }
 0x22e   : > { %v1832_v52 = vpop.f32.mrf.mxu0  ;;  %v1881_v62 = vpop.f32.mrf.mxu1 }
 0x22f   : > { %2032 = vrcp.f32 %v2908_v21  ;;  %v1882_v56 = vadd.f32 %v1881_v62, %v1880_v58  ;;  %v1833_v49 = vadd.f32 %v1832_v52, %v1831_v33 }
 0x230   : > { %v1834_v14 = vpop.f32.mrf.mxu0  ;;  %v2027_v7 = vpop.eup %2026 }
 0x231   : > { %v1883_v46 = vpop.f32.mrf.mxu1  ;;  %v2911_v43 = vadd.f32 %v1882_v56, %v1818_v42  ;;  %1370 = vperm.xlu0 %1928, %v2027_v7  }
 0x232   : > { %v1835_v57 = vpop.f32.mrf.mxu0 }
 0x233   : > { %v1884_v12 = vpop.f32.mrf.mxu1  ;;  %2034 = vrcp.f32 %v2911_v43  ;;  %v1836_v32 = vadd.f32 %v1835_v57, %v1834_v14 }
 0x234   : > { %v1837_v24 = vpop.f32.mrf.mxu0  ;;  %v1885_v8 = vadd.f32 %v1884_v12, %v1883_v46  ;;  %v2029_v29 = vpop.eup %2028 }
 0x235   : > { %v1886_v10 = vpop.f32.mrf.mxu1  ;;  %1375 = vperm.xlu1 %1929, %v2029_v29  }
 0x236   : > { %v2914_v47 = vadd.f32 %v1885_v8, %v1821_v0  ;;  %v1838_v15 = vpop.f32.mrf.mxu0 }
 0x237   : > { %v1887_v27 = vpop.f32.mrf.mxu1  ;;  %v1839_v28 = vadd.f32 %v1838_v15, %v1837_v24 }
 0x238   : > { %2036 = vrcp.f32 %v2914_v47  ;;  %v1888_v63 = vadd.f32 %v1887_v27, %v1886_v10  ;;  %v2031_v22 = vpop.eup %2030  ;;  %v1840_v1 = vpop.f32.mrf.mxu0 }
 0x239   : > { %v1889_v4 = vpop.f32.mrf.mxu1  ;;  %1380 = vperm.xlu1 %1929, %v2031_v22  }
 0x23a   : > { %v2917_v5 = vadd.f32 %v1888_v63, %v1824_v23  ;;  %v1841_v39 = vpop.f32.mrf.mxu0 }
 0x23b   : > { %v1890_v13 = vpop.f32.mrf.mxu1  ;;  %v1842_v20 = vadd.f32 %v1841_v39, %v1840_v1 }
 0x23c   : > { %2038 = vrcp.f32 %v2917_v5  ;;  %v1891_v48 = vadd.f32 %v1890_v13, %v1889_v4  ;;  %v2033_v19 = vpop.eup %2032  ;;  %v1843_v35 = vpop.f32.mrf.mxu0 }
 0x23d   : > { %v1892_v36 = vpop.f32.mrf.mxu1  ;;  %1385 = vperm.xlu1 %1929, %v2033_v19  }
 0x23e   : > { %v2920_v2 = vadd.f32 %v1891_v48, %v1827_v34  ;;  %v1844_v59 = vpop.f32.mrf.mxu0 }
 0x23f   : > { %v1893_v45 = vpop.f32.mrf.mxu1  ;;  %v1845_v57 = vadd.f32 %v1844_v59, %v1843_v35 }
 0x240   : > { %2040 = vrcp.f32 %v2920_v2  ;;  %v1894_v53 = vadd.f32 %v1893_v45, %v1892_v36  ;;  %v2035_v3 = vpop.eup %2034  ;;  %v1846_v37 = vpop.f32.mrf.mxu0 }
 0x241   : > { %v1895_v50 = vpop.f32.mrf.mxu1  ;;  %1390 = vperm.xlu1 %1929, %v2035_v3  }
 0x242   : > { %v2923_v51 = vadd.f32 %v1894_v53, %v1830_v44  ;;  %v1847_v58 = vpop.f32.mrf.mxu0 }
 0x243   : > { %v1896_v11 = vpop.f32.mrf.mxu1  ;;  %v1848_v29 = vadd.f32 %v1847_v58, %v1846_v37 }
 0x244   : > { %2042 = vrcp.f32 %v2923_v51  ;;  %v1897_v54 = vadd.f32 %v1896_v11, %v1895_v50  ;;  %v1849_v46 = vpop.f32.mrf.mxu0 }
 0x245   : > { %v2037_v40 = vpop.eup %2036  ;;  %v1898_v30 = vpop.f32.mrf.mxu1 }
 0x246   : > { %v2926_v17 = vadd.f32 %v1897_v54, %v1833_v49  ;;  %1395 = vperm.xlu1 %1929, %v2037_v40   ;;  %v1850_v23 = vpop.f32.mrf.mxu0 }
 0x247   : > { %v1899_v18 = vpop.f32.mrf.mxu1  ;;  %v1851_v4 = vadd.f32 %v1850_v23, %v1849_v46 }
 0x248   : > { %2044 = vrcp.f32 %v2926_v17  ;;  %v1900_v60 = vadd.f32 %v1899_v18, %v1898_v30 }
 0x249   : > { %v2039_v16 = vpop.eup %2038  ;;  %v1901_v31 = vpop.f32.mrf.mxu1 }
 0x24a   : > { %v2929_v6 = vadd.f32 %v1900_v60, %v1836_v32  ;;  %1400 = vperm.xlu1 %1929, %v2039_v16  }
 0x24b   : > { %v1902_v61 = vpop.f32.mrf.mxu1 }
 0x24c   : > { %2046 = vrcp.f32 %v2929_v6  ;;  %v1903_v9 = vadd.f32 %v1902_v61, %v1901_v31 }
 0x24d   : > { %v2041_v55 = vpop.eup %2040  ;;  %v1904_v33 = vpop.f32.mrf.mxu1 }
 0x24e   : > { %v2932_v25 = vadd.f32 %v1903_v9, %v1839_v28  ;;  %1405 = vperm.xlu1 %1929, %v2041_v55  }
 0x24f   : > { %v1905_v52 = vpop.f32.mrf.mxu1 }
 0x250   : > { %2048 = vrcp.f32 %v2932_v25  ;;  %v1906_v42 = vadd.f32 %v1905_v52, %v1904_v33 }
 0x251   : > { %v2043_v14 = vpop.eup %2042  ;;  %v1907_v62 = vpop.f32.mrf.mxu1 }
 0x252   : > { %v2935_v56 = vadd.f32 %v1906_v42, %v1842_v20  ;;  %1410 = vperm.xlu1 %1929, %v2043_v14  }
 0x253   : > { %v1908_v7 = vpop.f32.mrf.mxu1 }
 0x254   : > { %2050 = vrcp.f32 %v2935_v56  ;;  %v1909_v0 = vadd.f32 %v1908_v7, %v1907_v62 }
 0x255   : > { %v2045_v12 = vpop.eup %2044  ;;  %v1910_v24 = vpop.f32.mrf.mxu1 }
 0x256   : > { %v2938_v8 = vadd.f32 %v1909_v0, %v1845_v57  ;;  %1415 = vperm.xlu0 %1928, %v2045_v12  }
 0x257   : > { %v1911_v10 = vpop.f32.mrf.mxu1 }
 0x258   : > { %2052 = vrcp.f32 %v2938_v8  ;;  %v1912_v27 = vadd.f32 %v1911_v10, %v1910_v24 }
 0x259   : > { %v2047_v15 = vpop.eup %2046  ;;  %v1913_v63 = vpop.f32.mrf.mxu1 }
 0x25a   : > { %v2941_v22 = vadd.f32 %v1912_v27, %v1848_v29  ;;  %1420 = vperm.xlu1 %1929, %v2047_v15  }
 0x25b   : > { %v1914_v34 = vpop.f32.mrf.mxu1 }
 0x25c   : > { %2054 = vrcp.f32 %v2941_v22  ;;  %v1915_v13 = vadd.f32 %v1914_v34, %v1913_v63 }
 0x25d   : > { %v2049_v1 = vpop.eup %2048 }
 0x25e   : > { %v2944_v48 = vadd.f32 %v1915_v13, %v1851_v4  ;;  %1425 = vperm.xlu0 %1928, %v2049_v1  }
 0x260   : > { %2056 = vrcp.f32 %v2944_v48 }
 0x261   : > { %v2051_v19 = vpop.eup %2050 }
 0x262   : > { %1430 = vperm.xlu1 %1929, %v2051_v19  }
 0x265   : > { %v2053_v36 = vpop.eup %2052 }
 0x266   : > { %1435 = vperm.xlu0 %1928, %v2053_v36  }
 0x269   : > { %v2055_v44 = vpop.eup %2054 }
 0x26a   : > { %1440 = vperm.xlu1 %1929, %v2055_v44  }
 0x26d   : > { %v2057_v45 = vpop.eup %2056 }
 0x26e   : > { %1445 = vperm.xlu0 %1928, %v2057_v45  }
 0x2ac   : > { %v1371_v39 = vpop.permute.xlu0 %1370 }
 0x2ad   : > { %v2948_v53 = vmul.f32 %v1371_v39, %v2899_v38 }
 0x2af   : > { %v1465_v3 = vsel %vm1464_vm12, %v2948_v53, -inf }
 0x2b0   : > { %v1376_v50 = vpop.permute.xlu1 %1375  ;;  %1466 = vmax.xlane.f32.xlu1 %v1465_v3 }
 0x2b1   : > { %v2953_v49 = vmul.f32 %v1376_v50, %v2902_v26 }
 0x2b3   : > { %v1468_v11 = vsel %vm1464_vm12, %v2953_v49, -inf }
 0x2b4   : > { %v1381_v35 = vpop.permute.xlu1 %1380  ;;  %1469 = vmax.xlane.f32.xlu0 %v1468_v11 }
 0x2b5   : > { %v2958_v54 = vmul.f32 %v1381_v35, %v2905_v41 }
 0x2b7   : > { %v1471_v38 = vsel %vm1464_vm12, %v2958_v54, -inf }
 0x2b8   : > { %v1386_v40 = vpop.permute.xlu1 %1385  ;;  %1472 = vmax.xlane.f32.xlu0 %v1471_v38 }
 0x2b9   : > { %v2963_v30 = vmul.f32 %v1386_v40, %v2908_v21 }
 0x2bb   : > { %v1474_v26 = vsel %vm1464_vm12, %v2963_v30, -inf }
 0x2bc   : > { %v1391_v32 = vpop.permute.xlu1 %1390  ;;  %1475 = vmax.xlane.f32.xlu1 %v1474_v26 }
 0x2bd   : > { %v2968_v18 = vmul.f32 %v1391_v32, %v2911_v43 }
 0x2bf   : > { %v1477_v41 = vsel %vm1464_vm12, %v2968_v18, -inf }
 0x2c0   : > { %1478 = vmax.xlane.f32.xlu0 %v1477_v41 }
 0x2c1   : > { %v1396_v59 = vpop.permute.xlu1 %1395 }
 0x2c2   : > { %v2973_v60 = vmul.f32 %v1396_v59, %v2914_v47 }
 0x2c4   : > { %v1480_v21 = vsel %vm1464_vm12, %v2973_v60, -inf }
 0x2c5   : > { %v1401_v16 = vpop.permute.xlu1 %1400  ;;  %1481 = vmax.xlane.f32.xlu1 %v1480_v21 }
 0x2c6   : > { %v2978_v31 = vmul.f32 %v1401_v16, %v2917_v5 }
 0x2c8   : > { %v1483_v43 = vsel %vm1464_vm12, %v2978_v31, -inf }
 0x2c9   : > { %v1406_v28 = vpop.permute.xlu1 %1405  ;;  %1484 = vmax.xlane.f32.xlu0 %v1483_v43 }
 0x2ca   : > { %v2983_v61 = vmul.f32 %v1406_v28, %v2920_v2 }
 0x2cc   : > { %v1486_v47 = vsel %vm1464_vm12, %v2983_v61, -inf }
 0x2cd   : > { %v1411_v37 = vpop.permute.xlu1 %1410  ;;  %1487 = vmax.xlane.f32.xlu1 %v1486_v47 }
 0x2ce   : > { %v2988_v9 = vmul.f32 %v1411_v37, %v2923_v51 }
 0x2d0   : > { %v1489_v5 = vsel %vm1464_vm12, %v2988_v9, -inf }
 0x2d1   : > { %1490 = vmax.xlane.f32.xlu0 %v1489_v5  ;;  %v1416_v55 = vpop.permute.xlu0 %1415 }
 0x2d2   : > { %v2993_v33 = vmul.f32 %v1416_v55, %v2926_v17 }
 0x2d4   : > { %v1492_v2 = vsel %vm1464_vm12, %v2993_v33, -inf }
 0x2d5   : > { %v1421_v20 = vpop.permute.xlu1 %1420  ;;  %1493 = vmax.xlane.f32.xlu1 %v1492_v2 }
 0x2d6   : > { %v2998_v52 = vmul.f32 %v1421_v20, %v2929_v6 }
 0x2d8   : > { %v1495_v51 = vsel %vm1464_vm12, %v2998_v52, -inf }
 0x2d9   : > { %1496 = vmax.xlane.f32.xlu0 %v1495_v51  ;;  %v1426_v58 = vpop.permute.xlu0 %1425 }
 0x2da   : > { %v3003_v42 = vmul.f32 %v1426_v58, %v2932_v25 }
 0x2dc   : > { %v1498_v17 = vsel %vm1464_vm12, %v3003_v42, -inf }
 0x2dd   : > { %v1431_v14 = vpop.permute.xlu1 %1430  ;;  %1499 = vmax.xlane.f32.xlu1 %v1498_v17 }
 0x2de   : > { %v3008_v62 = vmul.f32 %v1431_v14, %v2935_v56 }
 0x2e0   : > { %v1501_v6 = vsel %vm1464_vm12, %v3008_v62, -inf }
 0x2e1   : > { %1502 = vmax.xlane.f32.xlu0 %v1501_v6  ;;  %v1436_v57 = vpop.permute.xlu0 %1435 }
 0x2e2   : > { %v3013_v7 = vmul.f32 %v1436_v57, %v2938_v8 }
 0x2e4   : > { %v1504_v25 = vsel %vm1464_vm12, %v3013_v7, -inf }
 0x2e5   : > { %v1441_v46 = vpop.permute.xlu1 %1440  ;;  %1505 = vmax.xlane.f32.xlu1 %v1504_v25 }
 0x2e6   : > { %v3018_v0 = vmul.f32 %v1441_v46, %v2941_v22 }
 0x2e8   : > { %v1507_v56 = vsel %vm1464_vm12, %v3018_v0, -inf }
 0x2e9   : > { %1508 = vmax.xlane.f32.xlu0 %v1507_v56  ;;  %v1446_v12 = vpop.permute.xlu0 %1445 }
 0x2ea   : > { %v3023_v24 = vmul.f32 %v1446_v12, %v2944_v48 }
 0x2ec   : > { %v1510_v8 = vsel %vm1464_vm12, %v3023_v24, -inf }
 0x2ed   : > { %1511 = vmax.xlane.f32.xlu1 %v1510_v8 }
 0x339   : > { %v1467_v29 = vpop.xlane.xlu1 %1466 }
 0x33a   : > { %v3028_v10 = vsub.f32 %v2948_v53, %v1467_v29 }
 0x33c   : > { %v1529_v23 = vmul.f32 1.442695, %v3028_v10 }
 0x33d   : > { %v1470_v27 = vpop.xlane.xlu0 %1469 }
 0x33e   : > { %2058 = vpow2.f32 %v1529_v23  ;;  %v3032_v15 = vsub.f32 %v2953_v49, %v1470_v27 }
 0x340   : > { %v1531_v63 = vmul.f32 1.442695, %v3032_v15 }
 0x341   : > { %v1473_v22 = vpop.xlane.xlu0 %1472 }
 0x342   : > { %2060 = vpow2.f32 %v1531_v63  ;;  %v3036_v4 = vsub.f32 %v2958_v54, %v1473_v22 }
 0x344   : > { %v1533_v34 = vmul.f32 1.442695, %v3036_v4 }
 0x345   : > { %v1476_v13 = vpop.xlane.xlu1 %1475 }
 0x346   : > { %2062 = vpow2.f32 %v1533_v34  ;;  %v3040_v1 = vsub.f32 %v2963_v30, %v1476_v13 }
 0x348   : > { %v1535_v48 = vmul.f32 1.442695, %v3040_v1 }
 0x349   : > { %v1479_v19 = vpop.xlane.xlu0 %1478 }
 0x34a   : > { %2064 = vpow2.f32 %v1535_v48  ;;  %v3044_v36 = vsub.f32 %v2968_v18, %v1479_v19 }
 0x34b   : > { %v2059_v44 = vpop.eup %2058 }
 0x34c   : > { %v1537_v45 = vmul.f32 1.442695, %v3044_v36  ;;  %v1561_v39 = vsel %vm1464_vm12, %v2059_v44, 0.0 }
 0x34d   : > { %1562 = vadd.xlane.f32.xlu0 %v1561_v39 }
 0x34e   : > { %v1482_v53 = vpop.xlane.xlu1 %1481  ;;  %2066 = vpow2.f32 %v1537_v45 }
 0x34f   : > { %v3049_v3 = vsub.f32 %v2973_v60, %v1482_v53  ;;  %v2061_v50 = vpop.eup %2060 }
 0x350   : > { %v1564_v11 = vsel %vm1464_vm12, %v2061_v50, 0.0 }
 0x351   : > { %v1539_v49 = vmul.f32 1.442695, %v3049_v3  ;;  %1565 = vadd.xlane.f32.xlu1 %v1564_v11 }
 0x352   : > { %v1485_v35 = vpop.xlane.xlu0 %1484 }
 0x353   : > { %2068 = vpow2.f32 %v1539_v49  ;;  %v3054_v54 = vsub.f32 %v2978_v31, %v1485_v35  ;;  %v2063_v38 = vpop.eup %2062 }
 0x354   : > { %v1567_v30 = vsel %vm1464_vm12, %v2063_v38, 0.0 }
 0x355   : > { %v1541_v40 = vmul.f32 1.442695, %v3054_v54  ;;  %1568 = vadd.xlane.f32.xlu0 %v1567_v30 }
 0x356   : > { %v1488_v26 = vpop.xlane.xlu1 %1487 }
 0x357   : > { %2070 = vpow2.f32 %v1541_v40  ;;  %v3059_v32 = vsub.f32 %v2983_v61, %v1488_v26  ;;  %v2065_v18 = vpop.eup %2064 }
 0x358   : > { %v1570_v59 = vsel %vm1464_vm12, %v2065_v18, 0.0 }
 0x359   : > { %v1543_v41 = vmul.f32 1.442695, %v3059_v32  ;;  %1571 = vadd.xlane.f32.xlu1 %v1570_v59 }
 0x35a   : > { %v1491_v60 = vpop.xlane.xlu0 %1490 }
 0x35b   : > { %2072 = vpow2.f32 %v1543_v41  ;;  %v3064_v21 = vsub.f32 %v2988_v9, %v1491_v60  ;;  %v2067_v16 = vpop.eup %2066 }
 0x35c   : > { %v1573_v43 = vsel %vm1464_vm12, %v2067_v16, 0.0 }
 0x35d   : > { %v1545_v31 = vmul.f32 1.442695, %v3064_v21  ;;  %1574 = vadd.xlane.f32.xlu0 %v1573_v43 }
 0x35e   : > { %v1494_v28 = vpop.xlane.xlu1 %1493 }
 0x35f   : > { %2074 = vpow2.f32 %v1545_v31  ;;  %v3069_v61 = vsub.f32 %v2993_v33, %v1494_v28 }
 0x360   : > { %v2069_v47 = vpop.eup %2068 }
 0x361   : > { %v1547_v37 = vmul.f32 1.442695, %v3069_v61  ;;  %v1576_v5 = vsel %vm1464_vm12, %v2069_v47, 0.0 }
 0x362   : > { %1577 = vadd.xlane.f32.xlu1 %v1576_v5  ;;  %v1497_v55 = vpop.xlane.xlu0 %1496 }
 0x363   : > { %2076 = vpow2.f32 %v1547_v37  ;;  %v3074_v9 = vsub.f32 %v2998_v52, %v1497_v55 }
 0x364   : > { %v2071_v2 = vpop.eup %2070 }
 0x365   : > { %v1549_v20 = vmul.f32 1.442695, %v3074_v9  ;;  %v1579_v51 = vsel %vm1464_vm12, %v2071_v2, 0.0 }
 0x366   : > { %v1500_v58 = vpop.xlane.xlu1 %1499  ;;  %1580 = vadd.xlane.f32.xlu0 %v1579_v51 }
 0x367   : > { %2078 = vpow2.f32 %v1549_v20  ;;  %v3079_v33 = vsub.f32 %v3003_v42, %v1500_v58 }
 0x368   : > { %v2073_v17 = vpop.eup %2072 }
 0x369   : > { %v1551_v14 = vmul.f32 1.442695, %v3079_v33  ;;  %v1582_v6 = vsel %vm1464_vm12, %v2073_v17, 0.0 }
 0x36a   : > { %1583 = vadd.xlane.f32.xlu1 %v1582_v6  ;;  %v1503_v57 = vpop.xlane.xlu0 %1502 }
 0x36b   : > { %2080 = vpow2.f32 %v1551_v14  ;;  %v3084_v52 = vsub.f32 %v3008_v62, %v1503_v57 }
 0x36c   : > { %v2075_v25 = vpop.eup %2074 }
 0x36d   : > { %v1553_v46 = vmul.f32 1.442695, %v3084_v52  ;;  %v1585_v56 = vsel %vm1464_vm12, %v2075_v25, 0.0 }
 0x36e   : > { %v1506_v12 = vpop.xlane.xlu1 %1505  ;;  %1586 = vadd.xlane.f32.xlu0 %v1585_v56 }
 0x36f   : > { %2082 = vpow2.f32 %v1553_v46  ;;  %v3089_v42 = vsub.f32 %v3013_v7, %v1506_v12 }
 0x370   : > { %v2077_v8 = vpop.eup %2076 }
 0x371   : > { %v1555_v29 = vmul.f32 1.442695, %v3089_v42  ;;  %v1588_v23 = vsel %vm1464_vm12, %v2077_v8, 0.0 }
 0x372   : > { %1589 = vadd.xlane.f32.xlu1 %v1588_v23  ;;  %v1509_v27 = vpop.xlane.xlu0 %1508 }
 0x373   : > { %2084 = vpow2.f32 %v1555_v29  ;;  %v3094_v62 = vsub.f32 %v3018_v0, %v1509_v27 }
 0x374   : > { %v2079_v63 = vpop.eup %2078 }
 0x375   : > { %v1557_v22 = vmul.f32 1.442695, %v3094_v62  ;;  %v1591_v34 = vsel %vm1464_vm12, %v2079_v63, 0.0 }
 0x376   : > { %v1512_v13 = vpop.xlane.xlu1 %1511  ;;  %1592 = vadd.xlane.f32.xlu0 %v1591_v34 }
 0x377   : > { %2086 = vpow2.f32 %v1557_v22  ;;  %v3099_v7 = vsub.f32 %v3023_v24, %v1512_v13 }
 0x378   : > { %v2081_v48 = vpop.eup %2080 }
 0x379   : > { %v1559_v19 = vmul.f32 1.442695, %v3099_v7  ;;  %v1594_v44 = vsel %vm1464_vm12, %v2081_v48, 0.0 }
 0x37a   : > { %1595 = vadd.xlane.f32.xlu1 %v1594_v44 }
 0x37b   : > { %2088 = vpow2.f32 %v1559_v19 }
 0x37c   : > { %v2083_v0 = vpop.eup %2082 }
 0x37d   : > { %v1597_v45 = vsel %vm1464_vm12, %v2083_v0, 0.0 }
 0x37e   : > { %1598 = vadd.xlane.f32.xlu0 %v1597_v45 }
 0x380   : > { %v2085_v39 = vpop.eup %2084 }
 0x381   : > { %v1600_v53 = vsel %vm1464_vm12, %v2085_v39, 0.0 }
 0x382   : > { %1601 = vadd.xlane.f32.xlu1 %v1600_v53 }
 0x384   : > { %v2087_v50 = vpop.eup %2086 }
 0x385   : > { %v1603_v24 = vsel %vm1464_vm12, %v2087_v50, 0.0 }
 0x386   : > { %1604 = vadd.xlane.f32.xlu0 %v1603_v24 }
 0x388   : > { %v2089_v49 = vpop.eup %2088 }
 0x389   : > { %v1606_v11 = vsel %vm1464_vm12, %v2089_v49, 0.0 }
 0x38a   : > { %1607 = vadd.xlane.f32.xlu1 %v1606_v11 }
 0x3d6   : > { %v1563_v35 = vpop.xlane.xlu0 %1562 }
 0x3d7   : > { %2090 = vlog2.f32 %v1563_v35 }
 0x3da   : > { %v1566_v38 = vpop.xlane.xlu1 %1565 }
 0x3db   : > { %2092 = vlog2.f32 %v1566_v38 }
 0x3de   : > { %v1569_v40 = vpop.xlane.xlu0 %1568 }
 0x3df   : > { %2094 = vlog2.f32 %v1569_v40 }
 0x3e2   : > { %v1572_v30 = vpop.xlane.xlu1 %1571 }
 0x3e3   : > { %2096 = vlog2.f32 %v1572_v30 }
 0x3e4   : > { %v2091_v26 = vpop.eup %2090 }
 0x3e5   : > { %v1610_v18 = vmul.f32 0.6931472, %v2091_v26 }
 0x3e6   : > { %v1575_v41 = vpop.xlane.xlu0 %1574 }
 0x3e7   : > { %v1641_v59 = vsub.f32 %v3028_v10, %v1610_v18  ;;  %2098 = vlog2.f32 %v1575_v41 }
 0x3e8   : > { %v2093_v60 = vpop.eup %2092 }
 0x3e9   : > { %1657 = vst.msk [vmem:[%s3112_s26] sm:$0xff] %vm1464_vm12, %v1641_v59  ;;  %v1612_v16 = vmul.f32 0.6931472, %v2093_v60 }
 0x3eb   : > { %v1578_v31 = vpop.xlane.xlu1 %1577  ;;  %v1642_v43 = vsub.f32 %v3032_v15, %v1612_v16 }
 0x3ec   : > { %2100 = vlog2.f32 %v1578_v31  ;;  %v2095_v28 = vpop.eup %2094 }
 0x3ed   : > { %1658 = vst.msk [vmem:[%s3112_s26 + $0x8] sm:$0xff] %vm1464_vm12, %v1642_v43  ;;  %v1614_v47 = vmul.f32 0.6931472, %v2095_v28 }
 0x3ef   : > { %v1581_v37 = vpop.xlane.xlu0 %1580  ;;  %v1643_v5 = vsub.f32 %v3036_v4, %v1614_v47 }
 0x3f0   : > { %2102 = vlog2.f32 %v1581_v37  ;;  %v2097_v10 = vpop.eup %2096 }
 0x3f1   : > { %1659 = vst.msk [vmem:[%s3112_s26 + $0x10] sm:$0xff] %vm1464_vm12, %v1643_v5  ;;  %v1616_v55 = vmul.f32 0.6931472, %v2097_v10 }
 0x3f3   : > { %v1584_v2 = vpop.xlane.xlu1 %1583  ;;  %v1644_v20 = vsub.f32 %v3040_v1, %v1616_v55 }
 0x3f4   : > { %2104 = vlog2.f32 %v1584_v2  ;;  %v2099_v15 = vpop.eup %2098 }
 0x3f5   : > { %1660 = vst.msk [vmem:[%s3112_s26 + $0x18] sm:$0xff] %vm1464_vm12, %v1644_v20  ;;  %v1618_v51 = vmul.f32 0.6931472, %v2099_v15 }
 0x3f7   : > { %v1587_v58 = vpop.xlane.xlu0 %1586  ;;  %v1645_v17 = vsub.f32 %v3044_v36, %v1618_v51 }
 0x3f8   : > { %2106 = vlog2.f32 %v1587_v58 }
 0x3f9   : > { %v2101_v4 = vpop.eup %2100  ;;  %1661 = vst.msk [vmem:[%s3112_s26 + $0x20] sm:$0xff] %vm1464_vm12, %v1645_v17 }
 0x3fa   : > { %v1620_v14 = vmul.f32 0.6931472, %v2101_v4 }
 0x3fb   : > { %v1590_v6 = vpop.xlane.xlu1 %1589 }
 0x3fc   : > { %v1646_v57 = vsub.f32 %v3049_v3, %v1620_v14  ;;  %2108 = vlog2.f32 %v1590_v6 }
 0x3fd   : > { %v2103_v1 = vpop.eup %2102 }
 0x3fe   : > { %1662 = vst.msk [vmem:[%s3112_s26 + $0x28] sm:$0xff] %vm1464_vm12, %v1646_v57  ;;  %v1622_v25 = vmul.f32 0.6931472, %v2103_v1 }
 0x3ff   : > { %v1593_v46 = vpop.xlane.xlu0 %1592 }
 0x400   : > { %v1647_v56 = vsub.f32 %v3054_v54, %v1622_v25  ;;  %2110 = vlog2.f32 %v1593_v46 }
 0x401   : > { %v2105_v36 = vpop.eup %2104 }
 0x402   : > { %1663 = vst.msk [vmem:[%s3112_s26 + $0x30] sm:$0xff] %vm1464_vm12, %v1647_v56  ;;  %v1624_v12 = vmul.f32 0.6931472, %v2105_v36 }
 0x403   : > { %v1596_v8 = vpop.xlane.xlu1 %1595 }
 0x404   : > { %v1648_v29 = vsub.f32 %v3059_v32, %v1624_v12  ;;  %2112 = vlog2.f32 %v1596_v8 }
 0x405   : > { %v2107_v3 = vpop.eup %2106 }
 0x406   : > { %1664 = vst.msk [vmem:[%s3112_s26 + $0x38] sm:$0xff] %vm1464_vm12, %v1648_v29  ;;  %v1626_v23 = vmul.f32 0.6931472, %v2107_v3 }
 0x407   : > { %v1599_v27 = vpop.xlane.xlu0 %1598 }
 0x408   : > { %v1649_v63 = vsub.f32 %v3064_v21, %v1626_v23  ;;  %2114 = vlog2.f32 %v1599_v27 }
 0x409   : > { %v2109_v54 = vpop.eup %2108 }
 0x40a   : > { %1665 = vst.msk [vmem:[%s3112_s26 + $0x40] sm:$0xff] %vm1464_vm12, %v1649_v63  ;;  %v1628_v22 = vmul.f32 0.6931472, %v2109_v54 }
 0x40b   : > { %v1602_v34 = vpop.xlane.xlu1 %1601 }
 0x40c   : > { %v1650_v13 = vsub.f32 %v3069_v61, %v1628_v22  ;;  %2116 = vlog2.f32 %v1602_v34 }
 0x40d   : > { %v2111_v32 = vpop.eup %2110 }
 0x40e   : > { %1666 = vst.msk [vmem:[%s3112_s26 + $0x48] sm:$0xff] %vm1464_vm12, %v1650_v13  ;;  %v1630_v48 = vmul.f32 0.6931472, %v2111_v32 }
 0x40f   : > { %v1605_v19 = vpop.xlane.xlu0 %1604 }
 0x410   : > { %v1651_v44 = vsub.f32 %v3074_v9, %v1630_v48  ;;  %2118 = vlog2.f32 %v1605_v19 }
 0x411   : > { %v2113_v21 = vpop.eup %2112 }
 0x412   : > { %1667 = vst.msk [vmem:[%s3112_s26 + $0x50] sm:$0xff] %vm1464_vm12, %v1651_v44  ;;  %v1632_v0 = vmul.f32 0.6931472, %v2113_v21 }
 0x413   : > { %v1608_v45 = vpop.xlane.xlu1 %1607 }
 0x414   : > { %v1652_v39 = vsub.f32 %v3079_v33, %v1632_v0  ;;  %2120 = vlog2.f32 %v1608_v45 }
 0x415   : > { %v2115_v61 = vpop.eup %2114 }
 0x416   : > { %1668 = vst.msk [vmem:[%s3112_s26 + $0x58] sm:$0xff] %vm1464_vm12, %v1652_v39  ;;  %v1634_v53 = vmul.f32 0.6931472, %v2115_v61 }
 0x418   : > { %v1653_v50 = vsub.f32 %v3084_v52, %v1634_v53 }
 0x419   : > { %v2117_v24 = vpop.eup %2116 }
 0x41a   : > { %1669 = vst.msk [vmem:[%s3112_s26 + $0x60] sm:$0xff] %vm1464_vm12, %v1653_v50  ;;  %v1636_v9 = vmul.f32 0.6931472, %v2117_v24 }
 0x41c   : > { %v1654_v49 = vsub.f32 %v3089_v42, %v1636_v9 }
 0x41d   : > { %v2119_v11 = vpop.eup %2118 }
 0x41e   : > { %1670 = vst.msk [vmem:[%s3112_s26 + $0x68] sm:$0xff] %vm1464_vm12, %v1654_v49  ;;  %v1638_v35 = vmul.f32 0.6931472, %v2119_v11 }
 0x420   : > { %v1655_v33 = vsub.f32 %v3094_v62, %v1638_v35 }
 0x421   : > { %v2121_v38 = vpop.eup %2120 }
 0x422   : > { %1671 = vst.msk [vmem:[%s3112_s26 + $0x70] sm:$0xff] %vm1464_vm12, %v1655_v33  ;;  %v1640_v40 = vmul.f32 0.6931472, %v2121_v38 }
 0x424   : > { %v1656_v30 = vsub.f32 %v3099_v7, %v1640_v40 }
 0x426   : > { %1672 = vst.msk [vmem:[%s3112_s26 + $0x78] sm:$0xff] %vm1464_vm12, %v1656_v30 }
 0x427 PF: > { %s14_s15 = sadd.s32 1, %s2128_s15  }
 0x428   : > { %p11_p5 = scmp.ge.s32.totalorder %s14_s15, 6  }
 0x42a   :  { %13 = sbr.rel (!%p11_p5) target bundleno = 1 (0x1), region = 69 }

</bundles_post_ra>
